<compile_context>
chip_gen: v6e
topology: v6e:2x2x1
jax: 0.10.0
libtpu: 0.0.40
codegen_flags: <defaults>
</compile_context>

<pallas_src>
import jax
import jax.numpy as jnp
import numpy as np
from jax.experimental import pallas as pl
from jax.experimental.pallas import tpu as pltpu


HIDDEN = 256                # per-head hidden width of the MLPs
PACKED_H = 3 * HIDDEN       # 768: fused hidden width (xy | z | conf)
OUT_LANES = 128             # lane-dense packed output (xy: 0-1, z: 2, conf: 3-4)


# ----------------------------------------------------------------------------
# Pallas kernel: fused 3-head MLP with K-tiled layer 1.
#   grid = (D_pad // tk,)  -- reduction axis, "arbitrary"
#   layer 1: (N, tk) x (tk, 768) bf16 matmul accumulated in f32 scratch
#   on the last K step: +b1, ReLU, per-head bf16 L2 dots, ReLU, packed bf16 L3.
# ----------------------------------------------------------------------------
def _heads_kernel(x_ref, w1_ref, b1_ref, w2_ref, b2_ref, w3_ref, b3_ref,
                  out_ref, acc_ref):
    k = pl.program_id(0)

    @pl.when(k == 0)
    def _():
        acc_ref[...] = jnp.zeros_like(acc_ref)

    # layer-1 partial matmul (bf16 inputs, f32 accumulate on the MXU)
    acc_ref[...] += jnp.dot(x_ref[...], w1_ref[...],
                            preferred_element_type=jnp.float32)

    @pl.when(k == pl.num_programs(0) - 1)
    def _():
        # (N, 768) hidden; bf16 operands for the epilogue dots (f32 accumulate).
        h1 = jnp.maximum(acc_ref[...] + b1_ref[...], 0.0).astype(jnp.bfloat16)

        # layer 2: three per-head (N,256)x(256,256) dots (no block-diag zeros).
        h2_parts = []
        for hd in range(3):
            sl = slice(hd * HIDDEN, (hd + 1) * HIDDEN)
            h2_parts.append(jnp.dot(h1[:, sl], w2_ref[:, sl],
                                    preferred_element_type=jnp.float32))
        h2 = jnp.concatenate(h2_parts, axis=-1) + b2_ref[...]
        h2 = jnp.maximum(h2, 0.0).astype(jnp.bfloat16)

        # layer 3: packed (768, 128) bf16 -> single unmasked 128-lane store.
        out_ref[...] = (jnp.dot(h2, w3_ref[...],
                                preferred_element_type=jnp.float32)
                        + b3_ref[...])


def _run_heads_batched(x, params, tk):
    """x: (N, D) f32 flattened ROI features (all images concatenated).

    Returns (xy (N, 2), z (N, 1), conf (N, 2)).
    """
    w1, b1, w2, b2, w3, b3 = params
    n, d = x.shape
    d_pad = w1.shape[0]
    n_tiles = d_pad // tk
    # static bucket for N -> one compiled kernel across varying ROI counts
    n_pad = max(128, pl.cdiv(n, 128) * 128)

    # single fused pad of the already-bf16 features (no zeros + update-slice).
    x_pad = jnp.pad(x.astype(jnp.bfloat16), ((0, n_pad - n), (0, d_pad - d)))

    grid_spec = pltpu.PrefetchScalarGridSpec(
        num_scalar_prefetch=0,
        grid=(n_tiles,),
        in_specs=[
            pl.BlockSpec((n_pad, tk), lambda k: (0, k)),           # x (K-tiled, bf16)
            pl.BlockSpec((tk, PACKED_H), lambda k: (k, 0)),        # W1 (K-tiled, bf16)
            pl.BlockSpec((1, PACKED_H), lambda k: (0, 0)),         # b1 (f32)
            pl.BlockSpec((HIDDEN, PACKED_H), lambda k: (0, 0)),    # W2 per-head stack (bf16)
            pl.BlockSpec((1, PACKED_H), lambda k: (0, 0)),         # b2 (f32)
            pl.BlockSpec((PACKED_H, OUT_LANES), lambda k: (0, 0)), # W3 packed (bf16)
            pl.BlockSpec((1, OUT_LANES), lambda k: (0, 0)),        # b3 packed (f32)
        ],
        out_specs=pl.BlockSpec((n_pad, OUT_LANES), lambda k: (0, 0)),
        scratch_shapes=[pltpu.VMEM((n_pad, PACKED_H), jnp.float32)],
    )

    out = pl.pallas_call(
        _heads_kernel,
        out_shape=jax.ShapeDtypeStruct((n_pad, OUT_LANES), jnp.float32),
        grid_spec=grid_spec,
        compiler_params=pltpu.CompilerParams(
            dimension_semantics=("arbitrary",),     # K is a reduction axis
            vmem_limit_bytes=32 * 1024 * 1024,      # safe on v5e/v6e/v7x; footprint ~10 MiB
        ),
    )(x_pad, w1, b1, w2, b2, w3, b3)

    xy = out[:n, 0:2]
    z = out[:n, 2:3]
    conf = out[:n, 3:5]
    return xy, z, conf


# ----------------------------------------------------------------------------
# roi_align (plain JAX, torchvision semantics, aligned=False, spatial_scale=1.0;
# the module already divides bbox by 32 outside).  The bilinear gather is
# reformulated as two SEPARABLE interpolation matmuls so it runs on the MXU:
#   sample(n, c, a, b) = sum_h sum_w Wy[n,a,h] * Wx[n,b,w] * feature[c,h,w]
# where Wy/Wx carry the per-axis bilinear weights, torchvision clamping and the
# validity mask (the joint validity condition factors per axis).
# ----------------------------------------------------------------------------
def roi_align_jax(feature, boxes, output_size=7, sampling_ratio=2, spatial_scale=1.0):
    # feature: (C, H, W); boxes: (N, 4) as x1, y1, x2, y2 (feature-map coords)
    C, H, W = feature.shape
    N = boxes.shape[0]
    P, S = output_size, sampling_ratio

    x1 = boxes[:, 0] * spatial_scale
    y1 = boxes[:, 1] * spatial_scale
    x2 = boxes[:, 2] * spatial_scale
    y2 = boxes[:, 3] * spatial_scale
    roi_w = jnp.maximum(x2 - x1, 1.0)
    roi_h = jnp.maximum(y2 - y1, 1.0)
    bin_w = roi_w / P
    bin_h = roi_h / P

    pidx = jnp.arange(P, dtype=jnp.float32)
    sidx = jnp.arange(S, dtype=jnp.float32)
    # per-axis sample coords (roi, bin, sub-sample): (N, P, S)
    ys = (y1[:, None, None] + pidx[None, :, None] * bin_h[:, None, None]
          + (sidx[None, None, :] + 0.5) * bin_h[:, None, None] / S)
    xs = (x1[:, None, None] + pidx[None, :, None] * bin_w[:, None, None]
          + (sidx[None, None, :] + 0.5) * bin_w[:, None, None] / S)

    def interp_matrix(coords, size):
        # 1-D bilinear interpolation matrix (N, P*S, size) with torchvision
        # clamping and out-of-range zeroing folded in.
        valid = ((coords >= -1.0) & (coords <= size)).astype(jnp.float32)
        c = jnp.maximum(coords, 0.0)
        lo = jnp.floor(c).astype(jnp.int32)
        c = jnp.where(lo >= size - 1, jnp.float32(size - 1), c)
        lo = jnp.minimum(lo, size - 1)
        hi = jnp.minimum(lo + 1, size - 1)
        l = c - lo.astype(jnp.float32)
        h = 1.0 - l
        grid = jnp.arange(size, dtype=jnp.int32)
        w_lo = (grid[None, None, None, :] == lo[..., None]).astype(jnp.float32) * h[..., None]
        w_hi = (grid[None, None, None, :] == hi[..., None]).astype(jnp.float32) * l[..., None]
        wmat = (w_lo + w_hi) * valid[..., None]
        return wmat.reshape(N, P * S, size)

    wy = interp_matrix(ys, H)   # (N, P*S, H)
    wx = interp_matrix(xs, W)   # (N, P*S, W)

    # two MXU contractions replace the fancy-index gather
    t = jnp.einsum('nah,chw->ncaw', wy, feature,
                   preferred_element_type=jnp.float32)      # (N, C, P*S, W)
    v = jnp.einsum('nbw,ncaw->ncab', wx, t,
                   preferred_element_type=jnp.float32)      # (N, C, P*S, P*S)
    v = v.reshape(N, C, P, S, P, S)
    pooled = v.mean(axis=(3, 5))                            # (N, C, P, P)
    return pooled


# ----------------------------------------------------------------------------
# Module wrapper
# ----------------------------------------------------------------------------
class WDM3DPredictorHeadPallas:
    OUT_DIMS = (2, 1, 2)   # xy, z, conf -> output lanes [0:2], [2:3], [3:5]

    def __init__(self, channels=256, key=None):
        if key is None:
            key = jax.random.PRNGKey(0)
        self.channels = channels
        d = channels * 7 * 7
        self.d = d

        # K-tile: multiple of 256, ~<=3072 per tile with minimal padding of D.
        # Large enough to amortize the ~0.35 us/step overhead (v6e/v5e), small
        # enough to keep 2x(x tile) + 2x(W1 tile) + acc well under the 32 MiB
        # v7x scoped-VMEM default.
        d256 = pl.cdiv(d, 256) * 256
        n_tiles = max(1, pl.cdiv(d256, 3072))
        self.tk = pl.cdiv(pl.cdiv(d256, n_tiles), 256) * 256
        self.d_pad = self.tk * n_tiles

        # Random init in (in, out) layout.
        keys = jax.random.split(key, 18)

        def rnd(kk, shape):
            return jax.random.normal(kk, shape, jnp.float32) * 0.02

        heads, ki = [], 0
        for od in self.OUT_DIMS:
            heads.append((
                rnd(keys[ki + 0], (d, HIDDEN)), rnd(keys[ki + 1], (HIDDEN,)),
                rnd(keys[ki + 2], (HIDDEN, HIDDEN)), rnd(keys[ki + 3], (HIDDEN,)),
                rnd(keys[ki + 4], (HIDDEN, od)), rnd(keys[ki + 5], (od,)),
            ))
            ki += 6
        self.set_head_params(heads)

    def load_from_torch(self, torch_heads):
        """Explicit checkpoint loader: torch_heads is a list of 3 tuples
        (w1, b1, w2, b2, w3, b3) in nn.Linear (out, in) layout, ordered
        [location_xy, location_z, orientation_conf].  Transposes to (in, out)."""
        heads = []
        for (w1, b1, w2, b2, w3, b3) in torch_heads:
            heads.append((jnp.asarray(w1).T, jnp.asarray(b1),
                          jnp.asarray(w2).T, jnp.asarray(b2),
                          jnp.asarray(w3).T, jnp.asarray(b3)))
        self.set_head_params(heads)

    def set_head_params(self, heads):
        """heads: 3 tuples (w1 (d,256), b1, w2 (256,256), b2, w3 (256,od), b3)
        in (in, out) layout.  Packs the fused kernel operands."""
        d, d_pad = self.d, self.d_pad
        assert len(heads) == 3
        for (w1h, _, w2h, _, w3h, _), od in zip(heads, self.OUT_DIMS):
            assert w1h.shape == (d, HIDDEN), (
                "expected (in,out) weight layout; transpose nn.Linear weights "
                "(use load_from_torch for PyTorch checkpoints)")
            assert w2h.shape == (HIDDEN, HIDDEN)
            assert w3h.shape == (HIDDEN, od)
        self.heads_f32 = [tuple(jnp.asarray(p, jnp.float32) for p in h) for h in heads]

        w1 = jnp.zeros((d_pad, PACKED_H), jnp.float32)
        b1 = jnp.zeros((1, PACKED_H), jnp.float32)
        w2 = jnp.zeros((HIDDEN, PACKED_H), jnp.float32)   # per-head blocks stacked along lanes
        b2 = jnp.zeros((1, PACKED_H), jnp.float32)
        w3 = jnp.zeros((PACKED_H, OUT_LANES), jnp.float32)
        b3 = jnp.zeros((1, OUT_LANES), jnp.float32)
        out_off = 0
        for hd, ((w1h, b1h, w2h, b2h, w3h, b3h), od) in enumerate(
                zip(self.heads_f32, self.OUT_DIMS)):
            c0, c1 = hd * HIDDEN, (hd + 1) * HIDDEN
            w1 = w1.at[:d, c0:c1].set(w1h)
            b1 = b1.at[0, c0:c1].set(b1h)
            w2 = w2.at[:, c0:c1].set(w2h)
            b2 = b2.at[0, c0:c1].set(b2h)
            w3 = w3.at[c0:c1, out_off:out_off + od].set(w3h)
            b3 = b3.at[0, out_off:out_off + od].set(b3h)
            out_off += od

        # bf16 weights (halve HBM/VMEM traffic; MXU accumulates in f32),
        # f32 biases (added to the f32 accumulators).
        self.params = (w1.astype(jnp.bfloat16), b1,
                       w2.astype(jnp.bfloat16), b2,
                       w3.astype(jnp.bfloat16), b3)

    def __call__(self, feature, bbox):
        """feature: (B, C, H, W) f32; bbox: list of B arrays (N_i, >=4)."""
        b = feature.shape[0]
        feats, counts = [], []
        for i in range(b):
            boxes = bbox[i][:, :4] / 32.0
            rois = roi_align_jax(feature[i], boxes, output_size=7)   # (N_i, C, 7, 7)
            feats.append(rois.reshape(-1, self.channels * 7 * 7))
            counts.append(boxes.shape[0])

        # one batched kernel call over all images' ROIs
        x = jnp.concatenate(feats, axis=0)                           # (sum N_i, D)
        xy_all, z_all, conf_all = _run_heads_batched(x, self.params, self.tk)

        location_xy, location_z, orientation_conf = [], [], []
        off = 0
        for n_i in counts:
            location_xy.append(xy_all[off:off + n_i])
            location_z.append(z_all[off:off + n_i])
            orientation_conf.append(conf_all[off:off + n_i])
            off += n_i
        return location_xy, location_z, orientation_conf


if __name__ == "__main__":
    key = jax.random.PRNGKey(0)
    k_feat, k_box0, k_box1, k_params = jax.random.split(key, 4)

    B, C, H, W = 2, 32, 16, 16  # small synthetic shapes (feature map of a /32 stride backbone)
    feature = jax.random.normal(k_feat, (B, C, H, W), jnp.float32)

    def make_boxes(k, n):
        k1, k2, k3 = jax.random.split(k, 3)
        x1 = jax.random.uniform(k1, (n,), minval=0.0, maxval=300.0)
        y1 = jax.random.uniform(k2, (n,), minval=0.0, maxval=300.0)
        wh = jax.random.uniform(k3, (n, 2), minval=40.0, maxval=200.0)
        score = jnp.ones((n, 1), jnp.float32)
        # boxes carry an extra column; forward slices [:, :4] just like PyTorch
        return jnp.concatenate(
            [x1[:, None], y1[:, None], x1[:, None] + wh[:, :1], y1[:, None] + wh[:, 1:], score],
            axis=1)

    bbox = [make_boxes(k_box0, 3), make_boxes(k_box1, 5)]

    head = WDM3DPredictorHeadPallas(channels=C, key=k_params)
    loc_xy, loc_z, orient = head(feature, bbox)

    for i in range(B):
        jax.block_until_ready(loc_xy[i])
        jax.block_until_ready(loc_z[i])
        jax.block_until_ready(orient[i])
        assert loc_xy[i].shape == (bbox[i].shape[0], 2)
        assert loc_z[i].shape == (bbox[i].shape[0], 1)
        assert orient[i].shape == (bbox[i].shape[0], 2)

    # f32 pure-JAX reference of the MLP heads (same roi_align features) to
    # bound the bf16-weight error of the fused Pallas kernel.
    for i in range(B):
        boxes = bbox[i][:, :4] / 32.0
        f = roi_align_jax(feature[i], boxes, output_size=7).reshape(-1, C * 7 * 7)
        refs = []
        for (w1, b1, w2, b2, w3, b3) in head.heads_f32:
            h = jnp.maximum(f @ w1 + b1, 0.0)
            h = jnp.maximum(h @ w2 + b2, 0.0)
            refs.append(h @ w3 + b3)
        np.testing.assert_allclose(np.asarray(loc_xy[i]), np.asarray(refs[0]),
                                   rtol=1e-1, atol=1e-2)
        np.testing.assert_allclose(np.asarray(loc_z[i]), np.asarray(refs[1]),
                                   rtol=1e-1, atol=1e-2)
        np.testing.assert_allclose(np.asarray(orient[i]), np.asarray(refs[2]),
                                   rtol=1e-1, atol=1e-2)

    print("KERNEL_OK")
</pallas_src>

<mosaic_0001>
module attributes {stable_mosaic.version = 11 : i64} {
  func.func @_heads_kernel(%arg0: i32, %arg1: memref<128x1792xbf16, #tpu.memory_space<vmem>>, %arg2: memref<1792x768xbf16, #tpu.memory_space<vmem>>, %arg3: memref<1x768xf32, #tpu.memory_space<vmem>>, %arg4: memref<256x768xbf16, #tpu.memory_space<vmem>>, %arg5: memref<1x768xf32, #tpu.memory_space<vmem>>, %arg6: memref<768x128xbf16, #tpu.memory_space<vmem>>, %arg7: memref<1x128xf32, #tpu.memory_space<vmem>>, %arg8: memref<128x128xf32, #tpu.memory_space<vmem>>, %arg9: memref<128x768xf32, #tpu.memory_space<vmem>>) attributes {dimension_semantics = [#tpu.dimension_semantics<arbitrary>], iteration_bounds = array<i64: 1>, scalar_prefetch = 0 : i64, scratch_operands = 1 : i64, tpu.core_type = #tpu.core_type<tc>, window_params = [{transform_indices = @transform_0, window_bounds = array<i64: 128, 1792>}, {transform_indices = @transform_1, window_bounds = array<i64: 1792, 768>}, {pipeline_mode = #tpu.pipeline_mode<synchronous>, transform_indices = @transform_2, window_bounds = array<i64: 1, 768>}, {pipeline_mode = #tpu.pipeline_mode<synchronous>, transform_indices = @transform_3, window_bounds = array<i64: 256, 768>}, {pipeline_mode = #tpu.pipeline_mode<synchronous>, transform_indices = @transform_4, window_bounds = array<i64: 1, 768>}, {pipeline_mode = #tpu.pipeline_mode<synchronous>, transform_indices = @transform_5, window_bounds = array<i64: 768, 128>}, {pipeline_mode = #tpu.pipeline_mode<synchronous>, transform_indices = @transform_6, window_bounds = array<i64: 1, 128>}, {pipeline_mode = #tpu.pipeline_mode<synchronous>, transform_indices = @transform_7, window_bounds = array<i64: 128, 128>}]} {
    %c0_i32 = arith.constant 0 : i32
    %0 = arith.cmpi eq, %arg0, %c0_i32 : i32
    %1 = arith.extui %0 : i1 to i32
    %c0_i32_0 = arith.constant 0 : i32
    %2 = arith.cmpi ne, %1, %c0_i32_0 : i32
    scf.if %2 {
      %cst_10 = arith.constant 0.000000e+00 : f32
      %12 = vector.broadcast %cst_10 : f32 to vector<128x768xf32>
      %c0_11 = arith.constant 0 : index
      %c0_12 = arith.constant 0 : index
      %13 = vector.load %arg9[%c0_11, %c0_12] : memref<128x768xf32, #tpu.memory_space<vmem>>, vector<128x768xf32>
      tpu.vector_store %arg9[%c0_11, %c0_12], %12 {strides = array<i32>} : memref<128x768xf32, #tpu.memory_space<vmem>>, vector<128x768xf32>,
    } else {
    }
    %c0 = arith.constant 0 : index
    %c0_1 = arith.constant 0 : index
    %3 = vector.load %arg9[%c0, %c0_1] : memref<128x768xf32, #tpu.memory_space<vmem>>, vector<128x768xf32>
    %c0_2 = arith.constant 0 : index
    %c0_3 = arith.constant 0 : index
    %4 = vector.load %arg1[%c0_2, %c0_3] : memref<128x1792xbf16, #tpu.memory_space<vmem>>, vector<128x1792xbf16>
    %c0_4 = arith.constant 0 : index
    %c0_5 = arith.constant 0 : index
    %5 = vector.load %arg2[%c0_4, %c0_5] : memref<1792x768xbf16, #tpu.memory_space<vmem>>, vector<1792x768xbf16>
    %cst = arith.constant dense<0.000000e+00> : vector<128x768xf32>
    %6 = tpu.matmul %4, %5, %cst {dimension_numbers = #tpu.dot_dimension_numbers<[1], [0], [0], [1], [0, 0, 1, 1], [], []>} : vector<128x1792xbf16>, vector<1792x768xbf16>, vector<128x768xf32> -> vector<128x768xf32>
    %7 = arith.addf %3, %6 : vector<128x768xf32>
    %c0_6 = arith.constant 0 : index
    %c0_7 = arith.constant 0 : index
    %8 = vector.load %arg9[%c0_6, %c0_7] : memref<128x768xf32, #tpu.memory_space<vmem>>, vector<128x768xf32>
    tpu.vector_store %arg9[%c0_6, %c0_7], %7 {strides = array<i32>} : memref<128x768xf32, #tpu.memory_space<vmem>>, vector<128x768xf32>,
    %c0_i32_8 = arith.constant 0 : i32
    %9 = arith.cmpi eq, %arg0, %c0_i32_8 : i32
    %10 = arith.extui %9 : i1 to i32
    %c0_i32_9 = arith.constant 0 : i32
    %11 = arith.cmpi ne, %10, %c0_i32_9 : i32
    scf.if %11 {
      %c0_10 = arith.constant 0 : index
      %c0_11 = arith.constant 0 : index
      %12 = vector.load %arg9[%c0_10, %c0_11] : memref<128x768xf32, #tpu.memory_space<vmem>>, vector<128x768xf32>
      %c0_12 = arith.constant 0 : index
      %c0_13 = arith.constant 0 : index
      %13 = vector.load %arg3[%c0_12, %c0_13] : memref<1x768xf32, #tpu.memory_space<vmem>>, vector<1x768xf32>
      %14 = vector.broadcast %13 : vector<1x768xf32> to vector<128x768xf32>
      %15 = arith.addf %12, %14 : vector<128x768xf32>
      %cst_14 = arith.constant 0.000000e+00 : f32
      %16 = vector.broadcast %cst_14 : f32 to vector<128x768xf32>
      %17 = arith.maximumf %15, %16 : vector<128x768xf32>
      %18 = arith.truncf %17 : vector<128x768xf32> to vector<128x768xbf16>
      %19 = vector.extract_strided_slice %18 {offsets = [0, 0], sizes = [128, 256], strides = [1, 1]} : vector<128x768xbf16> to vector<128x256xbf16>
      %c0_15 = arith.constant 0 : index
      %c0_16 = arith.constant 0 : index
      %20 = vector.load %arg4[%c0_15, %c0_16] : memref<256x768xbf16, #tpu.memory_space<vmem>>, vector<256x256xbf16>
      %cst_17 = arith.constant dense<0.000000e+00> : vector<128x256xf32>
      %21 = tpu.matmul %19, %20, %cst_17 {dimension_numbers = #tpu.dot_dimension_numbers<[1], [0], [0], [1], [0, 0, 1, 1], [], []>} : vector<128x256xbf16>, vector<256x256xbf16>, vector<128x256xf32> -> vector<128x256xf32>
      %22 = vector.extract_strided_slice %18 {offsets = [0, 256], sizes = [128, 256], strides = [1, 1]} : vector<128x768xbf16> to vector<128x256xbf16>
      %c0_18 = arith.constant 0 : index
      %c256 = arith.constant 256 : index
      %23 = vector.load %arg4[%c0_18, %c256] : memref<256x768xbf16, #tpu.memory_space<vmem>>, vector<256x256xbf16>
      %cst_19 = arith.constant dense<0.000000e+00> : vector<128x256xf32>
      %24 = tpu.matmul %22, %23, %cst_19 {dimension_numbers = #tpu.dot_dimension_numbers<[1], [0], [0], [1], [0, 0, 1, 1], [], []>} : vector<128x256xbf16>, vector<256x256xbf16>, vector<128x256xf32> -> vector<128x256xf32>
      %25 = vector.extract_strided_slice %18 {offsets = [0, 512], sizes = [128, 256], strides = [1, 1]} : vector<128x768xbf16> to vector<128x256xbf16>
      %c0_20 = arith.constant 0 : index
      %c512 = arith.constant 512 : index
      %26 = vector.load %arg4[%c0_20, %c512] : memref<256x768xbf16, #tpu.memory_space<vmem>>, vector<256x256xbf16>
      %cst_21 = arith.constant dense<0.000000e+00> : vector<128x256xf32>
      %27 = tpu.matmul %25, %26, %cst_21 {dimension_numbers = #tpu.dot_dimension_numbers<[1], [0], [0], [1], [0, 0, 1, 1], [], []>} : vector<128x256xbf16>, vector<256x256xbf16>, vector<128x256xf32> -> vector<128x256xf32>
      %28 = tpu.concatenate %21, %24, %27 in 1 : vector<128x256xf32>, vector<128x256xf32>, vector<128x256xf32> -> vector<128x768xf32>
      %c0_22 = arith.constant 0 : index
      %c0_23 = arith.constant 0 : index
      %29 = vector.load %arg5[%c0_22, %c0_23] : memref<1x768xf32, #tpu.memory_space<vmem>>, vector<1x768xf32>
      %30 = vector.broadcast %29 : vector<1x768xf32> to vector<128x768xf32>
      %31 = arith.addf %28, %30 : vector<128x768xf32>
      %cst_24 = arith.constant 0.000000e+00 : f32
      %32 = vector.broadcast %cst_24 : f32 to vector<128x768xf32>
      %33 = arith.maximumf %31, %32 : vector<128x768xf32>
      %34 = arith.truncf %33 : vector<128x768xf32> to vector<128x768xbf16>
      %c0_25 = arith.constant 0 : index
      %c0_26 = arith.constant 0 : index
      %35 = vector.load %arg6[%c0_25, %c0_26] : memref<768x128xbf16, #tpu.memory_space<vmem>>, vector<768x128xbf16>
      %cst_27 = arith.constant dense<0.000000e+00> : vector<128x128xf32>
      %36 = tpu.matmul %34, %35, %cst_27 {dimension_numbers = #tpu.dot_dimension_numbers<[1], [0], [0], [1], [0, 0, 1, 1], [], []>} : vector<128x768xbf16>, vector<768x128xbf16>, vector<128x128xf32> -> vector<128x128xf32>
      %c0_28 = arith.constant 0 : index
      %c0_29 = arith.constant 0 : index
      %37 = vector.load %arg7[%c0_28, %c0_29] : memref<1x128xf32, #tpu.memory_space<vmem>>, vector<1x128xf32>
      %38 = vector.broadcast %37 : vector<1x128xf32> to vector<128x128xf32>
      %39 = arith.addf %36, %38 : vector<128x128xf32>
      %c0_30 = arith.constant 0 : index
      %c0_31 = arith.constant 0 : index
      %40 = vector.load %arg8[%c0_30, %c0_31] : memref<128x128xf32, #tpu.memory_space<vmem>>, vector<128x128xf32>
      tpu.vector_store %arg8[%c0_30, %c0_31], %39 {strides = array<i32>} : memref<128x128xf32, #tpu.memory_space<vmem>>, vector<128x128xf32>,
    } else {
    }
    return
  }
  func.func @transform_0(%arg0: i32) -> (i32, i32) {
    %c0_i32 = arith.constant 0 : i32
    %c0_i32_0 = arith.constant 0 : i32
    return %c0_i32, %arg0 : i32, i32
  }
  func.func @transform_1(%arg0: i32) -> (i32, i32) {
    %c0_i32 = arith.constant 0 : i32
    %c0_i32_0 = arith.constant 0 : i32
    return %arg0, %c0_i32 : i32, i32
  }
  func.func @transform_2(%arg0: i32) -> (i32, i32) {
    %c0_i32 = arith.constant 0 : i32
    %c0_i32_0 = arith.constant 0 : i32
    %c0_i32_1 = arith.constant 0 : i32
    return %c0_i32, %c0_i32_0 : i32, i32
  }
  func.func @transform_3(%arg0: i32) -> (i32, i32) {
    %c0_i32 = arith.constant 0 : i32
    %c0_i32_0 = arith.constant 0 : i32
    %c0_i32_1 = arith.constant 0 : i32
    return %c0_i32, %c0_i32_0 : i32, i32
  }
  func.func @transform_4(%arg0: i32) -> (i32, i32) {
    %c0_i32 = arith.constant 0 : i32
    %c0_i32_0 = arith.constant 0 : i32
    %c0_i32_1 = arith.constant 0 : i32
    return %c0_i32, %c0_i32_0 : i32, i32
  }
  func.func @transform_5(%arg0: i32) -> (i32, i32) {
    %c0_i32 = arith.constant 0 : i32
    %c0_i32_0 = arith.constant 0 : i32
    %c0_i32_1 = arith.constant 0 : i32
    return %c0_i32, %c0_i32_0 : i32, i32
  }
  func.func @transform_6(%arg0: i32) -> (i32, i32) {
    %c0_i32 = arith.constant 0 : i32
    %c0_i32_0 = arith.constant 0 : i32
    %c0_i32_1 = arith.constant 0 : i32
    return %c0_i32, %c0_i32_0 : i32, i32
  }
  func.func @transform_7(%arg0: i32) -> (i32, i32) {
    %c0_i32 = arith.constant 0 : i32
    %c0_i32_0 = arith.constant 0 : i32
    %c0_i32_1 = arith.constant 0 : i32
    return %c0_i32, %c0_i32_0 : i32, i32
  }
}

</mosaic_0001>

<bundles_post_ra>
// kernel: tpu_custom_call.1
= control target key start
LH: loop header
LB: loop body
LE: loop exit
PB: predicated region body
PF: predicated region fallthrough
CT: control target
= control target key end

     0   :  { %12 = vsyncpa [#allocation4], 0  ;;  %s14386_s0 = inlined_call_operand.hbm [shape: bf16[128,1792], index: 0, kind: input, shape index: {}]   ;;  %s14387_s1 = inlined_call_operand.hbm [shape: bf16[1792,768], index: 1, kind: input, shape index: {}]   ;;  %s14388_s2 = inlined_call_operand.hbm [shape: f32[1,768], index: 2, kind: input, shape index: {}]   ;;  %s14389_s3 = inlined_call_operand.hbm [shape: bf16[256,768], index: 3, kind: input, shape index: {}]   ;;  %s14390_s4 = inlined_call_operand.hbm [shape: f32[1,768], index: 4, kind: input, shape index: {}]   ;;  %s14391_s5 = inlined_call_operand.hbm [shape: bf16[768,128], index: 5, kind: input, shape index: {}]   ;;  %s14392_s6 = inlined_call_operand.hbm [shape: f32[1,128], index: 6, kind: input, shape index: {}]   ;;  %s14393_s7 = inlined_call_operand.hbm [shape: f32[128,128], index: 7, kind: output, shape index: {}]  }
   0x1   :  { %13 = vsyncpa [#allocation7], 0 }
   0x2   :  { %14 = vsyncpa [#allocation10], 0 }
   0x3   :  { %15 = vsyncpa [#allocation13], 0 }
   0x4   :  { %16 = vsyncpa [#allocation5], 0  ;;  %s12776_s24 = smov [#allocation6]  }
   0x5   :  { %s34_s25 = sshll.u32 %s12776_s24, 4  ;;  %s35_s25 = int_to_ptr.vmem [resolvable:$true] %s34_s25 }
   0x6   :  { %s12614_s26 = scalar_lea.vmem %s35_s25, 86016  ;;  %p12619_p1 = scmp.lt.s32.totalorder %s35_s25, %s35_s25 }
   0x7   :  { %p12615_p0 = scmp.ne.s32.totalorder %s35_s25, %s12614_s26  ;;  %p12620_p2 = scmp.lt.s32.totalorder %s12614_s26, %s12614_s26 }
   0x9   :  { %p12621_p3 = por %p12620_p2, %p12619_p1 }
   0xb   :  { %p12622_p4 = pnand %p12621_p3, %p12615_p0 }
   0xd   :  { %12625 = shalt.err (!%p12622_p4)
}
   0xe   :  { %s12777_s27 = smov 384   ;;  %s12778_s28 = smov 24  }
   0xf   :  { %40 = dma.hbm_to_vmem [thread:$0]  %s14387_s1, 86016, %s35_s25, [#allocation7], %s12777_s27, %s12777_s27, %s12778_s28  }
  0x10   :  { %s12779_s8 = smov [#allocation9]   ;;  %s12780_s10 = smov [#allocation12]  }
  0x11   :  { %s56_s9 = sshll.u32 %s12779_s8, 4  ;;  %s78_s11 = sshll.u32 %s12780_s10, 4  ;;  %s57_s9 = int_to_ptr.vmem [resolvable:$true] %s56_s9  ;;  %s79_s11 = int_to_ptr.vmem [resolvable:$true] %s78_s11 }
  0x12   :  { %s12634_s12 = scalar_lea.vmem %s57_s9, 12288  ;;  %p12639_p6 = scmp.lt.s32.totalorder %s57_s9, %s57_s9 }
  0x13   :  { %p12635_p5 = scmp.ne.s32.totalorder %s57_s9, %s12634_s12  ;;  %p12640_p7 = scmp.lt.s32.totalorder %s12634_s12, %s12634_s12 }
  0x15   :  { %p12641_p8 = por %p12640_p7, %p12639_p6 }
  0x17   :  { %p12642_p9 = pnand %p12641_p8, %p12635_p5 }
  0x19   :  { %12645 = shalt.err (!%p12642_p9)
}
  0x1a   :  { %62 = dma.hbm_to_vmem [thread:$0]  %s14389_s3, 12288, %s57_s9, [#allocation10], %s12777_s27, %s12777_s27, %s12778_s28  }
  0x1b   :  { %s12654_s15 = scalar_lea.vmem %s79_s11, 6144  ;;  %p12659_p11 = scmp.lt.s32.totalorder %s79_s11, %s79_s11 }
  0x1c   :  { %p12655_p10 = scmp.ne.s32.totalorder %s79_s11, %s12654_s15  ;;  %p12660_p12 = scmp.lt.s32.totalorder %s12654_s15, %s12654_s15 }
  0x1e   :  { %p12661_p13 = por %p12660_p12, %p12659_p11 }
  0x20   :  { %p12662_p0 = pnand %p12661_p13, %p12655_p10 }
  0x22   :  { %12665 = shalt.err (!%p12662_p0)
}
  0x23   :  { %s12781_s1 = smov 64   ;;  %s12782_s16 = smov 4  }
  0x24   :  { %84 = dma.hbm_to_vmem [thread:$0]  %s14391_s5, 6144, %s79_s11, [#allocation13], %s12781_s1, %s12781_s1, %s12782_s16  }
  0x25   :  { %s12783_s19 = smov [#allocation3]  }
  0x26   :  { %s22_s20 = sshll.u32 %s12783_s19, 4  ;;  %s23_s20 = int_to_ptr.vmem [resolvable:$true] %s22_s20 }
  0x27   :  { %s12674_s21 = scalar_lea.vmem %s23_s20, 14336  ;;  %p12679_p2 = scmp.lt.s32.totalorder %s23_s20, %s23_s20 }
  0x28   :  { %p12675_p1 = scmp.ne.s32.totalorder %s23_s20, %s12674_s21  ;;  %p12680_p3 = scmp.lt.s32.totalorder %s12674_s21, %s12674_s21 }
  0x2a   :  { %p12681_p4 = por %p12680_p3, %p12679_p2 }
  0x2c   :  { %p12682_p5 = pnand %p12681_p4, %p12675_p1 }
  0x2e   :  { %12685 = shalt.err (!%p12682_p5)
}
  0x2f   :  { %s12784_s3 = smov 896   ;;  %s12785_s22 = smov 56  }
  0x30   :  { %28 = dma.hbm_to_vmem [thread:$0]  %s14386_s0, 14336, %s23_s20, [#allocation4], %s12784_s3, %s12784_s3, %s12785_s22  }
  0x31   :  { %s12786_s25 = smov [#allocation8]   ;;  %s12787_s27 = smov [#allocation11]  }
  0x32   :  { %s47_s26 = sshll.u32 %s12786_s25, 4  ;;  %s69_s5 = sshll.u32 %s12787_s27, 4  ;;  %s48_s26 = int_to_ptr.vmem [resolvable:$true] %s47_s26  ;;  %s70_s5 = int_to_ptr.vmem [resolvable:$true] %s69_s5 }
  0x33   :  { %s12694_s28 = scalar_lea.vmem %s48_s26, 96  ;;  %p12699_p7 = scmp.lt.s32.totalorder %s48_s26, %s48_s26 }
  0x34   :  { %p12695_p6 = scmp.ne.s32.totalorder %s48_s26, %s12694_s28  ;;  %p12700_p8 = scmp.lt.s32.totalorder %s12694_s28, %s12694_s28 }
  0x36   :  { %p12701_p9 = por %p12700_p8, %p12699_p7 }
  0x38   :  { %p12702_p10 = pnand %p12701_p9, %p12695_p6 }
  0x3a   :  { %12705 = shalt.err (!%p12702_p10)
}
  0x3b   :  { %50 = dma.hbm_to_vmem [thread:$0]  %s14388_s2, 96, %s48_s26, [#allocation7]  }
  0x3c   :  { %s12714_s8 = scalar_lea.vmem %s70_s5, 96  ;;  %p12719_p12 = scmp.lt.s32.totalorder %s70_s5, %s70_s5 }
  0x3d   :  { %p12715_p11 = scmp.ne.s32.totalorder %s70_s5, %s12714_s8  ;;  %p12720_p13 = scmp.lt.s32.totalorder %s12714_s8, %s12714_s8 }
  0x3f   :  { %p12721_p0 = por %p12720_p13, %p12719_p12 }
  0x41   :  { %p12722_p1 = pnand %p12721_p0, %p12715_p11 }
  0x43   :  { %12725 = shalt.err (!%p12722_p1)
}
  0x44   :  { %72 = dma.hbm_to_vmem [thread:$0]  %s14390_s4, 96, %s70_s5, [#allocation10]  }
  0x45   :  { %s12788_s10 = smov [#allocation14]  }
  0x46   :  { %s91_s11 = sshll.u32 %s12788_s10, 4  ;;  %s92_s11 = int_to_ptr.vmem [resolvable:$true] %s91_s11 }
  0x47   :  { %s12734_s12 = scalar_lea.vmem %s92_s11, 16  ;;  %s12738_s13 = scalar_lea.vmem %s92_s11, 32 }
  0x48   :  { %p12735_p2 = scmp.ne.s32.totalorder %s92_s11, %s12734_s12  ;;  %p12739_p3 = scmp.lt.s32.totalorder %s92_s11, %s92_s11 }
  0x49   :  { %p12740_p4 = scmp.lt.s32.totalorder %s12738_s13, %s12734_s12 }
  0x4b   :  { %p12741_p5 = por %p12740_p4, %p12739_p3 }
  0x4d   :  { %p12742_p6 = pnand %p12741_p5, %p12735_p2 }
  0x4f   :  { %12745 = shalt.err (!%p12742_p6)
}
  0x50   :  { %94 = dma.hbm_to_vmem [thread:$0]  %s14392_s6, 16, %s92_s11, [#allocation13]  }
  0x51   :  { %12766 = dma.done.wait [#allocation4], 14336  }
  0x52   :  { %12767 = vsyncadd [#allocation4], 4294952960 }
  0x53   :  { %12768 = dma.done.wait [#allocation7], 86112  }
  0x54   :  { %12769 = vsyncadd [#allocation7], 4294881184 }
  0x55   :  { %12770 = dma.done.wait [#allocation10], 12384  }
  0x56   :  { %12771 = vsyncadd [#allocation10], 4294954912 }
  0x57   :  { %12772 = dma.done.wait [#allocation13], 6160  }
  0x58   :  { %12773 = vsyncadd [#allocation13], 4294961136  ;;  %v11011_v0 = vld [vmem:[#allocation6 + $0x154] ss:$24 sps:$4 sm:$0xff]   ;;  %v11015_v2 = vld [vmem:[#allocation6 + $0x150] ss:$24 sps:$4 sm:$0xff]  }
  0x59   :  { %v11013_v1 = vld [vmem:[#allocation6 + $0x454] ss:$24 sps:$4 sm:$0xff]   ;;  %5017 = vmatprep.subr.bf16.mxu0 %v11011_v0  ;;  %v11016_v3 = vld [vmem:[#allocation6 + $0x450] ss:$24 sps:$4 sm:$0xff]   ;;  %v11017_v4 = vld [vmem:[#allocation6 + $0x124] ss:$24 sps:$4 sm:$0xff]  }
  0x5a   :  { %5130 = vmatprep.subr.bf16.mxu1 %v11013_v1  ;;  %5018 = vmatpush1.bf16.msra.mxu0 %v11015_v2  ;;  %v11019_v5 = vld [vmem:[#allocation6 + $0x424] ss:$24 sps:$4 sm:$0xff]   ;;  %v11021_v6 = vld [vmem:[#allocation6 + $0x120] ss:$24 sps:$4 sm:$0xff]   ;;  %v11023_v8 = vld [vmem:[#allocation6 + $0xf4] ss:$24 sps:$4 sm:$0xff]  }
  0x5b   :  { %5131 = vmatpush1.bf16.msra.mxu1 %v11016_v3  ;;  %5019 = vmatprep.subr.bf16.mxu0 %v11017_v4  ;;  %v11022_v7 = vld [vmem:[#allocation6 + $0x420] ss:$24 sps:$4 sm:$0xff]   ;;  %v11025_v9 = vld [vmem:[#allocation6 + $0x3f4] ss:$24 sps:$4 sm:$0xff]   ;;  %v11027_v10 = vld [vmem:[#allocation6 + $0xf0] ss:$24 sps:$4 sm:$0xff]  }
  0x5c   :  { %5132 = vmatprep.subr.bf16.mxu1 %v11019_v5  ;;  %v11028_v11 = vld [vmem:[#allocation6 + $0x3f0] ss:$24 sps:$4 sm:$0xff]   ;;  %v11029_v12 = vld [vmem:[#allocation6 + $0xc4] ss:$24 sps:$4 sm:$0xff]   ;;  %v11033_v14 = vld [vmem:[#allocation6 + $0xc0] ss:$24 sps:$4 sm:$0xff]  }
  0x5d   :  { %v11031_v13 = vld [vmem:[#allocation6 + $0x3c4] ss:$24 sps:$4 sm:$0xff]   ;;  %v11034_v15 = vld [vmem:[#allocation6 + $0x3c0] ss:$24 sps:$4 sm:$0xff]   ;;  %v11035_v16 = vld [vmem:[#allocation6 + $0x94] ss:$24 sps:$4 sm:$0xff]  }
  0x5e   :  { %5020 = vmatpush1.bf16.msra.mxu0 %v11021_v6  ;;  %v11037_v17 = vld [vmem:[#allocation6 + $0x394] ss:$24 sps:$4 sm:$0xff]   ;;  %v11039_v18 = vld [vmem:[#allocation6 + $0x90] ss:$24 sps:$4 sm:$0xff]   ;;  %v11041_v20 = vld [vmem:[#allocation6 + $0x64] ss:$24 sps:$4 sm:$0xff]  }
  0x5f   :  { %5133 = vmatpush1.bf16.msra.mxu1 %v11022_v7  ;;  %5021 = vmatprep.subr.bf16.mxu0 %v11023_v8  ;;  %v11040_v19 = vld [vmem:[#allocation6 + $0x390] ss:$24 sps:$4 sm:$0xff]   ;;  %v11043_v21 = vld [vmem:[#allocation6 + $0x364] ss:$24 sps:$4 sm:$0xff]   ;;  %v11045_v22 = vld [vmem:[#allocation6 + $0x60] ss:$24 sps:$4 sm:$0xff]  }
  0x60   :  { %5134 = vmatprep.subr.bf16.mxu1 %v11025_v9  ;;  %v11046_v23 = vld [vmem:[#allocation6 + $0x360] ss:$24 sps:$4 sm:$0xff]   ;;  %v11047_v24 = vld [vmem:[#allocation6 + $0x34] ss:$24 sps:$4 sm:$0xff]   ;;  %v11051_v26 = vld [vmem:[#allocation6 + $0x30] ss:$24 sps:$4 sm:$0xff]  }
  0x61   :  { %v11049_v25 = vld [vmem:[#allocation6 + $0x334] ss:$24 sps:$4 sm:$0xff]   ;;  %v11052_v27 = vld [vmem:[#allocation6 + $0x330] ss:$24 sps:$4 sm:$0xff]   ;;  %v11053_v28 = vld [vmem:[#allocation6 + $0x4] ss:$24 sps:$4 sm:$0xff]  }
  0x62   :  { %5022 = vmatpush1.bf16.msra.mxu0 %v11027_v10  ;;  %v11055_v29 = vld [vmem:[#allocation6 + $0x304] ss:$24 sps:$4 sm:$0xff]   ;;  %v11057_v30 = vld [vmem:[#allocation6] ss:$24 sps:$4 sm:$0xff]   ;;  %v11059_v32 = vld [vmem:[#allocation6 + $0x2d4] ss:$24 sps:$4 sm:$0xff]  }
  0x63   :  { %5135 = vmatpush1.bf16.msra.mxu1 %v11028_v11  ;;  %5023 = vmatprep.subr.bf16.mxu0 %v11029_v12  ;;  %v11058_v31 = vld [vmem:[#allocation6 + $0x300] ss:$24 sps:$4 sm:$0xff]   ;;  %v11061_v33 = vld [vmem:[#allocation6 + $0x5d4] ss:$24 sps:$4 sm:$0xff]   ;;  %v11063_v34 = vld [vmem:[#allocation6 + $0x2d0] ss:$24 sps:$4 sm:$0xff]  }
  0x64   :  { %5136 = vmatprep.subr.bf16.mxu1 %v11031_v13  ;;  %v11064_v35 = vld [vmem:[#allocation6 + $0x5d0] ss:$24 sps:$4 sm:$0xff]   ;;  %v11065_v36 = vld [vmem:[#allocation6 + $0x2a4] ss:$24 sps:$4 sm:$0xff]   ;;  %v11069_v38 = vld [vmem:[#allocation6 + $0x2a0] ss:$24 sps:$4 sm:$0xff]  }
  0x65   :  { %v11067_v37 = vld [vmem:[#allocation6 + $0x5a4] ss:$24 sps:$4 sm:$0xff]   ;;  %v11070_v39 = vld [vmem:[#allocation6 + $0x5a0] ss:$24 sps:$4 sm:$0xff]   ;;  %v11071_v40 = vld [vmem:[#allocation6 + $0x274] ss:$24 sps:$4 sm:$0xff]  }
  0x66   :  { %5024 = vmatpush1.bf16.msra.mxu0 %v11033_v14  ;;  %v11073_v41 = vld [vmem:[#allocation6 + $0x574] ss:$24 sps:$4 sm:$0xff]   ;;  %v11075_v42 = vld [vmem:[#allocation6 + $0x270] ss:$24 sps:$4 sm:$0xff]   ;;  %v11077_v44 = vld [vmem:[#allocation6 + $0x244] ss:$24 sps:$4 sm:$0xff]  }
  0x67   :  { %5137 = vmatpush1.bf16.msra.mxu1 %v11034_v15  ;;  %5025 = vmatprep.subr.bf16.mxu0 %v11035_v16  ;;  %v11076_v43 = vld [vmem:[#allocation6 + $0x570] ss:$24 sps:$4 sm:$0xff]   ;;  %v11079_v45 = vld [vmem:[#allocation6 + $0x544] ss:$24 sps:$4 sm:$0xff]   ;;  %v11081_v46 = vld [vmem:[#allocation6 + $0x240] ss:$24 sps:$4 sm:$0xff]  }
  0x68   :  { %5138 = vmatprep.subr.bf16.mxu1 %v11037_v17  ;;  %v11082_v47 = vld [vmem:[#allocation6 + $0x540] ss:$24 sps:$4 sm:$0xff]   ;;  %v11107_v48 = vld [vmem:[#allocation3 + $0x4] ss:$56 sps:$4 sm:$0xff]   ;;  %v11083_v49 = vld [vmem:[#allocation6 + $0x214] ss:$24 sps:$4 sm:$0xff]  }
  0x69   :  { %v11109_v50 = vld [vmem:[#allocation3 + $0xc] ss:$56 sps:$4 sm:$0xff]   ;;  %5049 = vmatprep.mubr.bf16.mxu0 %v11107_v48  ;;  %v11087_v52 = vld [vmem:[#allocation6 + $0x210] ss:$24 sps:$4 sm:$0xff]   ;;  %v11093_v56 = vld [vmem:[#allocation6 + $0x1e0] ss:$24 sps:$4 sm:$0xff]  }
  0x6a   :  { %5026 = vmatpush1.bf16.msra.mxu0 %v11039_v18  ;;  %v11085_v51 = vld [vmem:[#allocation6 + $0x514] ss:$24 sps:$4 sm:$0xff]   ;;  %5162 = vmatprep.mubr.bf16.mxu1 %v11109_v50  ;;  %v11088_v53 = vld [vmem:[#allocation6 + $0x510] ss:$24 sps:$4 sm:$0xff]   ;;  %v11089_v54 = vld [vmem:[#allocation6 + $0x1e4] ss:$24 sps:$4 sm:$0xff]  }
  0x6b   :  { %5139 = vmatpush1.bf16.msra.mxu1 %v11040_v19  ;;  %5027 = vmatprep.subr.bf16.mxu0 %v11041_v20  ;;  %v11091_v55 = vld [vmem:[#allocation6 + $0x4e4] ss:$24 sps:$4 sm:$0xff]   ;;  %v11094_v57 = vld [vmem:[#allocation6 + $0x4e0] ss:$24 sps:$4 sm:$0xff]   ;;  %v11095_v58 = vld [vmem:[#allocation6 + $0x1b4] ss:$24 sps:$4 sm:$0xff]  }
  0x6c   :  { %5140 = vmatprep.subr.bf16.mxu1 %v11043_v21  ;;  %v11097_v59 = vld [vmem:[#allocation6 + $0x4b4] ss:$24 sps:$4 sm:$0xff]   ;;  %v11099_v60 = vld [vmem:[#allocation6 + $0x1b0] ss:$24 sps:$4 sm:$0xff]   ;;  %v11101_v62 = vld [vmem:[#allocation6 + $0x184] ss:$24 sps:$4 sm:$0xff]  }
  0x6d   :  { %v11100_v61 = vld [vmem:[#allocation6 + $0x4b0] ss:$24 sps:$4 sm:$0xff]   ;;  %v11103_v63 = vld [vmem:[#allocation6 + $0x484] ss:$24 sps:$4 sm:$0xff]   ;;  %v11105_v0 = vld [vmem:[#allocation6 + $0x180] ss:$24 sps:$4 sm:$0xff]  }
  0x6e   :  { %5028 = vmatpush1.bf16.msra.mxu0 %v11045_v22  ;;  %v11106_v1 = vld [vmem:[#allocation6 + $0x480] ss:$24 sps:$4 sm:$0xff]   ;;  %v11115_v2 = vld [vmem:[#allocation6 + $0x754] ss:$24 sps:$4 sm:$0xff]   ;;  %v11113_v6 = vld [vmem:[#allocation6 + $0x750] ss:$24 sps:$4 sm:$0xff]  }
  0x6f   :  { %5141 = vmatpush1.bf16.msra.mxu1 %v11046_v23  ;;  %5029 = vmatprep.subr.bf16.mxu0 %v11047_v24  ;;  %v11118_v3 = vld [vmem:[#allocation6 + $0xa54] ss:$24 sps:$4 sm:$0xff]   ;;  %v11111_v4 = vld [vmem:[#allocation3] ss:$56 sps:$4 sm:$0xff]   ;;  %v11116_v7 = vld [vmem:[#allocation6 + $0xa50] ss:$24 sps:$4 sm:$0xff]  }
  0x70   :  { %5142 = vmatprep.subr.bf16.mxu1 %v11049_v25  ;;  %v11112_v5 = vld [vmem:[#allocation3 + $0x8] ss:$56 sps:$4 sm:$0xff]   ;;  %v11121_v8 = vld [vmem:[#allocation6 + $0x724] ss:$24 sps:$4 sm:$0xff]   ;;  %v11125_v10 = vld [vmem:[#allocation3 + $0x74] ss:$56 sps:$4 sm:$0xff]  }
  0x71   :  { %v11124_v9 = vld [vmem:[#allocation6 + $0xa24] ss:$24 sps:$4 sm:$0xff]   ;;  %v11119_v12 = vld [vmem:[#allocation6 + $0x720] ss:$24 sps:$4 sm:$0xff]   ;;  %v11133_v14 = vld [vmem:[#allocation6 + $0x6f4] ss:$24 sps:$4 sm:$0xff]  }
  0x72   :  { %5030 = vmatpush1.bf16.msra.mxu0 %v11051_v26  ;;  %v11127_v11 = vld [vmem:[#allocation3 + $0x7c] ss:$56 sps:$4 sm:$0xff]   ;;  %v11122_v13 = vld [vmem:[#allocation6 + $0xa20] ss:$24 sps:$4 sm:$0xff]   ;;  %v11129_v16 = vld [vmem:[#allocation3 + $0x70] ss:$56 sps:$4 sm:$0xff]  }
  0x73   :  { %5143 = vmatpush1.bf16.msra.mxu1 %v11052_v27  ;;  %5031 = vmatprep.subr.bf16.mxu0 %v11053_v28  ;;  %v11136_v15 = vld [vmem:[#allocation6 + $0x9f4] ss:$24 sps:$4 sm:$0xff]   ;;  %v11130_v17 = vld [vmem:[#allocation3 + $0x78] ss:$56 sps:$4 sm:$0xff]   ;;  %v11139_v20 = vld [vmem:[#allocation6 + $0x6c4] ss:$24 sps:$4 sm:$0xff]  }
  0x74   :  { %5144 = vmatprep.subr.bf16.mxu1 %v11055_v29  ;;  %v11131_v18 = vld [vmem:[#allocation6 + $0x6f0] ss:$24 sps:$4 sm:$0xff]   ;;  %v11142_v21 = vld [vmem:[#allocation6 + $0x9c4] ss:$24 sps:$4 sm:$0xff]   ;;  %v11137_v24 = vld [vmem:[#allocation6 + $0x6c0] ss:$24 sps:$4 sm:$0xff]  }
  0x75   :  { %v11134_v19 = vld [vmem:[#allocation6 + $0x9f0] ss:$24 sps:$4 sm:$0xff]   ;;  %v11143_v22 = vld [vmem:[#allocation3 + $0xe4] ss:$56 sps:$4 sm:$0xff]   ;;  %v11140_v25 = vld [vmem:[#allocation6 + $0x9c0] ss:$24 sps:$4 sm:$0xff]  }
  0x76   :  { %5032 = vmatpush1.bf16.msra.mxu0 %v11057_v30  ;;  %v11145_v23 = vld [vmem:[#allocation3 + $0xec] ss:$56 sps:$4 sm:$0xff]   ;;  %v11147_v28 = vld [vmem:[#allocation3 + $0xe0] ss:$56 sps:$4 sm:$0xff]   ;;  %v11149_v30 = vld [vmem:[#allocation6 + $0x690] ss:$24 sps:$4 sm:$0xff]  }
  0x77   :  { %5145 = vmatpush1.bf16.msra.mxu1 %v11058_v31  ;;  %5033 = vmatprep.subr.bf16.mxu0 %v11059_v32  ;;  %v11151_v26 = vld [vmem:[#allocation6 + $0x694] ss:$24 sps:$4 sm:$0xff]   ;;  %v11148_v29 = vld [vmem:[#allocation3 + $0xe8] ss:$56 sps:$4 sm:$0xff]   ;;  %v11157_v32 = vld [vmem:[#allocation6 + $0x664] ss:$24 sps:$4 sm:$0xff]  }
  0x78   :  { %5146 = vmatprep.subr.bf16.mxu1 %v11061_v33  ;;  %v11154_v27 = vld [vmem:[#allocation6 + $0x994] ss:$24 sps:$4 sm:$0xff]   ;;  %v11152_v31 = vld [vmem:[#allocation6 + $0x990] ss:$24 sps:$4 sm:$0xff]   ;;  %v11160_v33 = vld [vmem:[#allocation6 + $0x964] ss:$24 sps:$4 sm:$0xff]  }
  0x79   :  { %v11173_v48 = vld [vmem:[#allocation6 + $0x600] ss:$24 sps:$4 sm:$0xff]   ;;  %v11187_v50 = vld [vmem:[#allocation6 + $0x8d4] ss:$24 sps:$4 sm:$0xff]   ;;  %s12789_s4 = smov [#allocation15]  }
  0x7a   :  { %5034 = vmatpush2.bf16.msra.mxu0 %v11063_v34  ;;  %v11161_v34 = vld [vmem:[#allocation3 + $0x154] ss:$56 sps:$4 sm:$0xff]   ;;  %s9843_s6 = sshll.u32 %s12789_s4, 4  ;;  %s9844_s6 = int_to_ptr.vmem [resolvable:$true] %s9843_s6 }
  0x7b   :  { %5147 = vmatpush2.bf16.msra.mxu1 %v11064_v35  ;;  %5035 = vmatprep.subr.bf16.mxu0 %v11065_v36  ;;  %v11163_v35 = vld [vmem:[#allocation3 + $0x15c] ss:$56 sps:$4 sm:$0xff]   ;;  %v11155_v36 = vld [vmem:[#allocation6 + $0x660] ss:$24 sps:$4 sm:$0xff]   ;;  %s12746_s15 = scalar_lea.vmem %s9844_s6, 2048  ;;  %p12751_p8 = scmp.lt.s32.totalorder %s9844_s6, %s9844_s6 }
  0x7c   :  { %5148 = vmatprep.subr.bf16.mxu1 %v11067_v37  ;;  %v11158_v37 = vld [vmem:[#allocation6 + $0x960] ss:$24 sps:$4 sm:$0xff]   ;;  %p12747_p7 = scmp.ne.s32.totalorder %s9844_s6, %s12746_s15  ;;  %p12752_p9 = scmp.lt.s32.totalorder %s12746_s15, %s12746_s15 }
  0x7e   :  { %5036 = vmatpush2.bf16.msra.mxu0 %v11069_v38  ;;  %v11169_v38 = vld [vmem:[#allocation6 + $0x634] ss:$24 sps:$4 sm:$0xff]   ;;  %p12753_p10 = por %p12752_p9, %p12751_p8 }
  0x7f   :  { %5149 = vmatpush2.bf16.msra.mxu1 %v11070_v39  ;;  %5037 = vmatprep.subr.bf16.mxu0 %v11071_v40  ;;  %v11172_v39 = vld [vmem:[#allocation6 + $0x934] ss:$24 sps:$4 sm:$0xff]   ;;  %v11165_v40 = vld [vmem:[#allocation3 + $0x150] ss:$56 sps:$4 sm:$0xff]  }
  0x80   :  { %5150 = vmatprep.subr.bf16.mxu1 %v11073_v41  ;;  %v11166_v41 = vld [vmem:[#allocation3 + $0x158] ss:$56 sps:$4 sm:$0xff]   ;;  %p12754_p11 = pnand %p12753_p10, %p12747_p7 }
  0x82   :  { %5038 = vmatpush2.bf16.msra.mxu0 %v11075_v42  ;;  %v11167_v42 = vld [vmem:[#allocation6 + $0x630] ss:$24 sps:$4 sm:$0xff]  }
  0x83   :  { %5151 = vmatpush2.bf16.msra.mxu1 %v11076_v43  ;;  %5039 = vmatprep.subr.bf16.mxu0 %v11077_v44  ;;  %v11170_v43 = vld [vmem:[#allocation6 + $0x930] ss:$24 sps:$4 sm:$0xff]   ;;  %v11175_v44 = vld [vmem:[#allocation6 + $0x604] ss:$24 sps:$4 sm:$0xff]  }
  0x84   :  { %5152 = vmatprep.subr.bf16.mxu1 %v11079_v45  ;;  %v11178_v45 = vld [vmem:[#allocation6 + $0x904] ss:$24 sps:$4 sm:$0xff]  }
  0x86   :  { %5040 = vmatpush2.bf16.msra.mxu0 %v11081_v46  ;;  %v11179_v46 = vld [vmem:[#allocation3 + $0x1c4] ss:$56 sps:$4 sm:$0xff]  }
  0x87   :  { %5153 = vmatpush2.bf16.msra.mxu1 %v11082_v47  ;;  %5041 = vmatprep.subr.bf16.mxu0 %v11083_v49  ;;  %v11181_v47 = vld [vmem:[#allocation3 + $0x1cc] ss:$56 sps:$4 sm:$0xff]   ;;  %v11176_v49 = vld [vmem:[#allocation6 + $0x900] ss:$24 sps:$4 sm:$0xff]  }
  0x88   :  { %5154 = vmatprep.subr.bf16.mxu1 %v11085_v51  ;;  %v11190_v51 = vld [vmem:[#allocation6 + $0xbd4] ss:$24 sps:$4 sm:$0xff]  }
  0x8a   :  { %5042 = vmatpush2.bf16.msra.mxu0 %v11087_v52  ;;  %v11183_v52 = vld [vmem:[#allocation3 + $0x1c0] ss:$56 sps:$4 sm:$0xff]  }
  0x8b   :  { %5155 = vmatpush2.bf16.msra.mxu1 %v11088_v53  ;;  %5043 = vmatprep.subr.bf16.mxu0 %v11089_v54  ;;  %v11184_v53 = vld [vmem:[#allocation3 + $0x1c8] ss:$56 sps:$4 sm:$0xff]  }
  0x8c   :  { %5156 = vmatprep.subr.bf16.mxu1 %v11091_v55  ;;  %v11185_v54 = vld [vmem:[#allocation6 + $0x8d0] ss:$24 sps:$4 sm:$0xff]  }
  0x8d   :  { %v11188_v55 = vld [vmem:[#allocation6 + $0xbd0] ss:$24 sps:$4 sm:$0xff]  }
  0x8e   :  { %5044 = vmatpush2.bf16.msra.mxu0 %v11093_v56  ;;  %v11193_v56 = vld [vmem:[#allocation6 + $0x8a4] ss:$24 sps:$4 sm:$0xff]  }
  0x8f   :  { %5157 = vmatpush2.bf16.msra.mxu1 %v11094_v57  ;;  %5045 = vmatprep.subr.bf16.mxu0 %v11095_v58  ;;  %v11196_v57 = vld [vmem:[#allocation6 + $0xba4] ss:$24 sps:$4 sm:$0xff]   ;;  %v11197_v58 = vld [vmem:[#allocation3 + $0x234] ss:$56 sps:$4 sm:$0xff]  }
  0x90   :  { %5158 = vmatprep.subr.bf16.mxu1 %v11097_v59  ;;  %v11199_v59 = vld [vmem:[#allocation3 + $0x23c] ss:$56 sps:$4 sm:$0xff]  }
  0x92   :  { %5046 = vmatpush2.bf16.msra.mxu0 %v11099_v60  ;;  %v11191_v60 = vld [vmem:[#allocation6 + $0x8a0] ss:$24 sps:$4 sm:$0xff]  }
  0x93   :  { %5159 = vmatpush2.bf16.msra.mxu1 %v11100_v61  ;;  %5047 = vmatprep.subr.bf16.mxu0 %v11101_v62  ;;  %v11194_v61 = vld [vmem:[#allocation6 + $0xba0] ss:$24 sps:$4 sm:$0xff]   ;;  %v11205_v62 = vld [vmem:[#allocation6 + $0x874] ss:$24 sps:$4 sm:$0xff]  }
  0x94   :  { %5160 = vmatprep.subr.bf16.mxu1 %v11103_v63  ;;  %v11208_v63 = vld [vmem:[#allocation6 + $0xb74] ss:$24 sps:$4 sm:$0xff]  }
  0x96   :  { %5048 = vmatpush2.bf16.msra.mxu0 %v11105_v0  ;;  %v11201_v0 = vld [vmem:[#allocation3 + $0x230] ss:$56 sps:$4 sm:$0xff]  }
  0x97   :  { %5161 = vmatpush2.bf16.msra.mxu1 %v11106_v1  ;;  %5243 = vmatprep.subr.bf16.mxu0 %v11115_v2  ;;  %v11202_v1 = vld [vmem:[#allocation3 + $0x238] ss:$56 sps:$4 sm:$0xff]  }
  0x98   :  { %5356 = vmatprep.subr.bf16.mxu1 %v11118_v3  ;;  %v11203_v2 = vld [vmem:[#allocation6 + $0x870] ss:$24 sps:$4 sm:$0xff]  }
  0x99   :  { %5050 = vmatmul.mubr.bf16.vlgmr.msra.gmra.mxu0 %v11111_v4  ;;  %v11206_v3 = vld [vmem:[#allocation6 + $0xb70] ss:$24 sps:$4 sm:$0xff]   ;;  %v11211_v4 = vld [vmem:[#allocation6 + $0x844] ss:$24 sps:$4 sm:$0xff]  }
  0x9a   :  { %5163 = vmatmul.mubr.bf16.vlgmr.msra.gmra.mxu1 %v11112_v5  ;;  %5244 = vmatpush1.bf16.msra.mxu0 %v11113_v6  ;;  %v11214_v5 = vld [vmem:[#allocation6 + $0xb44] ss:$24 sps:$4 sm:$0xff]  }
  0x9b   :  { %5357 = vmatpush1.bf16.msra.mxu1 %v11116_v7  ;;  %5245 = vmatprep.subr.bf16.mxu0 %v11121_v8  ;;  %v11215_v6 = vld [vmem:[#allocation3 + $0x2a4] ss:$56 sps:$4 sm:$0xff]   ;;  %v11209_v8 = vld [vmem:[#allocation6 + $0x840] ss:$24 sps:$4 sm:$0xff]  }
  0x9c   :  { %5358 = vmatprep.subr.bf16.mxu1 %v11124_v9  ;;  %5059 = vmatprep.mubr.bf16.mxu0 %v11125_v10  ;;  %v11217_v7 = vld [vmem:[#allocation3 + $0x2ac] ss:$56 sps:$4 sm:$0xff]   ;;  %v11212_v9 = vld [vmem:[#allocation6 + $0xb40] ss:$24 sps:$4 sm:$0xff]  }
  0x9d   :  { %5172 = vmatprep.mubr.bf16.mxu1 %v11127_v11  ;;  %v11223_v10 = vld [vmem:[#allocation6 + $0x814] ss:$24 sps:$4 sm:$0xff]  }
  0x9e   :  { %5246 = vmatpush1.bf16.msra.mxu0 %v11119_v12  ;;  %v11226_v11 = vld [vmem:[#allocation6 + $0xb14] ss:$24 sps:$4 sm:$0xff]   ;;  %v11219_v12 = vld [vmem:[#allocation3 + $0x2a0] ss:$56 sps:$4 sm:$0xff]  }
  0x9f   :  { %5359 = vmatpush1.bf16.msra.mxu1 %v11122_v13  ;;  %5247 = vmatprep.subr.bf16.mxu0 %v11133_v14  ;;  %v11220_v13 = vld [vmem:[#allocation3 + $0x2a8] ss:$56 sps:$4 sm:$0xff]  }
  0xa0   :  { %5360 = vmatprep.subr.bf16.mxu1 %v11136_v15  ;;  %v11221_v14 = vld [vmem:[#allocation6 + $0x810] ss:$24 sps:$4 sm:$0xff]  }
  0xa1   :  { %5060 = vmatmul.mubr.bf16.gmra.mxu0 %v11129_v16  ;;  %v11224_v15 = vld [vmem:[#allocation6 + $0xb10] ss:$24 sps:$4 sm:$0xff]   ;;  %v11229_v16 = vld [vmem:[#allocation6 + $0x7e4] ss:$24 sps:$4 sm:$0xff]  }
  0xa2   :  { %5173 = vmatmul.mubr.bf16.gmra.mxu1 %v11130_v17  ;;  %5248 = vmatpush1.bf16.msra.mxu0 %v11131_v18  ;;  %v11232_v17 = vld [vmem:[#allocation6 + $0xae4] ss:$24 sps:$4 sm:$0xff]   ;;  %v11233_v18 = vld [vmem:[#allocation3 + $0x314] ss:$56 sps:$4 sm:$0xff]  }
  0xa3   :  { %5361 = vmatpush1.bf16.msra.mxu1 %v11134_v19  ;;  %5249 = vmatprep.subr.bf16.mxu0 %v11139_v20  ;;  %v11235_v19 = vld [vmem:[#allocation3 + $0x31c] ss:$56 sps:$4 sm:$0xff]   ;;  %v11227_v20 = vld [vmem:[#allocation6 + $0x7e0] ss:$24 sps:$4 sm:$0xff]  }
  0xa4   :  { %5362 = vmatprep.subr.bf16.mxu1 %v11142_v21  ;;  %5069 = vmatprep.mubr.bf16.mxu0 %v11143_v22  ;;  %v11230_v21 = vld [vmem:[#allocation6 + $0xae0] ss:$24 sps:$4 sm:$0xff]   ;;  %v11241_v22 = vld [vmem:[#allocation6 + $0x7b4] ss:$24 sps:$4 sm:$0xff]  }
  0xa5   :  { %5182 = vmatprep.mubr.bf16.mxu1 %v11145_v23  ;;  %v11244_v23 = vld [vmem:[#allocation6 + $0xab4] ss:$24 sps:$4 sm:$0xff]  }
  0xa6   :  { %5250 = vmatpush1.bf16.msra.mxu0 %v11137_v24  ;;  %v11237_v24 = vld [vmem:[#allocation3 + $0x310] ss:$56 sps:$4 sm:$0xff]  }
  0xa7   :  { %5363 = vmatpush1.bf16.msra.mxu1 %v11140_v25  ;;  %5251 = vmatprep.subr.bf16.mxu0 %v11151_v26  ;;  %v11238_v25 = vld [vmem:[#allocation3 + $0x318] ss:$56 sps:$4 sm:$0xff]  }
  0xa8   :  { %5364 = vmatprep.subr.bf16.mxu1 %v11154_v27  ;;  %v11239_v26 = vld [vmem:[#allocation6 + $0x7b0] ss:$24 sps:$4 sm:$0xff]  }
  0xa9   :  { %5070 = vmatmul.mubr.bf16.gmra.mxu0 %v11147_v28  ;;  %v11242_v27 = vld [vmem:[#allocation6 + $0xab0] ss:$24 sps:$4 sm:$0xff]   ;;  %v11247_v28 = vld [vmem:[#allocation6 + $0x784] ss:$24 sps:$4 sm:$0xff]  }
  0xaa   :  { %5183 = vmatmul.mubr.bf16.gmra.mxu1 %v11148_v29  ;;  %5252 = vmatpush1.bf16.msra.mxu0 %v11149_v30  ;;  %v11250_v29 = vld [vmem:[#allocation6 + $0xa84] ss:$24 sps:$4 sm:$0xff]   ;;  %v11253_v30 = vld [vmem:[#allocation3 + $0x14] ss:$56 sps:$4 sm:$0xff]  }
  0xab   :  { %5365 = vmatpush1.bf16.msra.mxu1 %v11152_v31  ;;  %5253 = vmatprep.subr.bf16.mxu0 %v11157_v32  ;;  %v11256_v31 = vld [vmem:[#allocation3 + $0x1c] ss:$56 sps:$4 sm:$0xff]   ;;  %v11245_v32 = vld [vmem:[#allocation6 + $0x780] ss:$24 sps:$4 sm:$0xff]  }
  0xac   :  { %5366 = vmatprep.subr.bf16.mxu1 %v11160_v33  ;;  %5079 = vmatprep.mubr.bf16.mxu0 %v11161_v34  ;;  %v11248_v33 = vld [vmem:[#allocation6 + $0xa80] ss:$24 sps:$4 sm:$0xff]   ;;  %v11259_v34 = vld [vmem:[#allocation6 + $0xd54] ss:$24 sps:$4 sm:$0xff]  }
  0xad   :  { %5192 = vmatprep.mubr.bf16.mxu1 %v11163_v35  ;;  %v11262_v35 = vld [vmem:[#allocation6 + $0x1054] ss:$24 sps:$4 sm:$0xff]  }
  0xae   :  { %5254 = vmatpush1.bf16.msra.mxu0 %v11155_v36  ;;  %v11251_v36 = vld [vmem:[#allocation3 + $0x10] ss:$56 sps:$4 sm:$0xff]  }
  0xaf   :  { %5367 = vmatpush1.bf16.msra.mxu1 %v11158_v37  ;;  %5255 = vmatprep.subr.bf16.mxu0 %v11169_v38  ;;  %v11254_v37 = vld [vmem:[#allocation3 + $0x18] ss:$56 sps:$4 sm:$0xff]  }
  0xb0   :  { %5368 = vmatprep.subr.bf16.mxu1 %v11172_v39  ;;  %v11257_v38 = vld [vmem:[#allocation6 + $0xd50] ss:$24 sps:$4 sm:$0xff]  }
  0xb1   :  { %5080 = vmatmul.mubr.bf16.gmra.mxu0 %v11165_v40  ;;  %v11260_v39 = vld [vmem:[#allocation6 + $0x1050] ss:$24 sps:$4 sm:$0xff]   ;;  %v11265_v40 = vld [vmem:[#allocation6 + $0xd24] ss:$24 sps:$4 sm:$0xff]  }
  0xb2   :  { %5193 = vmatmul.mubr.bf16.gmra.mxu1 %v11166_v41  ;;  %5256 = vmatpush1.bf16.msra.mxu0 %v11167_v42  ;;  %v11268_v41 = vld [vmem:[#allocation6 + $0x1024] ss:$24 sps:$4 sm:$0xff]  }
  0xb3   :  { %5369 = vmatpush1.bf16.msra.mxu1 %v11170_v43  ;;  %5257 = vmatprep.subr.bf16.mxu0 %v11175_v44  ;;  %v11269_v42 = vld [vmem:[#allocation3 + $0x84] ss:$56 sps:$4 sm:$0xff]   ;;  %v11263_v44 = vld [vmem:[#allocation6 + $0xd20] ss:$24 sps:$4 sm:$0xff]  }
  0xb4   :  { %5370 = vmatprep.subr.bf16.mxu1 %v11178_v45  ;;  %5089 = vmatprep.mubr.bf16.mxu0 %v11179_v46  ;;  %v11271_v43 = vld [vmem:[#allocation3 + $0x8c] ss:$56 sps:$4 sm:$0xff]   ;;  %v11266_v45 = vld [vmem:[#allocation6 + $0x1020] ss:$24 sps:$4 sm:$0xff]  }
  0xb5   :  { %5202 = vmatprep.mubr.bf16.mxu1 %v11181_v47  ;;  %v11277_v46 = vld [vmem:[#allocation6 + $0xcf4] ss:$24 sps:$4 sm:$0xff]  }
  0xb6   :  { %5258 = vmatpush1.bf16.msra.mxu0 %v11173_v48  ;;  %v11280_v47 = vld [vmem:[#allocation6 + $0xff4] ss:$24 sps:$4 sm:$0xff]   ;;  %v11273_v48 = vld [vmem:[#allocation3 + $0x80] ss:$56 sps:$4 sm:$0xff]  }
  0xb7   :  { %5371 = vmatpush1.bf16.msra.mxu1 %v11176_v49  ;;  %5259 = vmatprep.subr.bf16.mxu0 %v11187_v50  ;;  %v11274_v49 = vld [vmem:[#allocation3 + $0x88] ss:$56 sps:$4 sm:$0xff]  }
  0xb8   :  { %5372 = vmatprep.subr.bf16.mxu1 %v11190_v51  ;;  %v11275_v50 = vld [vmem:[#allocation6 + $0xcf0] ss:$24 sps:$4 sm:$0xff]  }
  0xb9   :  { %5090 = vmatmul.mubr.bf16.gmra.mxu0 %v11183_v52  ;;  %v11278_v51 = vld [vmem:[#allocation6 + $0xff0] ss:$24 sps:$4 sm:$0xff]   ;;  %v11283_v52 = vld [vmem:[#allocation6 + $0xcc4] ss:$24 sps:$4 sm:$0xff]  }
  0xba   :  { %5203 = vmatmul.mubr.bf16.gmra.mxu1 %v11184_v53  ;;  %5260 = vmatpush2.bf16.msra.mxu0 %v11185_v54  ;;  %v11286_v53 = vld [vmem:[#allocation6 + $0xfc4] ss:$24 sps:$4 sm:$0xff]   ;;  %v11287_v54 = vld [vmem:[#allocation3 + $0xf4] ss:$56 sps:$4 sm:$0xff]  }
  0xbb   :  { %5373 = vmatpush2.bf16.msra.mxu1 %v11188_v55  ;;  %5261 = vmatprep.subr.bf16.mxu0 %v11193_v56  ;;  %v11289_v55 = vld [vmem:[#allocation3 + $0xfc] ss:$56 sps:$4 sm:$0xff]   ;;  %v11281_v56 = vld [vmem:[#allocation6 + $0xcc0] ss:$24 sps:$4 sm:$0xff]  }
  0xbc   :  { %5374 = vmatprep.subr.bf16.mxu1 %v11196_v57  ;;  %5099 = vmatprep.mubr.bf16.mxu0 %v11197_v58  ;;  %v11284_v57 = vld [vmem:[#allocation6 + $0xfc0] ss:$24 sps:$4 sm:$0xff]   ;;  %v11295_v58 = vld [vmem:[#allocation6 + $0xc94] ss:$24 sps:$4 sm:$0xff]  }
  0xbd   :  { %5212 = vmatprep.mubr.bf16.mxu1 %v11199_v59  ;;  %v11298_v59 = vld [vmem:[#allocation6 + $0xf94] ss:$24 sps:$4 sm:$0xff]  }
  0xbe   :  { %5262 = vmatpush2.bf16.msra.mxu0 %v11191_v60  ;;  %v11291_v60 = vld [vmem:[#allocation3 + $0xf0] ss:$56 sps:$4 sm:$0xff]  }
  0xbf   :  { %5375 = vmatpush2.bf16.msra.mxu1 %v11194_v61  ;;  %5263 = vmatprep.subr.bf16.mxu0 %v11205_v62  ;;  %v11292_v61 = vld [vmem:[#allocation3 + $0xf8] ss:$56 sps:$4 sm:$0xff]  }
  0xc0   :  { %5376 = vmatprep.subr.bf16.mxu1 %v11208_v63  ;;  %v11293_v62 = vld [vmem:[#allocation6 + $0xc90] ss:$24 sps:$4 sm:$0xff]  }
  0xc1   :  { %5100 = vmatmul.mubr.bf16.gmra.mxu0 %v11201_v0  ;;  %v11296_v63 = vld [vmem:[#allocation6 + $0xf90] ss:$24 sps:$4 sm:$0xff]   ;;  %v11301_v0 = vld [vmem:[#allocation6 + $0xc64] ss:$24 sps:$4 sm:$0xff]  }
  0xc2   :  { %5213 = vmatmul.mubr.bf16.gmra.mxu1 %v11202_v1  ;;  %5264 = vmatpush2.bf16.msra.mxu0 %v11203_v2  ;;  %v11304_v1 = vld [vmem:[#allocation6 + $0xf64] ss:$24 sps:$4 sm:$0xff]  }
  0xc3   :  { %5377 = vmatpush2.bf16.msra.mxu1 %v11206_v3  ;;  %5265 = vmatprep.subr.bf16.mxu0 %v11211_v4  ;;  %v11305_v2 = vld [vmem:[#allocation3 + $0x164] ss:$56 sps:$4 sm:$0xff]   ;;  %v11299_v4 = vld [vmem:[#allocation6 + $0xc60] ss:$24 sps:$4 sm:$0xff]  }
  0xc4   :  { %5378 = vmatprep.subr.bf16.mxu1 %v11214_v5  ;;  %5109 = vmatprep.mubr.bf16.mxu0 %v11215_v6  ;;  %v11307_v3 = vld [vmem:[#allocation3 + $0x16c] ss:$56 sps:$4 sm:$0xff]   ;;  %v11302_v5 = vld [vmem:[#allocation6 + $0xf60] ss:$24 sps:$4 sm:$0xff]  }
  0xc5   :  { %5222 = vmatprep.mubr.bf16.mxu1 %v11217_v7  ;;  %v11313_v6 = vld [vmem:[#allocation6 + $0xc34] ss:$24 sps:$4 sm:$0xff]  }
  0xc6   :  { %5266 = vmatpush2.bf16.msra.mxu0 %v11209_v8  ;;  %v11316_v7 = vld [vmem:[#allocation6 + $0xf34] ss:$24 sps:$4 sm:$0xff]   ;;  %v11309_v8 = vld [vmem:[#allocation3 + $0x160] ss:$56 sps:$4 sm:$0xff]  }
  0xc7   :  { %5379 = vmatpush2.bf16.msra.mxu1 %v11212_v9  ;;  %5267 = vmatprep.subr.bf16.mxu0 %v11223_v10  ;;  %v11310_v9 = vld [vmem:[#allocation3 + $0x168] ss:$56 sps:$4 sm:$0xff]  }
  0xc8   :  { %5380 = vmatprep.subr.bf16.mxu1 %v11226_v11  ;;  %v11311_v10 = vld [vmem:[#allocation6 + $0xc30] ss:$24 sps:$4 sm:$0xff]  }
  0xc9   :  { %5110 = vmatmul.mubr.bf16.gmra.mxu0 %v11219_v12  ;;  %v11314_v11 = vld [vmem:[#allocation6 + $0xf30] ss:$24 sps:$4 sm:$0xff]   ;;  %v11319_v12 = vld [vmem:[#allocation6 + $0xc04] ss:$24 sps:$4 sm:$0xff]  }
  0xca   :  { %5223 = vmatmul.mubr.bf16.gmra.mxu1 %v11220_v13  ;;  %5268 = vmatpush2.bf16.msra.mxu0 %v11221_v14  ;;  %v11322_v13 = vld [vmem:[#allocation6 + $0xf04] ss:$24 sps:$4 sm:$0xff]   ;;  %v11323_v14 = vld [vmem:[#allocation3 + $0x1d4] ss:$56 sps:$4 sm:$0xff]  }
  0xcb   :  { %5381 = vmatpush2.bf16.msra.mxu1 %v11224_v15  ;;  %5269 = vmatprep.subr.bf16.mxu0 %v11229_v16  ;;  %v11325_v15 = vld [vmem:[#allocation3 + $0x1dc] ss:$56 sps:$4 sm:$0xff]   ;;  %v11317_v16 = vld [vmem:[#allocation6 + $0xc00] ss:$24 sps:$4 sm:$0xff]  }
  0xcc   :  { %5382 = vmatprep.subr.bf16.mxu1 %v11232_v17  ;;  %5119 = vmatprep.mubr.bf16.mxu0 %v11233_v18  ;;  %v11320_v17 = vld [vmem:[#allocation6 + $0xf00] ss:$24 sps:$4 sm:$0xff]   ;;  %v11331_v18 = vld [vmem:[#allocation6 + $0xed4] ss:$24 sps:$4 sm:$0xff]  }
  0xcd   :  { %5232 = vmatprep.mubr.bf16.mxu1 %v11235_v19  ;;  %v11334_v19 = vld [vmem:[#allocation6 + $0x11d4] ss:$24 sps:$4 sm:$0xff]  }
  0xce   :  { %5270 = vmatpush2.bf16.msra.mxu0 %v11227_v20  ;;  %v11327_v20 = vld [vmem:[#allocation3 + $0x1d0] ss:$56 sps:$4 sm:$0xff]  }
  0xcf   :  { %5383 = vmatpush2.bf16.msra.mxu1 %v11230_v21  ;;  %5271 = vmatprep.subr.bf16.mxu0 %v11241_v22  ;;  %v11328_v21 = vld [vmem:[#allocation3 + $0x1d8] ss:$56 sps:$4 sm:$0xff]  }
  0xd0   :  { %5384 = vmatprep.subr.bf16.mxu1 %v11244_v23  ;;  %v11329_v22 = vld [vmem:[#allocation6 + $0xed0] ss:$24 sps:$4 sm:$0xff]  }
  0xd1   :  { %5120 = vmatmul.mubr.bf16.gmra.mxu0 %v11237_v24  ;;  %v11332_v23 = vld [vmem:[#allocation6 + $0x11d0] ss:$24 sps:$4 sm:$0xff]   ;;  %v11337_v24 = vld [vmem:[#allocation6 + $0xea4] ss:$24 sps:$4 sm:$0xff]  }
  0xd2   :  { %5233 = vmatmul.mubr.bf16.gmra.mxu1 %v11238_v25  ;;  %5272 = vmatpush2.bf16.msra.mxu0 %v11239_v26  ;;  %v11340_v25 = vld [vmem:[#allocation6 + $0x11a4] ss:$24 sps:$4 sm:$0xff]  }
  0xd3   :  { %5385 = vmatpush2.bf16.msra.mxu1 %v11242_v27  ;;  %5273 = vmatprep.subr.bf16.mxu0 %v11247_v28  ;;  %v11341_v26 = vld [vmem:[#allocation3 + $0x244] ss:$56 sps:$4 sm:$0xff]   ;;  %v11335_v28 = vld [vmem:[#allocation6 + $0xea0] ss:$24 sps:$4 sm:$0xff]  }
  0xd4   :  { %5386 = vmatprep.subr.bf16.mxu1 %v11250_v29  ;;  %5275 = vmatprep.mubr.bf16.mxu0 %v11253_v30  ;;  %v11343_v27 = vld [vmem:[#allocation3 + $0x24c] ss:$56 sps:$4 sm:$0xff]   ;;  %v11338_v29 = vld [vmem:[#allocation6 + $0x11a0] ss:$24 sps:$4 sm:$0xff]  }
  0xd5   :  { %5388 = vmatprep.mubr.bf16.mxu1 %v11256_v31  ;;  %v11349_v30 = vld [vmem:[#allocation6 + $0xe74] ss:$24 sps:$4 sm:$0xff]  }
  0xd6   :  { %5274 = vmatpush2.bf16.msra.mxu0 %v11245_v32  ;;  %v11352_v31 = vld [vmem:[#allocation6 + $0x1174] ss:$24 sps:$4 sm:$0xff]   ;;  %v11345_v32 = vld [vmem:[#allocation3 + $0x240] ss:$56 sps:$4 sm:$0xff]  }
  0xd7   :  { %5387 = vmatpush2.bf16.msra.mxu1 %v11248_v33  ;;  %5469 = vmatprep.subr.bf16.mxu0 %v11259_v34  ;;  %v11346_v33 = vld [vmem:[#allocation3 + $0x248] ss:$56 sps:$4 sm:$0xff]  }
  0xd8   :  { %5582 = vmatprep.subr.bf16.mxu1 %v11262_v35  ;;  %v11347_v34 = vld [vmem:[#allocation6 + $0xe70] ss:$24 sps:$4 sm:$0xff]  }
  0xd9   :  { %5276 = vmatmul.mubr.bf16.vlgmr.msra.gmra.mxu0 %v11251_v36  ;;  %v11350_v35 = vld [vmem:[#allocation6 + $0x1170] ss:$24 sps:$4 sm:$0xff]   ;;  %v11355_v36 = vld [vmem:[#allocation6 + $0xe44] ss:$24 sps:$4 sm:$0xff]  }
  0xda   :  { %5389 = vmatmul.mubr.bf16.vlgmr.msra.gmra.mxu1 %v11254_v37  ;;  %5470 = vmatpush1.bf16.msra.mxu0 %v11257_v38  ;;  %v11358_v37 = vld [vmem:[#allocation6 + $0x1144] ss:$24 sps:$4 sm:$0xff]   ;;  %v11359_v38 = vld [vmem:[#allocation3 + $0x2b4] ss:$56 sps:$4 sm:$0xff]  }
  0xdb   :  { %5583 = vmatpush1.bf16.msra.mxu1 %v11260_v39  ;;  %5471 = vmatprep.subr.bf16.mxu0 %v11265_v40  ;;  %v11361_v39 = vld [vmem:[#allocation3 + $0x2bc] ss:$56 sps:$4 sm:$0xff]   ;;  %v11353_v40 = vld [vmem:[#allocation6 + $0xe40] ss:$24 sps:$4 sm:$0xff]  }
  0xdc   :  { %5584 = vmatprep.subr.bf16.mxu1 %v11268_v41  ;;  %5285 = vmatprep.mubr.bf16.mxu0 %v11269_v42  ;;  %v11356_v41 = vld [vmem:[#allocation6 + $0x1140] ss:$24 sps:$4 sm:$0xff]   ;;  %v11367_v42 = vld [vmem:[#allocation6 + $0xe14] ss:$24 sps:$4 sm:$0xff]  }
  0xdd   :  { %5398 = vmatprep.mubr.bf16.mxu1 %v11271_v43  ;;  %v11370_v43 = vld [vmem:[#allocation6 + $0x1114] ss:$24 sps:$4 sm:$0xff]  }
  0xde   :  { %5472 = vmatpush1.bf16.msra.mxu0 %v11263_v44  ;;  %v11363_v44 = vld [vmem:[#allocation3 + $0x2b0] ss:$56 sps:$4 sm:$0xff]  }
  0xdf   :  { %5585 = vmatpush1.bf16.msra.mxu1 %v11266_v45  ;;  %5473 = vmatprep.subr.bf16.mxu0 %v11277_v46  ;;  %v11364_v45 = vld [vmem:[#allocation3 + $0x2b8] ss:$56 sps:$4 sm:$0xff]  }
  0xe0   :  { %5586 = vmatprep.subr.bf16.mxu1 %v11280_v47  ;;  %v11365_v46 = vld [vmem:[#allocation6 + $0xe10] ss:$24 sps:$4 sm:$0xff]  }
  0xe1   :  { %5286 = vmatmul.mubr.bf16.gmra.mxu0 %v11273_v48  ;;  %v11368_v47 = vld [vmem:[#allocation6 + $0x1110] ss:$24 sps:$4 sm:$0xff]   ;;  %v11373_v48 = vld [vmem:[#allocation6 + $0xde4] ss:$24 sps:$4 sm:$0xff]  }
  0xe2   :  { %5399 = vmatmul.mubr.bf16.gmra.mxu1 %v11274_v49  ;;  %5474 = vmatpush1.bf16.msra.mxu0 %v11275_v50  ;;  %v11376_v49 = vld [vmem:[#allocation6 + $0x10e4] ss:$24 sps:$4 sm:$0xff]  }
  0xe3   :  { %5587 = vmatpush1.bf16.msra.mxu1 %v11278_v51  ;;  %5475 = vmatprep.subr.bf16.mxu0 %v11283_v52  ;;  %v11377_v50 = vld [vmem:[#allocation3 + $0x324] ss:$56 sps:$4 sm:$0xff]   ;;  %v11371_v52 = vld [vmem:[#allocation6 + $0xde0] ss:$24 sps:$4 sm:$0xff]  }
  0xe4   :  { %5588 = vmatprep.subr.bf16.mxu1 %v11286_v53  ;;  %5295 = vmatprep.mubr.bf16.mxu0 %v11287_v54  ;;  %v11379_v51 = vld [vmem:[#allocation3 + $0x32c] ss:$56 sps:$4 sm:$0xff]   ;;  %v11374_v53 = vld [vmem:[#allocation6 + $0x10e0] ss:$24 sps:$4 sm:$0xff]  }
  0xe5   :  { %5408 = vmatprep.mubr.bf16.mxu1 %v11289_v55  ;;  %v11385_v54 = vld [vmem:[#allocation6 + $0xdb4] ss:$24 sps:$4 sm:$0xff]  }
  0xe6   :  { %5476 = vmatpush1.bf16.msra.mxu0 %v11281_v56  ;;  %v11388_v55 = vld [vmem:[#allocation6 + $0x10b4] ss:$24 sps:$4 sm:$0xff]   ;;  %v11381_v56 = vld [vmem:[#allocation3 + $0x320] ss:$56 sps:$4 sm:$0xff]  }
  0xe7   :  { %5589 = vmatpush1.bf16.msra.mxu1 %v11284_v57  ;;  %5477 = vmatprep.subr.bf16.mxu0 %v11295_v58  ;;  %v11382_v57 = vld [vmem:[#allocation3 + $0x328] ss:$56 sps:$4 sm:$0xff]  }
  0xe8   :  { %5590 = vmatprep.subr.bf16.mxu1 %v11298_v59  ;;  %v11383_v58 = vld [vmem:[#allocation6 + $0xdb0] ss:$24 sps:$4 sm:$0xff]  }
  0xe9   :  { %5296 = vmatmul.mubr.bf16.gmra.mxu0 %v11291_v60  ;;  %v11386_v59 = vld [vmem:[#allocation6 + $0x10b0] ss:$24 sps:$4 sm:$0xff]   ;;  %v11391_v60 = vld [vmem:[#allocation6 + $0xd84] ss:$24 sps:$4 sm:$0xff]  }
  0xea   :  { %5409 = vmatmul.mubr.bf16.gmra.mxu1 %v11292_v61  ;;  %5478 = vmatpush1.bf16.msra.mxu0 %v11293_v62  ;;  %v11394_v61 = vld [vmem:[#allocation6 + $0x1084] ss:$24 sps:$4 sm:$0xff]  }
  0xeb   :  { %5591 = vmatpush1.bf16.msra.mxu1 %v11296_v63  ;;  %5479 = vmatprep.subr.bf16.mxu0 %v11301_v0  ;;  %v11397_v62 = vld [vmem:[#allocation3 + $0x24] ss:$56 sps:$4 sm:$0xff]   ;;  %v11389_v0 = vld [vmem:[#allocation6 + $0xd80] ss:$24 sps:$4 sm:$0xff]  }
  0xec   :  { %5592 = vmatprep.subr.bf16.mxu1 %v11304_v1  ;;  %5305 = vmatprep.mubr.bf16.mxu0 %v11305_v2  ;;  %v11400_v63 = vld [vmem:[#allocation3 + $0x2c] ss:$56 sps:$4 sm:$0xff]   ;;  %v11392_v1 = vld [vmem:[#allocation6 + $0x1080] ss:$24 sps:$4 sm:$0xff]  }
  0xed   :  { %5418 = vmatprep.mubr.bf16.mxu1 %v11307_v3  ;;  %v11403_v2 = vld [vmem:[#allocation6 + $0x1354] ss:$24 sps:$4 sm:$0xff]  }
  0xee   :  { %5480 = vmatpush1.bf16.msra.mxu0 %v11299_v4  ;;  %v11406_v3 = vld [vmem:[#allocation6 + $0x15c] ss:$24 sps:$4 sm:$0xff]   ;;  %v11395_v4 = vld [vmem:[#allocation3 + $0x20] ss:$56 sps:$4 sm:$0xff]  }
  0xef   :  { %5593 = vmatpush1.bf16.msra.mxu1 %v11302_v5  ;;  %5481 = vmatprep.subr.bf16.mxu0 %v11313_v6  ;;  %v11398_v5 = vld [vmem:[#allocation3 + $0x28] ss:$56 sps:$4 sm:$0xff]  }
  0xf0   :  { %5594 = vmatprep.subr.bf16.mxu1 %v11316_v7  ;;  %v11401_v6 = vld [vmem:[#allocation6 + $0x1350] ss:$24 sps:$4 sm:$0xff]  }
  0xf1   :  { %5306 = vmatmul.mubr.bf16.gmra.mxu0 %v11309_v8  ;;  %v11404_v7 = vld [vmem:[#allocation6 + $0x158] ss:$24 sps:$4 sm:$0xff]   ;;  %v11409_v8 = vld [vmem:[#allocation6 + $0x1324] ss:$24 sps:$4 sm:$0xff]  }
  0xf2   :  { %5419 = vmatmul.mubr.bf16.gmra.mxu1 %v11310_v9  ;;  %5482 = vmatpush1.bf16.msra.mxu0 %v11311_v10  ;;  %v11412_v9 = vld [vmem:[#allocation6 + $0x12c] ss:$24 sps:$4 sm:$0xff]  }
  0xf3   :  { %5595 = vmatpush1.bf16.msra.mxu1 %v11314_v11  ;;  %5483 = vmatprep.subr.bf16.mxu0 %v11319_v12  ;;  %v11413_v10 = vld [vmem:[#allocation3 + $0x94] ss:$56 sps:$4 sm:$0xff]   ;;  %v11407_v12 = vld [vmem:[#allocation6 + $0x1320] ss:$24 sps:$4 sm:$0xff]  }
  0xf4   :  { %5596 = vmatprep.subr.bf16.mxu1 %v11322_v13  ;;  %5315 = vmatprep.mubr.bf16.mxu0 %v11323_v14  ;;  %v11415_v11 = vld [vmem:[#allocation3 + $0x9c] ss:$56 sps:$4 sm:$0xff]   ;;  %v11410_v13 = vld [vmem:[#allocation6 + $0x128] ss:$24 sps:$4 sm:$0xff]  }
  0xf5   :  { %5428 = vmatprep.mubr.bf16.mxu1 %v11325_v15  ;;  %v11421_v14 = vld [vmem:[#allocation6 + $0x12f4] ss:$24 sps:$4 sm:$0xff]  }
  0xf6   :  { %5484 = vmatpush1.bf16.msra.mxu0 %v11317_v16  ;;  %v11424_v15 = vld [vmem:[#allocation6 + $0xfc] ss:$24 sps:$4 sm:$0xff]   ;;  %v11417_v16 = vld [vmem:[#allocation3 + $0x90] ss:$56 sps:$4 sm:$0xff]  }
  0xf7   :  { %5597 = vmatpush1.bf16.msra.mxu1 %v11320_v17  ;;  %5485 = vmatprep.subr.bf16.mxu0 %v11331_v18  ;;  %v11418_v17 = vld [vmem:[#allocation3 + $0x98] ss:$56 sps:$4 sm:$0xff]  }
  0xf8   :  { %5598 = vmatprep.subr.bf16.mxu1 %v11334_v19  ;;  %v11419_v18 = vld [vmem:[#allocation6 + $0x12f0] ss:$24 sps:$4 sm:$0xff]  }
  0xf9   :  { %5316 = vmatmul.mubr.bf16.gmra.mxu0 %v11327_v20  ;;  %v11422_v19 = vld [vmem:[#allocation6 + $0xf8] ss:$24 sps:$4 sm:$0xff]   ;;  %v11427_v20 = vld [vmem:[#allocation6 + $0x12c4] ss:$24 sps:$4 sm:$0xff]  }
  0xfa   :  { %5429 = vmatmul.mubr.bf16.gmra.mxu1 %v11328_v21  ;;  %5486 = vmatpush2.bf16.msra.mxu0 %v11329_v22  ;;  %v11430_v21 = vld [vmem:[#allocation6 + $0xcc] ss:$24 sps:$4 sm:$0xff]  }
  0xfb   :  { %5599 = vmatpush2.bf16.msra.mxu1 %v11332_v23  ;;  %5487 = vmatprep.subr.bf16.mxu0 %v11337_v24  ;;  %v11431_v22 = vld [vmem:[#allocation3 + $0x104] ss:$56 sps:$4 sm:$0xff]   ;;  %v11425_v24 = vld [vmem:[#allocation6 + $0x12c0] ss:$24 sps:$4 sm:$0xff]  }
  0xfc   :  { %5600 = vmatprep.subr.bf16.mxu1 %v11340_v25  ;;  %5325 = vmatprep.mubr.bf16.mxu0 %v11341_v26  ;;  %v11433_v23 = vld [vmem:[#allocation3 + $0x10c] ss:$56 sps:$4 sm:$0xff]   ;;  %v11428_v25 = vld [vmem:[#allocation6 + $0xc8] ss:$24 sps:$4 sm:$0xff]  }
  0xfd   :  { %5438 = vmatprep.mubr.bf16.mxu1 %v11343_v27  ;;  %v11439_v26 = vld [vmem:[#allocation6 + $0x1294] ss:$24 sps:$4 sm:$0xff]  }
  0xfe   :  { %5488 = vmatpush2.bf16.msra.mxu0 %v11335_v28  ;;  %v11442_v27 = vld [vmem:[#allocation6 + $0x9c] ss:$24 sps:$4 sm:$0xff]   ;;  %v11435_v28 = vld [vmem:[#allocation3 + $0x100] ss:$56 sps:$4 sm:$0xff]  }
  0xff   :  { %5601 = vmatpush2.bf16.msra.mxu1 %v11338_v29  ;;  %5489 = vmatprep.subr.bf16.mxu0 %v11349_v30  ;;  %v11436_v29 = vld [vmem:[#allocation3 + $0x108] ss:$56 sps:$4 sm:$0xff]  }
 0x100   :  { %5602 = vmatprep.subr.bf16.mxu1 %v11352_v31  ;;  %v11437_v30 = vld [vmem:[#allocation6 + $0x1290] ss:$24 sps:$4 sm:$0xff]  }
 0x101   :  { %5326 = vmatmul.mubr.bf16.gmra.mxu0 %v11345_v32  ;;  %v11440_v31 = vld [vmem:[#allocation6 + $0x98] ss:$24 sps:$4 sm:$0xff]   ;;  %v11445_v32 = vld [vmem:[#allocation6 + $0x1264] ss:$24 sps:$4 sm:$0xff]  }
 0x102   :  { %5439 = vmatmul.mubr.bf16.gmra.mxu1 %v11346_v33  ;;  %5490 = vmatpush2.bf16.msra.mxu0 %v11347_v34  ;;  %v11448_v33 = vld [vmem:[#allocation6 + $0x6c] ss:$24 sps:$4 sm:$0xff]  }
 0x103   :  { %5603 = vmatpush2.bf16.msra.mxu1 %v11350_v35  ;;  %5491 = vmatprep.subr.bf16.mxu0 %v11355_v36  ;;  %v11449_v34 = vld [vmem:[#allocation3 + $0x174] ss:$56 sps:$4 sm:$0xff]   ;;  %v11443_v36 = vld [vmem:[#allocation6 + $0x1260] ss:$24 sps:$4 sm:$0xff]  }
 0x104   :  { %5604 = vmatprep.subr.bf16.mxu1 %v11358_v37  ;;  %5335 = vmatprep.mubr.bf16.mxu0 %v11359_v38  ;;  %v11451_v35 = vld [vmem:[#allocation3 + $0x17c] ss:$56 sps:$4 sm:$0xff]   ;;  %v11446_v37 = vld [vmem:[#allocation6 + $0x68] ss:$24 sps:$4 sm:$0xff]  }
 0x105   :  { %5448 = vmatprep.mubr.bf16.mxu1 %v11361_v39  ;;  %v11457_v38 = vld [vmem:[#allocation6 + $0x1234] ss:$24 sps:$4 sm:$0xff]  }
 0x106   :  { %5492 = vmatpush2.bf16.msra.mxu0 %v11353_v40  ;;  %v11460_v39 = vld [vmem:[#allocation6 + $0x3c] ss:$24 sps:$4 sm:$0xff]   ;;  %v11453_v40 = vld [vmem:[#allocation3 + $0x170] ss:$56 sps:$4 sm:$0xff]  }
 0x107   :  { %5605 = vmatpush2.bf16.msra.mxu1 %v11356_v41  ;;  %5493 = vmatprep.subr.bf16.mxu0 %v11367_v42  ;;  %v11454_v41 = vld [vmem:[#allocation3 + $0x178] ss:$56 sps:$4 sm:$0xff]  }
 0x108   :  { %5606 = vmatprep.subr.bf16.mxu1 %v11370_v43  ;;  %v11455_v42 = vld [vmem:[#allocation6 + $0x1230] ss:$24 sps:$4 sm:$0xff]  }
 0x109   :  { %5336 = vmatmul.mubr.bf16.gmra.mxu0 %v11363_v44  ;;  %v11458_v43 = vld [vmem:[#allocation6 + $0x38] ss:$24 sps:$4 sm:$0xff]   ;;  %v11463_v44 = vld [vmem:[#allocation6 + $0x1204] ss:$24 sps:$4 sm:$0xff]  }
 0x10a   :  { %5449 = vmatmul.mubr.bf16.gmra.mxu1 %v11364_v45  ;;  %5494 = vmatpush2.bf16.msra.mxu0 %v11365_v46  ;;  %v11466_v45 = vld [vmem:[#allocation6 + $0xc] ss:$24 sps:$4 sm:$0xff]  }
 0x10b   :  { %5607 = vmatpush2.bf16.msra.mxu1 %v11368_v47  ;;  %5495 = vmatprep.subr.bf16.mxu0 %v11373_v48  ;;  %v11467_v46 = vld [vmem:[#allocation3 + $0x1e4] ss:$56 sps:$4 sm:$0xff]   ;;  %v11461_v48 = vld [vmem:[#allocation6 + $0x1200] ss:$24 sps:$4 sm:$0xff]  }
 0x10c   :  { %5608 = vmatprep.subr.bf16.mxu1 %v11376_v49  ;;  %5345 = vmatprep.mubr.bf16.mxu0 %v11377_v50  ;;  %v11469_v47 = vld [vmem:[#allocation3 + $0x1ec] ss:$56 sps:$4 sm:$0xff]   ;;  %v11464_v49 = vld [vmem:[#allocation6 + $0x8] ss:$24 sps:$4 sm:$0xff]  }
 0x10d   :  { %5458 = vmatprep.mubr.bf16.mxu1 %v11379_v51  ;;  %v11475_v50 = vld [vmem:[#allocation6 + $0x14d4] ss:$24 sps:$4 sm:$0xff]  }
 0x10e   :  { %5496 = vmatpush2.bf16.msra.mxu0 %v11371_v52  ;;  %v11478_v51 = vld [vmem:[#allocation6 + $0x2dc] ss:$24 sps:$4 sm:$0xff]   ;;  %v11471_v52 = vld [vmem:[#allocation3 + $0x1e0] ss:$56 sps:$4 sm:$0xff]  }
 0x10f   :  { %5609 = vmatpush2.bf16.msra.mxu1 %v11374_v53  ;;  %5497 = vmatprep.subr.bf16.mxu0 %v11385_v54  ;;  %v11472_v53 = vld [vmem:[#allocation3 + $0x1e8] ss:$56 sps:$4 sm:$0xff]  }
 0x110   :  { %5610 = vmatprep.subr.bf16.mxu1 %v11388_v55  ;;  %v11473_v54 = vld [vmem:[#allocation6 + $0x14d0] ss:$24 sps:$4 sm:$0xff]  }
 0x111   :  { %5346 = vmatmul.mubr.bf16.gmra.mxu0 %v11381_v56  ;;  %v11476_v55 = vld [vmem:[#allocation6 + $0x2d8] ss:$24 sps:$4 sm:$0xff]   ;;  %v11481_v56 = vld [vmem:[#allocation6 + $0x14a4] ss:$24 sps:$4 sm:$0xff]  }
 0x112   :  { %5459 = vmatmul.mubr.bf16.gmra.mxu1 %v11382_v57  ;;  %5498 = vmatpush2.bf16.msra.mxu0 %v11383_v58  ;;  %v11484_v57 = vld [vmem:[#allocation6 + $0x2ac] ss:$24 sps:$4 sm:$0xff]  }
 0x113   :  { %5611 = vmatpush2.bf16.msra.mxu1 %v11386_v59  ;;  %5499 = vmatprep.subr.bf16.mxu0 %v11391_v60  ;;  %v11485_v58 = vld [vmem:[#allocation3 + $0x254] ss:$56 sps:$4 sm:$0xff]   ;;  %v11479_v60 = vld [vmem:[#allocation6 + $0x14a0] ss:$24 sps:$4 sm:$0xff]  }
 0x114   :  { %5612 = vmatprep.subr.bf16.mxu1 %v11394_v61  ;;  %5501 = vmatprep.mubr.bf16.mxu0 %v11397_v62  ;;  %v11487_v59 = vld [vmem:[#allocation3 + $0x25c] ss:$56 sps:$4 sm:$0xff]   ;;  %v11482_v61 = vld [vmem:[#allocation6 + $0x2a8] ss:$24 sps:$4 sm:$0xff]  }
 0x115   :  { %5614 = vmatprep.mubr.bf16.mxu1 %v11400_v63  ;;  %v11493_v62 = vld [vmem:[#allocation6 + $0x1474] ss:$24 sps:$4 sm:$0xff]  }
 0x116   :  { %5500 = vmatpush2.bf16.msra.mxu0 %v11389_v0  ;;  %v11496_v63 = vld [vmem:[#allocation6 + $0x27c] ss:$24 sps:$4 sm:$0xff]   ;;  %v11489_v0 = vld [vmem:[#allocation3 + $0x250] ss:$56 sps:$4 sm:$0xff]  }
 0x117   :  { %5613 = vmatpush2.bf16.msra.mxu1 %v11392_v1  ;;  %5695 = vmatprep.subr.bf16.mxu0 %v11403_v2  ;;  %v11490_v1 = vld [vmem:[#allocation3 + $0x258] ss:$56 sps:$4 sm:$0xff]  }
 0x118   :  { %5808 = vmatprep.subr.bf16.mxu1 %v11406_v3  ;;  %v11491_v2 = vld [vmem:[#allocation6 + $0x1470] ss:$24 sps:$4 sm:$0xff]  }
 0x119   :  { %5502 = vmatmul.mubr.bf16.vlgmr.msra.gmra.mxu0 %v11395_v4  ;;  %v11494_v3 = vld [vmem:[#allocation6 + $0x278] ss:$24 sps:$4 sm:$0xff]   ;;  %v11499_v4 = vld [vmem:[#allocation6 + $0x1444] ss:$24 sps:$4 sm:$0xff]  }
 0x11a   :  { %5615 = vmatmul.mubr.bf16.vlgmr.msra.gmra.mxu1 %v11398_v5  ;;  %5696 = vmatpush1.bf16.msra.mxu0 %v11401_v6  ;;  %v11502_v5 = vld [vmem:[#allocation6 + $0x24c] ss:$24 sps:$4 sm:$0xff]  }
 0x11b   :  { %5809 = vmatpush1.bf16.msra.mxu1 %v11404_v7  ;;  %5697 = vmatprep.subr.bf16.mxu0 %v11409_v8  ;;  %v11503_v6 = vld [vmem:[#allocation3 + $0x2c4] ss:$56 sps:$4 sm:$0xff]   ;;  %v11497_v8 = vld [vmem:[#allocation6 + $0x1440] ss:$24 sps:$4 sm:$0xff]  }
 0x11c   :  { %5810 = vmatprep.subr.bf16.mxu1 %v11412_v9  ;;  %5511 = vmatprep.mubr.bf16.mxu0 %v11413_v10  ;;  %v11505_v7 = vld [vmem:[#allocation3 + $0x2cc] ss:$56 sps:$4 sm:$0xff]   ;;  %v11500_v9 = vld [vmem:[#allocation6 + $0x248] ss:$24 sps:$4 sm:$0xff]  }
 0x11d   :  { %5624 = vmatprep.mubr.bf16.mxu1 %v11415_v11  ;;  %v11511_v10 = vld [vmem:[#allocation6 + $0x1414] ss:$24 sps:$4 sm:$0xff]  }
 0x11e   :  { %5698 = vmatpush1.bf16.msra.mxu0 %v11407_v12  ;;  %v11514_v11 = vld [vmem:[#allocation6 + $0x21c] ss:$24 sps:$4 sm:$0xff]   ;;  %v11507_v12 = vld [vmem:[#allocation3 + $0x2c0] ss:$56 sps:$4 sm:$0xff]  }
 0x11f   :  { %5811 = vmatpush1.bf16.msra.mxu1 %v11410_v13  ;;  %5699 = vmatprep.subr.bf16.mxu0 %v11421_v14  ;;  %v11508_v13 = vld [vmem:[#allocation3 + $0x2c8] ss:$56 sps:$4 sm:$0xff]  }
 0x120   :  { %5812 = vmatprep.subr.bf16.mxu1 %v11424_v15  ;;  %v11509_v14 = vld [vmem:[#allocation6 + $0x1410] ss:$24 sps:$4 sm:$0xff]  }
 0x121   :  { %5512 = vmatmul.mubr.bf16.gmra.mxu0 %v11417_v16  ;;  %v11512_v15 = vld [vmem:[#allocation6 + $0x218] ss:$24 sps:$4 sm:$0xff]   ;;  %v11517_v16 = vld [vmem:[#allocation6 + $0x13e4] ss:$24 sps:$4 sm:$0xff]  }
 0x122   :  { %5625 = vmatmul.mubr.bf16.gmra.mxu1 %v11418_v17  ;;  %5700 = vmatpush1.bf16.msra.mxu0 %v11419_v18  ;;  %v11520_v17 = vld [vmem:[#allocation6 + $0x1ec] ss:$24 sps:$4 sm:$0xff]  }
 0x123   :  { %5813 = vmatpush1.bf16.msra.mxu1 %v11422_v19  ;;  %5701 = vmatprep.subr.bf16.mxu0 %v11427_v20  ;;  %v11521_v18 = vld [vmem:[#allocation3 + $0x334] ss:$56 sps:$4 sm:$0xff]   ;;  %v11515_v20 = vld [vmem:[#allocation6 + $0x13e0] ss:$24 sps:$4 sm:$0xff]  }
 0x124   :  { %5814 = vmatprep.subr.bf16.mxu1 %v11430_v21  ;;  %5521 = vmatprep.mubr.bf16.mxu0 %v11431_v22  ;;  %v11523_v19 = vld [vmem:[#allocation3 + $0x33c] ss:$56 sps:$4 sm:$0xff]   ;;  %v11518_v21 = vld [vmem:[#allocation6 + $0x1e8] ss:$24 sps:$4 sm:$0xff]  }
 0x125   :  { %5634 = vmatprep.mubr.bf16.mxu1 %v11433_v23  ;;  %v11529_v22 = vld [vmem:[#allocation6 + $0x13b4] ss:$24 sps:$4 sm:$0xff]  }
 0x126   :  { %5702 = vmatpush1.bf16.msra.mxu0 %v11425_v24  ;;  %v11532_v23 = vld [vmem:[#allocation6 + $0x1bc] ss:$24 sps:$4 sm:$0xff]   ;;  %v11525_v24 = vld [vmem:[#allocation3 + $0x330] ss:$56 sps:$4 sm:$0xff]  }
 0x127   :  { %5815 = vmatpush1.bf16.msra.mxu1 %v11428_v25  ;;  %5703 = vmatprep.subr.bf16.mxu0 %v11439_v26  ;;  %v11526_v25 = vld [vmem:[#allocation3 + $0x338] ss:$56 sps:$4 sm:$0xff]  }
 0x128   :  { %5816 = vmatprep.subr.bf16.mxu1 %v11442_v27  ;;  %v11527_v26 = vld [vmem:[#allocation6 + $0x13b0] ss:$24 sps:$4 sm:$0xff]  }
 0x129   :  { %5522 = vmatmul.mubr.bf16.gmra.mxu0 %v11435_v28  ;;  %v11530_v27 = vld [vmem:[#allocation6 + $0x1b8] ss:$24 sps:$4 sm:$0xff]   ;;  %v11535_v28 = vld [vmem:[#allocation6 + $0x1384] ss:$24 sps:$4 sm:$0xff]  }
 0x12a   :  { %5635 = vmatmul.mubr.bf16.gmra.mxu1 %v11436_v29  ;;  %5704 = vmatpush1.bf16.msra.mxu0 %v11437_v30  ;;  %v11538_v29 = vld [vmem:[#allocation6 + $0x18c] ss:$24 sps:$4 sm:$0xff]  }
 0x12b   :  { %5817 = vmatpush1.bf16.msra.mxu1 %v11440_v31  ;;  %5705 = vmatprep.subr.bf16.mxu0 %v11445_v32  ;;  %v11541_v30 = vld [vmem:[#allocation3 + $0x34] ss:$56 sps:$4 sm:$0xff]   ;;  %v11533_v31 = vld [vmem:[#allocation6 + $0x1380] ss:$24 sps:$4 sm:$0xff]  }
 0x12c   :  { %5818 = vmatprep.subr.bf16.mxu1 %v11448_v33  ;;  %5531 = vmatprep.mubr.bf16.mxu0 %v11449_v34  ;;  %v11536_v32 = vld [vmem:[#allocation6 + $0x188] ss:$24 sps:$4 sm:$0xff]   ;;  %v11544_v33 = vld [vmem:[#allocation6 + $0x45c] ss:$24 sps:$4 sm:$0xff]  }
 0x12d   :  { %5644 = vmatprep.mubr.bf16.mxu1 %v11451_v35  ;;  %v11547_v34 = vld [vmem:[#allocation6 + $0x75c] ss:$24 sps:$4 sm:$0xff]   ;;  %v11539_v35 = vld [vmem:[#allocation3 + $0x30] ss:$56 sps:$4 sm:$0xff]  }
 0x12e   :  { %5706 = vmatpush1.bf16.msra.mxu0 %v11443_v36  ;;  %v12379_v36 = vld [vmem:[#allocation3 + $0x4] ss:$56 sps:$4 sm:$0xff]  }
 0x12f   :  { %5819 = vmatpush1.bf16.msra.mxu1 %v11446_v37  ;;  %5707 = vmatprep.subr.bf16.mxu0 %v11457_v38  ;;  %v11542_v37 = vld [vmem:[#allocation6 + $0x458] ss:$24 sps:$4 sm:$0xff]  }
 0x130   :  { %5820 = vmatprep.subr.bf16.mxu1 %v11460_v39  ;;  %v11545_v38 = vld [vmem:[#allocation6 + $0x758] ss:$24 sps:$4 sm:$0xff]   ;;  %v11550_v39 = vld [vmem:[#allocation6 + $0x42c] ss:$24 sps:$4 sm:$0xff]  }
 0x131   :  { %5532 = vmatmul.mubr.bf16.gmra.mxu0 %v11453_v40  ;;  %v11553_v40 = vld [vmem:[#allocation6 + $0x72c] ss:$24 sps:$4 sm:$0xff]  }
 0x132   :  { %5645 = vmatmul.mubr.bf16.gmra.mxu1 %v11454_v41  ;;  %5708 = vmatpush1.bf16.msra.mxu0 %v11455_v42  ;;  %v11554_v41 = vld [vmem:[#allocation3 + $0xa4] ss:$56 sps:$4 sm:$0xff]  }
 0x133   :  { %5821 = vmatpush1.bf16.msra.mxu1 %v11458_v43  ;;  %5709 = vmatprep.subr.bf16.mxu0 %v11463_v44  ;;  %v12380_v44 = vld [vmem:[#allocation3] ss:$56 sps:$4 sm:$0xff]  }
 0x134   :  { %5822 = vmatprep.subr.bf16.mxu1 %v11466_v45  ;;  %5541 = vmatprep.mubr.bf16.mxu0 %v11467_v46  ;;  %v11548_v45 = vld [vmem:[#allocation6 + $0x428] ss:$24 sps:$4 sm:$0xff]  }
 0x135   :  { %5654 = vmatprep.mubr.bf16.mxu1 %v11469_v47  ;;  %v11551_v46 = vld [vmem:[#allocation6 + $0x728] ss:$24 sps:$4 sm:$0xff]  }
 0x136   :  { %5710 = vmatpush1.bf16.msra.mxu0 %v11461_v48  ;;  %v11559_v48 = vld [vmem:[#allocation6 + $0x3fc] ss:$24 sps:$4 sm:$0xff]  }
 0x137   :  { %5823 = vmatpush1.bf16.msra.mxu1 %v11464_v49  ;;  %5711 = vmatprep.subr.bf16.mxu0 %v11475_v50 }
 0x138   :  { %5824 = vmatprep.subr.bf16.mxu1 %v11478_v51  ;;  %v11562_v51 = vld [vmem:[#allocation6 + $0x6fc] ss:$24 sps:$4 sm:$0xff]  }
 0x139   :  { %5542 = vmatmul.mubr.bf16.gmra.mxu0 %v11471_v52 }
 0x13a   :  { %5655 = vmatmul.mubr.bf16.gmra.mxu1 %v11472_v53  ;;  %5712 = vmatpush2.bf16.msra.mxu0 %v11473_v54  ;;  %v12381_v53 = vld [vmem:[#allocation3 + $0x74] ss:$56 sps:$4 sm:$0xff]   ;;  %v11556_v54 = vld [vmem:[#allocation3 + $0xa0] ss:$56 sps:$4 sm:$0xff]  }
 0x13b   :  { %5825 = vmatpush2.bf16.msra.mxu1 %v11476_v55  ;;  %5713 = vmatprep.subr.bf16.mxu0 %v11481_v56 }
 0x13c   :  { %5826 = vmatprep.subr.bf16.mxu1 %v11484_v57  ;;  %5551 = vmatprep.mubr.bf16.mxu0 %v11485_v58  ;;  %v11557_v57 = vld [vmem:[#allocation6 + $0x3f8] ss:$24 sps:$4 sm:$0xff]  }
 0x13d   :  { %5664 = vmatprep.mubr.bf16.mxu1 %v11487_v59  ;;  %v11560_v58 = vld [vmem:[#allocation6 + $0x6f8] ss:$24 sps:$4 sm:$0xff]  }
 0x13e   :  { %5714 = vmatpush2.bf16.msra.mxu0 %v11479_v60  ;;  %v11565_v60 = vld [vmem:[#allocation6 + $0x3cc] ss:$24 sps:$4 sm:$0xff]  }
 0x13f   :  { %5827 = vmatpush2.bf16.msra.mxu1 %v11482_v61  ;;  %5715 = vmatprep.subr.bf16.mxu0 %v11493_v62 }
 0x140   :  { %5828 = vmatprep.subr.bf16.mxu1 %v11496_v63  ;;  %v11568_v63 = vld [vmem:[#allocation6 + $0x6cc] ss:$24 sps:$4 sm:$0xff]  }
 0x141   :  { %5552 = vmatmul.mubr.bf16.gmra.mxu0 %v11489_v0 }
 0x142   :  { %5665 = vmatmul.mubr.bf16.gmra.mxu1 %v11490_v1  ;;  %5716 = vmatpush2.bf16.msra.mxu0 %v11491_v2  ;;  %v11569_v1 = vld [vmem:[#allocation3 + $0x114] ss:$56 sps:$4 sm:$0xff]  }
 0x143   :  { %5829 = vmatpush2.bf16.msra.mxu1 %v11494_v3  ;;  %5717 = vmatprep.subr.bf16.mxu0 %v11499_v4  ;;  %v12382_v4 = vld [vmem:[#allocation3 + $0x70] ss:$56 sps:$4 sm:$0xff]  }
 0x144   :  { %5830 = vmatprep.subr.bf16.mxu1 %v11502_v5  ;;  %5561 = vmatprep.mubr.bf16.mxu0 %v11503_v6  ;;  %v11563_v5 = vld [vmem:[#allocation6 + $0x3c8] ss:$24 sps:$4 sm:$0xff]  }
 0x145   :  { %5674 = vmatprep.mubr.bf16.mxu1 %v11505_v7  ;;  %v11566_v6 = vld [vmem:[#allocation6 + $0x6c8] ss:$24 sps:$4 sm:$0xff]  }
 0x146   :  { %5718 = vmatpush2.bf16.msra.mxu0 %v11497_v8  ;;  %v11574_v8 = vld [vmem:[#allocation6 + $0x39c] ss:$24 sps:$4 sm:$0xff]  }
 0x147   :  { %5831 = vmatpush2.bf16.msra.mxu1 %v11500_v9  ;;  %5719 = vmatprep.subr.bf16.mxu0 %v11511_v10 }
 0x148   :  { %5832 = vmatprep.subr.bf16.mxu1 %v11514_v11  ;;  %v11577_v11 = vld [vmem:[#allocation6 + $0x69c] ss:$24 sps:$4 sm:$0xff]  }
 0x149   :  { %5562 = vmatmul.mubr.bf16.gmra.mxu0 %v11507_v12 }
 0x14a   :  { %5675 = vmatmul.mubr.bf16.gmra.mxu1 %v11508_v13  ;;  %5720 = vmatpush2.bf16.msra.mxu0 %v11509_v14  ;;  %v12383_v13 = vld [vmem:[#allocation3 + $0xe4] ss:$56 sps:$4 sm:$0xff]   ;;  %v11571_v14 = vld [vmem:[#allocation3 + $0x110] ss:$56 sps:$4 sm:$0xff]  }
 0x14b   :  { %5833 = vmatpush2.bf16.msra.mxu1 %v11512_v15  ;;  %5721 = vmatprep.subr.bf16.mxu0 %v11517_v16 }
 0x14c   :  { %5834 = vmatprep.subr.bf16.mxu1 %v11520_v17  ;;  %5571 = vmatprep.mubr.bf16.mxu0 %v11521_v18  ;;  %v11572_v17 = vld [vmem:[#allocation6 + $0x398] ss:$24 sps:$4 sm:$0xff]  }
 0x14d   :  { %5684 = vmatprep.mubr.bf16.mxu1 %v11523_v19  ;;  %v11575_v18 = vld [vmem:[#allocation6 + $0x698] ss:$24 sps:$4 sm:$0xff]  }
 0x14e   :  { %5722 = vmatpush2.bf16.msra.mxu0 %v11515_v20  ;;  %v11580_v20 = vld [vmem:[#allocation6 + $0x36c] ss:$24 sps:$4 sm:$0xff]  }
 0x14f   :  { %5835 = vmatpush2.bf16.msra.mxu1 %v11518_v21  ;;  %5723 = vmatprep.subr.bf16.mxu0 %v11529_v22 }
 0x150   :  { %5836 = vmatprep.subr.bf16.mxu1 %v11532_v23  ;;  %v11583_v23 = vld [vmem:[#allocation6 + $0x66c] ss:$24 sps:$4 sm:$0xff]  }
 0x151   :  { %5572 = vmatmul.mubr.bf16.gmra.mxu0 %v11525_v24 }
 0x152   :  { %5685 = vmatmul.mubr.bf16.gmra.mxu1 %v11526_v25  ;;  %5724 = vmatpush2.bf16.msra.mxu0 %v11527_v26  ;;  %v11584_v25 = vld [vmem:[#allocation3 + $0x184] ss:$56 sps:$4 sm:$0xff]  }
 0x153   :  { %5837 = vmatpush2.bf16.msra.mxu1 %v11530_v27  ;;  %5725 = vmatprep.subr.bf16.mxu0 %v11535_v28  ;;  %v12384_v28 = vld [vmem:[#allocation3 + $0xe0] ss:$56 sps:$4 sm:$0xff]  }
 0x154   :  { %5838 = vmatprep.subr.bf16.mxu1 %v11538_v29  ;;  %5727 = vmatprep.mubr.bf16.mxu0 %v11541_v30  ;;  %v11578_v29 = vld [vmem:[#allocation6 + $0x368] ss:$24 sps:$4 sm:$0xff]  }
 0x155   :  { %5840 = vmatprep.mubr.bf16.mxu1 %v12379_v36  ;;  %v11581_v30 = vld [vmem:[#allocation6 + $0x668] ss:$24 sps:$4 sm:$0xff]  }
 0x156   :  { %5726 = vmatpush2.bf16.msra.mxu0 %v11533_v31 }
 0x157   :  { %5839 = vmatpush2.bf16.msra.mxu1 %v11536_v32  ;;  %5921 = vmatprep.subr.bf16.mxu0 %v11544_v33  ;;  %v11589_v32 = vld [vmem:[#allocation6 + $0x33c] ss:$24 sps:$4 sm:$0xff]  }
 0x158   :  { %6034 = vmatprep.subr.bf16.mxu1 %v11547_v34 }
 0x159   :  { %v5051_v42 = vpop.f32.mrf.mxu0  ;;  %5728 = vmatmul.mubr.bf16.vlgmr.msra.gmra.mxu0 %v11539_v35  ;;  %v11592_v35 = vld [vmem:[#allocation6 + $0x63c] ss:$24 sps:$4 sm:$0xff]  }
 0x15a   :  { %v5164_v43 = vpop.f32.mrf.mxu1  ;;  %5841 = vmatmul.mubr.bf16.vlgmr.msra.gmra.mxu1 %v12380_v44  ;;  %5922 = vmatpush1.bf16.msra.mxu0 %v11542_v37  ;;  %v12385_v37 = vld [vmem:[#allocation3 + $0x154] ss:$56 sps:$4 sm:$0xff]  }
 0x15b   :  { %v12853_v47 = vadd.f32 %v5164_v43, %v5051_v42  ;;  %6035 = vmatpush1.bf16.msra.mxu1 %v11545_v38  ;;  %v5053_v49 = vpop.f32.mrf.mxu0  ;;  %5923 = vmatprep.subr.bf16.mxu0 %v11550_v39  ;;  %v11586_v38 = vld [vmem:[#allocation3 + $0x180] ss:$56 sps:$4 sm:$0xff]   ;;  %v11595_v44 = vld [vmem:[#allocation6 + $0x30c] ss:$24 sps:$4 sm:$0xff]  }
 0x15c   :  { %v5166_v50 = vpop.f32.mrf.mxu1  ;;  %6036 = vmatprep.subr.bf16.mxu1 %v11553_v40  ;;  %5737 = vmatprep.mubr.bf16.mxu0 %v11554_v41  ;;  %v11587_v41 = vld [vmem:[#allocation6 + $0x338] ss:$24 sps:$4 sm:$0xff]  }
 0x15d   :  { %v12855_v52 = vadd.f32 %v5166_v50, %v5053_v49  ;;  %5850 = vmatprep.mubr.bf16.mxu1 %v12381_v53  ;;  %v5055_v55 = vpop.f32.mrf.mxu0  ;;  %v11590_v42 = vld [vmem:[#allocation6 + $0x638] ss:$24 sps:$4 sm:$0xff]   ;;  %v11601_v50 = vld [vmem:[#allocation3 + $0x1f4] ss:$56 sps:$4 sm:$0xff]  }
 0x15e   :  { %v5168_v56 = vpop.f32.mrf.mxu1  ;;  %5924 = vmatpush1.bf16.msra.mxu0 %v11548_v45 }
 0x15f   :  { %v12857_v59 = vadd.f32 %v5168_v56, %v5055_v55  ;;  %6037 = vmatpush1.bf16.msra.mxu1 %v11551_v46  ;;  %v5057_v61 = vpop.f32.mrf.mxu0  ;;  %5925 = vmatprep.subr.bf16.mxu0 %v11559_v48  ;;  %v11598_v48 = vld [vmem:[#allocation6 + $0x60c] ss:$24 sps:$4 sm:$0xff]   ;;  %v11593_v55 = vld [vmem:[#allocation6 + $0x308] ss:$24 sps:$4 sm:$0xff]  }
 0x160   :  { %v5170_v62 = vpop.f32.mrf.mxu1  ;;  %6038 = vmatprep.subr.bf16.mxu1 %v11562_v51  ;;  %v11596_v56 = vld [vmem:[#allocation6 + $0x608] ss:$24 sps:$4 sm:$0xff]  }
 0x161   :  { %v12859_v0 = vadd.f32 %v5170_v62, %v5057_v61  ;;  %v5061_v2 = vpop.f32.mrf.mxu0  ;;  %5738 = vmatmul.mubr.bf16.gmra.mxu0 %v11556_v54  ;;  %v12386_v54 = vld [vmem:[#allocation3 + $0x150] ss:$56 sps:$4 sm:$0xff]   ;;  %v11607_v62 = vld [vmem:[#allocation6 + $0x8dc] ss:$24 sps:$4 sm:$0xff]  }
 0x162   :  { %v5174_v3 = vpop.f32.mrf.mxu1  ;;  %5851 = vmatmul.mubr.bf16.gmra.mxu1 %v12382_v4  ;;  %5926 = vmatpush1.bf16.msra.mxu0 %v11557_v57 }
 0x163   :  { %v12861_v7 = vadd.f32 %v5174_v3, %v5061_v2  ;;  %6039 = vmatpush1.bf16.msra.mxu1 %v11560_v58  ;;  %v5063_v9 = vpop.f32.mrf.mxu0  ;;  %5927 = vmatprep.subr.bf16.mxu0 %v11565_v60  ;;  %v11604_v58 = vld [vmem:[#allocation6 + $0x5dc] ss:$24 sps:$4 sm:$0xff]  }
 0x164   :  { %v5176_v10 = vpop.f32.mrf.mxu1  ;;  %6040 = vmatprep.subr.bf16.mxu1 %v11568_v63  ;;  %5747 = vmatprep.mubr.bf16.mxu0 %v11569_v1  ;;  %v11599_v1 = vld [vmem:[#allocation3 + $0x1f0] ss:$56 sps:$4 sm:$0xff]   ;;  %v12387_v2 = vld [vmem:[#allocation3 + $0x1c4] ss:$56 sps:$4 sm:$0xff]  }
 0x165   :  { %v12863_v12 = vadd.f32 %v5176_v10, %v5063_v9  ;;  %5860 = vmatprep.mubr.bf16.mxu1 %v12383_v13  ;;  %v5065_v15 = vpop.f32.mrf.mxu0  ;;  %v11610_v9 = vld [vmem:[#allocation6 + $0x5ac] ss:$24 sps:$4 sm:$0xff]  }
 0x166   :  { %v5178_v16 = vpop.f32.mrf.mxu1  ;;  %5928 = vmatpush1.bf16.msra.mxu0 %v11563_v5  ;;  %v11602_v5 = vld [vmem:[#allocation6 + $0x5d8] ss:$24 sps:$4 sm:$0xff]   ;;  %v11613_v13 = vld [vmem:[#allocation6 + $0x8ac] ss:$24 sps:$4 sm:$0xff]  }
 0x167   :  { %v12865_v19 = vadd.f32 %v5178_v16, %v5065_v15  ;;  %6041 = vmatpush1.bf16.msra.mxu1 %v11566_v6  ;;  %v5067_v21 = vpop.f32.mrf.mxu0  ;;  %5929 = vmatprep.subr.bf16.mxu0 %v11574_v8  ;;  %v11605_v6 = vld [vmem:[#allocation6 + $0x8d8] ss:$24 sps:$4 sm:$0xff]   ;;  %v11616_v15 = vld [vmem:[#allocation3 + $0x264] ss:$56 sps:$4 sm:$0xff]  }
 0x168   :  { %v5180_v22 = vpop.f32.mrf.mxu1  ;;  %6042 = vmatprep.subr.bf16.mxu1 %v11577_v11 }
 0x169   :  { %v12867_v24 = vadd.f32 %v5180_v22, %v5067_v21  ;;  %v5071_v26 = vpop.f32.mrf.mxu0  ;;  %5748 = vmatmul.mubr.bf16.gmra.mxu0 %v11571_v14  ;;  %v11611_v21 = vld [vmem:[#allocation6 + $0x8a8] ss:$24 sps:$4 sm:$0xff]  }
 0x16a   :  { %v5184_v27 = vpop.f32.mrf.mxu1  ;;  %5861 = vmatmul.mubr.bf16.gmra.mxu1 %v12384_v28  ;;  %5930 = vmatpush1.bf16.msra.mxu0 %v11572_v17 }
 0x16b   :  { %v12869_v31 = vadd.f32 %v5184_v27, %v5071_v26  ;;  %6043 = vmatpush1.bf16.msra.mxu1 %v11575_v18  ;;  %v5073_v33 = vpop.f32.mrf.mxu0  ;;  %5931 = vmatprep.subr.bf16.mxu0 %v11580_v20  ;;  %v12388_v18 = vld [vmem:[#allocation3 + $0x1c0] ss:$56 sps:$4 sm:$0xff]   ;;  %v11622_v27 = vld [vmem:[#allocation6 + $0x87c] ss:$24 sps:$4 sm:$0xff]  }
 0x16c   :  { %v5186_v34 = vpop.f32.mrf.mxu1  ;;  %6044 = vmatprep.subr.bf16.mxu1 %v11583_v23  ;;  %5757 = vmatprep.mubr.bf16.mxu0 %v11584_v25  ;;  %v11608_v20 = vld [vmem:[#allocation6 + $0x5a8] ss:$24 sps:$4 sm:$0xff]   ;;  %v11619_v23 = vld [vmem:[#allocation6 + $0x57c] ss:$24 sps:$4 sm:$0xff]  }
 0x16d   :  { %v12871_v36 = vadd.f32 %v5186_v34, %v5073_v33  ;;  %5870 = vmatprep.mubr.bf16.mxu1 %v12385_v37  ;;  %v5075_v39 = vpop.f32.mrf.mxu0  ;;  %v11617_v34 = vld [vmem:[#allocation6 + $0x578] ss:$24 sps:$4 sm:$0xff]  }
 0x16e   :  { %v5188_v40 = vpop.f32.mrf.mxu1  ;;  %5932 = vmatpush1.bf16.msra.mxu0 %v11578_v29  ;;  %v11614_v29 = vld [vmem:[#allocation3 + $0x260] ss:$56 sps:$4 sm:$0xff]  }
 0x16f   :  { %v12873_v43 = vadd.f32 %v5188_v40, %v5075_v39  ;;  %6045 = vmatpush1.bf16.msra.mxu1 %v11581_v30  ;;  %v5077_v45 = vpop.f32.mrf.mxu0  ;;  %5933 = vmatprep.subr.bf16.mxu0 %v11589_v32  ;;  %v12389_v30 = vld [vmem:[#allocation3 + $0x234] ss:$56 sps:$4 sm:$0xff]  }
 0x170   :  { %v5190_v46 = vpop.f32.mrf.mxu1  ;;  %6046 = vmatprep.subr.bf16.mxu1 %v11592_v35  ;;  %v11620_v35 = vld [vmem:[#allocation6 + $0x878] ss:$24 sps:$4 sm:$0xff]  }
 0x171   :  { %v12875_v49 = vadd.f32 %v5190_v46, %v5077_v45  ;;  %v5081_v51 = vpop.f32.mrf.mxu0  ;;  %5758 = vmatmul.mubr.bf16.gmra.mxu0 %v11586_v38  ;;  %v11625_v38 = vld [vmem:[#allocation6 + $0x54c] ss:$24 sps:$4 sm:$0xff]  }
 0x172   :  { %v5194_v53 = vpop.f32.mrf.mxu1  ;;  %5871 = vmatmul.mubr.bf16.gmra.mxu1 %v12386_v54  ;;  %5934 = vmatpush1.bf16.msra.mxu0 %v11587_v41  ;;  %v11628_v41 = vld [vmem:[#allocation6 + $0x84c] ss:$24 sps:$4 sm:$0xff]   ;;  %v11634_v54 = vld [vmem:[#allocation6 + $0x51c] ss:$24 sps:$4 sm:$0xff]  }
 0x173   :  { %v12877_v57 = vadd.f32 %v5194_v53, %v5081_v51  ;;  %6047 = vmatpush1.bf16.msra.mxu1 %v11590_v42  ;;  %v5083_v60 = vpop.f32.mrf.mxu0  ;;  %5935 = vmatprep.subr.bf16.mxu0 %v11595_v44  ;;  %v11631_v44 = vld [vmem:[#allocation3 + $0x2d4] ss:$56 sps:$4 sm:$0xff]   ;;  %v11626_v51 = vld [vmem:[#allocation6 + $0x848] ss:$24 sps:$4 sm:$0xff]  }
 0x174   :  { %v5196_v61 = vpop.f32.mrf.mxu1  ;;  %6048 = vmatprep.subr.bf16.mxu1 %v11598_v48  ;;  %5767 = vmatprep.mubr.bf16.mxu0 %v11601_v50  ;;  %v12390_v48 = vld [vmem:[#allocation3 + $0x230] ss:$56 sps:$4 sm:$0xff]  }
 0x175   :  { %v12879_v63 = vadd.f32 %v5196_v61, %v5083_v60  ;;  %5880 = vmatprep.mubr.bf16.mxu1 %v12387_v2  ;;  %v5085_v3 = vpop.f32.mrf.mxu0  ;;  %v11623_v50 = vld [vmem:[#allocation6 + $0x548] ss:$24 sps:$4 sm:$0xff]  }
 0x176   :  { %v5198_v4 = vpop.f32.mrf.mxu1  ;;  %5936 = vmatpush1.bf16.msra.mxu0 %v11593_v55  ;;  %v11629_v61 = vld [vmem:[#allocation3 + $0x2d0] ss:$56 sps:$4 sm:$0xff]  }
 0x177   :  { %v12881_v8 = vadd.f32 %v5198_v4, %v5085_v3  ;;  %6049 = vmatpush1.bf16.msra.mxu1 %v11596_v56  ;;  %v5087_v10 = vpop.f32.mrf.mxu0  ;;  %5937 = vmatprep.subr.bf16.mxu0 %v11604_v58  ;;  %v11637_v58 = vld [vmem:[#allocation6 + $0x81c] ss:$24 sps:$4 sm:$0xff]   ;;  %v11632_v3 = vld [vmem:[#allocation6 + $0x518] ss:$24 sps:$4 sm:$0xff]  }
 0x178   :  { %v5200_v11 = vpop.f32.mrf.mxu1  ;;  %6050 = vmatprep.subr.bf16.mxu1 %v11607_v62  ;;  %v12391_v62 = vld [vmem:[#allocation3 + $0x2a4] ss:$56 sps:$4 sm:$0xff]   ;;  %v11635_v4 = vld [vmem:[#allocation6 + $0x818] ss:$24 sps:$4 sm:$0xff]  }
 0x179   :  { %v12883_v14 = vadd.f32 %v5200_v11, %v5087_v10  ;;  %v5091_v16 = vpop.f32.mrf.mxu0  ;;  %5768 = vmatmul.mubr.bf16.gmra.mxu0 %v11599_v1  ;;  %v11643_v11 = vld [vmem:[#allocation6 + $0x7ec] ss:$24 sps:$4 sm:$0xff]  }
 0x17a   :  { %v5204_v17 = vpop.f32.mrf.mxu1  ;;  %5881 = vmatmul.mubr.bf16.gmra.mxu1 %v12388_v18  ;;  %5938 = vmatpush2.bf16.msra.mxu0 %v11602_v5  ;;  %v12392_v18 = vld [vmem:[#allocation3 + $0x2a0] ss:$56 sps:$4 sm:$0xff]  }
 0x17b   :  { %v12885_v22 = vadd.f32 %v5204_v17, %v5091_v16  ;;  %6051 = vmatpush2.bf16.msra.mxu1 %v11605_v6  ;;  %v5093_v25 = vpop.f32.mrf.mxu0  ;;  %5939 = vmatprep.subr.bf16.mxu0 %v11610_v9  ;;  %v11640_v6 = vld [vmem:[#allocation6 + $0x4ec] ss:$24 sps:$4 sm:$0xff]  }
 0x17c   :  { %v5206_v26 = vpop.f32.mrf.mxu1  ;;  %6052 = vmatprep.subr.bf16.mxu1 %v11613_v13  ;;  %5777 = vmatprep.mubr.bf16.mxu0 %v11616_v15  ;;  %v11646_v15 = vld [vmem:[#allocation3 + $0x344] ss:$56 sps:$4 sm:$0xff]  }
 0x17d   :  { %v12887_v28 = vadd.f32 %v5206_v26, %v5093_v25  ;;  %5890 = vmatprep.mubr.bf16.mxu1 %v12389_v30  ;;  %v5095_v32 = vpop.f32.mrf.mxu0  ;;  %v11649_v25 = vld [vmem:[#allocation6 + $0x4bc] ss:$24 sps:$4 sm:$0xff]  }
 0x17e   :  { %v5208_v33 = vpop.f32.mrf.mxu1  ;;  %5940 = vmatpush2.bf16.msra.mxu0 %v11608_v20  ;;  %v11638_v20 = vld [vmem:[#allocation6 + $0x4e8] ss:$24 sps:$4 sm:$0xff]  }
 0x17f   :  { %v12889_v37 = vadd.f32 %v5208_v33, %v5095_v32  ;;  %6053 = vmatpush2.bf16.msra.mxu1 %v11611_v21  ;;  %v5097_v39 = vpop.f32.mrf.mxu0  ;;  %5941 = vmatprep.subr.bf16.mxu0 %v11619_v23  ;;  %v11641_v21 = vld [vmem:[#allocation6 + $0x7e8] ss:$24 sps:$4 sm:$0xff]   ;;  %v12393_v33 = vld [vmem:[#allocation3 + $0x314] ss:$56 sps:$4 sm:$0xff]  }
 0x180   :  { %v5210_v40 = vpop.f32.mrf.mxu1  ;;  %6054 = vmatprep.subr.bf16.mxu1 %v11622_v27  ;;  %v11644_v32 = vld [vmem:[#allocation3 + $0x340] ss:$56 sps:$4 sm:$0xff]  }
 0x181   :  { %v12891_v42 = vadd.f32 %v5210_v40, %v5097_v39  ;;  %v5101_v45 = vpop.f32.mrf.mxu0  ;;  %5778 = vmatmul.mubr.bf16.gmra.mxu0 %v11614_v29  ;;  %v11652_v29 = vld [vmem:[#allocation6 + $0x7bc] ss:$24 sps:$4 sm:$0xff]   ;;  %v11650_v39 = vld [vmem:[#allocation6 + $0x7b8] ss:$24 sps:$4 sm:$0xff]  }
 0x182   :  { %v5214_v46 = vpop.f32.mrf.mxu1  ;;  %5891 = vmatmul.mubr.bf16.gmra.mxu1 %v12390_v48  ;;  %5942 = vmatpush2.bf16.msra.mxu0 %v11617_v34 }
 0x183   :  { %v12893_v53 = vadd.f32 %v5214_v46, %v5101_v45  ;;  %6055 = vmatpush2.bf16.msra.mxu1 %v11620_v35  ;;  %v5103_v55 = vpop.f32.mrf.mxu0  ;;  %5943 = vmatprep.subr.bf16.mxu0 %v11625_v38  ;;  %v11647_v38 = vld [vmem:[#allocation6 + $0x4b8] ss:$24 sps:$4 sm:$0xff]   ;;  %v11658_v46 = vld [vmem:[#allocation6 + $0x78c] ss:$24 sps:$4 sm:$0xff]  }
 0x184   :  { %v5216_v56 = vpop.f32.mrf.mxu1  ;;  %6056 = vmatprep.subr.bf16.mxu1 %v11628_v41  ;;  %5787 = vmatprep.mubr.bf16.mxu0 %v11631_v44  ;;  %v11655_v41 = vld [vmem:[#allocation6 + $0x48c] ss:$24 sps:$4 sm:$0xff]  }
 0x185   :  { %v12895_v60 = vadd.f32 %v5216_v56, %v5103_v55  ;;  %5900 = vmatprep.mubr.bf16.mxu1 %v12391_v62  ;;  %v5105_v1 = vpop.f32.mrf.mxu0  ;;  %v11653_v55 = vld [vmem:[#allocation6 + $0x488] ss:$24 sps:$4 sm:$0xff]  }
 0x186   :  { %v5218_v2 = vpop.f32.mrf.mxu1  ;;  %5944 = vmatpush2.bf16.msra.mxu0 %v11623_v50  ;;  %v11656_v56 = vld [vmem:[#allocation6 + $0x788] ss:$24 sps:$4 sm:$0xff]  }
 0x187   :  { %v12897_v5 = vadd.f32 %v5218_v2, %v5105_v1  ;;  %6057 = vmatpush2.bf16.msra.mxu1 %v11626_v51  ;;  %v5107_v9 = vpop.f32.mrf.mxu0  ;;  %5945 = vmatprep.subr.bf16.mxu0 %v11634_v54  ;;  %v12394_v54 = vld [vmem:[#allocation3 + $0x310] ss:$56 sps:$4 sm:$0xff]   ;;  %v11664_v2 = vld [vmem:[#allocation6 + $0xd5c] ss:$24 sps:$4 sm:$0xff]  }
 0x188   :  { %v5220_v10 = vpop.f32.mrf.mxu1  ;;  %6058 = vmatprep.subr.bf16.mxu1 %v11637_v58 }
 0x189   :  { %v12899_v13 = vadd.f32 %v5220_v10, %v5107_v9  ;;  %v5111_v16 = vpop.f32.mrf.mxu0  ;;  %5788 = vmatmul.mubr.bf16.gmra.mxu0 %v11629_v61  ;;  %v11661_v61 = vld [vmem:[#allocation6 + $0xa5c] ss:$24 sps:$4 sm:$0xff]  }
 0x18a   :  { %v5224_v17 = vpop.f32.mrf.mxu1  ;;  %5901 = vmatmul.mubr.bf16.gmra.mxu1 %v12392_v18  ;;  %5946 = vmatpush2.bf16.msra.mxu0 %v11632_v3 }
 0x18b   :  { %v12901_v23 = vadd.f32 %v5224_v17, %v5111_v16  ;;  %6059 = vmatpush2.bf16.msra.mxu1 %v11635_v4  ;;  %v5113_v26 = vpop.f32.mrf.mxu0  ;;  %5947 = vmatprep.subr.bf16.mxu0 %v11640_v6  ;;  %v12395_v4 = vld [vmem:[#allocation3 + $0xc] ss:$56 sps:$4 sm:$0xff]  }
 0x18c   :  { %v5226_v27 = vpop.f32.mrf.mxu1  ;;  %6060 = vmatprep.subr.bf16.mxu1 %v11643_v11  ;;  %5797 = vmatprep.mubr.bf16.mxu0 %v11646_v15  ;;  %v12396_v6 = vld [vmem:[#allocation3 + $0x14] ss:$56 sps:$4 sm:$0xff]   ;;  %v11659_v11 = vld [vmem:[#allocation6 + $0xa58] ss:$24 sps:$4 sm:$0xff]  }
 0x18d   :  { %v12903_v30 = vadd.f32 %v5226_v27, %v5113_v26  ;;  %5910 = vmatprep.mubr.bf16.mxu1 %v12393_v33  ;;  %v5115_v34 = vpop.f32.mrf.mxu0  ;;  %v11662_v15 = vld [vmem:[#allocation6 + $0xd58] ss:$24 sps:$4 sm:$0xff]   ;;  %v11667_v17 = vld [vmem:[#allocation6 + $0xa2c] ss:$24 sps:$4 sm:$0xff]   ;;  %v11665_v33 = vld [vmem:[#allocation6 + $0xa28] ss:$24 sps:$4 sm:$0xff]  }
 0x18e   :  { %v5228_v35 = vpop.f32.mrf.mxu1  ;;  %5948 = vmatpush2.bf16.msra.mxu0 %v11638_v20 }
 0x18f   :  { %v12905_v40 = vadd.f32 %v5228_v35, %v5115_v34  ;;  %6061 = vmatpush2.bf16.msra.mxu1 %v11641_v21  ;;  %v5117_v44 = vpop.f32.mrf.mxu0  ;;  %5949 = vmatprep.subr.bf16.mxu0 %v11649_v25  ;;  %v11670_v21 = vld [vmem:[#allocation6 + $0xd2c] ss:$24 sps:$4 sm:$0xff]   ;;  %v11668_v34 = vld [vmem:[#allocation6 + $0xd28] ss:$24 sps:$4 sm:$0xff]  }
 0x190   :  { %v5230_v45 = vpop.f32.mrf.mxu1  ;;  %6062 = vmatprep.subr.bf16.mxu1 %v11652_v29  ;;  %v12397_v29 = vld [vmem:[#allocation3 + $0x8] ss:$56 sps:$4 sm:$0xff]  }
 0x191   :  { %v12907_v48 = vadd.f32 %v5230_v45, %v5117_v44  ;;  %v5121_v50 = vpop.f32.mrf.mxu0  ;;  %5798 = vmatmul.mubr.bf16.gmra.mxu0 %v11644_v32  ;;  %v12398_v32 = vld [vmem:[#allocation3 + $0x10] ss:$56 sps:$4 sm:$0xff]   ;;  %v11676_v44 = vld [vmem:[#allocation6 + $0xcfc] ss:$24 sps:$4 sm:$0xff]  }
 0x192   :  { %v5234_v51 = vpop.f32.mrf.mxu1  ;;  %5911 = vmatmul.mubr.bf16.gmra.mxu1 %v12394_v54  ;;  %5950 = vmatpush2.bf16.msra.mxu0 %v11647_v38  ;;  %v11673_v38 = vld [vmem:[#allocation6 + $0x9fc] ss:$24 sps:$4 sm:$0xff]  }
 0x193   :  { %v12909_v58 = vadd.f32 %v5234_v51, %v5121_v50  ;;  %6063 = vmatpush2.bf16.msra.mxu1 %v11650_v39  ;;  %v5123_v62 = vpop.f32.mrf.mxu0  ;;  %5951 = vmatprep.subr.bf16.mxu0 %v11655_v41  ;;  %v12399_v50 = vld [vmem:[#allocation3 + $0x7c] ss:$56 sps:$4 sm:$0xff]  }
 0x194   :  { %v5236_v1 = vpop.f32.mrf.mxu1  ;;  %6064 = vmatprep.subr.bf16.mxu1 %v11658_v46  ;;  %5953 = vmatprep.mubr.bf16.mxu0 %v12395_v4  ;;  %v12400_v51 = vld [vmem:[#allocation3 + $0x84] ss:$56 sps:$4 sm:$0xff]  }
 0x195   :  { %v12911_v3 = vadd.f32 %v5236_v1, %v5123_v62  ;;  %6066 = vmatprep.mubr.bf16.mxu1 %v12396_v6  ;;  %v5125_v9 = vpop.f32.mrf.mxu0  ;;  %v11679_v1 = vld [vmem:[#allocation6 + $0x9cc] ss:$24 sps:$4 sm:$0xff]  }
 0x196   :  { %v5238_v10 = vpop.f32.mrf.mxu1  ;;  %5952 = vmatpush2.bf16.msra.mxu0 %v11653_v55 }
 0x197   :  { %v12913_v16 = vadd.f32 %v5238_v10, %v5125_v9  ;;  %6065 = vmatpush2.bf16.msra.mxu1 %v11656_v56  ;;  %v5127_v18 = vpop.f32.mrf.mxu0  ;;  %6147 = vmatprep.subr.bf16.mxu0 %v11661_v61  ;;  %v11671_v56 = vld [vmem:[#allocation6 + $0x9f8] ss:$24 sps:$4 sm:$0xff]  }
 0x198   :  { %v5240_v20 = vpop.f32.mrf.mxu1  ;;  %6260 = vmatprep.subr.bf16.mxu1 %v11664_v2 }
 0x199   :  { %v12915_v25 = vadd.f32 %v5240_v20, %v5127_v18  ;;  %v5277_v26 = vpop.f32.mrf.mxu0  ;;  %5954 = vmatmul.mubr.bf16.vlgmr.msra.gmra.mxu0 %v12397_v29  ;;  %v11677_v18 = vld [vmem:[#allocation6 + $0x9c8] ss:$24 sps:$4 sm:$0xff]  }
 0x19a   :  { %v5390_v27 = vpop.f32.mrf.mxu1  ;;  %6067 = vmatmul.mubr.bf16.vlgmr.msra.gmra.mxu1 %v12398_v32  ;;  %v5278_v35 = vadd.f32 %v5277_v26, %v12853_v47  ;;  %6148 = vmatpush1.bf16.msra.mxu0 %v11659_v11  ;;  %v11674_v47 = vld [vmem:[#allocation6 + $0xcf8] ss:$24 sps:$4 sm:$0xff]   ;;  %v11685_v26 = vld [vmem:[#allocation6 + $0x99c] ss:$24 sps:$4 sm:$0xff]  }
 0x19b   :  { %6261 = vmatpush1.bf16.msra.mxu1 %v11662_v15  ;;  %v5279_v39 = vpop.f32.mrf.mxu0  ;;  %6149 = vmatprep.subr.bf16.mxu0 %v11667_v17  ;;  %v12401_v15 = vld [vmem:[#allocation3 + $0x78] ss:$56 sps:$4 sm:$0xff]  }
 0x19c   :  { %v5392_v41 = vpop.f32.mrf.mxu1  ;;  %6262 = vmatprep.subr.bf16.mxu1 %v11670_v21  ;;  %v12918_v45 = vadd.f32 %v5390_v27, %v5278_v35  ;;  %v5280_v46 = vadd.f32 %v5279_v39, %v12855_v52  ;;  %5963 = vmatprep.mubr.bf16.mxu0 %v12399_v50  ;;  %v11682_v52 = vld [vmem:[#allocation6 + $0xccc] ss:$24 sps:$4 sm:$0xff]   ;;  %v12402_v17 = vld [vmem:[#allocation3 + $0x80] ss:$56 sps:$4 sm:$0xff]  }
 0x19d   :  { %6076 = vmatprep.mubr.bf16.mxu1 %v12400_v51  ;;  %v5281_v54 = vpop.f32.mrf.mxu0  ;;  %v12404_v35 = vld [vmem:[#allocation3 + $0xf4] ss:$56 sps:$4 sm:$0xff]  }
 0x19e   :  { %v5394_v55 = vpop.f32.mrf.mxu1  ;;  %v12921_v61 = vadd.f32 %v5392_v41, %v5280_v46  ;;  %v5282_v62 = vadd.f32 %v5281_v54, %v12857_v59  ;;  %6150 = vmatpush1.bf16.msra.mxu0 %v11665_v33  ;;  %v11680_v59 = vld [vmem:[#allocation6 + $0xcc8] ss:$24 sps:$4 sm:$0xff]   ;;  %v11683_v41 = vld [vmem:[#allocation6 + $0x998] ss:$24 sps:$4 sm:$0xff]   ;;  %v11691_v50 = vld [vmem:[#allocation6 + $0x96c] ss:$24 sps:$4 sm:$0xff]  }
 0x19f   :  { %6263 = vmatpush1.bf16.msra.mxu1 %v11668_v34  ;;  %v5283_v2 = vpop.f32.mrf.mxu0  ;;  %6151 = vmatprep.subr.bf16.mxu0 %v11673_v38  ;;  %v12403_v34 = vld [vmem:[#allocation3 + $0xec] ss:$56 sps:$4 sm:$0xff]  }
 0x1a0   :  { %v5396_v4 = vpop.f32.mrf.mxu1  ;;  %6264 = vmatprep.subr.bf16.mxu1 %v11676_v44  ;;  %v12924_v6 = vadd.f32 %v5394_v55, %v5282_v62  ;;  %v5284_v9 = vadd.f32 %v5283_v2, %v12859_v0  ;;  %v11688_v0 = vld [vmem:[#allocation6 + $0xc9c] ss:$24 sps:$4 sm:$0xff]   ;;  %v12406_v2 = vld [vmem:[#allocation3 + $0xf0] ss:$56 sps:$4 sm:$0xff]  }
 0x1a1   :  { %v5287_v10 = vpop.f32.mrf.mxu0  ;;  %5964 = vmatmul.mubr.bf16.gmra.mxu0 %v12401_v15 }
 0x1a2   :  { %v5400_v11 = vpop.f32.mrf.mxu1  ;;  %6077 = vmatmul.mubr.bf16.gmra.mxu1 %v12402_v17  ;;  %v12927_v20 = vadd.f32 %v5396_v4, %v5284_v9  ;;  %v5288_v21 = vadd.f32 %v5287_v10, %v12861_v7  ;;  %6152 = vmatpush1.bf16.msra.mxu0 %v11671_v56  ;;  %v11686_v7 = vld [vmem:[#allocation6 + $0xc98] ss:$24 sps:$4 sm:$0xff]   ;;  %v11689_v4 = vld [vmem:[#allocation6 + $0x968] ss:$24 sps:$4 sm:$0xff]   ;;  %v11697_v10 = vld [vmem:[#allocation6 + $0x93c] ss:$24 sps:$4 sm:$0xff]  }
 0x1a3   :  { %6265 = vmatpush1.bf16.msra.mxu1 %v11674_v47  ;;  %v5289_v27 = vpop.f32.mrf.mxu0  ;;  %6153 = vmatprep.subr.bf16.mxu0 %v11679_v1  ;;  %v12405_v1 = vld [vmem:[#allocation3 + $0xe8] ss:$56 sps:$4 sm:$0xff]  }
 0x1a4   :  { %v5402_v29 = vpop.f32.mrf.mxu1  ;;  %6266 = vmatprep.subr.bf16.mxu1 %v11682_v52  ;;  %v12930_v32 = vadd.f32 %v5400_v11, %v5288_v21  ;;  %v5290_v33 = vadd.f32 %v5289_v27, %v12863_v12  ;;  %5973 = vmatprep.mubr.bf16.mxu0 %v12403_v34  ;;  %v11694_v12 = vld [vmem:[#allocation6 + $0xc6c] ss:$24 sps:$4 sm:$0xff]  }
 0x1a5   :  { %6086 = vmatprep.mubr.bf16.mxu1 %v12404_v35  ;;  %v5291_v38 = vpop.f32.mrf.mxu0  ;;  %v12408_v21 = vld [vmem:[#allocation3 + $0x164] ss:$56 sps:$4 sm:$0xff]  }
 0x1a6   :  { %v5404_v39 = vpop.f32.mrf.mxu1  ;;  %v12933_v44 = vadd.f32 %v5402_v29, %v5290_v33  ;;  %v5292_v46 = vadd.f32 %v5291_v38, %v12865_v19  ;;  %6154 = vmatpush1.bf16.msra.mxu0 %v11677_v18  ;;  %v11692_v19 = vld [vmem:[#allocation6 + $0xc68] ss:$24 sps:$4 sm:$0xff]   ;;  %v11695_v29 = vld [vmem:[#allocation6 + $0x938] ss:$24 sps:$4 sm:$0xff]   ;;  %v11703_v34 = vld [vmem:[#allocation6 + $0x90c] ss:$24 sps:$4 sm:$0xff]  }
 0x1a7   :  { %6267 = vmatpush1.bf16.msra.mxu1 %v11680_v59  ;;  %v5293_v51 = vpop.f32.mrf.mxu0  ;;  %6155 = vmatprep.subr.bf16.mxu0 %v11685_v26  ;;  %v12407_v59 = vld [vmem:[#allocation3 + $0x15c] ss:$56 sps:$4 sm:$0xff]  }
 0x1a8   :  { %v5406_v54 = vpop.f32.mrf.mxu1  ;;  %6268 = vmatprep.subr.bf16.mxu1 %v11688_v0  ;;  %v12936_v55 = vadd.f32 %v5404_v39, %v5292_v46  ;;  %v5294_v56 = vadd.f32 %v5293_v51, %v12867_v24  ;;  %v11700_v24 = vld [vmem:[#allocation6 + $0xc3c] ss:$24 sps:$4 sm:$0xff]   ;;  %v12410_v51 = vld [vmem:[#allocation3 + $0x160] ss:$56 sps:$4 sm:$0xff]  }
 0x1a9   :  { %v5297_v47 = vpop.f32.mrf.mxu0  ;;  %5974 = vmatmul.mubr.bf16.gmra.mxu0 %v12405_v1 }
 0x1aa   :  { %v5410_v62 = vpop.f32.mrf.mxu1  ;;  %6087 = vmatmul.mubr.bf16.gmra.mxu1 %v12406_v2  ;;  %v12939_v52 = vadd.f32 %v5406_v54, %v5294_v56  ;;  %v5298_v9 = vadd.f32 %v5297_v47, %v12869_v31  ;;  %6156 = vmatpush1.bf16.msra.mxu0 %v11683_v41  ;;  %v11698_v31 = vld [vmem:[#allocation6 + $0xc38] ss:$24 sps:$4 sm:$0xff]   ;;  %v11701_v54 = vld [vmem:[#allocation6 + $0x908] ss:$24 sps:$4 sm:$0xff]   ;;  %v11709_v47 = vld [vmem:[#allocation6 + $0xbdc] ss:$24 sps:$4 sm:$0xff]  }
 0x1ab   :  { %6269 = vmatpush1.bf16.msra.mxu1 %v11686_v7  ;;  %v5299_v11 = vpop.f32.mrf.mxu0  ;;  %6157 = vmatprep.subr.bf16.mxu0 %v11691_v50  ;;  %v12409_v50 = vld [vmem:[#allocation3 + $0x158] ss:$56 sps:$4 sm:$0xff]  }
 0x1ac   :  { %v5412_v15 = vpop.f32.mrf.mxu1  ;;  %6270 = vmatprep.subr.bf16.mxu1 %v11694_v12  ;;  %v12942_v17 = vadd.f32 %v5410_v62, %v5298_v9  ;;  %v5300_v18 = vadd.f32 %v5299_v11, %v12871_v36  ;;  %5983 = vmatprep.mubr.bf16.mxu0 %v12407_v59  ;;  %v11706_v36 = vld [vmem:[#allocation6 + $0xc0c] ss:$24 sps:$4 sm:$0xff]  }
 0x1ad   :  { %6096 = vmatprep.mubr.bf16.mxu1 %v12408_v21  ;;  %v5301_v26 = vpop.f32.mrf.mxu0  ;;  %v12412_v9 = vld [vmem:[#allocation3 + $0x1d4] ss:$56 sps:$4 sm:$0xff]  }
 0x1ae   :  { %v5414_v27 = vpop.f32.mrf.mxu1  ;;  %v12945_v0 = vadd.f32 %v5412_v15, %v5300_v18  ;;  %v5302_v33 = vadd.f32 %v5301_v26, %v12873_v43  ;;  %6158 = vmatpush1.bf16.msra.mxu0 %v11689_v4  ;;  %v11704_v43 = vld [vmem:[#allocation6 + $0xc08] ss:$24 sps:$4 sm:$0xff]   ;;  %v11707_v15 = vld [vmem:[#allocation6 + $0xbd8] ss:$24 sps:$4 sm:$0xff]   ;;  %v11715_v59 = vld [vmem:[#allocation6 + $0xbac] ss:$24 sps:$4 sm:$0xff]  }
 0x1af   :  { %6271 = vmatpush1.bf16.msra.mxu1 %v11692_v19  ;;  %v5303_v35 = vpop.f32.mrf.mxu0  ;;  %6159 = vmatprep.subr.bf16.mxu0 %v11697_v10  ;;  %v12411_v19 = vld [vmem:[#allocation3 + $0x1cc] ss:$56 sps:$4 sm:$0xff]  }
 0x1b0   :  { %v5416_v38 = vpop.f32.mrf.mxu1  ;;  %6272 = vmatprep.subr.bf16.mxu1 %v11700_v24  ;;  %v12948_v39 = vadd.f32 %v5414_v27, %v5302_v33  ;;  %v5304_v41 = vadd.f32 %v5303_v35, %v12875_v49  ;;  %v11712_v49 = vld [vmem:[#allocation6 + $0xedc] ss:$24 sps:$4 sm:$0xff]   ;;  %v12414_v35 = vld [vmem:[#allocation3 + $0x1d0] ss:$56 sps:$4 sm:$0xff]  }
 0x1b1   :  { %v5307_v7 = vpop.f32.mrf.mxu0  ;;  %5984 = vmatmul.mubr.bf16.gmra.mxu0 %v12409_v50 }
 0x1b2   :  { %v5420_v46 = vpop.f32.mrf.mxu1  ;;  %6097 = vmatmul.mubr.bf16.gmra.mxu1 %v12410_v51  ;;  %v12951_v12 = vadd.f32 %v5416_v38, %v5304_v41  ;;  %v5308_v56 = vadd.f32 %v5307_v7, %v12877_v57  ;;  %6160 = vmatpush1.bf16.msra.mxu0 %v11695_v29  ;;  %v11710_v57 = vld [vmem:[#allocation6 + $0xed8] ss:$24 sps:$4 sm:$0xff]   ;;  %v11713_v38 = vld [vmem:[#allocation6 + $0xba8] ss:$24 sps:$4 sm:$0xff]   ;;  %v11721_v7 = vld [vmem:[#allocation6 + $0xb7c] ss:$24 sps:$4 sm:$0xff]  }
 0x1b3   :  { %6273 = vmatpush1.bf16.msra.mxu1 %v11698_v31  ;;  %v5309_v62 = vpop.f32.mrf.mxu0  ;;  %6161 = vmatprep.subr.bf16.mxu0 %v11703_v34  ;;  %v12413_v34 = vld [vmem:[#allocation3 + $0x1c8] ss:$56 sps:$4 sm:$0xff]  }
 0x1b4   :  { %v5422_v1 = vpop.f32.mrf.mxu1  ;;  %6274 = vmatprep.subr.bf16.mxu1 %v11706_v36  ;;  %v12954_v2 = vadd.f32 %v5420_v46, %v5308_v56  ;;  %v5310_v4 = vadd.f32 %v5309_v62, %v12879_v63  ;;  %5993 = vmatprep.mubr.bf16.mxu0 %v12411_v19  ;;  %v11718_v63 = vld [vmem:[#allocation6 + $0xeac] ss:$24 sps:$4 sm:$0xff]  }
 0x1b5   :  { %6106 = vmatprep.mubr.bf16.mxu1 %v12412_v9  ;;  %v5311_v10 = vpop.f32.mrf.mxu0  ;;  %v12416_v56 = vld [vmem:[#allocation3 + $0x244] ss:$56 sps:$4 sm:$0xff]  }
 0x1b6   :  { %v5424_v11 = vpop.f32.mrf.mxu1  ;;  %v12957_v24 = vadd.f32 %v5422_v1, %v5310_v4  ;;  %v5312_v18 = vadd.f32 %v5311_v10, %v12881_v8  ;;  %6162 = vmatpush1.bf16.msra.mxu0 %v11701_v54  ;;  %v11716_v8 = vld [vmem:[#allocation6 + $0xea8] ss:$24 sps:$4 sm:$0xff]   ;;  %v11719_v1 = vld [vmem:[#allocation6 + $0xb78] ss:$24 sps:$4 sm:$0xff]   ;;  %v11727_v19 = vld [vmem:[#allocation6 + $0xb4c] ss:$24 sps:$4 sm:$0xff]  }
 0x1b7   :  { %6275 = vmatpush1.bf16.msra.mxu1 %v11704_v43  ;;  %v5313_v21 = vpop.f32.mrf.mxu0  ;;  %6163 = vmatprep.subr.bf16.mxu0 %v11709_v47  ;;  %v12415_v43 = vld [vmem:[#allocation3 + $0x23c] ss:$56 sps:$4 sm:$0xff]  }
 0x1b8   :  { %v5426_v26 = vpop.f32.mrf.mxu1  ;;  %6276 = vmatprep.subr.bf16.mxu1 %v11712_v49  ;;  %v12960_v27 = vadd.f32 %v5424_v11, %v5312_v18  ;;  %v5314_v29 = vadd.f32 %v5313_v21, %v12883_v14  ;;  %v11724_v14 = vld [vmem:[#allocation6 + $0xe7c] ss:$24 sps:$4 sm:$0xff]   ;;  %v12418_v21 = vld [vmem:[#allocation3 + $0x240] ss:$56 sps:$4 sm:$0xff]  }
 0x1b9   :  { %v5317_v31 = vpop.f32.mrf.mxu0  ;;  %5994 = vmatmul.mubr.bf16.gmra.mxu0 %v12413_v34 }
 0x1ba   :  { %v5430_v33 = vpop.f32.mrf.mxu1  ;;  %6107 = vmatmul.mubr.bf16.gmra.mxu1 %v12414_v35  ;;  %v12963_v36 = vadd.f32 %v5426_v26, %v5314_v29  ;;  %v5318_v41 = vadd.f32 %v5317_v31, %v12885_v22  ;;  %6164 = vmatpush2.bf16.msra.mxu0 %v11707_v15  ;;  %v11722_v22 = vld [vmem:[#allocation6 + $0xe78] ss:$24 sps:$4 sm:$0xff]   ;;  %v11725_v26 = vld [vmem:[#allocation6 + $0xb48] ss:$24 sps:$4 sm:$0xff]   ;;  %v11733_v31 = vld [vmem:[#allocation6 + $0xb1c] ss:$24 sps:$4 sm:$0xff]  }
 0x1bb   :  { %6277 = vmatpush2.bf16.msra.mxu1 %v11710_v57  ;;  %v5319_v46 = vpop.f32.mrf.mxu0  ;;  %6165 = vmatprep.subr.bf16.mxu0 %v11715_v59  ;;  %v12417_v59 = vld [vmem:[#allocation3 + $0x238] ss:$56 sps:$4 sm:$0xff]  }
 0x1bc   :  { %v5432_v50 = vpop.f32.mrf.mxu1  ;;  %6278 = vmatprep.subr.bf16.mxu1 %v11718_v63  ;;  %v12966_v51 = vadd.f32 %v5430_v33, %v5318_v41  ;;  %v5320_v54 = vadd.f32 %v5319_v46, %v12887_v28  ;;  %6003 = vmatprep.mubr.bf16.mxu0 %v12415_v43  ;;  %v11730_v28 = vld [vmem:[#allocation6 + $0xe4c] ss:$24 sps:$4 sm:$0xff]  }
 0x1bd   :  { %6116 = vmatprep.mubr.bf16.mxu1 %v12416_v56  ;;  %v5321_v47 = vpop.f32.mrf.mxu0  ;;  %v12420_v41 = vld [vmem:[#allocation3 + $0x2b4] ss:$56 sps:$4 sm:$0xff]  }
 0x1be   :  { %v5434_v62 = vpop.f32.mrf.mxu1  ;;  %v12969_v49 = vadd.f32 %v5432_v50, %v5320_v54  ;;  %v5322_v4 = vadd.f32 %v5321_v47, %v12889_v37  ;;  %6166 = vmatpush2.bf16.msra.mxu0 %v11713_v38  ;;  %v11728_v37 = vld [vmem:[#allocation6 + $0xe48] ss:$24 sps:$4 sm:$0xff]   ;;  %v11731_v50 = vld [vmem:[#allocation6 + $0xb18] ss:$24 sps:$4 sm:$0xff]   ;;  %v11739_v43 = vld [vmem:[#allocation6 + $0xaec] ss:$24 sps:$4 sm:$0xff]  }
 0x1bf   :  { %6279 = vmatpush2.bf16.msra.mxu1 %v11716_v8  ;;  %v5323_v9 = vpop.f32.mrf.mxu0  ;;  %6167 = vmatprep.subr.bf16.mxu0 %v11721_v7  ;;  %v12419_v8 = vld [vmem:[#allocation3 + $0x2ac] ss:$56 sps:$4 sm:$0xff]  }
 0x1c0   :  { %v5436_v10 = vpop.f32.mrf.mxu1  ;;  %6280 = vmatprep.subr.bf16.mxu1 %v11724_v14  ;;  %v12972_v11 = vadd.f32 %v5434_v62, %v5322_v4  ;;  %v5324_v15 = vadd.f32 %v5323_v9, %v12891_v42  ;;  %v11736_v42 = vld [vmem:[#allocation6 + $0xe1c] ss:$24 sps:$4 sm:$0xff]   ;;  %v12422_v9 = vld [vmem:[#allocation3 + $0x2b0] ss:$56 sps:$4 sm:$0xff]  }
 0x1c1   :  { %v5327_v57 = vpop.f32.mrf.mxu0  ;;  %6004 = vmatmul.mubr.bf16.gmra.mxu0 %v12417_v59  ;;  %v11745_v59 = vld [vmem:[#allocation6 + $0xabc] ss:$24 sps:$4 sm:$0xff]  }
 0x1c2   :  { %v5440_v18 = vpop.f32.mrf.mxu1  ;;  %6117 = vmatmul.mubr.bf16.gmra.mxu1 %v12418_v21  ;;  %v12975_v63 = vadd.f32 %v5436_v10, %v5324_v15  ;;  %v5328_v29 = vadd.f32 %v5327_v57, %v12893_v53  ;;  %6168 = vmatpush2.bf16.msra.mxu0 %v11719_v1  ;;  %v11734_v53 = vld [vmem:[#allocation6 + $0xe18] ss:$24 sps:$4 sm:$0xff]   ;;  %v11737_v10 = vld [vmem:[#allocation6 + $0xae8] ss:$24 sps:$4 sm:$0xff]  }
 0x1c3   :  { %6281 = vmatpush2.bf16.msra.mxu1 %v11722_v22  ;;  %v5329_v33 = vpop.f32.mrf.mxu0  ;;  %6169 = vmatprep.subr.bf16.mxu0 %v11727_v19  ;;  %v12421_v19 = vld [vmem:[#allocation3 + $0x2a8] ss:$56 sps:$4 sm:$0xff]  }
 0x1c4   :  { %v5442_v34 = vpop.f32.mrf.mxu1  ;;  %6282 = vmatprep.subr.bf16.mxu1 %v11730_v28  ;;  %v12978_v35 = vadd.f32 %v5440_v18, %v5328_v29  ;;  %v5330_v38 = vadd.f32 %v5329_v33, %v12895_v60  ;;  %6013 = vmatprep.mubr.bf16.mxu0 %v12419_v8  ;;  %v11742_v60 = vld [vmem:[#allocation6 + $0xdec] ss:$24 sps:$4 sm:$0xff]   ;;  %v11740_v15 = vld [vmem:[#allocation6 + $0xde8] ss:$24 sps:$4 sm:$0xff]  }
 0x1c5   :  { %6126 = vmatprep.mubr.bf16.mxu1 %v12420_v41  ;;  %v5331_v7 = vpop.f32.mrf.mxu0  ;;  %v12424_v29 = vld [vmem:[#allocation3 + $0x324] ss:$56 sps:$4 sm:$0xff]  }
 0x1c6   :  { %v5444_v46 = vpop.f32.mrf.mxu1  ;;  %v12981_v14 = vadd.f32 %v5442_v34, %v5330_v38  ;;  %v5332_v54 = vadd.f32 %v5331_v7, %v12897_v5  ;;  %6170 = vmatpush2.bf16.msra.mxu0 %v11725_v26  ;;  %v11746_v38 = vld [vmem:[#allocation6 + $0xdb8] ss:$24 sps:$4 sm:$0xff]   ;;  %v11751_v7 = vld [vmem:[#allocation6 + $0xa8c] ss:$24 sps:$4 sm:$0xff]  }
 0x1c7   :  { %6283 = vmatpush2.bf16.msra.mxu1 %v11728_v37  ;;  %v5333_v56 = vpop.f32.mrf.mxu0  ;;  %6171 = vmatprep.subr.bf16.mxu0 %v11733_v31  ;;  %v12423_v37 = vld [vmem:[#allocation3 + $0x31c] ss:$56 sps:$4 sm:$0xff]  }
 0x1c8   :  { %v5446_v47 = vpop.f32.mrf.mxu1  ;;  %6284 = vmatprep.subr.bf16.mxu1 %v11736_v42  ;;  %v12984_v62 = vadd.f32 %v5444_v46, %v5332_v54  ;;  %v5334_v1 = vadd.f32 %v5333_v56, %v12899_v13  ;;  %v11748_v13 = vld [vmem:[#allocation6 + $0xdbc] ss:$24 sps:$4 sm:$0xff]   ;;  %v12426_v56 = vld [vmem:[#allocation3 + $0x320] ss:$56 sps:$4 sm:$0xff]  }
 0x1c9   :  { %v5337_v22 = vpop.f32.mrf.mxu0  ;;  %6014 = vmatmul.mubr.bf16.gmra.mxu0 %v12421_v19  ;;  %v11757_v19 = vld [vmem:[#allocation6 + $0x105c] ss:$24 sps:$4 sm:$0xff]  }
 0x1ca   :  { %v5450_v4 = vpop.f32.mrf.mxu1  ;;  %6127 = vmatmul.mubr.bf16.gmra.mxu1 %v12422_v9  ;;  %v12987_v5 = vadd.f32 %v5446_v47, %v5334_v1  ;;  %v5338_v28 = vadd.f32 %v5337_v22, %v12901_v23  ;;  %6172 = vmatpush2.bf16.msra.mxu0 %v11731_v50  ;;  %v11743_v23 = vld [vmem:[#allocation6 + $0xab8] ss:$24 sps:$4 sm:$0xff]   ;;  %v11752_v1 = vld [vmem:[#allocation6 + $0xd88] ss:$24 sps:$4 sm:$0xff]  }
 0x1cb   :  { %6285 = vmatpush2.bf16.msra.mxu1 %v11734_v53  ;;  %v5339_v57 = vpop.f32.mrf.mxu0  ;;  %6173 = vmatprep.subr.bf16.mxu0 %v11739_v43  ;;  %v12425_v43 = vld [vmem:[#allocation3 + $0x318] ss:$56 sps:$4 sm:$0xff]  }
 0x1cc   :  { %v5452_v18 = vpop.f32.mrf.mxu1  ;;  %6286 = vmatprep.subr.bf16.mxu1 %v11742_v60  ;;  %v12990_v21 = vadd.f32 %v5450_v4, %v5338_v28  ;;  %v5340_v26 = vadd.f32 %v5339_v57, %v12903_v30  ;;  %6023 = vmatprep.mubr.bf16.mxu0 %v12423_v37  ;;  %v11754_v30 = vld [vmem:[#allocation6 + $0xd8c] ss:$24 sps:$4 sm:$0xff]   ;;  %v12427_v28 = vld [vmem:[#allocation3 + $0x1c] ss:$56 sps:$4 sm:$0xff]  }
 0x1cd   :  { %6136 = vmatprep.mubr.bf16.mxu1 %v12424_v29  ;;  %v5341_v31 = vpop.f32.mrf.mxu0 }
 0x1ce   :  { %v5454_v33 = vpop.f32.mrf.mxu1  ;;  %v12993_v34 = vadd.f32 %v5452_v18, %v5340_v26  ;;  %v5342_v42 = vadd.f32 %v5341_v31, %v12905_v40  ;;  %6174 = vmatpush2.bf16.msra.mxu0 %v11737_v10  ;;  %v11749_v40 = vld [vmem:[#allocation6 + $0xa88] ss:$24 sps:$4 sm:$0xff]   ;;  %v11758_v26 = vld [vmem:[#allocation6 + $0x1358] ss:$24 sps:$4 sm:$0xff]   ;;  %v11763_v31 = vld [vmem:[#allocation6 + $0x102c] ss:$24 sps:$4 sm:$0xff]  }
 0x1cf   :  { %6287 = vmatpush2.bf16.msra.mxu1 %v11740_v15  ;;  %v5343_v8 = vpop.f32.mrf.mxu0  ;;  %6175 = vmatprep.subr.bf16.mxu0 %v11745_v59  ;;  %v12428_v15 = vld [vmem:[#allocation3 + $0x24] ss:$56 sps:$4 sm:$0xff]  }
 0x1d0   :  { %v5456_v41 = vpop.f32.mrf.mxu1  ;;  %6288 = vmatprep.subr.bf16.mxu1 %v11748_v13  ;;  %v12996_v46 = vadd.f32 %v5454_v33, %v5342_v42  ;;  %v5344_v50 = vadd.f32 %v5343_v8, %v12907_v48  ;;  %v11760_v48 = vld [vmem:[#allocation6 + $0x135c] ss:$24 sps:$4 sm:$0xff]   ;;  %v12429_v8 = vld [vmem:[#allocation3 + $0x18] ss:$56 sps:$4 sm:$0xff]  }
 0x1d1   :  { %v5347_v53 = vpop.f32.mrf.mxu0  ;;  %6024 = vmatmul.mubr.bf16.gmra.mxu0 %v12425_v43  ;;  %v11769_v43 = vld [vmem:[#allocation6 + $0xffc] ss:$24 sps:$4 sm:$0xff]  }
 0x1d2   :  { %v5460_v54 = vpop.f32.mrf.mxu1  ;;  %6137 = vmatmul.mubr.bf16.gmra.mxu1 %v12426_v56  ;;  %v12999_v47 = vadd.f32 %v5456_v41, %v5344_v50  ;;  %v5348_v60 = vadd.f32 %v5347_v53, %v12909_v58  ;;  %6176 = vmatpush2.bf16.msra.mxu0 %v11743_v23  ;;  %v11755_v58 = vld [vmem:[#allocation6 + $0x1058] ss:$24 sps:$4 sm:$0xff]   ;;  %v11764_v50 = vld [vmem:[#allocation6 + $0x1328] ss:$24 sps:$4 sm:$0xff]  }
 0x1d3   :  { %6289 = vmatpush2.bf16.msra.mxu1 %v11746_v38  ;;  %v5349_v22 = vpop.f32.mrf.mxu0  ;;  %6177 = vmatprep.subr.bf16.mxu0 %v11751_v7  ;;  %v12430_v41 = vld [vmem:[#allocation3 + $0x20] ss:$56 sps:$4 sm:$0xff]  }
 0x1d4   :  { %v5462_v4 = vpop.f32.mrf.mxu1  ;;  %6290 = vmatprep.subr.bf16.mxu1 %v11754_v30  ;;  %v13002_v9 = vadd.f32 %v5460_v54, %v5348_v60  ;;  %v5350_v10 = vadd.f32 %v5349_v22, %v12911_v3  ;;  %6179 = vmatprep.mubr.bf16.mxu0 %v12427_v28  ;;  %v11766_v3 = vld [vmem:[#allocation6 + $0x132c] ss:$24 sps:$4 sm:$0xff]  }
 0x1d5   :  { %6292 = vmatprep.mubr.bf16.mxu1 %v12428_v15  ;;  %v5351_v57 = vpop.f32.mrf.mxu0  ;;  %v12431_v60 = vld [vmem:[#allocation3 + $0x8c] ss:$56 sps:$4 sm:$0xff]  }
 0x1d6   :  { %v5464_v18 = vpop.f32.mrf.mxu1  ;;  %v13005_v59 = vadd.f32 %v5462_v4, %v5350_v10  ;;  %v5352_v13 = vadd.f32 %v5351_v57, %v12913_v16  ;;  %6178 = vmatpush2.bf16.msra.mxu0 %v11749_v40  ;;  %v11761_v16 = vld [vmem:[#allocation6 + $0x1028] ss:$24 sps:$4 sm:$0xff]   ;;  %v11770_v10 = vld [vmem:[#allocation6 + $0x12f8] ss:$24 sps:$4 sm:$0xff]   ;;  %v11775_v57 = vld [vmem:[#allocation6 + $0xfcc] ss:$24 sps:$4 sm:$0xff]  }
 0x1d7   :  { %6291 = vmatpush2.bf16.msra.mxu1 %v11752_v1  ;;  %v5353_v37 = vpop.f32.mrf.mxu0  ;;  %6373 = vmatprep.subr.bf16.mxu0 %v11757_v19  ;;  %v12432_v1 = vld [vmem:[#allocation3 + $0x94] ss:$56 sps:$4 sm:$0xff]  }
 0x1d8   :  { %v5466_v29 = vpop.f32.mrf.mxu1  ;;  %6486 = vmatprep.subr.bf16.mxu1 %v11760_v48  ;;  %v13008_v33 = vadd.f32 %v5464_v18, %v5352_v13  ;;  %v5354_v23 = vadd.f32 %v5353_v37, %v12915_v25  ;;  %v11772_v25 = vld [vmem:[#allocation6 + $0x12fc] ss:$24 sps:$4 sm:$0xff]   ;;  %v12433_v37 = vld [vmem:[#allocation3 + $0x88] ss:$56 sps:$4 sm:$0xff]  }
 0x1d9   :  { %v5503_v42 = vpop.f32.mrf.mxu0  ;;  %6180 = vmatmul.mubr.bf16.vlgmr.msra.gmra.mxu0 %v12429_v8  ;;  %v11781_v8 = vld [vmem:[#allocation6 + $0xf9c] ss:$24 sps:$4 sm:$0xff]  }
 0x1da   :  { %v5616_v38 = vpop.f32.mrf.mxu1  ;;  %6293 = vmatmul.mubr.bf16.vlgmr.msra.gmra.mxu1 %v12430_v41  ;;  %v13011_v7 = vadd.f32 %v5466_v29, %v5354_v23  ;;  %v5504_v30 = vadd.f32 %v5503_v42, %v12918_v45  ;;  %6374 = vmatpush1.bf16.msra.mxu0 %v11755_v58  ;;  %v11767_v45 = vld [vmem:[#allocation6 + $0xff8] ss:$24 sps:$4 sm:$0xff]   ;;  %v11776_v23 = vld [vmem:[#allocation6 + $0x12c8] ss:$24 sps:$4 sm:$0xff]  }
 0x1db   :  { %6487 = vmatpush1.bf16.msra.mxu1 %v11758_v26  ;;  %v5505_v53 = vpop.f32.mrf.mxu0  ;;  %6375 = vmatprep.subr.bf16.mxu0 %v11763_v31  ;;  %v12434_v29 = vld [vmem:[#allocation3 + $0x90] ss:$56 sps:$4 sm:$0xff]  }
 0x1dc   :  { %v5618_v54 = vpop.f32.mrf.mxu1  ;;  %6488 = vmatprep.subr.bf16.mxu1 %v11766_v3  ;;  %v13014_v56 = vadd.f32 %v5616_v38, %v5504_v30  ;;  %v5506_v40 = vadd.f32 %v5505_v53, %v12921_v61  ;;  %6189 = vmatprep.mubr.bf16.mxu0 %v12431_v60  ;;  %v11778_v61 = vld [vmem:[#allocation6 + $0x12cc] ss:$24 sps:$4 sm:$0xff]   ;;  %v12435_v30 = vld [vmem:[#allocation3 + $0xfc] ss:$56 sps:$4 sm:$0xff]  }
 0x1dd   :  { %6302 = vmatprep.mubr.bf16.mxu1 %v12432_v1  ;;  %v5507_v22 = vpop.f32.mrf.mxu0 }
 0x1de   :  { %v5620_v4 = vpop.f32.mrf.mxu1  ;;  %v13017_v19 = vadd.f32 %v5618_v54, %v5506_v40  ;;  %v5508_v48 = vadd.f32 %v5507_v22, %v12924_v6  ;;  %6376 = vmatpush1.bf16.msra.mxu0 %v11761_v16  ;;  %v11773_v6 = vld [vmem:[#allocation6 + $0xfc8] ss:$24 sps:$4 sm:$0xff]   ;;  %v11782_v40 = vld [vmem:[#allocation6 + $0x1298] ss:$24 sps:$4 sm:$0xff]   ;;  %v11787_v22 = vld [vmem:[#allocation6 + $0xf6c] ss:$24 sps:$4 sm:$0xff]  }
 0x1df   :  { %6489 = vmatpush1.bf16.msra.mxu1 %v11764_v50  ;;  %v5509_v28 = vpop.f32.mrf.mxu0  ;;  %6377 = vmatprep.subr.bf16.mxu0 %v11769_v43  ;;  %v12436_v50 = vld [vmem:[#allocation3 + $0x104] ss:$56 sps:$4 sm:$0xff]  }
 0x1e0   :  { %v5622_v15 = vpop.f32.mrf.mxu1  ;;  %6490 = vmatprep.subr.bf16.mxu1 %v11772_v25  ;;  %v13020_v18 = vadd.f32 %v5620_v4, %v5508_v48  ;;  %v5510_v58 = vadd.f32 %v5509_v28, %v12927_v20  ;;  %v11784_v20 = vld [vmem:[#allocation6 + $0x129c] ss:$24 sps:$4 sm:$0xff]   ;;  %v12437_v28 = vld [vmem:[#allocation3 + $0xf8] ss:$56 sps:$4 sm:$0xff]  }
 0x1e1   :  { %v5513_v13 = vpop.f32.mrf.mxu0  ;;  %6190 = vmatmul.mubr.bf16.gmra.mxu0 %v12433_v37  ;;  %v11793_v37 = vld [vmem:[#allocation6 + $0xf3c] ss:$24 sps:$4 sm:$0xff]  }
 0x1e2   :  { %v5626_v26 = vpop.f32.mrf.mxu1  ;;  %6303 = vmatmul.mubr.bf16.gmra.mxu1 %v12434_v29  ;;  %v13023_v31 = vadd.f32 %v5622_v15, %v5510_v58  ;;  %v5514_v3 = vadd.f32 %v5513_v13, %v12930_v32  ;;  %6378 = vmatpush1.bf16.msra.mxu0 %v11767_v45  ;;  %v11779_v32 = vld [vmem:[#allocation6 + $0xf98] ss:$24 sps:$4 sm:$0xff]   ;;  %v11788_v58 = vld [vmem:[#allocation6 + $0x1268] ss:$24 sps:$4 sm:$0xff]  }
 0x1e3   :  { %6491 = vmatpush1.bf16.msra.mxu1 %v11770_v10  ;;  %v5515_v42 = vpop.f32.mrf.mxu0  ;;  %6379 = vmatprep.subr.bf16.mxu0 %v11775_v57  ;;  %v12438_v15 = vld [vmem:[#allocation3 + $0x100] ss:$56 sps:$4 sm:$0xff]  }
 0x1e4   :  { %v5628_v38 = vpop.f32.mrf.mxu1  ;;  %6492 = vmatprep.subr.bf16.mxu1 %v11778_v61  ;;  %v13026_v41 = vadd.f32 %v5626_v26, %v5514_v3  ;;  %v5516_v16 = vadd.f32 %v5515_v42, %v12933_v44  ;;  %6199 = vmatprep.mubr.bf16.mxu0 %v12435_v30  ;;  %v11790_v44 = vld [vmem:[#allocation6 + $0x126c] ss:$24 sps:$4 sm:$0xff]  }
 0x1e5   :  { %6312 = vmatprep.mubr.bf16.mxu1 %v12436_v50  ;;  %v5517_v53 = vpop.f32.mrf.mxu0  ;;  %v12439_v3 = vld [vmem:[#allocation3 + $0x16c] ss:$56 sps:$4 sm:$0xff]  }
 0x1e6   :  { %v5630_v54 = vpop.f32.mrf.mxu1  ;;  %v13029_v43 = vadd.f32 %v5628_v38, %v5516_v16  ;;  %v5518_v25 = vadd.f32 %v5517_v53, %v12936_v55  ;;  %6380 = vmatpush1.bf16.msra.mxu0 %v11773_v6  ;;  %v11785_v55 = vld [vmem:[#allocation6 + $0xf68] ss:$24 sps:$4 sm:$0xff]   ;;  %v11794_v16 = vld [vmem:[#allocation6 + $0x1238] ss:$24 sps:$4 sm:$0xff]   ;;  %v11799_v53 = vld [vmem:[#allocation6 + $0xf0c] ss:$24 sps:$4 sm:$0xff]  }
 0x1e7   :  { %6493 = vmatpush1.bf16.msra.mxu1 %v11776_v23  ;;  %v5519_v60 = vpop.f32.mrf.mxu0  ;;  %6381 = vmatprep.subr.bf16.mxu0 %v11781_v8  ;;  %v12440_v23 = vld [vmem:[#allocation3 + $0x174] ss:$56 sps:$4 sm:$0xff]  }
 0x1e8   :  { %v5632_v1 = vpop.f32.mrf.mxu1  ;;  %6494 = vmatprep.subr.bf16.mxu1 %v11784_v20  ;;  %v13032_v4 = vadd.f32 %v5630_v54, %v5518_v25  ;;  %v5520_v45 = vadd.f32 %v5519_v60, %v12939_v52  ;;  %v11796_v52 = vld [vmem:[#allocation6 + $0x123c] ss:$24 sps:$4 sm:$0xff]   ;;  %v12441_v60 = vld [vmem:[#allocation3 + $0x168] ss:$56 sps:$4 sm:$0xff]  }
 0x1e9   :  { %v5523_v48 = vpop.f32.mrf.mxu0  ;;  %6200 = vmatmul.mubr.bf16.gmra.mxu0 %v12437_v28  ;;  %v11805_v28 = vld [vmem:[#allocation6 + $0x11dc] ss:$24 sps:$4 sm:$0xff]  }
 0x1ea   :  { %v5636_v10 = vpop.f32.mrf.mxu1  ;;  %6313 = vmatmul.mubr.bf16.gmra.mxu1 %v12438_v15  ;;  %v13035_v57 = vadd.f32 %v5632_v1, %v5520_v45  ;;  %v5524_v61 = vadd.f32 %v5523_v48, %v12942_v17  ;;  %6382 = vmatpush1.bf16.msra.mxu0 %v11779_v32  ;;  %v11791_v17 = vld [vmem:[#allocation6 + $0xf38] ss:$24 sps:$4 sm:$0xff]   ;;  %v11800_v45 = vld [vmem:[#allocation6 + $0x1208] ss:$24 sps:$4 sm:$0xff]  }
 0x1eb   :  { %6495 = vmatpush1.bf16.msra.mxu1 %v11782_v40  ;;  %v5525_v13 = vpop.f32.mrf.mxu0  ;;  %6383 = vmatprep.subr.bf16.mxu0 %v11787_v22  ;;  %v12442_v1 = vld [vmem:[#allocation3 + $0x170] ss:$56 sps:$4 sm:$0xff]  }
 0x1ec   :  { %v5638_v26 = vpop.f32.mrf.mxu1  ;;  %6496 = vmatprep.subr.bf16.mxu1 %v11790_v44  ;;  %v13038_v29 = vadd.f32 %v5636_v10, %v5524_v61  ;;  %v5526_v6 = vadd.f32 %v5525_v13, %v12945_v0  ;;  %6209 = vmatprep.mubr.bf16.mxu0 %v12439_v3  ;;  %v11802_v0 = vld [vmem:[#allocation6 + $0x120c] ss:$24 sps:$4 sm:$0xff]   ;;  %v12443_v61 = vld [vmem:[#allocation3 + $0x1dc] ss:$56 sps:$4 sm:$0xff]  }
 0x1ed   :  { %6322 = vmatprep.mubr.bf16.mxu1 %v12440_v23  ;;  %v5527_v42 = vpop.f32.mrf.mxu0 }
 0x1ee   :  { %v5640_v38 = vpop.f32.mrf.mxu1  ;;  %v13041_v8 = vadd.f32 %v5638_v26, %v5526_v6  ;;  %v5528_v20 = vadd.f32 %v5527_v42, %v12948_v39  ;;  %6384 = vmatpush1.bf16.msra.mxu0 %v11785_v55  ;;  %v11797_v39 = vld [vmem:[#allocation6 + $0xf08] ss:$24 sps:$4 sm:$0xff]   ;;  %v11806_v6 = vld [vmem:[#allocation6 + $0x14d8] ss:$24 sps:$4 sm:$0xff]   ;;  %v11811_v42 = vld [vmem:[#allocation6 + $0x11ac] ss:$24 sps:$4 sm:$0xff]  }
 0x1ef   :  { %6497 = vmatpush1.bf16.msra.mxu1 %v11788_v58  ;;  %v5529_v30 = vpop.f32.mrf.mxu0  ;;  %6385 = vmatprep.subr.bf16.mxu0 %v11793_v37  ;;  %v12444_v58 = vld [vmem:[#allocation3 + $0x1e4] ss:$56 sps:$4 sm:$0xff]  }
 0x1f0   :  { %v5642_v50 = vpop.f32.mrf.mxu1  ;;  %6498 = vmatprep.subr.bf16.mxu1 %v11796_v52  ;;  %v13044_v54 = vadd.f32 %v5640_v38, %v5528_v20  ;;  %v5530_v32 = vadd.f32 %v5529_v30, %v12951_v12  ;;  %v11808_v12 = vld [vmem:[#allocation6 + $0x14dc] ss:$24 sps:$4 sm:$0xff]   ;;  %v12445_v30 = vld [vmem:[#allocation3 + $0x1d8] ss:$56 sps:$4 sm:$0xff]  }
 0x1f1   :  { %v5533_v25 = vpop.f32.mrf.mxu0  ;;  %6210 = vmatmul.mubr.bf16.gmra.mxu0 %v12441_v60  ;;  %v11817_v60 = vld [vmem:[#allocation6 + $0x117c] ss:$24 sps:$4 sm:$0xff]  }
 0x1f2   :  { %v5646_v40 = vpop.f32.mrf.mxu1  ;;  %6323 = vmatmul.mubr.bf16.gmra.mxu1 %v12442_v1  ;;  %v13047_v22 = vadd.f32 %v5642_v50, %v5530_v32  ;;  %v5534_v44 = vadd.f32 %v5533_v25, %v12954_v2  ;;  %6386 = vmatpush1.bf16.msra.mxu0 %v11791_v17  ;;  %v11803_v2 = vld [vmem:[#allocation6 + $0x11d8] ss:$24 sps:$4 sm:$0xff]   ;;  %v11812_v32 = vld [vmem:[#allocation6 + $0x14a8] ss:$24 sps:$4 sm:$0xff]  }
 0x1f3   :  { %6499 = vmatpush1.bf16.msra.mxu1 %v11794_v16  ;;  %v5535_v48 = vpop.f32.mrf.mxu0  ;;  %6387 = vmatprep.subr.bf16.mxu0 %v11799_v53  ;;  %v12446_v50 = vld [vmem:[#allocation3 + $0x1e0] ss:$56 sps:$4 sm:$0xff]  }
 0x1f4   :  { %v5648_v10 = vpop.f32.mrf.mxu1  ;;  %6500 = vmatprep.subr.bf16.mxu1 %v11802_v0  ;;  %v13050_v15 = vadd.f32 %v5646_v40, %v5534_v44  ;;  %v5536_v55 = vadd.f32 %v5535_v48, %v12957_v24  ;;  %6219 = vmatprep.mubr.bf16.mxu0 %v12443_v61  ;;  %v11814_v24 = vld [vmem:[#allocation6 + $0x14ac] ss:$24 sps:$4 sm:$0xff]  }
 0x1f5   :  { %6332 = vmatprep.mubr.bf16.mxu1 %v12444_v58  ;;  %v5537_v13 = vpop.f32.mrf.mxu0  ;;  %v12447_v44 = vld [vmem:[#allocation3 + $0x24c] ss:$56 sps:$4 sm:$0xff]  }
 0x1f6   :  { %v5650_v26 = vpop.f32.mrf.mxu1  ;;  %v13053_v37 = vadd.f32 %v5648_v10, %v5536_v55  ;;  %v5538_v52 = vadd.f32 %v5537_v13, %v12960_v27  ;;  %6388 = vmatpush1.bf16.msra.mxu0 %v11797_v39  ;;  %v11809_v27 = vld [vmem:[#allocation6 + $0x11a8] ss:$24 sps:$4 sm:$0xff]   ;;  %v11818_v55 = vld [vmem:[#allocation6 + $0x1478] ss:$24 sps:$4 sm:$0xff]   ;;  %v11823_v13 = vld [vmem:[#allocation6 + $0x114c] ss:$24 sps:$4 sm:$0xff]  }
 0x1f7   :  { %6501 = vmatpush1.bf16.msra.mxu1 %v11800_v45  ;;  %v5539_v3 = vpop.f32.mrf.mxu0  ;;  %6389 = vmatprep.subr.bf16.mxu0 %v11805_v28  ;;  %v12448_v45 = vld [vmem:[#allocation3 + $0x254] ss:$56 sps:$4 sm:$0xff]  }
 0x1f8   :  { %v5652_v23 = vpop.f32.mrf.mxu1  ;;  %6502 = vmatprep.subr.bf16.mxu1 %v11808_v12  ;;  %v13056_v38 = vadd.f32 %v5650_v26, %v5538_v52  ;;  %v5540_v17 = vadd.f32 %v5539_v3, %v12963_v36  ;;  %v11820_v36 = vld [vmem:[#allocation6 + $0x147c] ss:$24 sps:$4 sm:$0xff]   ;;  %v12449_v3 = vld [vmem:[#allocation3 + $0x248] ss:$56 sps:$4 sm:$0xff]  }
 0x1f9   :  { %v5543_v20 = vpop.f32.mrf.mxu0  ;;  %6220 = vmatmul.mubr.bf16.gmra.mxu0 %v12445_v30  ;;  %v11829_v30 = vld [vmem:[#allocation6 + $0x111c] ss:$24 sps:$4 sm:$0xff]  }
 0x1fa   :  { %v5656_v16 = vpop.f32.mrf.mxu1  ;;  %6333 = vmatmul.mubr.bf16.gmra.mxu1 %v12446_v50  ;;  %v13059_v53 = vadd.f32 %v5652_v23, %v5540_v17  ;;  %v5544_v0 = vadd.f32 %v5543_v20, %v12966_v51  ;;  %6390 = vmatpush2.bf16.msra.mxu0 %v11803_v2  ;;  %v11815_v51 = vld [vmem:[#allocation6 + $0x1178] ss:$24 sps:$4 sm:$0xff]   ;;  %v11824_v17 = vld [vmem:[#allocation6 + $0x1448] ss:$24 sps:$4 sm:$0xff]  }
 0x1fb   :  { %6503 = vmatpush2.bf16.msra.mxu1 %v11806_v6  ;;  %v5545_v25 = vpop.f32.mrf.mxu0  ;;  %6391 = vmatprep.subr.bf16.mxu0 %v11811_v42  ;;  %v12450_v23 = vld [vmem:[#allocation3 + $0x250] ss:$56 sps:$4 sm:$0xff]  }
 0x1fc   :  { %v5658_v40 = vpop.f32.mrf.mxu1  ;;  %6504 = vmatprep.subr.bf16.mxu1 %v11814_v24  ;;  %v13062_v1 = vadd.f32 %v5656_v16, %v5544_v0  ;;  %v5546_v39 = vadd.f32 %v5545_v25, %v12969_v49  ;;  %6229 = vmatprep.mubr.bf16.mxu0 %v12447_v44  ;;  %v11826_v49 = vld [vmem:[#allocation6 + $0x144c] ss:$24 sps:$4 sm:$0xff]   ;;  %v12451_v0 = vld [vmem:[#allocation3 + $0x2bc] ss:$56 sps:$4 sm:$0xff]  }
 0x1fd   :  { %6342 = vmatprep.mubr.bf16.mxu1 %v12448_v45  ;;  %v5547_v48 = vpop.f32.mrf.mxu0 }
 0x1fe   :  { %v5660_v10 = vpop.f32.mrf.mxu1  ;;  %v13065_v28 = vadd.f32 %v5658_v40, %v5546_v39  ;;  %v5548_v12 = vadd.f32 %v5547_v48, %v12972_v11  ;;  %6392 = vmatpush2.bf16.msra.mxu0 %v11809_v27  ;;  %v11821_v11 = vld [vmem:[#allocation6 + $0x1148] ss:$24 sps:$4 sm:$0xff]   ;;  %v11830_v39 = vld [vmem:[#allocation6 + $0x1418] ss:$24 sps:$4 sm:$0xff]   ;;  %v11835_v48 = vld [vmem:[#allocation6 + $0x10ec] ss:$24 sps:$4 sm:$0xff]  }
 0x1ff   :  { %6505 = vmatpush2.bf16.msra.mxu1 %v11812_v32  ;;  %v5549_v61 = vpop.f32.mrf.mxu0  ;;  %6393 = vmatprep.subr.bf16.mxu0 %v11817_v60  ;;  %v12452_v32 = vld [vmem:[#allocation3 + $0x2c4] ss:$56 sps:$4 sm:$0xff]  }
 0x200   :  { %v5662_v58 = vpop.f32.mrf.mxu1  ;;  %6506 = vmatprep.subr.bf16.mxu1 %v11820_v36  ;;  %v13068_v26 = vadd.f32 %v5660_v10, %v5548_v12  ;;  %v5550_v2 = vadd.f32 %v5549_v61, %v12975_v63  ;;  %v11832_v63 = vld [vmem:[#allocation6 + $0x141c] ss:$24 sps:$4 sm:$0xff]   ;;  %v12453_v61 = vld [vmem:[#allocation3 + $0x2b8] ss:$56 sps:$4 sm:$0xff]  }
 0x201   :  { %v5553_v52 = vpop.f32.mrf.mxu0  ;;  %6230 = vmatmul.mubr.bf16.gmra.mxu0 %v12449_v3  ;;  %v11841_v3 = vld [vmem:[#allocation6 + $0x10bc] ss:$24 sps:$4 sm:$0xff]  }
 0x202   :  { %v5666_v6 = vpop.f32.mrf.mxu1  ;;  %6343 = vmatmul.mubr.bf16.gmra.mxu1 %v12450_v23  ;;  %v13071_v42 = vadd.f32 %v5662_v58, %v5550_v2  ;;  %v5554_v24 = vadd.f32 %v5553_v52, %v12978_v35  ;;  %6394 = vmatpush2.bf16.msra.mxu0 %v11815_v51  ;;  %v11827_v35 = vld [vmem:[#allocation6 + $0x1118] ss:$24 sps:$4 sm:$0xff]   ;;  %v11836_v2 = vld [vmem:[#allocation6 + $0x13e8] ss:$24 sps:$4 sm:$0xff]  }
 0x203   :  { %6507 = vmatpush2.bf16.msra.mxu1 %v11818_v55  ;;  %v5555_v20 = vpop.f32.mrf.mxu0  ;;  %6395 = vmatprep.subr.bf16.mxu0 %v11823_v13  ;;  %v12454_v58 = vld [vmem:[#allocation3 + $0x2c0] ss:$56 sps:$4 sm:$0xff]  }
 0x204   :  { %v5668_v16 = vpop.f32.mrf.mxu1  ;;  %6508 = vmatprep.subr.bf16.mxu1 %v11826_v49  ;;  %v13074_v50 = vadd.f32 %v5666_v6, %v5554_v24  ;;  %v5556_v27 = vadd.f32 %v5555_v20, %v12981_v14  ;;  %6239 = vmatprep.mubr.bf16.mxu0 %v12451_v0  ;;  %v11838_v14 = vld [vmem:[#allocation6 + $0x13ec] ss:$24 sps:$4 sm:$0xff]   ;;  %v7683_v0 = vlaneseq }
 0x205   :  { %6352 = vmatprep.mubr.bf16.mxu1 %v12452_v32  ;;  %v5557_v25 = vpop.f32.mrf.mxu0  ;;  %v12455_v24 = vld [vmem:[#allocation3 + $0x32c] ss:$56 sps:$4 sm:$0xff]  }
 0x206   :  { %v5670_v40 = vpop.f32.mrf.mxu1  ;;  %v13077_v60 = vadd.f32 %v5668_v16, %v5556_v27  ;;  %v5558_v36 = vadd.f32 %v5557_v25, %v12984_v62  ;;  %6396 = vmatpush2.bf16.msra.mxu0 %v11821_v11  ;;  %v11833_v62 = vld [vmem:[#allocation6 + $0x10e8] ss:$24 sps:$4 sm:$0xff]   ;;  %v11842_v27 = vld [vmem:[#allocation6 + $0x13b8] ss:$24 sps:$4 sm:$0xff]  }
 0x207   :  { %6509 = vmatpush2.bf16.msra.mxu1 %v11824_v17  ;;  %v5559_v44 = vpop.f32.mrf.mxu0  ;;  %6397 = vmatprep.subr.bf16.mxu0 %v11829_v30  ;;  %v12456_v17 = vld [vmem:[#allocation3 + $0x334] ss:$56 sps:$4 sm:$0xff]  }
 0x208   :  { %v5672_v45 = vpop.f32.mrf.mxu1  ;;  %6510 = vmatprep.subr.bf16.mxu1 %v11832_v63  ;;  %v13080_v10 = vadd.f32 %v5670_v40, %v5558_v36  ;;  %v5560_v51 = vadd.f32 %v5559_v44, %v12987_v5  ;;  %v11844_v5 = vld [vmem:[#allocation6 + $0x13bc] ss:$24 sps:$4 sm:$0xff]   ;;  %v11850_v40 = vld [vmem:[#allocation6 + $0x138c] ss:$24 sps:$4 sm:$0xff]  }
 0x209   :  { %v5563_v12 = vpop.f32.mrf.mxu0  ;;  %6240 = vmatmul.mubr.bf16.gmra.mxu0 %v12453_v61 }
 0x20a   :  { %v5676_v55 = vpop.f32.mrf.mxu1  ;;  %6353 = vmatmul.mubr.bf16.gmra.mxu1 %v12454_v58  ;;  %v13083_v13 = vadd.f32 %v5672_v45, %v5560_v51  ;;  %v5564_v49 = vadd.f32 %v5563_v12, %v12990_v21  ;;  %6398 = vmatpush2.bf16.msra.mxu0 %v11827_v35  ;;  %v11839_v21 = vld [vmem:[#allocation6 + $0x10b8] ss:$24 sps:$4 sm:$0xff]   ;;  %v12457_v45 = vld [vmem:[#allocation3 + $0x328] ss:$56 sps:$4 sm:$0xff]  }
 0x20b   :  { %6511 = vmatpush2.bf16.msra.mxu1 %v11830_v39  ;;  %v5565_v52 = vpop.f32.mrf.mxu0  ;;  %6399 = vmatprep.subr.bf16.mxu0 %v11835_v48  ;;  %v12458_v48 = vld [vmem:[#allocation3 + $0x330] ss:$56 sps:$4 sm:$0xff]  }
 0x20c   :  { %v5678_v6 = vpop.f32.mrf.mxu1  ;;  %6512 = vmatprep.subr.bf16.mxu1 %v11838_v14  ;;  %v13086_v23 = vadd.f32 %v5676_v55, %v5564_v49  ;;  %v5566_v11 = vadd.f32 %v5565_v52, %v12993_v34  ;;  %6249 = vmatprep.mubr.bf16.mxu0 %v12455_v24  ;;  %v11847_v34 = vld [vmem:[#allocation6 + $0x108c] ss:$24 sps:$4 sm:$0xff]   ;;  %v11848_v12 = vld [vmem:[#allocation6 + $0x1388] ss:$24 sps:$4 sm:$0xff]   ;;  %v13098_v55 = vshrl.u32 %v7683_v0, 7 }
 0x20d   :  { %6362 = vmatprep.mubr.bf16.mxu1 %v12456_v17  ;;  %v5567_v20 = vpop.f32.mrf.mxu0  ;;  %v12459_v52 = vld [vmem:[#allocation3 + $0x2c] ss:$56 sps:$4 sm:$0xff]  }
 0x20e   :  { %v5680_v16 = vpop.f32.mrf.mxu1  ;;  %v13089_v30 = vadd.f32 %v5678_v6, %v5566_v11  ;;  %v5568_v63 = vadd.f32 %v5567_v20, %v12996_v46  ;;  %6400 = vmatpush2.bf16.msra.mxu0 %v11833_v62  ;;  %v11845_v46 = vld [vmem:[#allocation6 + $0x1088] ss:$24 sps:$4 sm:$0xff]   ;;  %14414 = vst [vmem:[#allocation21_spill] sm:$0xff] %v13098_v55  ;;  %v11856_v62 = vld [vmem:[#allocation6 + $0x464] ss:$24 sps:$4 sm:$0xff]   ;;  %v14394_v20 = vsub.s32 0, %v13098_v55 }
 0x20f   :  { %6513 = vmatpush2.bf16.msra.mxu1 %v11836_v2  ;;  %v5569_v32 = vpop.f32.mrf.mxu0  ;;  %6401 = vmatprep.subr.bf16.mxu0 %v11841_v3  ;;  %v12460_v6 = vld [vmem:[#allocation3 + $0x34] ss:$56 sps:$4 sm:$0xff]   ;;  %v11851_v11 = vld [vmem:[#allocation6 + $0x160] ss:$24 sps:$4 sm:$0xff]  }
 0x210   :  { %v5682_v25 = vpop.f32.mrf.mxu1  ;;  %6514 = vmatprep.subr.bf16.mxu1 %v11844_v5  ;;  %v13092_v35 = vadd.f32 %v5680_v16, %v5568_v63  ;;  %v5570_v36 = vadd.f32 %v5569_v32, %v12999_v47  ;;  %v11853_v47 = vld [vmem:[#allocation6 + $0x164] ss:$24 sps:$4 sm:$0xff]   ;;  %v11854_v16 = vld [vmem:[#allocation6 + $0x460] ss:$24 sps:$4 sm:$0xff]  }
 0x211   :  { %v5573_v39 = vpop.f32.mrf.mxu0  ;;  %6250 = vmatmul.mubr.bf16.gmra.mxu0 %v12457_v45  ;;  %v7681_v5 = vld [vmem:[#allocation8] sm:$0x3f] }
 0x212   :  { %v5686_v44 = vpop.f32.mrf.mxu1  ;;  %6363 = vmatmul.mubr.bf16.gmra.mxu1 %v12458_v48  ;;  %v13095_v14 = vadd.f32 %v5682_v25, %v5570_v36  ;;  %v5574_v51 = vadd.f32 %v5573_v39, %v13002_v9  ;;  %6402 = vmatpush2.bf16.msra.mxu0 %v11839_v21  ;;  %v14395_v25 = vsub.s32 1, %v13098_v55  ;;  %v12462_v36 = vld [vmem:[#allocation3 + $0x30] ss:$56 sps:$4 sm:$0xff]   ;;  %v13118_v48 = vrot.slane %v7681_v5, %v14394_v20 }
 0x213   :  { %6515 = vmatpush2.bf16.msra.mxu1 %v11842_v27  ;;  %v5575_v61 = vpop.f32.mrf.mxu0  ;;  %6403 = vmatprep.subr.bf16.mxu0 %v11847_v34  ;;  %v11862_v27 = vld [vmem:[#allocation6 + $0x434] ss:$24 sps:$4 sm:$0xff]   ;;  %v11857_v39 = vld [vmem:[#allocation6 + $0x130] ss:$24 sps:$4 sm:$0xff]  }
 0x214   :  { %v5688_v58 = vpop.f32.mrf.mxu1  ;;  %6516 = vmatprep.subr.bf16.mxu1 %v11850_v40  ;;  %v13100_v49 = vadd.f32 %v5686_v44, %v5574_v51  ;;  %v5576_v2 = vadd.f32 %v5575_v61, %v13005_v59  ;;  %6405 = vmatprep.mubr.bf16.mxu0 %v12459_v52  ;;  %v11859_v59 = vld [vmem:[#allocation6 + $0x134] ss:$24 sps:$4 sm:$0xff]   ;;  %v11868_v61 = vld [vmem:[#allocation6 + $0x404] ss:$24 sps:$4 sm:$0xff]  }
 0x215   :  { %6518 = vmatprep.mubr.bf16.mxu1 %v12460_v6  ;;  %v5577_v9 = vpop.f32.mrf.mxu0  ;;  %v11863_v6 = vld [vmem:[#allocation6 + $0x100] ss:$24 sps:$4 sm:$0xff]  }
 0x216   :  { %v5690_v3 = vpop.f32.mrf.mxu1  ;;  %v13103_v24 = vadd.f32 %v5688_v58, %v5576_v2  ;;  %v5578_v17 = vadd.f32 %v5577_v9, %v13008_v33  ;;  %6404 = vmatpush2.bf16.msra.mxu0 %v11845_v46  ;;  %v12461_v33 = vld [vmem:[#allocation3 + $0x28] ss:$56 sps:$4 sm:$0xff]  }
 0x217   :  { %6517 = vmatpush2.bf16.msra.mxu1 %v11848_v12  ;;  %v5579_v21 = vpop.f32.mrf.mxu0  ;;  %6599 = vmatprep.subr.bf16.mxu0 %v11853_v47  ;;  %v11865_v12 = vld [vmem:[#allocation6 + $0x104] ss:$24 sps:$4 sm:$0xff]   ;;  %v13125_v47 = vrot.slane %v7681_v5, %v14395_v25  ;;  %v11871_v5 = vld [vmem:[#allocation6 + $0xd4] ss:$24 sps:$4 sm:$0xff]  }
 0x218   :  { %v5692_v63 = vpop.f32.mrf.mxu1  ;;  %6712 = vmatprep.subr.bf16.mxu1 %v11856_v62  ;;  %v13107_v0 = vadd.f32 %v5690_v3, %v5578_v17  ;;  %v5580_v32 = vadd.f32 %v5579_v21, %v13011_v7  ;;  %v11860_v7 = vld [vmem:[#allocation6 + $0x430] ss:$24 sps:$4 sm:$0xff]   ;;  %v12464_v62 = vld [vmem:[#allocation3 + $0xa4] ss:$56 sps:$4 sm:$0xff]  }
 0x219   :  { %v5729_v34 = vpop.f32.mrf.mxu0  ;;  %6406 = vmatmul.mubr.bf16.vlgmr.msra.gmra.mxu0 %v12461_v33  ;;  %v11869_v33 = vld [vmem:[#allocation6 + $0xd0] ss:$24 sps:$4 sm:$0xff]  }
 0x21a   :  { %v13111_v40 = vpop.f32.mrf.mxu1  ;;  %6519 = vmatmul.mubr.bf16.vlgmr.msra.gmra.mxu1 %v12462_v36  ;;  %v13113_v44 = vadd.f32 %v5692_v63, %v5580_v32  ;;  %v5730_v45 = vadd.f32 %v5729_v34, %v13014_v56  ;;  %6600 = vmatpush1.bf16.msra.mxu0 %v11851_v11  ;;  %v12463_v56 = vld [vmem:[#allocation3 + $0x9c] ss:$56 sps:$4 sm:$0xff]   ;;  %v11866_v11 = vld [vmem:[#allocation6 + $0x400] ss:$24 sps:$4 sm:$0xff]  }
 0x21b   :  { %6713 = vmatpush1.bf16.msra.mxu1 %v11854_v16  ;;  %v5731_v46 = vpop.f32.mrf.mxu0  ;;  %6601 = vmatprep.subr.bf16.mxu0 %v11859_v59  ;;  %v11874_v16 = vld [vmem:[#allocation6 + $0x3d4] ss:$24 sps:$4 sm:$0xff]   ;;  %v12466_v34 = vld [vmem:[#allocation3 + $0xa0] ss:$56 sps:$4 sm:$0xff]  }
 0x21c   :  { %v13120_v51 = vpop.f32.mrf.mxu1  ;;  %6714 = vmatprep.subr.bf16.mxu1 %v11862_v27  ;;  %v5732_v58 = vadd.f32 %v5731_v46, %v13017_v19  ;;  %6415 = vmatprep.mubr.bf16.mxu0 %v12463_v56  ;;  %v7713_v9 = vadd.f32 %v13118_v48, %v5730_v45  ;;  %v11872_v46 = vld [vmem:[#allocation6 + $0x3d0] ss:$24 sps:$4 sm:$0xff]  }
 0x21d   :  { %6528 = vmatprep.mubr.bf16.mxu1 %v12464_v62  ;;  %v5733_v2 = vpop.f32.mrf.mxu0 }
 0x21e   :  { %v13127_v52 = vpop.f32.mrf.mxu1  ;;  %v5734_v3 = vadd.f32 %v5733_v2, %v13020_v18  ;;  %6602 = vmatpush1.bf16.msra.mxu0 %v11857_v39  ;;  %v7714_v21 = vadd.f32 %v13125_v47, %v5732_v58  ;;  %v12465_v18 = vld [vmem:[#allocation3 + $0x98] ss:$56 sps:$4 sm:$0xff]   ;;  %v7809_v36 = vmax.f32 %v7713_v9, 0.0  ;;  %v11880_v58 = vld [vmem:[#allocation6 + $0x3a4] ss:$24 sps:$4 sm:$0xff]  }
 0x21f   :  { %6715 = vmatpush1.bf16.msra.mxu1 %v11860_v7  ;;  %v5735_v19 = vpop.f32.mrf.mxu0  ;;  %6603 = vmatprep.subr.bf16.mxu0 %v11865_v12 }
 0x220   :  { %v13131_v17 = vpop.f32.mrf.mxu1  ;;  %6716 = vmatprep.subr.bf16.mxu1 %v11868_v61  ;;  %v7719_v63 = vadd.f32 %v13118_v48, %v5734_v3  ;;  %v5736_v59 = vadd.f32 %v5735_v19, %v13023_v31  ;;  %v11877_v31 = vld [vmem:[#allocation6 + $0xa4] ss:$24 sps:$4 sm:$0xff]   ;;  %v7810_v56 = vmax.f32 %v7714_v21, 0.0  ;;  %v12468_v19 = vld [vmem:[#allocation3 + $0x114] ss:$56 sps:$4 sm:$0xff]  }
 0x221   :  { %v5739_v27 = vpop.f32.mrf.mxu0  ;;  %6416 = vmatmul.mubr.bf16.gmra.mxu0 %v12465_v18  ;;  %v12467_v3 = vld [vmem:[#allocation3 + $0x10c] ss:$56 sps:$4 sm:$0xff]  }
 0x222   :  { %v13136_v32 = vpop.f32.mrf.mxu1  ;;  %6529 = vmatmul.mubr.bf16.gmra.mxu1 %v12466_v34  ;;  %v7815_v39 = vmax.f32 %v7719_v63, 0.0  ;;  %v7720_v45 = vadd.f32 %v13125_v47, %v5736_v59  ;;  %v5740_v7 = vadd.f32 %v5739_v27, %v13026_v41  ;;  %6604 = vmatpush1.bf16.msra.mxu0 %v11863_v6  ;;  %v11886_v18 = vld [vmem:[#allocation6 + $0x374] ss:$24 sps:$4 sm:$0xff]  }
 0x223   :  { %6717 = vmatpush1.bf16.msra.mxu1 %v11866_v11  ;;  %v5741_v12 = vpop.f32.mrf.mxu0  ;;  %6605 = vmatprep.subr.bf16.mxu0 %v11871_v5  ;;  %v11875_v11 = vld [vmem:[#allocation6 + $0xa0] ss:$24 sps:$4 sm:$0xff]  }
 0x224   :  { %v13140_v61 = vpop.f32.mrf.mxu1  ;;  %6718 = vmatprep.subr.bf16.mxu1 %v11874_v16  ;;  %v13142_v62 = vpack.c.bf16 %v7815_v39, %v7809_v36  ;;  %v7816_v2 = vmax.f32 %v7720_v45, 0.0  ;;  %v5742_v9 = vadd.f32 %v5741_v12, %v13029_v43  ;;  %6425 = vmatprep.mubr.bf16.mxu0 %v12467_v3  ;;  %v7725_v63 = vadd.f32 %v13118_v48, %v5740_v7  ;;  %v11878_v16 = vld [vmem:[#allocation6 + $0x3a0] ss:$24 sps:$4 sm:$0xff]   ;;  %v11883_v43 = vld [vmem:[#allocation6 + $0x74] ss:$24 sps:$4 sm:$0xff]  }
 0x225   :  { %6538 = vmatprep.mubr.bf16.mxu1 %v12468_v19  ;;  %v5743_v41 = vpop.f32.mrf.mxu0  ;;  %v12470_v7 = vld [vmem:[#allocation3 + $0x110] ss:$56 sps:$4 sm:$0xff]   ;;  %v11892_v19 = vld [vmem:[#allocation6 + $0x344] ss:$24 sps:$4 sm:$0xff]  }
 0x226   :  { %v13145_v6 = vpop.f32.mrf.mxu1  ;;  %v5744_v5 = vadd.f32 %v5743_v41, %v13032_v4  ;;  %6606 = vmatpush1.bf16.msra.mxu0 %v11869_v33  ;;  %v13149_v21 = vpack.c.bf16 %v7816_v2, %v7810_v56  ;;  %v7726_v34 = vadd.f32 %v13125_v47, %v5742_v9  ;;  %v12469_v33 = vld [vmem:[#allocation3 + $0x108] ss:$56 sps:$4 sm:$0xff]   ;;  %v7821_v12 = vmax.f32 %v7725_v63, 0.0 }
 0x227   :  { %6719 = vmatpush1.bf16.msra.mxu1 %v11872_v46  ;;  %v5745_v59 = vpop.f32.mrf.mxu0  ;;  %6607 = vmatprep.subr.bf16.mxu0 %v11877_v31  ;;  %v11881_v46 = vld [vmem:[#allocation6 + $0x70] ss:$24 sps:$4 sm:$0xff]  }
 0x228   :  { %v13151_v27 = vpop.f32.mrf.mxu1  ;;  %6720 = vmatprep.subr.bf16.mxu1 %v11880_v58  ;;  %v7731_v36 = vadd.f32 %v13118_v48, %v5744_v5  ;;  %v5746_v39 = vadd.f32 %v5745_v59, %v13035_v57  ;;  %v11884_v2 = vld [vmem:[#allocation6 + $0x370] ss:$24 sps:$4 sm:$0xff]   ;;  %v11889_v57 = vld [vmem:[#allocation6 + $0x44] ss:$24 sps:$4 sm:$0xff]   ;;  %v7822_v41 = vmax.f32 %v7726_v34, 0.0 }
 0x229   :  { %v5749_v45 = vpop.f32.mrf.mxu0  ;;  %6426 = vmatmul.mubr.bf16.gmra.mxu0 %v12469_v33 }
 0x22a   :  { %v13156_v4 = vpop.f32.mrf.mxu1  ;;  %6539 = vmatmul.mubr.bf16.gmra.mxu1 %v12470_v7  ;;  %v7827_v56 = vmax.f32 %v7731_v36, 0.0  ;;  %v7732_v31 = vadd.f32 %v13125_v47, %v5746_v39  ;;  %v5750_v58 = vadd.f32 %v5749_v45, %v13038_v29  ;;  %6608 = vmatpush1.bf16.msra.mxu0 %v11875_v11  ;;  %v12471_v36 = vld [vmem:[#allocation3 + $0x17c] ss:$56 sps:$4 sm:$0xff]  }
 0x22b   :  { %6721 = vmatpush1.bf16.msra.mxu1 %v11878_v16  ;;  %v5751_v9 = vpop.f32.mrf.mxu0  ;;  %6609 = vmatprep.subr.bf16.mxu0 %v11883_v43  ;;  %v12472_v39 = vld [vmem:[#allocation3 + $0x184] ss:$56 sps:$4 sm:$0xff]   ;;  %v11887_v16 = vld [vmem:[#allocation6 + $0x40] ss:$24 sps:$4 sm:$0xff]  }
 0x22c   :  { %v13160_v3 = vpop.f32.mrf.mxu1  ;;  %6722 = vmatprep.subr.bf16.mxu1 %v11886_v18  ;;  %v13162_v5 = vpack.c.bf16 %v7827_v56, %v7821_v12  ;;  %v7828_v59 = vmax.f32 %v7732_v31, 0.0  ;;  %v5752_v63 = vadd.f32 %v5751_v9, %v13041_v8  ;;  %6435 = vmatprep.mubr.bf16.mxu0 %v12471_v36  ;;  %v7737_v45 = vadd.f32 %v13118_v48, %v5750_v58  ;;  %v11890_v18 = vld [vmem:[#allocation6 + $0x340] ss:$24 sps:$4 sm:$0xff]   ;;  %v11895_v8 = vld [vmem:[#allocation6 + $0x14] ss:$24 sps:$4 sm:$0xff]  }
 0x22d   :  { %6548 = vmatprep.mubr.bf16.mxu1 %v12472_v39  ;;  %v5753_v29 = vpop.f32.mrf.mxu0  ;;  %v11898_v12 = vld [vmem:[#allocation6 + $0x314] ss:$24 sps:$4 sm:$0xff]  }
 0x22e   :  { %v13165_v11 = vpop.f32.mrf.mxu1  ;;  %v5754_v43 = vadd.f32 %v5753_v29, %v13044_v54  ;;  %6610 = vmatpush1.bf16.msra.mxu0 %v11881_v46  ;;  %v13169_v34 = vpack.c.bf16 %v7828_v59, %v7822_v41  ;;  %v7738_v56 = vadd.f32 %v13125_v47, %v5752_v63  ;;  %v12473_v46 = vld [vmem:[#allocation3 + $0x178] ss:$56 sps:$4 sm:$0xff]   ;;  %v7833_v59 = vmax.f32 %v7737_v45, 0.0 }
 0x22f   :  { %6723 = vmatpush1.bf16.msra.mxu1 %v11884_v2  ;;  %v5755_v33 = vpop.f32.mrf.mxu0  ;;  %6611 = vmatprep.subr.bf16.mxu0 %v11889_v57  ;;  %v12474_v2 = vld [vmem:[#allocation3 + $0x180] ss:$56 sps:$4 sm:$0xff]   ;;  %v11893_v41 = vld [vmem:[#allocation6 + $0x10] ss:$24 sps:$4 sm:$0xff]  }
 0x230   :  { %v13171_v7 = vpop.f32.mrf.mxu1  ;;  %6724 = vmatprep.subr.bf16.mxu1 %v11892_v19  ;;  %v7743_v31 = vadd.f32 %v13118_v48, %v5754_v43  ;;  %v5756_v58 = vadd.f32 %v5755_v33, %v13047_v22  ;;  %v11896_v63 = vld [vmem:[#allocation6 + $0x310] ss:$24 sps:$4 sm:$0xff]   ;;  %v11901_v22 = vld [vmem:[#allocation6 + $0x2e4] ss:$24 sps:$4 sm:$0xff]   ;;  %v7834_v33 = vmax.f32 %v7738_v56, 0.0 }
 0x231   :  { %v5759_v9 = vpop.f32.mrf.mxu0  ;;  %6436 = vmatmul.mubr.bf16.gmra.mxu0 %v12473_v46  ;;  %v11904_v43 = vld [vmem:[#allocation6 + $0x5e4] ss:$24 sps:$4 sm:$0xff]   ;;  %v11907_v56 = vld [vmem:[#allocation6 + $0x2b4] ss:$24 sps:$4 sm:$0xff]  }
 0x232   :  { %v13176_v54 = vpop.f32.mrf.mxu1  ;;  %6549 = vmatmul.mubr.bf16.gmra.mxu1 %v12474_v2  ;;  %v7839_v36 = vmax.f32 %v7743_v31, 0.0  ;;  %v7744_v57 = vadd.f32 %v13125_v47, %v5756_v58  ;;  %v5760_v19 = vadd.f32 %v5759_v9, %v13050_v15  ;;  %6612 = vmatpush1.bf16.msra.mxu0 %v11887_v16  ;;  %v12475_v31 = vld [vmem:[#allocation3 + $0x1ec] ss:$56 sps:$4 sm:$0xff]   ;;  %v11899_v15 = vld [vmem:[#allocation6 + $0x2e0] ss:$24 sps:$4 sm:$0xff]  }
 0x233   :  { %6725 = vmatpush1.bf16.msra.mxu1 %v11890_v18  ;;  %v5761_v39 = vpop.f32.mrf.mxu0  ;;  %6613 = vmatprep.subr.bf16.mxu0 %v11895_v8  ;;  %v12476_v58 = vld [vmem:[#allocation3 + $0x1f4] ss:$56 sps:$4 sm:$0xff]   ;;  %v11902_v9 = vld [vmem:[#allocation6 + $0x5e0] ss:$24 sps:$4 sm:$0xff]  }
 0x234   :  { %v13180_v29 = vpop.f32.mrf.mxu1  ;;  %6726 = vmatprep.subr.bf16.mxu1 %v11898_v12  ;;  %v13182_v46 = vpack.c.bf16 %v7839_v36, %v7833_v59  ;;  %v7840_v2 = vmax.f32 %v7744_v57, 0.0  ;;  %v5762_v45 = vadd.f32 %v5761_v39, %v13053_v37  ;;  %6445 = vmatprep.mubr.bf16.mxu0 %v12475_v31  ;;  %v7749_v8 = vadd.f32 %v13118_v48, %v5760_v19  ;;  %v11910_v57 = vld [vmem:[#allocation6 + $0x5b4] ss:$24 sps:$4 sm:$0xff]   ;;  %v11905_v19 = vld [vmem:[#allocation6 + $0x2b0] ss:$24 sps:$4 sm:$0xff]  }
 0x235   :  { %6558 = vmatprep.mubr.bf16.mxu1 %v12476_v58  ;;  %v5763_v16 = vpop.f32.mrf.mxu0 }
 0x236   :  { %14415 = vst [vmem:[#allocation22_spill] sm:$0xff] %v13182_v46  ;;  %v13185_v18 = vpop.f32.mrf.mxu1  ;;  %v5764_v12 = vadd.f32 %v5763_v16, %v13056_v38  ;;  %6614 = vmatpush1.bf16.msra.mxu0 %v11893_v41  ;;  %v13189_v59 = vpack.c.bf16 %v7840_v2, %v7834_v33  ;;  %v7750_v39 = vadd.f32 %v13125_v47, %v5762_v45  ;;  %v12477_v41 = vld [vmem:[#allocation3 + $0x1e8] ss:$56 sps:$4 sm:$0xff]   ;;  %v7845_v2 = vmax.f32 %v7749_v8, 0.0 }
 0x237   :  { %6727 = vmatpush1.bf16.msra.mxu1 %v11896_v63  ;;  %v5765_v36 = vpop.f32.mrf.mxu0  ;;  %6615 = vmatprep.subr.bf16.mxu0 %v11901_v22  ;;  %v12478_v63 = vld [vmem:[#allocation3 + $0x1f0] ss:$56 sps:$4 sm:$0xff]  }
 0x238   :  { %v13191_v37 = vpop.f32.mrf.mxu1  ;;  %6728 = vmatprep.subr.bf16.mxu1 %v11904_v43  ;;  %v7755_v31 = vadd.f32 %v13118_v48, %v5764_v12  ;;  %v5766_v58 = vadd.f32 %v5765_v36, %v13059_v53  ;;  %v11908_v33 = vld [vmem:[#allocation6 + $0x5b0] ss:$24 sps:$4 sm:$0xff]   ;;  %v11913_v53 = vld [vmem:[#allocation6 + $0x284] ss:$24 sps:$4 sm:$0xff]   ;;  %v7846_v25 = vmax.f32 %v7750_v39, 0.0 }
 0x239   :  { %v5769_v20 = vpop.f32.mrf.mxu0  ;;  %6446 = vmatmul.mubr.bf16.gmra.mxu0 %v12477_v41  ;;  %v11916_v36 = vld [vmem:[#allocation6 + $0x584] ss:$24 sps:$4 sm:$0xff]  }
 0x23a   :  { %v13196_v38 = vpop.f32.mrf.mxu1  ;;  %6559 = vmatmul.mubr.bf16.gmra.mxu1 %v12478_v63  ;;  %v7851_v16 = vmax.f32 %v7755_v31, 0.0  ;;  %v7756_v22 = vadd.f32 %v13125_v47, %v5766_v58  ;;  %v5770_v43 = vadd.f32 %v5769_v20, %v13062_v1  ;;  %6616 = vmatpush2.bf16.msra.mxu0 %v11899_v15  ;;  %v12479_v31 = vld [vmem:[#allocation3 + $0x25c] ss:$56 sps:$4 sm:$0xff]   ;;  %v11911_v1 = vld [vmem:[#allocation6 + $0x280] ss:$24 sps:$4 sm:$0xff]  }
 0x23b   :  { %6729 = vmatpush2.bf16.msra.mxu1 %v11902_v9  ;;  %v5771_v45 = vpop.f32.mrf.mxu0  ;;  %6617 = vmatprep.subr.bf16.mxu0 %v11907_v56  ;;  %v12480_v58 = vld [vmem:[#allocation3 + $0x264] ss:$56 sps:$4 sm:$0xff]   ;;  %v11914_v20 = vld [vmem:[#allocation6 + $0x580] ss:$24 sps:$4 sm:$0xff]  }
 0x23c   :  { %v13200_v12 = vpop.f32.mrf.mxu1  ;;  %6730 = vmatprep.subr.bf16.mxu1 %v11910_v57  ;;  %v13202_v41 = vpack.c.bf16 %v7851_v16, %v7845_v2  ;;  %v7852_v63 = vmax.f32 %v7756_v22, 0.0  ;;  %v5772_v8 = vadd.f32 %v5771_v45, %v13065_v28  ;;  %6455 = vmatprep.mubr.bf16.mxu0 %v12479_v31  ;;  %v7761_v56 = vadd.f32 %v13118_v48, %v5770_v43  ;;  %v11919_v28 = vld [vmem:[#allocation6 + $0x254] ss:$24 sps:$4 sm:$0xff]   ;;  %v11917_v43 = vld [vmem:[#allocation6 + $0x250] ss:$24 sps:$4 sm:$0xff]  }
 0x23d   :  { %6568 = vmatprep.mubr.bf16.mxu1 %v12480_v58  ;;  %v5773_v15 = vpop.f32.mrf.mxu0  ;;  %v11922_v22 = vld [vmem:[#allocation6 + $0x554] ss:$24 sps:$4 sm:$0xff]  }
 0x23e   :  { %14416 = vst [vmem:[#allocation23_spill] sm:$0xff] %v13202_v41  ;;  %v13205_v9 = vpop.f32.mrf.mxu1  ;;  %v5774_v57 = vadd.f32 %v5773_v15, %v13068_v26  ;;  %6618 = vmatpush2.bf16.msra.mxu0 %v11905_v19  ;;  %v13209_v39 = vpack.c.bf16 %v7852_v63, %v7846_v25  ;;  %v7762_v45 = vadd.f32 %v13125_v47, %v5772_v8  ;;  %v11920_v41 = vld [vmem:[#allocation6 + $0x550] ss:$24 sps:$4 sm:$0xff]   ;;  %v7857_v63 = vmax.f32 %v7761_v56, 0.0 }
 0x23f   :  { %6731 = vmatpush2.bf16.msra.mxu1 %v11908_v33  ;;  %v5775_v2 = vpop.f32.mrf.mxu0  ;;  %6619 = vmatprep.subr.bf16.mxu0 %v11913_v53  ;;  %v12481_v25 = vld [vmem:[#allocation3 + $0x258] ss:$56 sps:$4 sm:$0xff]  }
 0x240   :  { %14417 = vst [vmem:[#allocation24_spill] sm:$0xff] %v13209_v39  ;;  %v13211_v16 = vpop.f32.mrf.mxu1  ;;  %6732 = vmatprep.subr.bf16.mxu1 %v11916_v36  ;;  %v7767_v31 = vadd.f32 %v13118_v48, %v5774_v57  ;;  %v5776_v58 = vadd.f32 %v5775_v2, %v13071_v42  ;;  %v12482_v33 = vld [vmem:[#allocation3 + $0x260] ss:$56 sps:$4 sm:$0xff]   ;;  %v11925_v42 = vld [vmem:[#allocation6 + $0x224] ss:$24 sps:$4 sm:$0xff]   ;;  %v7858_v39 = vmax.f32 %v7762_v45, 0.0 }
 0x241   :  { %v5779_v26 = vpop.f32.mrf.mxu0  ;;  %6456 = vmatmul.mubr.bf16.gmra.mxu0 %v12481_v25  ;;  %v11928_v2 = vld [vmem:[#allocation6 + $0x524] ss:$24 sps:$4 sm:$0xff]  }
 0x242   :  { %v13216_v19 = vpop.f32.mrf.mxu1  ;;  %6569 = vmatmul.mubr.bf16.gmra.mxu1 %v12482_v33  ;;  %v7863_v53 = vmax.f32 %v7767_v31, 0.0  ;;  %v7768_v36 = vadd.f32 %v13125_v47, %v5776_v58  ;;  %v5780_v15 = vadd.f32 %v5779_v26, %v13074_v50  ;;  %6620 = vmatpush2.bf16.msra.mxu0 %v11911_v1  ;;  %v12483_v31 = vld [vmem:[#allocation3 + $0x2cc] ss:$56 sps:$4 sm:$0xff]   ;;  %v11923_v50 = vld [vmem:[#allocation6 + $0x220] ss:$24 sps:$4 sm:$0xff]  }
 0x243   :  { %6733 = vmatpush2.bf16.msra.mxu1 %v11914_v20  ;;  %v5781_v8 = vpop.f32.mrf.mxu0  ;;  %6621 = vmatprep.subr.bf16.mxu0 %v11919_v28  ;;  %v12484_v58 = vld [vmem:[#allocation3 + $0x2d4] ss:$56 sps:$4 sm:$0xff]   ;;  %v11926_v1 = vld [vmem:[#allocation6 + $0x520] ss:$24 sps:$4 sm:$0xff]  }
 0x244   :  { %v13220_v57 = vpop.f32.mrf.mxu1  ;;  %6734 = vmatprep.subr.bf16.mxu1 %v11922_v22  ;;  %v13222_v46 = vpack.c.bf16 %v7863_v53, %v7857_v63  ;;  %v7864_v25 = vmax.f32 %v7768_v36, 0.0  ;;  %v5782_v56 = vadd.f32 %v5781_v8, %v13077_v60  ;;  %6465 = vmatprep.mubr.bf16.mxu0 %v12483_v31  ;;  %v7773_v28 = vadd.f32 %v13118_v48, %v5780_v15  ;;  %v11931_v60 = vld [vmem:[#allocation6 + $0x1f4] ss:$24 sps:$4 sm:$0xff]   ;;  %v11929_v15 = vld [vmem:[#allocation6 + $0x1f0] ss:$24 sps:$4 sm:$0xff]  }
 0x245   :  { %6578 = vmatprep.mubr.bf16.mxu1 %v12484_v58  ;;  %v5783_v20 = vpop.f32.mrf.mxu0  ;;  %v11934_v53 = vld [vmem:[#allocation6 + $0x4f4] ss:$24 sps:$4 sm:$0xff]   ;;  %v11932_v58 = vld [vmem:[#allocation6 + $0x4f0] ss:$24 sps:$4 sm:$0xff]  }
 0x246   :  { %14418 = vst [vmem:[#allocation25_spill] sm:$0xff] %v13222_v46  ;;  %v13225_v26 = vpop.f32.mrf.mxu1  ;;  %v5784_v22 = vadd.f32 %v5783_v20, %v13080_v10  ;;  %6622 = vmatpush2.bf16.msra.mxu0 %v11917_v43  ;;  %v13229_v45 = vpack.c.bf16 %v7864_v25, %v7858_v39  ;;  %v7774_v36 = vadd.f32 %v13125_v47, %v5782_v56  ;;  %v12486_v39 = vld [vmem:[#allocation3 + $0x2d0] ss:$56 sps:$4 sm:$0xff]   ;;  %v7869_v25 = vmax.f32 %v7773_v28, 0.0 }
 0x247   :  { %6735 = vmatpush2.bf16.msra.mxu1 %v11920_v41  ;;  %v5785_v33 = vpop.f32.mrf.mxu0  ;;  %6623 = vmatprep.subr.bf16.mxu0 %v11925_v42  ;;  %v12485_v41 = vld [vmem:[#allocation3 + $0x2c8] ss:$56 sps:$4 sm:$0xff]  }
 0x248   :  { %14419 = vst [vmem:[#allocation26_spill] sm:$0xff] %v13229_v45  ;;  %v13231_v63 = vpop.f32.mrf.mxu1  ;;  %6736 = vmatprep.subr.bf16.mxu1 %v11928_v2  ;;  %v7779_v8 = vadd.f32 %v13118_v48, %v5784_v22  ;;  %v5786_v31 = vadd.f32 %v5785_v33, %v13083_v13  ;;  %v11937_v13 = vld [vmem:[#allocation6 + $0x1c4] ss:$24 sps:$4 sm:$0xff]   ;;  %v7870_v46 = vmax.f32 %v7774_v36, 0.0 }
 0x249   :  { %v5789_v10 = vpop.f32.mrf.mxu0  ;;  %6466 = vmatmul.mubr.bf16.gmra.mxu0 %v12485_v41  ;;  %v11940_v33 = vld [vmem:[#allocation6 + $0x4c4] ss:$24 sps:$4 sm:$0xff]  }
 0x24a   :  { %v13236_v43 = vpop.f32.mrf.mxu1  ;;  %6579 = vmatmul.mubr.bf16.gmra.mxu1 %v12486_v39  ;;  %v7875_v42 = vmax.f32 %v7779_v8, 0.0  ;;  %v7780_v2 = vadd.f32 %v13125_v47, %v5786_v31  ;;  %v5790_v20 = vadd.f32 %v5789_v10, %v13086_v23  ;;  %6624 = vmatpush2.bf16.msra.mxu0 %v11923_v50  ;;  %v12487_v8 = vld [vmem:[#allocation3 + $0x33c] ss:$56 sps:$4 sm:$0xff]   ;;  %v11935_v23 = vld [vmem:[#allocation6 + $0x1c0] ss:$24 sps:$4 sm:$0xff]  }
 0x24b   :  { %6737 = vmatpush2.bf16.msra.mxu1 %v11926_v1  ;;  %v5791_v56 = vpop.f32.mrf.mxu0  ;;  %6625 = vmatprep.subr.bf16.mxu0 %v11931_v60  ;;  %v12488_v31 = vld [vmem:[#allocation3 + $0x344] ss:$56 sps:$4 sm:$0xff]   ;;  %v11938_v50 = vld [vmem:[#allocation6 + $0x4c0] ss:$24 sps:$4 sm:$0xff]  }
 0x24c   :  { %v13240_v22 = vpop.f32.mrf.mxu1  ;;  %6738 = vmatprep.subr.bf16.mxu1 %v11934_v53  ;;  %v13242_v45 = vpack.c.bf16 %v7875_v42, %v7869_v25  ;;  %v7876_v41 = vmax.f32 %v7780_v2, 0.0  ;;  %v5792_v28 = vadd.f32 %v5791_v56, %v13089_v30  ;;  %6475 = vmatprep.mubr.bf16.mxu0 %v12487_v8  ;;  %v7785_v60 = vadd.f32 %v13118_v48, %v5790_v20  ;;  %v11943_v30 = vld [vmem:[#allocation6 + $0x194] ss:$24 sps:$4 sm:$0xff]   ;;  %v11941_v20 = vld [vmem:[#allocation6 + $0x190] ss:$24 sps:$4 sm:$0xff]  }
 0x24d   :  { %6588 = vmatprep.mubr.bf16.mxu1 %v12488_v31  ;;  %v5793_v1 = vpop.f32.mrf.mxu0  ;;  %v11946_v42 = vld [vmem:[#allocation6 + $0x494] ss:$24 sps:$4 sm:$0xff]   ;;  %v11944_v31 = vld [vmem:[#allocation6 + $0x490] ss:$24 sps:$4 sm:$0xff]  }
 0x24e   :  { %14420 = vst [vmem:[#allocation27_spill] sm:$0xff] %v13242_v45  ;;  %v13245_v10 = vpop.f32.mrf.mxu1  ;;  %v5794_v53 = vadd.f32 %v5793_v1, %v13092_v35  ;;  %6626 = vmatpush2.bf16.msra.mxu0 %v11929_v15  ;;  %v13249_v36 = vpack.c.bf16 %v7876_v41, %v7870_v46  ;;  %v7786_v2 = vadd.f32 %v13125_v47, %v5792_v28  ;;  %v12489_v46 = vld [vmem:[#allocation3 + $0x338] ss:$56 sps:$4 sm:$0xff]   ;;  %v7881_v41 = vmax.f32 %v7785_v60, 0.0 }
 0x24f   :  { %6739 = vmatpush2.bf16.msra.mxu1 %v11932_v58  ;;  %v5795_v39 = vpop.f32.mrf.mxu0  ;;  %6627 = vmatprep.subr.bf16.mxu0 %v11937_v13  ;;  %v12490_v58 = vld [vmem:[#allocation3 + $0x340] ss:$56 sps:$4 sm:$0xff]  }
 0x250   :  { %14421 = vst [vmem:[#allocation28_spill] sm:$0xff] %v13249_v36  ;;  %v13251_v25 = vpop.f32.mrf.mxu1  ;;  %6740 = vmatprep.subr.bf16.mxu1 %v11940_v33  ;;  %v7791_v56 = vadd.f32 %v13118_v48, %v5794_v53  ;;  %v5796_v8 = vadd.f32 %v5795_v39, %v13095_v14  ;;  %v11949_v14 = vld [vmem:[#allocation6 + $0x764] ss:$24 sps:$4 sm:$0xff]   ;;  %v7882_v45 = vmax.f32 %v7786_v2, 0.0 }
 0x251   :  { %v5799_v35 = vpop.f32.mrf.mxu0  ;;  %6476 = vmatmul.mubr.bf16.gmra.mxu0 %v12489_v46  ;;  %v11952_v39 = vld [vmem:[#allocation6 + $0xa64] ss:$24 sps:$4 sm:$0xff]  }
 0x252   :  { %v13256_v15 = vpop.f32.mrf.mxu1  ;;  %6589 = vmatmul.mubr.bf16.gmra.mxu1 %v12490_v58  ;;  %v7887_v13 = vmax.f32 %v7791_v56, 0.0  ;;  %v7792_v33 = vadd.f32 %v13125_v47, %v5796_v8  ;;  %v5800_v1 = vadd.f32 %v5799_v35, %v13100_v49  ;;  %6628 = vmatpush2.bf16.msra.mxu0 %v11935_v23  ;;  %v12491_v56 = vld [vmem:[#allocation3 + $0x4] ss:$56 sps:$4 sm:$0xff]   ;;  %v11947_v49 = vld [vmem:[#allocation6 + $0x760] ss:$24 sps:$4 sm:$0xff]  }
 0x253   :  { %6741 = vmatpush2.bf16.msra.mxu1 %v11938_v50  ;;  %v5801_v28 = vpop.f32.mrf.mxu0  ;;  %6629 = vmatprep.subr.bf16.mxu0 %v11943_v30  ;;  %v12492_v8 = vld [vmem:[#allocation3 + $0xc] ss:$56 sps:$4 sm:$0xff]   ;;  %v11950_v23 = vld [vmem:[#allocation6 + $0xa60] ss:$24 sps:$4 sm:$0xff]  }
 0x254   :  { %v13260_v53 = vpop.f32.mrf.mxu1  ;;  %6742 = vmatprep.subr.bf16.mxu1 %v11946_v42  ;;  %v13262_v36 = vpack.c.bf16 %v7887_v13, %v7881_v41  ;;  %v7888_v46 = vmax.f32 %v7792_v33, 0.0  ;;  %v5802_v60 = vadd.f32 %v5801_v28, %v13103_v24  ;;  %6631 = vmatprep.mubr.bf16.mxu0 %v12491_v56  ;;  %v7797_v30 = vadd.f32 %v13118_v48, %v5800_v1  ;;  %v11955_v13 = vld [vmem:[#allocation6 + $0x734] ss:$24 sps:$4 sm:$0xff]   ;;  %v11953_v1 = vld [vmem:[#allocation6 + $0x730] ss:$24 sps:$4 sm:$0xff]  }
 0x255   :  { %6744 = vmatprep.mubr.bf16.mxu1 %v12492_v8  ;;  %v5803_v50 = vpop.f32.mrf.mxu0  ;;  %v11958_v33 = vld [vmem:[#allocation6 + $0xa34] ss:$24 sps:$4 sm:$0xff]   ;;  %v11956_v8 = vld [vmem:[#allocation6 + $0xa30] ss:$24 sps:$4 sm:$0xff]  }
 0x256   :  { %14422 = vst [vmem:[#allocation29_spill] sm:$0xff] %v13262_v36  ;;  %v13265_v35 = vpop.f32.mrf.mxu1  ;;  %v5804_v42 = vadd.f32 %v5803_v50, %v13107_v0  ;;  %6630 = vmatpush2.bf16.msra.mxu0 %v11941_v20  ;;  %v13269_v2 = vpack.c.bf16 %v7888_v46, %v7882_v45  ;;  %v7798_v58 = vadd.f32 %v13125_v47, %v5802_v60  ;;  %v12494_v45 = vld [vmem:[#allocation3 + $0x8] ss:$56 sps:$4 sm:$0xff]   ;;  %v7893_v46 = vmax.f32 %v7797_v30, 0.0 }
 0x257   :  { %6743 = vmatpush2.bf16.msra.mxu1 %v11944_v31  ;;  %v5805_v24 = vpop.f32.mrf.mxu0  ;;  %6825 = vmatprep.subr.bf16.mxu0 %v11949_v14  ;;  %v12493_v31 = vld [vmem:[#allocation3] ss:$56 sps:$4 sm:$0xff]  }
 0x258   :  { %14423 = vst [vmem:[#allocation30_spill] sm:$0xff] %v13269_v2  ;;  %v13272_v41 = vpop.f32.mrf.mxu1  ;;  %6938 = vmatprep.subr.bf16.mxu1 %v11952_v39  ;;  %v7803_v28 = vadd.f32 %v13118_v48, %v5804_v42  ;;  %v5806_v56 = vadd.f32 %v5805_v24, %v13113_v44  ;;  %v7894_v39 = vmax.f32 %v7798_v58, 0.0  ;;  %v11961_v44 = vld [vmem:[#allocation6 + $0x704] ss:$24 sps:$4 sm:$0xff]  }
 0x259   :  { %v5955_v0 = vpop.f32.mrf.mxu0  ;;  %6632 = vmatmul.mubr.bf16.vlgmr.msra.gmra.mxu0 %v12493_v31  ;;  %v11964_v24 = vld [vmem:[#allocation6 + $0xa04] ss:$24 sps:$4 sm:$0xff]  }
 0x25a   :  { %v6068_v20 = vpop.f32.mrf.mxu1  ;;  %6745 = vmatmul.mubr.bf16.vlgmr.msra.gmra.mxu1 %v12494_v45  ;;  %v7899_v60 = vmax.f32 %v7803_v28, 0.0  ;;  %v7804_v50 = vadd.f32 %v13125_v47, %v5806_v56  ;;  %v5956_v14 = vadd.f32 %v5955_v0, %v13111_v40  ;;  %6826 = vmatpush1.bf16.msra.mxu0 %v11947_v49  ;;  %v12495_v28 = vld [vmem:[#allocation3 + $0x74] ss:$56 sps:$4 sm:$0xff]   ;;  %v11959_v40 = vld [vmem:[#allocation6 + $0x700] ss:$24 sps:$4 sm:$0xff]  }
 0x25b   :  { %6939 = vmatpush1.bf16.msra.mxu1 %v11950_v23  ;;  %v5957_v48 = vpop.f32.mrf.mxu0  ;;  %6827 = vmatprep.subr.bf16.mxu0 %v11955_v13  ;;  %v12496_v47 = vld [vmem:[#allocation3 + $0x7c] ss:$56 sps:$4 sm:$0xff]   ;;  %v11962_v49 = vld [vmem:[#allocation6 + $0xa00] ss:$24 sps:$4 sm:$0xff]  }
 0x25c   :  { %v6070_v42 = vpop.f32.mrf.mxu1  ;;  %6940 = vmatprep.subr.bf16.mxu1 %v11958_v33  ;;  %v13278_v36 = vpack.c.bf16 %v7899_v60, %v7893_v46  ;;  %v7900_v31 = vmax.f32 %v7804_v50, 0.0  ;;  %v13280_v2 = vadd.f32 %v6068_v20, %v5956_v14  ;;  %v5958_v30 = vadd.f32 %v5957_v48, %v13120_v51  ;;  %6641 = vmatprep.mubr.bf16.mxu0 %v12495_v28  ;;  %v11967_v51 = vld [vmem:[#allocation6 + $0x6d4] ss:$24 sps:$4 sm:$0xff]   ;;  %v11965_v50 = vld [vmem:[#allocation6 + $0x6d0] ss:$24 sps:$4 sm:$0xff]  }
 0x25d   :  { %6754 = vmatprep.mubr.bf16.mxu1 %v12496_v47  ;;  %v5959_v23 = vpop.f32.mrf.mxu0  ;;  %v11970_v45 = vld [vmem:[#allocation6 + $0x9d4] ss:$24 sps:$4 sm:$0xff]   ;;  %v11968_v14 = vld [vmem:[#allocation6 + $0x9d0] ss:$24 sps:$4 sm:$0xff]   ;;  %v12499_v47 = vld [vmem:[#allocation3 + $0xe4] ss:$56 sps:$4 sm:$0xff]  }
 0x25e   :  { %v6072_v58 = vpop.f32.mrf.mxu1  ;;  %v13283_v56 = vadd.f32 %v6070_v42, %v5958_v30  ;;  %v5960_v13 = vadd.f32 %v5959_v23, %v13127_v52  ;;  %6828 = vmatpush1.bf16.msra.mxu0 %v11953_v1  ;;  %v13286_v33 = vpack.c.bf16 %v7900_v31, %v7894_v39  ;;  %v12497_v30 = vld [vmem:[#allocation3 + $0x70] ss:$56 sps:$4 sm:$0xff]   ;;  %v11973_v1 = vld [vmem:[#allocation6 + $0x6a4] ss:$24 sps:$4 sm:$0xff]  }
 0x25f   :  { %6941 = vmatpush1.bf16.msra.mxu1 %v11956_v8  ;;  %v5961_v0 = vpop.f32.mrf.mxu0  ;;  %6829 = vmatprep.subr.bf16.mxu0 %v11961_v44  ;;  %v12498_v52 = vld [vmem:[#allocation3 + $0x78] ss:$56 sps:$4 sm:$0xff]   ;;  %v11976_v8 = vld [vmem:[#allocation6 + $0x9a4] ss:$24 sps:$4 sm:$0xff]  }
 0x260   :  { %v6074_v20 = vpop.f32.mrf.mxu1  ;;  %6942 = vmatprep.subr.bf16.mxu1 %v11964_v24  ;;  %v13288_v46 = vadd.f32 %v6072_v58, %v5960_v13  ;;  %v5962_v60 = vadd.f32 %v5961_v0, %v13131_v17  ;;  %v12500_v23 = vld [vmem:[#allocation3 + $0xec] ss:$56 sps:$4 sm:$0xff]   ;;  %v11971_v58 = vld [vmem:[#allocation6 + $0x6a0] ss:$24 sps:$4 sm:$0xff]  }
 0x261   :  { %v5965_v48 = vpop.f32.mrf.mxu0  ;;  %6642 = vmatmul.mubr.bf16.gmra.mxu0 %v12497_v30  ;;  %v11974_v13 = vld [vmem:[#allocation6 + $0x9a0] ss:$24 sps:$4 sm:$0xff]   ;;  %v11980_v30 = vld [vmem:[#allocation6 + $0x970] ss:$24 sps:$4 sm:$0xff]  }
 0x262   :  { %v6078_v42 = vpop.f32.mrf.mxu1  ;;  %6755 = vmatmul.mubr.bf16.gmra.mxu1 %v12498_v52  ;;  %v13291_v39 = vadd.f32 %v6074_v20, %v5962_v60  ;;  %v5966_v44 = vadd.f32 %v5965_v48, %v13136_v32  ;;  %6830 = vmatpush1.bf16.msra.mxu0 %v11959_v40  ;;  %v11979_v60 = vld [vmem:[#allocation6 + $0x674] ss:$24 sps:$4 sm:$0xff]  }
 0x263   :  { %6943 = vmatpush1.bf16.msra.mxu1 %v11962_v49  ;;  %v5967_v24 = vpop.f32.mrf.mxu0  ;;  %6831 = vmatprep.subr.bf16.mxu0 %v11967_v51  ;;  %v11982_v32 = vld [vmem:[#allocation6 + $0x974] ss:$24 sps:$4 sm:$0xff]  }
 0x264   :  { %v6080_v31 = vpop.f32.mrf.mxu1  ;;  %6944 = vmatprep.subr.bf16.mxu1 %v11970_v45  ;;  %v13294_v17 = vadd.f32 %v6078_v42, %v5966_v44  ;;  %v5968_v28 = vadd.f32 %v5967_v24, %v13140_v61  ;;  %6651 = vmatprep.mubr.bf16.mxu0 %v12499_v47  ;;  %v11977_v42 = vld [vmem:[#allocation6 + $0x670] ss:$24 sps:$4 sm:$0xff]   ;;  %v12501_v24 = vld [vmem:[#allocation3 + $0xe0] ss:$56 sps:$4 sm:$0xff]  }
 0x265   :  { %6764 = vmatprep.mubr.bf16.mxu1 %v12500_v23  ;;  %v5969_v0 = vpop.f32.mrf.mxu0  ;;  %v12503_v23 = vld [vmem:[#allocation3 + $0x154] ss:$56 sps:$4 sm:$0xff]  }
 0x266   :  { %v6082_v20 = vpop.f32.mrf.mxu1  ;;  %v13297_v40 = vadd.f32 %v6080_v31, %v5968_v28  ;;  %v5970_v49 = vadd.f32 %v5969_v0, %v13145_v6  ;;  %6832 = vmatpush1.bf16.msra.mxu0 %v11965_v50  ;;  %v12502_v31 = vld [vmem:[#allocation3 + $0xe8] ss:$56 sps:$4 sm:$0xff]   ;;  %v11985_v28 = vld [vmem:[#allocation6 + $0x644] ss:$24 sps:$4 sm:$0xff]  }
 0x267   :  { %6945 = vmatpush1.bf16.msra.mxu1 %v11968_v14  ;;  %v5971_v51 = vpop.f32.mrf.mxu0  ;;  %6833 = vmatprep.subr.bf16.mxu0 %v11973_v1  ;;  %v11988_v6 = vld [vmem:[#allocation6 + $0x944] ss:$24 sps:$4 sm:$0xff]  }
 0x268   :  { %v6084_v45 = vpop.f32.mrf.mxu1  ;;  %6946 = vmatprep.subr.bf16.mxu1 %v11976_v8  ;;  %v13300_v61 = vadd.f32 %v6082_v20, %v5970_v49  ;;  %v5972_v48 = vadd.f32 %v5971_v51, %v13151_v27  ;;  %v12504_v0 = vld [vmem:[#allocation3 + $0x15c] ss:$56 sps:$4 sm:$0xff]   ;;  %v11983_v20 = vld [vmem:[#allocation6 + $0x640] ss:$24 sps:$4 sm:$0xff]  }
 0x269   :  { %v5975_v52 = vpop.f32.mrf.mxu0  ;;  %6652 = vmatmul.mubr.bf16.gmra.mxu0 %v12501_v24  ;;  %v11986_v49 = vld [vmem:[#allocation6 + $0x940] ss:$24 sps:$4 sm:$0xff]   ;;  %v11992_v24 = vld [vmem:[#allocation6 + $0x910] ss:$24 sps:$4 sm:$0xff]  }
 0x26a   :  { %v6088_v44 = vpop.f32.mrf.mxu1  ;;  %6765 = vmatmul.mubr.bf16.gmra.mxu1 %v12502_v31  ;;  %v13303_v50 = vadd.f32 %v6084_v45, %v5972_v48  ;;  %v5976_v14 = vadd.f32 %v5975_v52, %v13156_v4  ;;  %6834 = vmatpush1.bf16.msra.mxu0 %v11971_v58  ;;  %v11991_v48 = vld [vmem:[#allocation6 + $0x614] ss:$24 sps:$4 sm:$0xff]  }
 0x26b   :  { %6947 = vmatpush1.bf16.msra.mxu1 %v11974_v13  ;;  %v5977_v1 = vpop.f32.mrf.mxu0  ;;  %6835 = vmatprep.subr.bf16.mxu0 %v11979_v60  ;;  %v11994_v4 = vld [vmem:[#allocation6 + $0x914] ss:$24 sps:$4 sm:$0xff]  }
 0x26c   :  { %v6090_v8 = vpop.f32.mrf.mxu1  ;;  %6948 = vmatprep.subr.bf16.mxu1 %v11982_v32  ;;  %v13306_v27 = vadd.f32 %v6088_v44, %v5976_v14  ;;  %v5978_v47 = vadd.f32 %v5977_v1, %v13160_v3  ;;  %6661 = vmatprep.mubr.bf16.mxu0 %v12503_v23  ;;  %v11989_v44 = vld [vmem:[#allocation6 + $0x610] ss:$24 sps:$4 sm:$0xff]  }
 0x26d   :  { %6774 = vmatprep.mubr.bf16.mxu1 %v12504_v0  ;;  %v5979_v51 = vpop.f32.mrf.mxu0  ;;  %v12505_v1 = vld [vmem:[#allocation3 + $0x150] ss:$56 sps:$4 sm:$0xff]   ;;  %v12507_v0 = vld [vmem:[#allocation3 + $0x1c4] ss:$56 sps:$4 sm:$0xff]  }
 0x26e   :  { %v6092_v45 = vpop.f32.mrf.mxu1  ;;  %v13309_v58 = vadd.f32 %v6090_v8, %v5978_v47  ;;  %v5980_v13 = vadd.f32 %v5979_v51, %v13165_v11  ;;  %6836 = vmatpush1.bf16.msra.mxu0 %v11977_v42  ;;  %v12506_v8 = vld [vmem:[#allocation3 + $0x158] ss:$56 sps:$4 sm:$0xff]   ;;  %v11997_v47 = vld [vmem:[#allocation6 + $0x8e4] ss:$24 sps:$4 sm:$0xff]  }
 0x26f   :  { %6949 = vmatpush1.bf16.msra.mxu1 %v11980_v30  ;;  %v5981_v60 = vpop.f32.mrf.mxu0  ;;  %6837 = vmatprep.subr.bf16.mxu0 %v11985_v28  ;;  %v12000_v11 = vld [vmem:[#allocation6 + $0xbe4] ss:$24 sps:$4 sm:$0xff]  }
 0x270   :  { %v6094_v32 = vpop.f32.mrf.mxu1  ;;  %6950 = vmatprep.subr.bf16.mxu1 %v11988_v6  ;;  %v13312_v3 = vadd.f32 %v6092_v45, %v5980_v13  ;;  %v5982_v52 = vadd.f32 %v5981_v60, %v13171_v7  ;;  %v12508_v51 = vld [vmem:[#allocation3 + $0x1cc] ss:$56 sps:$4 sm:$0xff]   ;;  %v11995_v45 = vld [vmem:[#allocation6 + $0x8e0] ss:$24 sps:$4 sm:$0xff]  }
 0x271   :  { %v5985_v31 = vpop.f32.mrf.mxu0  ;;  %6662 = vmatmul.mubr.bf16.gmra.mxu0 %v12505_v1  ;;  %v11998_v13 = vld [vmem:[#allocation6 + $0xbe0] ss:$24 sps:$4 sm:$0xff]   ;;  %v12004_v1 = vld [vmem:[#allocation6 + $0xbb0] ss:$24 sps:$4 sm:$0xff]  }
 0x272   :  { %v6098_v14 = vpop.f32.mrf.mxu1  ;;  %6775 = vmatmul.mubr.bf16.gmra.mxu1 %v12506_v8  ;;  %v13315_v42 = vadd.f32 %v6094_v32, %v5982_v52  ;;  %v5986_v30 = vadd.f32 %v5985_v31, %v13176_v54  ;;  %6838 = vmatpush1.bf16.msra.mxu0 %v11983_v20  ;;  %v12003_v52 = vld [vmem:[#allocation6 + $0x8b4] ss:$24 sps:$4 sm:$0xff]  }
 0x273   :  { %6951 = vmatpush1.bf16.msra.mxu1 %v11986_v49  ;;  %v5987_v28 = vpop.f32.mrf.mxu0  ;;  %6839 = vmatprep.subr.bf16.mxu0 %v11991_v48  ;;  %v12006_v54 = vld [vmem:[#allocation6 + $0xbb4] ss:$24 sps:$4 sm:$0xff]  }
 0x274   :  { %v6100_v6 = vpop.f32.mrf.mxu1  ;;  %6952 = vmatprep.subr.bf16.mxu1 %v11994_v4  ;;  %v13318_v7 = vadd.f32 %v6098_v14, %v5986_v30  ;;  %v5988_v23 = vadd.f32 %v5987_v28, %v13180_v29  ;;  %6671 = vmatprep.mubr.bf16.mxu0 %v12507_v0  ;;  %v12001_v14 = vld [vmem:[#allocation6 + $0x8b0] ss:$24 sps:$4 sm:$0xff]   ;;  %v12509_v28 = vld [vmem:[#allocation3 + $0x1c0] ss:$56 sps:$4 sm:$0xff]  }
 0x275   :  { %6784 = vmatprep.mubr.bf16.mxu1 %v12508_v51  ;;  %v5989_v60 = vpop.f32.mrf.mxu0  ;;  %v12511_v51 = vld [vmem:[#allocation3 + $0x234] ss:$56 sps:$4 sm:$0xff]  }
 0x276   :  { %v6102_v32 = vpop.f32.mrf.mxu1  ;;  %v13321_v20 = vadd.f32 %v6100_v6, %v5988_v23  ;;  %v5990_v49 = vadd.f32 %v5989_v60, %v13185_v18  ;;  %6840 = vmatpush1.bf16.msra.mxu0 %v11989_v44  ;;  %v12510_v6 = vld [vmem:[#allocation3 + $0x1c8] ss:$56 sps:$4 sm:$0xff]   ;;  %v12009_v23 = vld [vmem:[#allocation6 + $0x884] ss:$24 sps:$4 sm:$0xff]  }
 0x277   :  { %6953 = vmatpush1.bf16.msra.mxu1 %v11992_v24  ;;  %v5991_v48 = vpop.f32.mrf.mxu0  ;;  %6841 = vmatprep.subr.bf16.mxu0 %v11997_v47  ;;  %v12012_v18 = vld [vmem:[#allocation6 + $0xb84] ss:$24 sps:$4 sm:$0xff]  }
 0x278   :  { %v6104_v4 = vpop.f32.mrf.mxu1  ;;  %6954 = vmatprep.subr.bf16.mxu1 %v12000_v11  ;;  %v13324_v29 = vadd.f32 %v6102_v32, %v5990_v49  ;;  %v5992_v31 = vadd.f32 %v5991_v48, %v13191_v37  ;;  %v12512_v60 = vld [vmem:[#allocation3 + $0x23c] ss:$56 sps:$4 sm:$0xff]   ;;  %v12007_v32 = vld [vmem:[#allocation6 + $0x880] ss:$24 sps:$4 sm:$0xff]  }
 0x279   :  { %v5995_v8 = vpop.f32.mrf.mxu0  ;;  %6672 = vmatmul.mubr.bf16.gmra.mxu0 %v12509_v28  ;;  %v12010_v49 = vld [vmem:[#allocation6 + $0xb80] ss:$24 sps:$4 sm:$0xff]   ;;  %v12016_v28 = vld [vmem:[#allocation6 + $0xb50] ss:$24 sps:$4 sm:$0xff]  }
 0x27a   :  { %v6108_v30 = vpop.f32.mrf.mxu1  ;;  %6785 = vmatmul.mubr.bf16.gmra.mxu1 %v12510_v6  ;;  %v13327_v44 = vadd.f32 %v6104_v4, %v5992_v31  ;;  %v5996_v24 = vadd.f32 %v5995_v8, %v13196_v38  ;;  %6842 = vmatpush2.bf16.msra.mxu0 %v11995_v45  ;;  %v12015_v31 = vld [vmem:[#allocation6 + $0x854] ss:$24 sps:$4 sm:$0xff]  }
 0x27b   :  { %6955 = vmatpush2.bf16.msra.mxu1 %v11998_v13  ;;  %v5997_v47 = vpop.f32.mrf.mxu0  ;;  %6843 = vmatprep.subr.bf16.mxu0 %v12003_v52  ;;  %v12018_v38 = vld [vmem:[#allocation6 + $0xb54] ss:$24 sps:$4 sm:$0xff]  }
 0x27c   :  { %v6110_v11 = vpop.f32.mrf.mxu1  ;;  %6956 = vmatprep.subr.bf16.mxu1 %v12006_v54  ;;  %v13330_v37 = vadd.f32 %v6108_v30, %v5996_v24  ;;  %v5998_v0 = vadd.f32 %v5997_v47, %v13200_v12  ;;  %6681 = vmatprep.mubr.bf16.mxu0 %v12511_v51  ;;  %v12013_v30 = vld [vmem:[#allocation6 + $0x850] ss:$24 sps:$4 sm:$0xff]  }
 0x27d   :  { %6794 = vmatprep.mubr.bf16.mxu1 %v12512_v60  ;;  %v5999_v48 = vpop.f32.mrf.mxu0  ;;  %v12513_v47 = vld [vmem:[#allocation3 + $0x230] ss:$56 sps:$4 sm:$0xff]   ;;  %v12515_v60 = vld [vmem:[#allocation3 + $0x2a4] ss:$56 sps:$4 sm:$0xff]  }
 0x27e   :  { %v6112_v4 = vpop.f32.mrf.mxu1  ;;  %v13333_v45 = vadd.f32 %v6110_v11, %v5998_v0  ;;  %v6000_v13 = vadd.f32 %v5999_v48, %v13205_v9  ;;  %6844 = vmatpush2.bf16.msra.mxu0 %v12001_v14  ;;  %v12514_v11 = vld [vmem:[#allocation3 + $0x238] ss:$56 sps:$4 sm:$0xff]   ;;  %v12021_v0 = vld [vmem:[#allocation6 + $0x824] ss:$24 sps:$4 sm:$0xff]  }
 0x27f   :  { %6957 = vmatpush2.bf16.msra.mxu1 %v12004_v1  ;;  %v6001_v52 = vpop.f32.mrf.mxu0  ;;  %6845 = vmatprep.subr.bf16.mxu0 %v12009_v23  ;;  %v12024_v9 = vld [vmem:[#allocation6 + $0xb24] ss:$24 sps:$4 sm:$0xff]  }
 0x280   :  { %v6114_v54 = vpop.f32.mrf.mxu1  ;;  %6958 = vmatprep.subr.bf16.mxu1 %v12012_v18  ;;  %v13336_v12 = vadd.f32 %v6112_v4, %v6000_v13  ;;  %v6002_v8 = vadd.f32 %v6001_v52, %v13211_v16  ;;  %v12516_v48 = vld [vmem:[#allocation3 + $0x2ac] ss:$56 sps:$4 sm:$0xff]   ;;  %v12019_v4 = vld [vmem:[#allocation6 + $0x820] ss:$24 sps:$4 sm:$0xff]  }
 0x281   :  { %v6005_v6 = vpop.f32.mrf.mxu0  ;;  %6682 = vmatmul.mubr.bf16.gmra.mxu0 %v12513_v47  ;;  %v12022_v13 = vld [vmem:[#allocation6 + $0xb20] ss:$24 sps:$4 sm:$0xff]   ;;  %v12028_v47 = vld [vmem:[#allocation6 + $0xaf0] ss:$24 sps:$4 sm:$0xff]  }
 0x282   :  { %v6118_v24 = vpop.f32.mrf.mxu1  ;;  %6795 = vmatmul.mubr.bf16.gmra.mxu1 %v12514_v11  ;;  %v13339_v14 = vadd.f32 %v6114_v54, %v6002_v8  ;;  %v6006_v1 = vadd.f32 %v6005_v6, %v13216_v19  ;;  %6846 = vmatpush2.bf16.msra.mxu0 %v12007_v32  ;;  %v12027_v8 = vld [vmem:[#allocation6 + $0x7f4] ss:$24 sps:$4 sm:$0xff]  }
 0x283   :  { %6959 = vmatpush2.bf16.msra.mxu1 %v12010_v49  ;;  %v6007_v23 = vpop.f32.mrf.mxu0  ;;  %6847 = vmatprep.subr.bf16.mxu0 %v12015_v31  ;;  %v12030_v19 = vld [vmem:[#allocation6 + $0xaf4] ss:$24 sps:$4 sm:$0xff]  }
 0x284   :  { %v6120_v18 = vpop.f32.mrf.mxu1  ;;  %6960 = vmatprep.subr.bf16.mxu1 %v12018_v38  ;;  %v13342_v16 = vadd.f32 %v6118_v24, %v6006_v1  ;;  %v6008_v51 = vadd.f32 %v6007_v23, %v13220_v57  ;;  %6691 = vmatprep.mubr.bf16.mxu0 %v12515_v60  ;;  %v12025_v24 = vld [vmem:[#allocation6 + $0x7f0] ss:$24 sps:$4 sm:$0xff]   ;;  %v12517_v23 = vld [vmem:[#allocation3 + $0x2a0] ss:$56 sps:$4 sm:$0xff]  }
 0x285   :  { %6804 = vmatprep.mubr.bf16.mxu1 %v12516_v48  ;;  %v6009_v52 = vpop.f32.mrf.mxu0  ;;  %v12519_v48 = vld [vmem:[#allocation3 + $0x314] ss:$56 sps:$4 sm:$0xff]  }
 0x286   :  { %v6122_v54 = vpop.f32.mrf.mxu1  ;;  %v13345_v32 = vadd.f32 %v6120_v18, %v6008_v51  ;;  %v6010_v49 = vadd.f32 %v6009_v52, %v13225_v26  ;;  %6848 = vmatpush2.bf16.msra.mxu0 %v12013_v30  ;;  %v12518_v18 = vld [vmem:[#allocation3 + $0x2a8] ss:$56 sps:$4 sm:$0xff]   ;;  %v12033_v51 = vld [vmem:[#allocation6 + $0x7c4] ss:$24 sps:$4 sm:$0xff]  }
 0x287   :  { %6961 = vmatpush2.bf16.msra.mxu1 %v12016_v28  ;;  %v6011_v31 = vpop.f32.mrf.mxu0  ;;  %6849 = vmatprep.subr.bf16.mxu0 %v12021_v0  ;;  %v12036_v26 = vld [vmem:[#allocation6 + $0xac4] ss:$24 sps:$4 sm:$0xff]  }
 0x288   :  { %v6124_v38 = vpop.f32.mrf.mxu1  ;;  %6962 = vmatprep.subr.bf16.mxu1 %v12024_v9  ;;  %v13348_v57 = vadd.f32 %v6122_v54, %v6010_v49  ;;  %v6012_v6 = vadd.f32 %v6011_v31, %v13231_v63  ;;  %v12520_v52 = vld [vmem:[#allocation3 + $0x31c] ss:$56 sps:$4 sm:$0xff]   ;;  %v12031_v54 = vld [vmem:[#allocation6 + $0x7c0] ss:$24 sps:$4 sm:$0xff]  }
 0x289   :  { %v6015_v11 = vpop.f32.mrf.mxu0  ;;  %6692 = vmatmul.mubr.bf16.gmra.mxu0 %v12517_v23  ;;  %v12034_v49 = vld [vmem:[#allocation6 + $0xac0] ss:$24 sps:$4 sm:$0xff]   ;;  %v12040_v23 = vld [vmem:[#allocation6 + $0xa90] ss:$24 sps:$4 sm:$0xff]  }
 0x28a   :  { %v6128_v1 = vpop.f32.mrf.mxu1  ;;  %6805 = vmatmul.mubr.bf16.gmra.mxu1 %v12518_v18  ;;  %v13351_v30 = vadd.f32 %v6124_v38, %v6012_v6  ;;  %v6016_v28 = vadd.f32 %v6015_v11, %v13236_v43  ;;  %6850 = vmatpush2.bf16.msra.mxu0 %v12019_v4  ;;  %v12039_v6 = vld [vmem:[#allocation6 + $0x794] ss:$24 sps:$4 sm:$0xff]  }
 0x28b   :  { %6963 = vmatpush2.bf16.msra.mxu1 %v12022_v13  ;;  %v6017_v0 = vpop.f32.mrf.mxu0  ;;  %6851 = vmatprep.subr.bf16.mxu0 %v12027_v8  ;;  %v12042_v43 = vld [vmem:[#allocation6 + $0xa94] ss:$24 sps:$4 sm:$0xff]  }
 0x28c   :  { %v6130_v9 = vpop.f32.mrf.mxu1  ;;  %6964 = vmatprep.subr.bf16.mxu1 %v12030_v19  ;;  %v13354_v63 = vadd.f32 %v6128_v1, %v6016_v28  ;;  %v6018_v60 = vadd.f32 %v6017_v0, %v13240_v22  ;;  %6701 = vmatprep.mubr.bf16.mxu0 %v12519_v48  ;;  %v12037_v1 = vld [vmem:[#allocation6 + $0x790] ss:$24 sps:$4 sm:$0xff]  }
 0x28d   :  { %6814 = vmatprep.mubr.bf16.mxu1 %v12520_v52  ;;  %v6019_v31 = vpop.f32.mrf.mxu0  ;;  %v12521_v0 = vld [vmem:[#allocation3 + $0x310] ss:$56 sps:$4 sm:$0xff]   ;;  %v12523_v52 = vld [vmem:[#allocation3 + $0x14] ss:$56 sps:$4 sm:$0xff]  }
 0x28e   :  { %v6132_v38 = vpop.f32.mrf.mxu1  ;;  %v13357_v4 = vadd.f32 %v6130_v9, %v6018_v60  ;;  %v6020_v13 = vadd.f32 %v6019_v31, %v13245_v10  ;;  %6852 = vmatpush2.bf16.msra.mxu0 %v12025_v24  ;;  %v12522_v9 = vld [vmem:[#allocation3 + $0x318] ss:$56 sps:$4 sm:$0xff]   ;;  %v12045_v60 = vld [vmem:[#allocation6 + $0xd64] ss:$24 sps:$4 sm:$0xff]  }
 0x28f   :  { %6965 = vmatpush2.bf16.msra.mxu1 %v12028_v47  ;;  %v6021_v8 = vpop.f32.mrf.mxu0  ;;  %6853 = vmatprep.subr.bf16.mxu0 %v12033_v51  ;;  %v12048_v10 = vld [vmem:[#allocation6 + $0x1064] ss:$24 sps:$4 sm:$0xff]  }
 0x290   :  { %v6134_v19 = vpop.f32.mrf.mxu1  ;;  %6966 = vmatprep.subr.bf16.mxu1 %v12036_v26  ;;  %v13360_v22 = vadd.f32 %v6132_v38, %v6020_v13  ;;  %v6022_v11 = vadd.f32 %v6021_v8, %v13251_v25  ;;  %v12524_v31 = vld [vmem:[#allocation3 + $0x1c] ss:$56 sps:$4 sm:$0xff]   ;;  %v12043_v38 = vld [vmem:[#allocation6 + $0xd60] ss:$24 sps:$4 sm:$0xff]  }
 0x291   :  { %v6025_v18 = vpop.f32.mrf.mxu0  ;;  %6702 = vmatmul.mubr.bf16.gmra.mxu0 %v12521_v0  ;;  %v12046_v13 = vld [vmem:[#allocation6 + $0x1060] ss:$24 sps:$4 sm:$0xff]   ;;  %v12052_v0 = vld [vmem:[#allocation6 + $0x1030] ss:$24 sps:$4 sm:$0xff]  }
 0x292   :  { %v6138_v28 = vpop.f32.mrf.mxu1  ;;  %6815 = vmatmul.mubr.bf16.gmra.mxu1 %v12522_v9  ;;  %v13363_v24 = vadd.f32 %v6134_v19, %v6022_v11  ;;  %v6026_v47 = vadd.f32 %v6025_v18, %v13256_v15  ;;  %6854 = vmatpush2.bf16.msra.mxu0 %v12031_v54  ;;  %v12051_v11 = vld [vmem:[#allocation6 + $0xd34] ss:$24 sps:$4 sm:$0xff]  }
 0x293   :  { %6967 = vmatpush2.bf16.msra.mxu1 %v12034_v49  ;;  %v6027_v51 = vpop.f32.mrf.mxu0  ;;  %6855 = vmatprep.subr.bf16.mxu0 %v12039_v6  ;;  %v12054_v15 = vld [vmem:[#allocation6 + $0x1034] ss:$24 sps:$4 sm:$0xff]  }
 0x294   :  { %v6140_v26 = vpop.f32.mrf.mxu1  ;;  %6968 = vmatprep.subr.bf16.mxu1 %v12042_v43  ;;  %v13366_v25 = vadd.f32 %v6138_v28, %v6026_v47  ;;  %v6028_v48 = vadd.f32 %v6027_v51, %v13260_v53  ;;  %6857 = vmatprep.mubr.bf16.mxu0 %v12523_v52  ;;  %v12049_v28 = vld [vmem:[#allocation6 + $0xd30] ss:$24 sps:$4 sm:$0xff]  }
 0x295   :  { %6970 = vmatprep.mubr.bf16.mxu1 %v12524_v31  ;;  %v6029_v8 = vpop.f32.mrf.mxu0  ;;  %v12525_v51 = vld [vmem:[#allocation3 + $0x10] ss:$56 sps:$4 sm:$0xff]   ;;  %v12527_v31 = vld [vmem:[#allocation3 + $0x84] ss:$56 sps:$4 sm:$0xff]  }
 0x296   :  { %v6142_v19 = vpop.f32.mrf.mxu1  ;;  %v13369_v54 = vadd.f32 %v6140_v26, %v6028_v48  ;;  %v6030_v49 = vadd.f32 %v6029_v8, %v13265_v35  ;;  %6856 = vmatpush2.bf16.msra.mxu0 %v12037_v1  ;;  %v12526_v26 = vld [vmem:[#allocation3 + $0x18] ss:$56 sps:$4 sm:$0xff]   ;;  %v12057_v48 = vld [vmem:[#allocation6 + $0xd04] ss:$24 sps:$4 sm:$0xff]  }
 0x297   :  { %6969 = vmatpush2.bf16.msra.mxu1 %v12040_v23  ;;  %v6031_v6 = vpop.f32.mrf.mxu0  ;;  %7051 = vmatprep.subr.bf16.mxu0 %v12045_v60  ;;  %v12060_v35 = vld [vmem:[#allocation6 + $0x1004] ss:$24 sps:$4 sm:$0xff]  }
 0x298   :  { %v6144_v43 = vpop.f32.mrf.mxu1  ;;  %7164 = vmatprep.subr.bf16.mxu1 %v12048_v10  ;;  %v13372_v53 = vadd.f32 %v6142_v19, %v6030_v49  ;;  %v6032_v18 = vadd.f32 %v6031_v6, %v13272_v41  ;;  %v12528_v8 = vld [vmem:[#allocation3 + $0x8c] ss:$56 sps:$4 sm:$0xff]   ;;  %v12055_v19 = vld [vmem:[#allocation6 + $0xd00] ss:$24 sps:$4 sm:$0xff]  }
 0x299   :  { %v6181_v9 = vpop.f32.mrf.mxu0  ;;  %6858 = vmatmul.mubr.bf16.vlgmr.msra.gmra.mxu0 %v12525_v51  ;;  %v12058_v49 = vld [vmem:[#allocation6 + $0x1000] ss:$24 sps:$4 sm:$0xff]   ;;  %v12064_v51 = vld [vmem:[#allocation6 + $0xfd0] ss:$24 sps:$4 sm:$0xff]  }
 0x29a   :  { %v6294_v47 = vpop.f32.mrf.mxu1  ;;  %6971 = vmatmul.mubr.bf16.vlgmr.msra.gmra.mxu1 %v12526_v26  ;;  %v13375_v1 = vadd.f32 %v6144_v43, %v6032_v18  ;;  %v6182_v23 = vadd.f32 %v6181_v9, %v13280_v2  ;;  %7052 = vmatpush1.bf16.msra.mxu0 %v12043_v38  ;;  %v12063_v18 = vld [vmem:[#allocation6 + $0xcd4] ss:$24 sps:$4 sm:$0xff]  }
 0x29b   :  { %7165 = vmatpush1.bf16.msra.mxu1 %v12046_v13  ;;  %v6183_v60 = vpop.f32.mrf.mxu0  ;;  %7053 = vmatprep.subr.bf16.mxu0 %v12051_v11  ;;  %v12066_v2 = vld [vmem:[#allocation6 + $0xfd4] ss:$24 sps:$4 sm:$0xff]  }
 0x29c   :  { %v6296_v10 = vpop.f32.mrf.mxu1  ;;  %7166 = vmatprep.subr.bf16.mxu1 %v12054_v15  ;;  %v13378_v41 = vadd.f32 %v6294_v47, %v6182_v23  ;;  %v6184_v52 = vadd.f32 %v6183_v60, %v13283_v56  ;;  %6867 = vmatprep.mubr.bf16.mxu0 %v12527_v31  ;;  %v12061_v47 = vld [vmem:[#allocation6 + $0xcd0] ss:$24 sps:$4 sm:$0xff]   ;;  %v12529_v60 = vld [vmem:[#allocation3 + $0x80] ss:$56 sps:$4 sm:$0xff]  }
 0x29d   :  { %6980 = vmatprep.mubr.bf16.mxu1 %v12528_v8  ;;  %v6185_v6 = vpop.f32.mrf.mxu0  ;;  %v12531_v8 = vld [vmem:[#allocation3 + $0xf4] ss:$56 sps:$4 sm:$0xff]  }
 0x29e   :  { %v6298_v43 = vpop.f32.mrf.mxu1  ;;  %v13381_v38 = vadd.f32 %v6296_v10, %v6184_v52  ;;  %v6186_v13 = vadd.f32 %v6185_v6, %v13288_v46  ;;  %7054 = vmatpush1.bf16.msra.mxu0 %v12049_v28  ;;  %v12530_v10 = vld [vmem:[#allocation3 + $0x88] ss:$56 sps:$4 sm:$0xff]   ;;  %v12069_v52 = vld [vmem:[#allocation6 + $0xca4] ss:$24 sps:$4 sm:$0xff]  }
 0x29f   :  { %7167 = vmatpush1.bf16.msra.mxu1 %v12052_v0  ;;  %v6187_v11 = vpop.f32.mrf.mxu0  ;;  %7055 = vmatprep.subr.bf16.mxu0 %v12057_v48  ;;  %v12072_v46 = vld [vmem:[#allocation6 + $0xfa4] ss:$24 sps:$4 sm:$0xff]  }
 0x2a0   :  { %v6300_v15 = vpop.f32.mrf.mxu1  ;;  %7168 = vmatprep.subr.bf16.mxu1 %v12060_v35  ;;  %v13384_v56 = vadd.f32 %v6298_v43, %v6186_v13  ;;  %v6188_v9 = vadd.f32 %v6187_v11, %v13291_v39  ;;  %v12532_v6 = vld [vmem:[#allocation3 + $0xfc] ss:$56 sps:$4 sm:$0xff]   ;;  %v12067_v43 = vld [vmem:[#allocation6 + $0xca0] ss:$24 sps:$4 sm:$0xff]  }
 0x2a1   :  { %v6191_v26 = vpop.f32.mrf.mxu0  ;;  %6868 = vmatmul.mubr.bf16.gmra.mxu0 %v12529_v60  ;;  %v12070_v13 = vld [vmem:[#allocation6 + $0xfa0] ss:$24 sps:$4 sm:$0xff]   ;;  %v12076_v60 = vld [vmem:[#allocation6 + $0xf70] ss:$24 sps:$4 sm:$0xff]  }
 0x2a2   :  { %v6304_v23 = vpop.f32.mrf.mxu1  ;;  %6981 = vmatmul.mubr.bf16.gmra.mxu1 %v12530_v10  ;;  %v13387_v28 = vadd.f32 %v6300_v15, %v6188_v9  ;;  %v6192_v0 = vadd.f32 %v6191_v26, %v13294_v17  ;;  %7056 = vmatpush1.bf16.msra.mxu0 %v12055_v19  ;;  %v12075_v9 = vld [vmem:[#allocation6 + $0xc74] ss:$24 sps:$4 sm:$0xff]  }
 0x2a3   :  { %7169 = vmatpush1.bf16.msra.mxu1 %v12058_v49  ;;  %v6193_v48 = vpop.f32.mrf.mxu0  ;;  %7057 = vmatprep.subr.bf16.mxu0 %v12063_v18  ;;  %v12078_v17 = vld [vmem:[#allocation6 + $0xf74] ss:$24 sps:$4 sm:$0xff]  }
 0x2a4   :  { %v6306_v35 = vpop.f32.mrf.mxu1  ;;  %7170 = vmatprep.subr.bf16.mxu1 %v12066_v2  ;;  %v13390_v39 = vadd.f32 %v6304_v23, %v6192_v0  ;;  %v6194_v31 = vadd.f32 %v6193_v48, %v13297_v40  ;;  %6877 = vmatprep.mubr.bf16.mxu0 %v12531_v8  ;;  %v12073_v23 = vld [vmem:[#allocation6 + $0xc70] ss:$24 sps:$4 sm:$0xff]  }
 0x2a5   :  { %6990 = vmatprep.mubr.bf16.mxu1 %v12532_v6  ;;  %v6195_v11 = vpop.f32.mrf.mxu0  ;;  %v12533_v48 = vld [vmem:[#allocation3 + $0xf0] ss:$56 sps:$4 sm:$0xff]   ;;  %v12535_v6 = vld [vmem:[#allocation3 + $0x164] ss:$56 sps:$4 sm:$0xff]  }
 0x2a6   :  { %v6308_v15 = vpop.f32.mrf.mxu1  ;;  %v13393_v19 = vadd.f32 %v6306_v35, %v6194_v31  ;;  %v6196_v49 = vadd.f32 %v6195_v11, %v13300_v61  ;;  %7058 = vmatpush1.bf16.msra.mxu0 %v12061_v47  ;;  %v12534_v35 = vld [vmem:[#allocation3 + $0xf8] ss:$56 sps:$4 sm:$0xff]   ;;  %v12081_v31 = vld [vmem:[#allocation6 + $0xc44] ss:$24 sps:$4 sm:$0xff]  }
 0x2a7   :  { %7171 = vmatpush1.bf16.msra.mxu1 %v12064_v51  ;;  %v6197_v18 = vpop.f32.mrf.mxu0  ;;  %7059 = vmatprep.subr.bf16.mxu0 %v12069_v52  ;;  %v12084_v61 = vld [vmem:[#allocation6 + $0xf44] ss:$24 sps:$4 sm:$0xff]  }
 0x2a8   :  { %v6310_v2 = vpop.f32.mrf.mxu1  ;;  %7172 = vmatprep.subr.bf16.mxu1 %v12072_v46  ;;  %v13396_v40 = vadd.f32 %v6308_v15, %v6196_v49  ;;  %v6198_v26 = vadd.f32 %v6197_v18, %v13303_v50  ;;  %v12536_v11 = vld [vmem:[#allocation3 + $0x16c] ss:$56 sps:$4 sm:$0xff]   ;;  %v12079_v15 = vld [vmem:[#allocation6 + $0xc40] ss:$24 sps:$4 sm:$0xff]  }
 0x2a9   :  { %v6201_v10 = vpop.f32.mrf.mxu0  ;;  %6878 = vmatmul.mubr.bf16.gmra.mxu0 %v12533_v48  ;;  %v12082_v49 = vld [vmem:[#allocation6 + $0xf40] ss:$24 sps:$4 sm:$0xff]  }
 0x2aa   :  { %v6314_v0 = vpop.f32.mrf.mxu1  ;;  %6991 = vmatmul.mubr.bf16.gmra.mxu1 %v12534_v35  ;;  %v13399_v47 = vadd.f32 %v6310_v2, %v6198_v26  ;;  %v6202_v51 = vadd.f32 %v6201_v10, %v13306_v27  ;;  %7060 = vmatpush1.bf16.msra.mxu0 %v12067_v43  ;;  %v12087_v26 = vld [vmem:[#allocation6 + $0xc14] ss:$24 sps:$4 sm:$0xff]   ;;  %v12537_v35 = vld [vmem:[#allocation3 + $0x160] ss:$56 sps:$4 sm:$0xff]  }
 0x2ab   :  { %7173 = vmatpush1.bf16.msra.mxu1 %v12070_v13  ;;  %v6203_v52 = vpop.f32.mrf.mxu0  ;;  %7061 = vmatprep.subr.bf16.mxu0 %v12075_v9 }
 0x2ac   :  { %v6316_v46 = vpop.f32.mrf.mxu1  ;;  %7174 = vmatprep.subr.bf16.mxu1 %v12078_v17  ;;  %v13402_v50 = vadd.f32 %v6314_v0, %v6202_v51  ;;  %v6204_v8 = vadd.f32 %v6203_v52, %v13309_v58  ;;  %6887 = vmatprep.mubr.bf16.mxu0 %v12535_v6  ;;  %v12090_v58 = vld [vmem:[#allocation6 + $0xf14] ss:$24 sps:$4 sm:$0xff]   ;;  %v12538_v51 = vld [vmem:[#allocation3 + $0x168] ss:$56 sps:$4 sm:$0xff]  }
 0x2ad   :  { %7000 = vmatprep.mubr.bf16.mxu1 %v12536_v11  ;;  %v6205_v18 = vpop.f32.mrf.mxu0  ;;  %v12539_v11 = vld [vmem:[#allocation3 + $0x1d4] ss:$56 sps:$4 sm:$0xff]  }
 0x2ae   :  { %v6318_v2 = vpop.f32.mrf.mxu1  ;;  %v13405_v27 = vadd.f32 %v6316_v46, %v6204_v8  ;;  %v6206_v43 = vadd.f32 %v6205_v18, %v13312_v3  ;;  %7062 = vmatpush1.bf16.msra.mxu0 %v12073_v23  ;;  %v12085_v23 = vld [vmem:[#allocation6 + $0xc10] ss:$24 sps:$4 sm:$0xff]   ;;  %v12093_v46 = vld [vmem:[#allocation6 + $0xee4] ss:$24 sps:$4 sm:$0xff]  }
 0x2af   :  { %7175 = vmatpush1.bf16.msra.mxu1 %v12076_v60  ;;  %v6207_v13 = vpop.f32.mrf.mxu0  ;;  %7063 = vmatprep.subr.bf16.mxu0 %v12081_v31  ;;  %v12088_v60 = vld [vmem:[#allocation6 + $0xf10] ss:$24 sps:$4 sm:$0xff]   ;;  %v12540_v18 = vld [vmem:[#allocation3 + $0x1dc] ss:$56 sps:$4 sm:$0xff]  }
 0x2b0   :  { %v6320_v9 = vpop.f32.mrf.mxu1  ;;  %7176 = vmatprep.subr.bf16.mxu1 %v12084_v61  ;;  %v13408_v17 = vadd.f32 %v6318_v2, %v6206_v43  ;;  %v6208_v10 = vadd.f32 %v6207_v13, %v13315_v42  ;;  %v12096_v42 = vld [vmem:[#allocation6 + $0x11e4] ss:$24 sps:$4 sm:$0xff]   ;;  %v12094_v43 = vld [vmem:[#allocation6 + $0x11e0] ss:$24 sps:$4 sm:$0xff]  }
 0x2b1   :  { %v6211_v0 = vpop.f32.mrf.mxu0  ;;  %6888 = vmatmul.mubr.bf16.gmra.mxu0 %v12537_v35 }
 0x2b2   :  { %v6324_v48 = vpop.f32.mrf.mxu1  ;;  %7001 = vmatmul.mubr.bf16.gmra.mxu1 %v12538_v51  ;;  %v13411_v52 = vadd.f32 %v6320_v9, %v6208_v10  ;;  %v6212_v3 = vadd.f32 %v6211_v0, %v13318_v7  ;;  %7064 = vmatpush1.bf16.msra.mxu0 %v12079_v15  ;;  %v12541_v51 = vld [vmem:[#allocation3 + $0x1d0] ss:$56 sps:$4 sm:$0xff]  }
 0x2b3   :  { %7177 = vmatpush1.bf16.msra.mxu1 %v12082_v49  ;;  %v6213_v31 = vpop.f32.mrf.mxu0  ;;  %7065 = vmatprep.subr.bf16.mxu0 %v12087_v26  ;;  %v12091_v26 = vld [vmem:[#allocation6 + $0xee0] ss:$24 sps:$4 sm:$0xff]  }
 0x2b4   :  { %v6326_v61 = vpop.f32.mrf.mxu1  ;;  %7178 = vmatprep.subr.bf16.mxu1 %v12090_v58  ;;  %v13414_v8 = vadd.f32 %v6324_v48, %v6212_v3  ;;  %v6214_v6 = vadd.f32 %v6213_v31, %v13321_v20  ;;  %6897 = vmatprep.mubr.bf16.mxu0 %v12539_v11  ;;  %v12099_v58 = vld [vmem:[#allocation6 + $0xeb4] ss:$24 sps:$4 sm:$0xff]   ;;  %v12542_v3 = vld [vmem:[#allocation3 + $0x1d8] ss:$56 sps:$4 sm:$0xff]  }
 0x2b5   :  { %7010 = vmatprep.mubr.bf16.mxu1 %v12540_v18  ;;  %v6215_v2 = vpop.f32.mrf.mxu0  ;;  %v12102_v20 = vld [vmem:[#allocation6 + $0x11b4] ss:$24 sps:$4 sm:$0xff]   ;;  %v12100_v31 = vld [vmem:[#allocation6 + $0x11b0] ss:$24 sps:$4 sm:$0xff]   ;;  %v12543_v18 = vld [vmem:[#allocation3 + $0x244] ss:$56 sps:$4 sm:$0xff]  }
 0x2b6   :  { %v6328_v7 = vpop.f32.mrf.mxu1  ;;  %v13417_v15 = vadd.f32 %v6326_v61, %v6214_v6  ;;  %v6216_v49 = vadd.f32 %v6215_v2, %v13324_v29  ;;  %7066 = vmatpush1.bf16.msra.mxu0 %v12085_v23  ;;  %v12544_v2 = vld [vmem:[#allocation3 + $0x24c] ss:$56 sps:$4 sm:$0xff]  }
 0x2b7   :  { %7179 = vmatpush1.bf16.msra.mxu1 %v12088_v60  ;;  %v6217_v13 = vpop.f32.mrf.mxu0  ;;  %7067 = vmatprep.subr.bf16.mxu0 %v12093_v46  ;;  %v12097_v60 = vld [vmem:[#allocation6 + $0xeb0] ss:$24 sps:$4 sm:$0xff]  }
 0x2b8   :  { %v6330_v9 = vpop.f32.mrf.mxu1  ;;  %7180 = vmatprep.subr.bf16.mxu1 %v12096_v42  ;;  %v13420_v10 = vadd.f32 %v6328_v7, %v6216_v49  ;;  %v6218_v0 = vadd.f32 %v6217_v13, %v13327_v44  ;;  %v12105_v42 = vld [vmem:[#allocation6 + $0xe84] ss:$24 sps:$4 sm:$0xff]   ;;  %v12106_v13 = vld [vmem:[#allocation6 + $0x1180] ss:$24 sps:$4 sm:$0xff]  }
 0x2b9   :  { %v6221_v48 = vpop.f32.mrf.mxu0  ;;  %6898 = vmatmul.mubr.bf16.gmra.mxu0 %v12541_v51  ;;  %v12108_v44 = vld [vmem:[#allocation6 + $0x1184] ss:$24 sps:$4 sm:$0xff]  }
 0x2ba   :  { %v6334_v35 = vpop.f32.mrf.mxu1  ;;  %7011 = vmatmul.mubr.bf16.gmra.mxu1 %v12542_v3  ;;  %v13423_v29 = vadd.f32 %v6330_v9, %v6218_v0  ;;  %v6222_v23 = vadd.f32 %v6221_v48, %v13330_v37  ;;  %7068 = vmatpush2.bf16.msra.mxu0 %v12091_v26  ;;  %v12545_v3 = vld [vmem:[#allocation3 + $0x240] ss:$56 sps:$4 sm:$0xff]  }
 0x2bb   :  { %7181 = vmatpush2.bf16.msra.mxu1 %v12094_v43  ;;  %v6223_v61 = vpop.f32.mrf.mxu0  ;;  %7069 = vmatprep.subr.bf16.mxu0 %v12099_v58  ;;  %v12103_v43 = vld [vmem:[#allocation6 + $0xe80] ss:$24 sps:$4 sm:$0xff]  }
 0x2bc   :  { %v6336_v46 = vpop.f32.mrf.mxu1  ;;  %7182 = vmatprep.subr.bf16.mxu1 %v12102_v20  ;;  %v13426_v6 = vadd.f32 %v6334_v35, %v6222_v23  ;;  %v6224_v11 = vadd.f32 %v6223_v61, %v13333_v45  ;;  %6907 = vmatprep.mubr.bf16.mxu0 %v12543_v18  ;;  %v12111_v20 = vld [vmem:[#allocation6 + $0xe54] ss:$24 sps:$4 sm:$0xff]   ;;  %v12546_v23 = vld [vmem:[#allocation3 + $0x248] ss:$56 sps:$4 sm:$0xff]  }
 0x2bd   :  { %7020 = vmatprep.mubr.bf16.mxu1 %v12544_v2  ;;  %v6225_v7 = vpop.f32.mrf.mxu0  ;;  %v12114_v45 = vld [vmem:[#allocation6 + $0x1154] ss:$24 sps:$4 sm:$0xff]   ;;  %v12112_v61 = vld [vmem:[#allocation6 + $0x1150] ss:$24 sps:$4 sm:$0xff]  }
 0x2be   :  { %v6338_v37 = vpop.f32.mrf.mxu1  ;;  %v13429_v49 = vadd.f32 %v6336_v46, %v6224_v11  ;;  %v6226_v26 = vadd.f32 %v6225_v7, %v13336_v12  ;;  %7070 = vmatpush2.bf16.msra.mxu0 %v12097_v60  ;;  %v12547_v2 = vld [vmem:[#allocation3 + $0x2b4] ss:$56 sps:$4 sm:$0xff]  }
 0x2bf   :  { %7183 = vmatpush2.bf16.msra.mxu1 %v12100_v31  ;;  %v6227_v9 = vpop.f32.mrf.mxu0  ;;  %7071 = vmatprep.subr.bf16.mxu0 %v12105_v42  ;;  %v12109_v31 = vld [vmem:[#allocation6 + $0xe50] ss:$24 sps:$4 sm:$0xff]   ;;  %v12548_v7 = vld [vmem:[#allocation3 + $0x2bc] ss:$56 sps:$4 sm:$0xff]  }
 0x2c0   :  { %v6340_v58 = vpop.f32.mrf.mxu1  ;;  %7184 = vmatprep.subr.bf16.mxu1 %v12108_v44  ;;  %v13432_v0 = vadd.f32 %v6338_v37, %v6226_v26  ;;  %v6228_v48 = vadd.f32 %v6227_v9, %v13339_v14  ;;  %v12117_v44 = vld [vmem:[#allocation6 + $0xe24] ss:$24 sps:$4 sm:$0xff]   ;;  %v12118_v9 = vld [vmem:[#allocation6 + $0x1120] ss:$24 sps:$4 sm:$0xff]  }
 0x2c1   :  { %v6231_v35 = vpop.f32.mrf.mxu0  ;;  %6908 = vmatmul.mubr.bf16.gmra.mxu0 %v12545_v3  ;;  %v12120_v14 = vld [vmem:[#allocation6 + $0x1124] ss:$24 sps:$4 sm:$0xff]  }
 0x2c2   :  { %v6344_v51 = vpop.f32.mrf.mxu1  ;;  %7021 = vmatmul.mubr.bf16.gmra.mxu1 %v12546_v23  ;;  %v13435_v12 = vadd.f32 %v6340_v58, %v6228_v48  ;;  %v6232_v60 = vadd.f32 %v6231_v35, %v13342_v16  ;;  %7072 = vmatpush2.bf16.msra.mxu0 %v12103_v43  ;;  %v12549_v23 = vld [vmem:[#allocation3 + $0x2b0] ss:$56 sps:$4 sm:$0xff]  }
 0x2c3   :  { %7185 = vmatpush2.bf16.msra.mxu1 %v12106_v13  ;;  %v6233_v46 = vpop.f32.mrf.mxu0  ;;  %7073 = vmatprep.subr.bf16.mxu0 %v12111_v20  ;;  %v12115_v13 = vld [vmem:[#allocation6 + $0xe20] ss:$24 sps:$4 sm:$0xff]  }
 0x2c4   :  { %v6346_v42 = vpop.f32.mrf.mxu1  ;;  %7186 = vmatprep.subr.bf16.mxu1 %v12114_v45  ;;  %v13438_v11 = vadd.f32 %v6344_v51, %v6232_v60  ;;  %v6234_v18 = vadd.f32 %v6233_v46, %v13345_v32  ;;  %6917 = vmatprep.mubr.bf16.mxu0 %v12547_v2  ;;  %v12123_v45 = vld [vmem:[#allocation6 + $0xdf4] ss:$24 sps:$4 sm:$0xff]   ;;  %v12550_v60 = vld [vmem:[#allocation3 + $0x2b8] ss:$56 sps:$4 sm:$0xff]  }
 0x2c5   :  { %7030 = vmatprep.mubr.bf16.mxu1 %v12548_v7  ;;  %v6235_v37 = vpop.f32.mrf.mxu0  ;;  %v12126_v32 = vld [vmem:[#allocation6 + $0x10f4] ss:$24 sps:$4 sm:$0xff]   ;;  %v12124_v46 = vld [vmem:[#allocation6 + $0x10f0] ss:$24 sps:$4 sm:$0xff]   ;;  %v12551_v7 = vld [vmem:[#allocation3 + $0x324] ss:$56 sps:$4 sm:$0xff]  }
 0x2c6   :  { %v6348_v16 = vpop.f32.mrf.mxu1  ;;  %v13441_v26 = vadd.f32 %v6346_v42, %v6234_v18  ;;  %v6236_v43 = vadd.f32 %v6235_v37, %v13348_v57  ;;  %7074 = vmatpush2.bf16.msra.mxu0 %v12109_v31  ;;  %v12552_v37 = vld [vmem:[#allocation3 + $0x32c] ss:$56 sps:$4 sm:$0xff]  }
 0x2c7   :  { %7187 = vmatpush2.bf16.msra.mxu1 %v12112_v61  ;;  %v6237_v58 = vpop.f32.mrf.mxu0  ;;  %7075 = vmatprep.subr.bf16.mxu0 %v12117_v44  ;;  %v12121_v61 = vld [vmem:[#allocation6 + $0xdf0] ss:$24 sps:$4 sm:$0xff]  }
 0x2c8   :  { %v6350_v20 = vpop.f32.mrf.mxu1  ;;  %7188 = vmatprep.subr.bf16.mxu1 %v12120_v14  ;;  %v13444_v48 = vadd.f32 %v6348_v16, %v6236_v43  ;;  %v6238_v35 = vadd.f32 %v6237_v58, %v13351_v30  ;;  %v12129_v14 = vld [vmem:[#allocation6 + $0xdc4] ss:$24 sps:$4 sm:$0xff]   ;;  %v12130_v58 = vld [vmem:[#allocation6 + $0x10c0] ss:$24 sps:$4 sm:$0xff]  }
 0x2c9   :  { %v6241_v51 = vpop.f32.mrf.mxu0  ;;  %6918 = vmatmul.mubr.bf16.gmra.mxu0 %v12549_v23  ;;  %v12132_v30 = vld [vmem:[#allocation6 + $0x10c4] ss:$24 sps:$4 sm:$0xff]  }
 0x2ca   :  { %v6354_v3 = vpop.f32.mrf.mxu1  ;;  %7031 = vmatmul.mubr.bf16.gmra.mxu1 %v12550_v60  ;;  %v13447_v57 = vadd.f32 %v6350_v20, %v6238_v35  ;;  %v6242_v31 = vadd.f32 %v6241_v51, %v13354_v63  ;;  %7076 = vmatpush2.bf16.msra.mxu0 %v12115_v13  ;;  %v12553_v60 = vld [vmem:[#allocation3 + $0x320] ss:$56 sps:$4 sm:$0xff]  }
 0x2cb   :  { %7189 = vmatpush2.bf16.msra.mxu1 %v12118_v9  ;;  %v6243_v42 = vpop.f32.mrf.mxu0  ;;  %7077 = vmatprep.subr.bf16.mxu0 %v12123_v45  ;;  %v12127_v9 = vld [vmem:[#allocation6 + $0xdc0] ss:$24 sps:$4 sm:$0xff]  }
 0x2cc   :  { %v6356_v44 = vpop.f32.mrf.mxu1  ;;  %7190 = vmatprep.subr.bf16.mxu1 %v12126_v32  ;;  %v13450_v18 = vadd.f32 %v6354_v3, %v6242_v31  ;;  %v6244_v2 = vadd.f32 %v6243_v42, %v13357_v4  ;;  %6927 = vmatprep.mubr.bf16.mxu0 %v12551_v7  ;;  %v12135_v32 = vld [vmem:[#allocation6 + $0xd94] ss:$24 sps:$4 sm:$0xff]   ;;  %v12554_v31 = vld [vmem:[#allocation3 + $0x328] ss:$56 sps:$4 sm:$0xff]  }
 0x2cd   :  { %7040 = vmatprep.mubr.bf16.mxu1 %v12552_v37  ;;  %v6245_v16 = vpop.f32.mrf.mxu0  ;;  %v12138_v4 = vld [vmem:[#allocation6 + $0x1094] ss:$24 sps:$4 sm:$0xff]   ;;  %v12136_v42 = vld [vmem:[#allocation6 + $0x1090] ss:$24 sps:$4 sm:$0xff]   ;;  %v12555_v37 = vld [vmem:[#allocation3 + $0x24] ss:$56 sps:$4 sm:$0xff]  }
 0x2ce   :  { %v6358_v63 = vpop.f32.mrf.mxu1  ;;  %v13453_v43 = vadd.f32 %v6356_v44, %v6244_v2  ;;  %v6246_v13 = vadd.f32 %v6245_v16, %v13360_v22  ;;  %7078 = vmatpush2.bf16.msra.mxu0 %v12121_v61  ;;  %v12556_v16 = vld [vmem:[#allocation3 + $0x2c] ss:$56 sps:$4 sm:$0xff]  }
 0x2cf   :  { %7191 = vmatpush2.bf16.msra.mxu1 %v12124_v46  ;;  %v6247_v20 = vpop.f32.mrf.mxu0  ;;  %7079 = vmatprep.subr.bf16.mxu0 %v12129_v14  ;;  %v12133_v46 = vld [vmem:[#allocation6 + $0xd90] ss:$24 sps:$4 sm:$0xff]  }
 0x2d0   :  { %v6360_v45 = vpop.f32.mrf.mxu1  ;;  %7192 = vmatprep.subr.bf16.mxu1 %v12132_v30  ;;  %v13456_v35 = vadd.f32 %v6358_v63, %v6246_v13  ;;  %v6248_v51 = vadd.f32 %v6247_v20, %v13363_v24  ;;  %v12141_v30 = vld [vmem:[#allocation6 + $0x1364] ss:$24 sps:$4 sm:$0xff]   ;;  %v12142_v20 = vld [vmem:[#allocation9 + $0x150] ss:$24 sps:$4 sm:$0xff]  }
 0x2d1   :  { %v6251_v3 = vpop.f32.mrf.mxu0  ;;  %6928 = vmatmul.mubr.bf16.gmra.mxu0 %v12553_v60  ;;  %v12144_v24 = vld [vmem:[#allocation9 + $0x154] ss:$24 sps:$4 sm:$0xff]  }
 0x2d2   :  { %v6364_v23 = vpop.f32.mrf.mxu1  ;;  %7041 = vmatmul.mubr.bf16.gmra.mxu1 %v12554_v31  ;;  %v13459_v22 = vadd.f32 %v6360_v45, %v6248_v51  ;;  %v6252_v61 = vadd.f32 %v6251_v3, %v13366_v25  ;;  %7080 = vmatpush2.bf16.msra.mxu0 %v12127_v9  ;;  %v12150_v51 = vld [vmem:[#allocation9 + $0x124] ss:$24 sps:$4 sm:$0xff]  }
 0x2d3   :  { %7193 = vmatpush2.bf16.msra.mxu1 %v12130_v58  ;;  %v6253_v44 = vpop.f32.mrf.mxu0  ;;  %7081 = vmatprep.subr.bf16.mxu0 %v12135_v32  ;;  %v12139_v58 = vld [vmem:[#allocation6 + $0x1360] ss:$24 sps:$4 sm:$0xff]  }
 0x2d4   :  { %v6366_v14 = vpop.f32.mrf.mxu1  ;;  %7194 = vmatprep.subr.bf16.mxu1 %v12138_v4  ;;  %v13462_v2 = vadd.f32 %v6364_v23, %v6252_v61  ;;  %v6254_v7 = vadd.f32 %v6253_v44, %v13369_v54  ;;  %7083 = vmatprep.mubr.bf16.mxu0 %v12555_v37  ;;  %v14396_v4 = vsub.s32 2, %v13098_v55  ;;  %v12147_v54 = vld [vmem:[#allocation6 + $0x1334] ss:$24 sps:$4 sm:$0xff]   ;;  %v12557_v61 = vld [vmem:[#allocation3 + $0x20] ss:$56 sps:$4 sm:$0xff]  }
 0x2d5   :  { %7196 = vmatprep.mubr.bf16.mxu1 %v12556_v16  ;;  %v6255_v63 = vpop.f32.mrf.mxu0  ;;  %v12153_v16 = vld [vmem:[#allocation6 + $0x1304] ss:$24 sps:$4 sm:$0xff]  }
 0x2d6   :  { %v6368_v25 = vpop.f32.mrf.mxu1  ;;  %v13465_v13 = vadd.f32 %v6366_v14, %v6254_v7  ;;  %v6256_v9 = vadd.f32 %v6255_v63, %v13372_v53  ;;  %7082 = vmatpush2.bf16.msra.mxu0 %v12133_v46  ;;  %v12558_v53 = vld [vmem:[#allocation3 + $0x28] ss:$56 sps:$4 sm:$0xff]   ;;  %v14397_v46 = vsub.s32 3, %v13098_v55  ;;  %v12156_v63 = vld [vmem:[#allocation9 + $0xf4] ss:$24 sps:$4 sm:$0xff]  }
 0x2d7   :  { %7195 = vmatpush2.bf16.msra.mxu1 %v12136_v42  ;;  %v6257_v45 = vpop.f32.mrf.mxu0  ;;  %7277 = vmatprep.subr.bf16.mxu0 %v12141_v30  ;;  %v12145_v14 = vld [vmem:[#allocation6 + $0x1330] ss:$24 sps:$4 sm:$0xff]  }
 0x2d8   :  { %v6370_v32 = vpop.f32.mrf.mxu1  ;;  %8145 = vmatprep.subr.bf16.mxu1 %v12144_v24  ;;  %v13469_v3 = vadd.f32 %v6368_v25, %v6256_v9  ;;  %v6258_v23 = vadd.f32 %v6257_v45, %v13375_v1  ;;  %v12148_v30 = vld [vmem:[#allocation9 + $0x120] ss:$24 sps:$4 sm:$0xff]   ;;  %v12560_v45 = vld [vmem:[#allocation3 + $0x94] ss:$56 sps:$4 sm:$0xff]  }
 0x2d9   :  { %v6407_v60 = vpop.f32.mrf.mxu0  ;;  %7084 = vmatmul.mubr.bf16.vlgmr.msra.gmra.mxu0 %v12557_v61  ;;  %v12559_v24 = vld [vmem:[#allocation8] sm:$0x3f] }
 0x2da   :  { %v6520_v31 = vpop.f32.mrf.mxu1  ;;  %7197 = vmatmul.mubr.bf16.vlgmr.msra.gmra.mxu1 %v12558_v53  ;;  %v13473_v42 = vadd.f32 %v6370_v32, %v6258_v23  ;;  %v6408_v44 = vadd.f32 %v6407_v60, %v13378_v41  ;;  %7278 = vmatpush1.bf16.msra.mxu0 %v12139_v58  ;;  %v13478_v1 = vrot.slane %v12559_v24, %v14396_v4  ;;  %v12561_v41 = vld [vmem:[#allocation3 + $0x9c] ss:$56 sps:$4 sm:$0xff]  }
 0x2db   :  { %8146 = vmatpush1.bf16.msra.mxu1 %v12142_v20  ;;  %v6409_v7 = vpop.f32.mrf.mxu0  ;;  %7279 = vmatprep.subr.bf16.mxu0 %v12147_v54  ;;  %v13483_v58 = vrot.slane %v12559_v24, %v14397_v46  ;;  %v12151_v54 = vld [vmem:[#allocation6 + $0x1300] ss:$24 sps:$4 sm:$0xff]   ;;  %v12159_v53 = vld [vmem:[#allocation6 + $0x12d4] ss:$24 sps:$4 sm:$0xff]  }
 0x2dc   :  { %v6522_v37 = vpop.f32.mrf.mxu1  ;;  %8147 = vmatprep.subr.bf16.mxu1 %v12150_v51  ;;  %v6521_v25 = vadd.f32 %v6520_v31, %v6408_v44  ;;  %v6410_v9 = vadd.f32 %v6409_v7, %v13381_v38  ;;  %7093 = vmatprep.mubr.bf16.mxu0 %v12560_v45  ;;  %v12154_v51 = vld [vmem:[#allocation9 + $0xf0] ss:$24 sps:$4 sm:$0xff]   ;;  %v12162_v44 = vld [vmem:[#allocation9 + $0xc4] ss:$24 sps:$4 sm:$0xff]   ;;  %v12316_v46 = vld [vmem:[#allocation9 + $0x2b4] ss:$24 sps:$4 sm:$0xff]  }
 0x2dd   :  { %7206 = vmatprep.mubr.bf16.mxu1 %v12561_v41  ;;  %v6411_v20 = vpop.f32.mrf.mxu0 }
 0x2de   :  { %v6524_v32 = vpop.f32.mrf.mxu1  ;;  %v6523_v23 = vadd.f32 %v6522_v37, %v6410_v9  ;;  %v6412_v60 = vadd.f32 %v6411_v20, %v13384_v56  ;;  %7280 = vmatpush1.bf16.msra.mxu0 %v12145_v14  ;;  %v7715_v31 = vadd.f32 %v13478_v1, %v6521_v25  ;;  %v12562_v56 = vld [vmem:[#allocation3 + $0x90] ss:$56 sps:$4 sm:$0xff]  }
 0x2df   :  { %8148 = vmatpush1.bf16.msra.mxu1 %v12148_v30  ;;  %v6413_v38 = vpop.f32.mrf.mxu0  ;;  %7281 = vmatprep.subr.bf16.mxu0 %v12153_v16  ;;  %v12563_v14 = vld [vmem:[#allocation3 + $0x98] ss:$56 sps:$4 sm:$0xff]  }
 0x2e0   :  { %v6526_v61 = vpop.f32.mrf.mxu1  ;;  %8149 = vmatprep.subr.bf16.mxu1 %v12156_v63  ;;  %v6525_v7 = vadd.f32 %v6524_v32, %v6412_v60  ;;  %v6414_v24 = vadd.f32 %v6413_v38, %v13387_v28  ;;  %v7716_v45 = vadd.f32 %v13483_v58, %v6523_v23  ;;  %v12157_v16 = vld [vmem:[#allocation6 + $0x12d0] ss:$24 sps:$4 sm:$0xff]   ;;  %v7811_v20 = vmax.f32 %v7715_v31, 0.0  ;;  %v12165_v23 = vld [vmem:[#allocation6 + $0x12a4] ss:$24 sps:$4 sm:$0xff]  }
 0x2e1   :  { %v6417_v37 = vpop.f32.mrf.mxu0  ;;  %7094 = vmatmul.mubr.bf16.gmra.mxu0 %v12562_v56  ;;  %v12160_v63 = vld [vmem:[#allocation9 + $0xc0] ss:$24 sps:$4 sm:$0xff]   ;;  %v12168_v60 = vld [vmem:[#allocation9 + $0x94] ss:$24 sps:$4 sm:$0xff]  }
 0x2e2   :  { %v6530_v9 = vpop.f32.mrf.mxu1  ;;  %7207 = vmatmul.mubr.bf16.gmra.mxu1 %v12563_v14  ;;  %v7721_v30 = vadd.f32 %v13478_v1, %v6525_v7  ;;  %v6527_v25 = vadd.f32 %v6526_v61, %v6414_v24  ;;  %v6418_v41 = vadd.f32 %v6417_v37, %v13390_v39  ;;  %7282 = vmatpush1.bf16.msra.mxu0 %v12151_v54  ;;  %v12564_v61 = vld [vmem:[#allocation3 + $0x104] ss:$56 sps:$4 sm:$0xff]   ;;  %v7812_v24 = vmax.f32 %v7716_v45, 0.0 }
 0x2e3   :  { %8150 = vmatpush1.bf16.msra.mxu1 %v12154_v51  ;;  %v6419_v32 = vpop.f32.mrf.mxu0  ;;  %7283 = vmatprep.subr.bf16.mxu0 %v12159_v53  ;;  %v12565_v39 = vld [vmem:[#allocation3 + $0x10c] ss:$56 sps:$4 sm:$0xff]  }
 0x2e4   :  { %v6532_v28 = vpop.f32.mrf.mxu1  ;;  %8151 = vmatprep.subr.bf16.mxu1 %v12162_v44  ;;  %v7817_v38 = vmax.f32 %v7721_v30, 0.0  ;;  %v7722_v56 = vadd.f32 %v13483_v58, %v6527_v25  ;;  %v6531_v14 = vadd.f32 %v6530_v9, %v6418_v41  ;;  %v6420_v7 = vadd.f32 %v6419_v32, %v13393_v19  ;;  %7103 = vmatprep.mubr.bf16.mxu0 %v12564_v61  ;;  %v12163_v44 = vld [vmem:[#allocation6 + $0x12a0] ss:$24 sps:$4 sm:$0xff]   ;;  %v12171_v19 = vld [vmem:[#allocation6 + $0x1274] ss:$24 sps:$4 sm:$0xff]  }
 0x2e5   :  { %7216 = vmatprep.mubr.bf16.mxu1 %v12565_v39  ;;  %v6421_v54 = vpop.f32.mrf.mxu0  ;;  %v12166_v30 = vld [vmem:[#allocation9 + $0x90] ss:$24 sps:$4 sm:$0xff]   ;;  %v12174_v32 = vld [vmem:[#allocation9 + $0x64] ss:$24 sps:$4 sm:$0xff]  }
 0x2e6   :  { %v6534_v51 = vpop.f32.mrf.mxu1  ;;  %v13493_v31 = vpack.c.bf16 %v7817_v38, %v7811_v20  ;;  %v7818_v37 = vmax.f32 %v7722_v56, 0.0  ;;  %v6533_v53 = vadd.f32 %v6532_v28, %v6420_v7  ;;  %7284 = vmatpush1.bf16.msra.mxu0 %v12157_v16  ;;  %v6422_v25 = vadd.f32 %v6421_v54, %v13396_v40  ;;  %v12567_v38 = vld [vmem:[#allocation3 + $0x108] ss:$56 sps:$4 sm:$0xff]  }
 0x2e7   :  { %8152 = vmatpush1.bf16.msra.mxu1 %v12160_v63  ;;  %v6423_v9 = vpop.f32.mrf.mxu0  ;;  %7285 = vmatprep.subr.bf16.mxu0 %v12165_v23  ;;  %v7727_v45 = vadd.f32 %v13478_v1, %v6531_v14  ;;  %v12566_v63 = vld [vmem:[#allocation3 + $0x100] ss:$56 sps:$4 sm:$0xff]   ;;  %v12169_v23 = vld [vmem:[#allocation6 + $0x1270] ss:$24 sps:$4 sm:$0xff]  }
 0x2e8   :  { %v6536_v41 = vpop.f32.mrf.mxu1  ;;  %8153 = vmatprep.subr.bf16.mxu1 %v12168_v60  ;;  %v6424_v61 = vadd.f32 %v6423_v9, %v13399_v47  ;;  %v13497_v39 = vpack.c.bf16 %v7818_v37, %v7812_v24  ;;  %v6535_v20 = vadd.f32 %v6534_v51, %v6422_v25  ;;  %v12172_v60 = vld [vmem:[#allocation9 + $0x60] ss:$24 sps:$4 sm:$0xff]   ;;  %v7728_v47 = vadd.f32 %v13483_v58, %v6533_v53  ;;  %v12180_v24 = vld [vmem:[#allocation9 + $0x34] ss:$24 sps:$4 sm:$0xff]  }
 0x2e9   :  { %v6427_v28 = vpop.f32.mrf.mxu0  ;;  %7104 = vmatmul.mubr.bf16.gmra.mxu0 %v12566_v63  ;;  %v12177_v51 = vld [vmem:[#allocation6 + $0x1244] ss:$24 sps:$4 sm:$0xff]   ;;  %v12178_v63 = vld [vmem:[#allocation9 + $0x30] ss:$24 sps:$4 sm:$0xff]  }
 0x2ea   :  { %v6540_v16 = vpop.f32.mrf.mxu1  ;;  %7217 = vmatmul.mubr.bf16.gmra.mxu1 %v12567_v38  ;;  %v6537_v40 = vadd.f32 %v6536_v41, %v6424_v61  ;;  %v6428_v56 = vadd.f32 %v6427_v28, %v13402_v50  ;;  %7286 = vmatpush1.bf16.msra.mxu0 %v12163_v44  ;;  %v7733_v7 = vadd.f32 %v13478_v1, %v6535_v20  ;;  %v12568_v50 = vld [vmem:[#allocation3 + $0x174] ss:$56 sps:$4 sm:$0xff]   ;;  %v7824_v38 = vmax.f32 %v7728_v47, 0.0  ;;  %v12571_v47 = vld [vmem:[#allocation3 + $0x178] ss:$56 sps:$4 sm:$0xff]  }
 0x2eb   :  { %8154 = vmatpush1.bf16.msra.mxu1 %v12166_v30  ;;  %v6429_v54 = vpop.f32.mrf.mxu0  ;;  %7287 = vmatprep.subr.bf16.mxu0 %v12171_v19  ;;  %v12569_v44 = vld [vmem:[#allocation3 + $0x17c] ss:$56 sps:$4 sm:$0xff]   ;;  %v7823_v30 = vmax.f32 %v7727_v45, 0.0 }
 0x2ec   :  { %v6542_v14 = vpop.f32.mrf.mxu1  ;;  %8155 = vmatprep.subr.bf16.mxu1 %v12174_v32  ;;  %v7734_v37 = vadd.f32 %v13483_v58, %v6537_v40  ;;  %v6541_v25 = vadd.f32 %v6540_v16, %v6428_v56  ;;  %v6430_v9 = vadd.f32 %v6429_v54, %v13405_v27  ;;  %7113 = vmatprep.mubr.bf16.mxu0 %v12568_v50  ;;  %v7829_v41 = vmax.f32 %v7733_v7, 0.0  ;;  %v12175_v32 = vld [vmem:[#allocation6 + $0x1240] ss:$24 sps:$4 sm:$0xff]   ;;  %v12183_v45 = vld [vmem:[#allocation6 + $0x1214] ss:$24 sps:$4 sm:$0xff]  }
 0x2ed   :  { %7226 = vmatprep.mubr.bf16.mxu1 %v12569_v44  ;;  %v6431_v53 = vpop.f32.mrf.mxu0  ;;  %v12186_v7 = vld [vmem:[#allocation9 + $0x4] ss:$24 sps:$4 sm:$0xff]   ;;  %v12184_v44 = vld [vmem:[#allocation9] ss:$24 sps:$4 sm:$0xff]  }
 0x2ee   :  { %v6544_v61 = vpop.f32.mrf.mxu1  ;;  %v7830_v20 = vmax.f32 %v7734_v37, 0.0  ;;  %v6543_v28 = vadd.f32 %v6542_v14, %v6430_v9  ;;  %v6432_v19 = vadd.f32 %v6431_v53, %v13408_v17  ;;  %7288 = vmatpush1.bf16.msra.mxu0 %v12169_v23  ;;  %v13506_v16 = vpack.c.bf16 %v7829_v41, %v7823_v30  ;;  %v12570_v37 = vld [vmem:[#allocation3 + $0x170] ss:$56 sps:$4 sm:$0xff]   ;;  %v12189_v53 = vld [vmem:[#allocation6 + $0x14e4] ss:$24 sps:$4 sm:$0xff]  }
 0x2ef   :  { %8156 = vmatpush1.bf16.msra.mxu1 %v12172_v60  ;;  %v7739_v27 = vadd.f32 %v13478_v1, %v6541_v25  ;;  %v6433_v40 = vpop.f32.mrf.mxu0  ;;  %7289 = vmatprep.subr.bf16.mxu0 %v12177_v51 }
 0x2f0   :  { %v6546_v56 = vpop.f32.mrf.mxu1  ;;  %8157 = vmatprep.subr.bf16.mxu1 %v12180_v24  ;;  %v6545_v54 = vadd.f32 %v6544_v61, %v6432_v19  ;;  %v6434_v14 = vadd.f32 %v6433_v40, %v13411_v52  ;;  %v7740_v17 = vadd.f32 %v13483_v58, %v6543_v28  ;;  %v13511_v9 = vpack.c.bf16 %v7830_v20, %v7824_v38  ;;  %v12181_v24 = vld [vmem:[#allocation6 + $0x1210] ss:$24 sps:$4 sm:$0xff]   ;;  %v12572_v40 = vld [vmem:[#allocation3 + $0x1e4] ss:$56 sps:$4 sm:$0xff]  }
 0x2f1   :  { %v6437_v23 = vpop.f32.mrf.mxu0  ;;  %7114 = vmatmul.mubr.bf16.gmra.mxu0 %v12570_v37  ;;  %v7835_v52 = vmax.f32 %v7739_v27, 0.0  ;;  %v12192_v61 = vld [vmem:[#allocation9 + $0x2d4] ss:$24 sps:$4 sm:$0xff]  }
 0x2f2   :  { %v6550_v60 = vpop.f32.mrf.mxu1  ;;  %7227 = vmatmul.mubr.bf16.gmra.mxu1 %v12571_v47  ;;  %v7745_v25 = vadd.f32 %v13478_v1, %v6545_v54  ;;  %v6547_v50 = vadd.f32 %v6546_v56, %v6434_v14  ;;  %v6438_v51 = vadd.f32 %v6437_v23, %v13414_v8  ;;  %7290 = vmatpush1.bf16.msra.mxu0 %v12175_v32  ;;  %v12573_v8 = vld [vmem:[#allocation3 + $0x1ec] ss:$56 sps:$4 sm:$0xff]   ;;  %v7836_v56 = vmax.f32 %v7740_v17, 0.0 }
 0x2f3   :  { %8158 = vmatpush1.bf16.msra.mxu1 %v12178_v63  ;;  %v6439_v30 = vpop.f32.mrf.mxu0  ;;  %7291 = vmatprep.subr.bf16.mxu0 %v12183_v45  ;;  %v12190_v14 = vld [vmem:[#allocation9 + $0x2d0] ss:$24 sps:$4 sm:$0xff]   ;;  %v12198_v47 = vld [vmem:[#allocation9 + $0x2a4] ss:$24 sps:$4 sm:$0xff]  }
 0x2f4   :  { %v6552_v41 = vpop.f32.mrf.mxu1  ;;  %8159 = vmatprep.subr.bf16.mxu1 %v12186_v7  ;;  %v7841_v28 = vmax.f32 %v7745_v25, 0.0  ;;  %v7746_v20 = vadd.f32 %v13483_v58, %v6547_v50  ;;  %v6551_v19 = vadd.f32 %v6550_v60, %v6438_v51  ;;  %v6440_v38 = vadd.f32 %v6439_v30, %v13417_v15  ;;  %7123 = vmatprep.mubr.bf16.mxu0 %v12572_v40  ;;  %v12187_v7 = vld [vmem:[#allocation6 + $0x14e0] ss:$24 sps:$4 sm:$0xff]   ;;  %v12195_v15 = vld [vmem:[#allocation6 + $0x14b4] ss:$24 sps:$4 sm:$0xff]  }
 0x2f5   :  { %7236 = vmatprep.mubr.bf16.mxu1 %v12573_v8  ;;  %v6441_v32 = vpop.f32.mrf.mxu0  ;;  %v12575_v30 = vld [vmem:[#allocation3 + $0x1e8] ss:$56 sps:$4 sm:$0xff]   ;;  %v12204_v40 = vld [vmem:[#allocation9 + $0x274] ss:$24 sps:$4 sm:$0xff]  }
 0x2f6   :  { %v6554_v63 = vpop.f32.mrf.mxu1  ;;  %v13517_v27 = vpack.c.bf16 %v7841_v28, %v7835_v52  ;;  %v7842_v54 = vmax.f32 %v7746_v20, 0.0  ;;  %v6553_v45 = vadd.f32 %v6552_v41, %v6440_v38  ;;  %7292 = vmatpush1.bf16.msra.mxu0 %v12181_v24  ;;  %v6442_v23 = vadd.f32 %v6441_v32, %v13420_v10  ;;  %v12201_v38 = vld [vmem:[#allocation6 + $0x1484] ss:$24 sps:$4 sm:$0xff]  }
 0x2f7   :  { %8160 = vmatpush1.bf16.msra.mxu1 %v12184_v44  ;;  %v6443_v60 = vpop.f32.mrf.mxu0  ;;  %7293 = vmatprep.subr.bf16.mxu0 %v12189_v53  ;;  %v7751_v17 = vadd.f32 %v13478_v1, %v6551_v19  ;;  %v12574_v44 = vld [vmem:[#allocation3 + $0x1e0] ss:$56 sps:$4 sm:$0xff]   ;;  %v12193_v53 = vld [vmem:[#allocation6 + $0x14b0] ss:$24 sps:$4 sm:$0xff]  }
 0x2f8   :  { %v6556_v37 = vpop.f32.mrf.mxu1  ;;  %8161 = vmatprep.subr.bf16.mxu1 %v12192_v61  ;;  %v6444_v25 = vadd.f32 %v6443_v60, %v13423_v29  ;;  %v13521_v50 = vpack.c.bf16 %v7842_v54, %v7836_v56  ;;  %v6555_v51 = vadd.f32 %v6554_v63, %v6442_v23  ;;  %v12196_v61 = vld [vmem:[#allocation9 + $0x2a0] ss:$24 sps:$4 sm:$0xff]   ;;  %v7752_v29 = vadd.f32 %v13483_v58, %v6553_v45 }
 0x2f9   :  { %v6447_v52 = vpop.f32.mrf.mxu0  ;;  %7124 = vmatmul.mubr.bf16.gmra.mxu0 %v12574_v44  ;;  %v12577_v56 = vld [vmem:[#allocation3 + $0x25c] ss:$56 sps:$4 sm:$0xff]   ;;  %v7847_v54 = vmax.f32 %v7751_v17, 0.0  ;;  %v12210_v44 = vld [vmem:[#allocation9 + $0x244] ss:$24 sps:$4 sm:$0xff]  }
 0x2fa   :  { %v6560_v24 = vpop.f32.mrf.mxu1  ;;  %7237 = vmatmul.mubr.bf16.gmra.mxu1 %v12575_v30  ;;  %v6557_v10 = vadd.f32 %v6556_v37, %v6444_v25  ;;  %v6448_v41 = vadd.f32 %v6447_v52, %v13426_v6  ;;  %7294 = vmatpush2.bf16.msra.mxu0 %v12187_v7  ;;  %v7757_v28 = vadd.f32 %v13478_v1, %v6555_v51  ;;  %v12576_v6 = vld [vmem:[#allocation3 + $0x254] ss:$56 sps:$4 sm:$0xff]   ;;  %v7848_v25 = vmax.f32 %v7752_v29, 0.0  ;;  %v12579_v29 = vld [vmem:[#allocation3 + $0x258] ss:$56 sps:$4 sm:$0xff]  }
 0x2fb   :  { %8162 = vmatpush2.bf16.msra.mxu1 %v12190_v14  ;;  %v6449_v20 = vpop.f32.mrf.mxu0  ;;  %7295 = vmatprep.subr.bf16.mxu0 %v12195_v15  ;;  %v12199_v15 = vld [vmem:[#allocation6 + $0x1480] ss:$24 sps:$4 sm:$0xff]   ;;  %v12207_v17 = vld [vmem:[#allocation6 + $0x1454] ss:$24 sps:$4 sm:$0xff]  }
 0x2fc   :  { %v6562_v19 = vpop.f32.mrf.mxu1  ;;  %8163 = vmatprep.subr.bf16.mxu1 %v12198_v47  ;;  %v7758_v8 = vadd.f32 %v13483_v58, %v6557_v10  ;;  %v6561_v32 = vadd.f32 %v6560_v24, %v6448_v41  ;;  %v6450_v63 = vadd.f32 %v6449_v20, %v13429_v49  ;;  %7133 = vmatprep.mubr.bf16.mxu0 %v12576_v6  ;;  %v7853_v7 = vmax.f32 %v7757_v28, 0.0  ;;  %v12202_v47 = vld [vmem:[#allocation9 + $0x270] ss:$24 sps:$4 sm:$0xff]   ;;  %v12213_v6 = vld [vmem:[#allocation6 + $0x1424] ss:$24 sps:$4 sm:$0xff]  }
 0x2fd   :  { %7246 = vmatprep.mubr.bf16.mxu1 %v12577_v56  ;;  %v6451_v45 = vpop.f32.mrf.mxu0  ;;  %v12216_v56 = vld [vmem:[#allocation9 + $0x214] ss:$24 sps:$4 sm:$0xff]  }
 0x2fe   :  { %v6564_v14 = vpop.f32.mrf.mxu1  ;;  %v7854_v23 = vmax.f32 %v7758_v8, 0.0  ;;  %v6563_v60 = vadd.f32 %v6562_v19, %v6450_v63  ;;  %v6452_v37 = vadd.f32 %v6451_v45, %v13432_v0  ;;  %7296 = vmatpush2.bf16.msra.mxu0 %v12193_v53  ;;  %v13530_v51 = vpack.c.bf16 %v7853_v7, %v7847_v54  ;;  %v12208_v8 = vld [vmem:[#allocation9 + $0x240] ss:$24 sps:$4 sm:$0xff]  }
 0x2ff   :  { %8164 = vmatpush2.bf16.msra.mxu1 %v12196_v61  ;;  %v7763_v49 = vadd.f32 %v13478_v1, %v6561_v32  ;;  %v6453_v52 = vpop.f32.mrf.mxu0  ;;  %7297 = vmatprep.subr.bf16.mxu0 %v12201_v38  ;;  %v12578_v61 = vld [vmem:[#allocation3 + $0x250] ss:$56 sps:$4 sm:$0xff]  }
 0x300   :  { %v6566_v24 = vpop.f32.mrf.mxu1  ;;  %8165 = vmatprep.subr.bf16.mxu1 %v12204_v40  ;;  %v6565_v30 = vadd.f32 %v6564_v14, %v6452_v37  ;;  %v6454_v10 = vadd.f32 %v6453_v52, %v13435_v12  ;;  %v7764_v0 = vadd.f32 %v13483_v58, %v6563_v60  ;;  %v13535_v28 = vpack.c.bf16 %v7854_v23, %v7848_v25  ;;  %v12205_v40 = vld [vmem:[#allocation6 + $0x1450] ss:$24 sps:$4 sm:$0xff]   ;;  %v12580_v23 = vld [vmem:[#allocation3 + $0x2c4] ss:$56 sps:$4 sm:$0xff]   ;;  %v12211_v52 = vld [vmem:[#allocation6 + $0x1420] ss:$24 sps:$4 sm:$0xff]  }
 0x301   :  { %v6457_v41 = vpop.f32.mrf.mxu0  ;;  %7134 = vmatmul.mubr.bf16.gmra.mxu0 %v12578_v61  ;;  %v7859_v12 = vmax.f32 %v7763_v49, 0.0 }
 0x302   :  { %v6570_v53 = vpop.f32.mrf.mxu1  ;;  %7247 = vmatmul.mubr.bf16.gmra.mxu1 %v12579_v29  ;;  %v7769_v20 = vadd.f32 %v13478_v1, %v6565_v30  ;;  %v6567_v19 = vadd.f32 %v6566_v24, %v6454_v10  ;;  %v6458_v38 = vadd.f32 %v6457_v41, %v13438_v11  ;;  %7298 = vmatpush2.bf16.msra.mxu0 %v12199_v15  ;;  %v12581_v11 = vld [vmem:[#allocation3 + $0x2cc] ss:$56 sps:$4 sm:$0xff]   ;;  %v7860_v15 = vmax.f32 %v7764_v0, 0.0 }
 0x303   :  { %8166 = vmatpush2.bf16.msra.mxu1 %v12202_v47  ;;  %v6459_v32 = vpop.f32.mrf.mxu0  ;;  %7299 = vmatprep.subr.bf16.mxu0 %v12207_v17  ;;  %v12214_v24 = vld [vmem:[#allocation9 + $0x210] ss:$24 sps:$4 sm:$0xff]   ;;  %v12222_v10 = vld [vmem:[#allocation9 + $0x1e4] ss:$24 sps:$4 sm:$0xff]  }
 0x304   :  { %v6572_v63 = vpop.f32.mrf.mxu1  ;;  %8167 = vmatprep.subr.bf16.mxu1 %v12210_v44  ;;  %v7865_v54 = vmax.f32 %v7769_v20, 0.0  ;;  %v7770_v7 = vadd.f32 %v13483_v58, %v6567_v19  ;;  %v6571_v45 = vadd.f32 %v6570_v53, %v6458_v38  ;;  %v6460_v14 = vadd.f32 %v6459_v32, %v13441_v26  ;;  %7143 = vmatprep.mubr.bf16.mxu0 %v12580_v23  ;;  %v12219_v26 = vld [vmem:[#allocation6 + $0x13f4] ss:$24 sps:$4 sm:$0xff]   ;;  %v12582_v19 = vld [vmem:[#allocation3 + $0x2c0] ss:$56 sps:$4 sm:$0xff]  }
 0x305   :  { %7256 = vmatprep.mubr.bf16.mxu1 %v12581_v11  ;;  %v6461_v60 = vpop.f32.mrf.mxu0  ;;  %v12583_v38 = vld [vmem:[#allocation3 + $0x2c8] ss:$56 sps:$4 sm:$0xff]   ;;  %v12585_v23 = vld [vmem:[#allocation3 + $0x33c] ss:$56 sps:$4 sm:$0xff]  }
 0x306   :  { %v6574_v37 = vpop.f32.mrf.mxu1  ;;  %v13541_v47 = vpack.c.bf16 %v7865_v54, %v7859_v12  ;;  %v7866_v25 = vmax.f32 %v7770_v7, 0.0  ;;  %v6573_v49 = vadd.f32 %v6572_v63, %v6460_v14  ;;  %7300 = vmatpush2.bf16.msra.mxu0 %v12205_v40  ;;  %v6462_v17 = vadd.f32 %v6461_v60, %v13444_v48  ;;  %v12220_v12 = vld [vmem:[#allocation9 + $0x1e0] ss:$24 sps:$4 sm:$0xff]   ;;  %v12228_v54 = vld [vmem:[#allocation9 + $0x1b4] ss:$24 sps:$4 sm:$0xff]  }
 0x307   :  { %8168 = vmatpush2.bf16.msra.mxu1 %v12208_v8  ;;  %v6463_v44 = vpop.f32.mrf.mxu0  ;;  %7301 = vmatprep.subr.bf16.mxu0 %v12213_v6  ;;  %v7775_v0 = vadd.f32 %v13478_v1, %v6571_v45  ;;  %v12217_v8 = vld [vmem:[#allocation6 + $0x13f0] ss:$24 sps:$4 sm:$0xff]  }
 0x308   :  { %v6576_v30 = vpop.f32.mrf.mxu1  ;;  %8169 = vmatprep.subr.bf16.mxu1 %v12216_v56  ;;  %v6464_v41 = vadd.f32 %v6463_v44, %v13447_v57  ;;  %v13545_v53 = vpack.c.bf16 %v7866_v25, %v7860_v15  ;;  %v6575_v61 = vadd.f32 %v6574_v37, %v6462_v17  ;;  %v7776_v57 = vadd.f32 %v13483_v58, %v6573_v49  ;;  %v12225_v56 = vld [vmem:[#allocation6 + $0x13c4] ss:$24 sps:$4 sm:$0xff]   ;;  %v12226_v17 = vld [vmem:[#allocation9 + $0x1b0] ss:$24 sps:$4 sm:$0xff]  }
 0x309   :  { %v6467_v29 = vpop.f32.mrf.mxu0  ;;  %7144 = vmatmul.mubr.bf16.gmra.mxu0 %v12582_v19  ;;  %v7871_v11 = vmax.f32 %v7775_v0, 0.0 }
 0x30a   :  { %v6580_v20 = vpop.f32.mrf.mxu1  ;;  %7257 = vmatmul.mubr.bf16.gmra.mxu1 %v12583_v38  ;;  %v6577_v48 = vadd.f32 %v6576_v30, %v6464_v41  ;;  %v6468_v40 = vadd.f32 %v6467_v29, %v13450_v18  ;;  %7302 = vmatpush2.bf16.msra.mxu0 %v12211_v52  ;;  %v7781_v32 = vadd.f32 %v13478_v1, %v6575_v61  ;;  %v12584_v18 = vld [vmem:[#allocation3 + $0x334] ss:$56 sps:$4 sm:$0xff]   ;;  %v7872_v44 = vmax.f32 %v7776_v57, 0.0  ;;  %v12586_v38 = vld [vmem:[#allocation3 + $0x330] ss:$56 sps:$4 sm:$0xff]  }
 0x30b   :  { %8170 = vmatpush2.bf16.msra.mxu1 %v12214_v24  ;;  %v6469_v63 = vpop.f32.mrf.mxu0  ;;  %7303 = vmatprep.subr.bf16.mxu0 %v12219_v26  ;;  %v12223_v24 = vld [vmem:[#allocation6 + $0x13c0] ss:$24 sps:$4 sm:$0xff]   ;;  %v12231_v41 = vld [vmem:[#allocation6 + $0x1394] ss:$24 sps:$4 sm:$0xff]  }
 0x30c   :  { %v6582_v6 = vpop.f32.mrf.mxu1  ;;  %8171 = vmatprep.subr.bf16.mxu1 %v12222_v10  ;;  %v7782_v7 = vadd.f32 %v13483_v58, %v6577_v48  ;;  %v6581_v45 = vadd.f32 %v6580_v20, %v6468_v40  ;;  %v6470_v14 = vadd.f32 %v6469_v63, %v13453_v43  ;;  %7153 = vmatprep.mubr.bf16.mxu0 %v12584_v18  ;;  %v7877_v60 = vmax.f32 %v7781_v32, 0.0  ;;  %v12234_v29 = vld [vmem:[#allocation9 + $0x184] ss:$24 sps:$4 sm:$0xff]   ;;  %v12587_v48 = vld [vmem:[#allocation3 + $0x338] ss:$56 sps:$4 sm:$0xff]  }
 0x30d   :  { %7266 = vmatprep.mubr.bf16.mxu1 %v12585_v23  ;;  %v6471_v37 = vpop.f32.mrf.mxu0  ;;  %v12229_v32 = vld [vmem:[#allocation6 + $0x1390] ss:$24 sps:$4 sm:$0xff]   ;;  %v12588_v23 = vld [vmem:[#allocation3 + $0x34] ss:$56 sps:$4 sm:$0xff]  }
 0x30e   :  { %v6584_v15 = vpop.f32.mrf.mxu1  ;;  %v7878_v25 = vmax.f32 %v7782_v7, 0.0  ;;  %v6583_v49 = vadd.f32 %v6582_v6, %v6470_v14  ;;  %v6472_v52 = vadd.f32 %v6471_v37, %v13456_v35  ;;  %7304 = vmatpush2.bf16.msra.mxu0 %v12217_v8  ;;  %v13554_v30 = vpack.c.bf16 %v7877_v60, %v7871_v11 }
 0x30f   :  { %8172 = vmatpush2.bf16.msra.mxu1 %v12220_v12  ;;  %v7787_v43 = vadd.f32 %v13478_v1, %v6581_v45  ;;  %v6473_v26 = vpop.f32.mrf.mxu0  ;;  %7305 = vmatprep.subr.bf16.mxu0 %v12225_v56 }
 0x310   :  { %v6586_v10 = vpop.f32.mrf.mxu1  ;;  %8173 = vmatprep.subr.bf16.mxu1 %v12228_v54  ;;  %v6585_v0 = vadd.f32 %v6584_v15, %v6472_v52  ;;  %v6474_v61 = vadd.f32 %v6473_v26, %v13459_v22  ;;  %v7788_v35 = vadd.f32 %v13483_v58, %v6583_v49  ;;  %v13559_v40 = vpack.c.bf16 %v7878_v25, %v7872_v44  ;;  %v12232_v22 = vld [vmem:[#allocation9 + $0x180] ss:$24 sps:$4 sm:$0xff]   ;;  %v12237_v54 = vld [vmem:[#allocation9 + $0x15c] ss:$24 sps:$4 sm:$0xff]  }
 0x311   :  { %v6477_v20 = vpop.f32.mrf.mxu0  ;;  %7154 = vmatmul.mubr.bf16.gmra.mxu0 %v12586_v38  ;;  %v7883_v63 = vmax.f32 %v7787_v43, 0.0  ;;  %v12235_v25 = vld [vmem:[#allocation9 + $0x158] ss:$24 sps:$4 sm:$0xff]  }
 0x312   :  { %v6590_v19 = vpop.f32.mrf.mxu1  ;;  %7267 = vmatmul.mubr.bf16.gmra.mxu1 %v12587_v48  ;;  %v7793_v8 = vadd.f32 %v13478_v1, %v6585_v0  ;;  %v6587_v12 = vadd.f32 %v6586_v10, %v6474_v61  ;;  %v6478_v57 = vadd.f32 %v6477_v20, %v13462_v2  ;;  %7306 = vmatpush2.bf16.msra.mxu0 %v12223_v24  ;;  %v7884_v60 = vmax.f32 %v7788_v35, 0.0  ;;  %v12589_v0 = vld [vmem:[#allocation3 + $0x30] ss:$56 sps:$4 sm:$0xff]   ;;  %v12590_v38 = vld [vmem:[#allocation3 + $0xa4] ss:$56 sps:$4 sm:$0xff]  }
 0x313   :  { %8174 = vmatpush2.bf16.msra.mxu1 %v12226_v17  ;;  %8177 = vmatprep.mubr.bf16.mxu1 %v13149_v21  ;;  %v6479_v6 = vpop.f32.mrf.mxu0  ;;  %v12240_v17 = vld [vmem:[#allocation9 + $0x12c] ss:$24 sps:$4 sm:$0xff]   ;;  %v12243_v48 = vld [vmem:[#allocation9 + $0xfc] ss:$24 sps:$4 sm:$0xff]  }
 0x314   :  { %v6592_v56 = vpop.f32.mrf.mxu1  ;;  %7307 = vmatprep.subr.bf16.mxu0 %v12231_v41  ;;  %v7889_v7 = vmax.f32 %v7793_v8, 0.0  ;;  %v7794_v45 = vadd.f32 %v13483_v58, %v6587_v12  ;;  %v6591_v14 = vadd.f32 %v6590_v19, %v6478_v57  ;;  %v6480_v18 = vadd.f32 %v6479_v6, %v13465_v13  ;;  %8175 = vmatprep.subr.bf16.mxu1 %v12234_v29 }
 0x315   :  { %7309 = vmatprep.mubr.bf16.mxu0 %v12588_v23  ;;  %v6481_v2 = vpop.f32.mrf.mxu0 }
 0x316   :  { %v6594_v11 = vpop.f32.mrf.mxu1  ;;  %v13566_v37 = vpack.c.bf16 %v7889_v7, %v7883_v63  ;;  %v7890_v15 = vmax.f32 %v7794_v45, 0.0  ;;  %v6593_v21 = vadd.f32 %v6592_v56, %v6480_v18  ;;  %7308 = vmatpush2.bf16.msra.mxu0 %v12229_v32  ;;  %v6482_v49 = vadd.f32 %v6481_v2, %v13469_v3  ;;  %v12246_v45 = vld [vmem:[#allocation9 + $0xcc] ss:$24 sps:$4 sm:$0xff]   ;;  %v12591_v2 = vld [vmem:[#allocation3 + $0xa0] ss:$56 sps:$4 sm:$0xff]  }
 0x317   :  { %8176 = vmatpush2.bf16.msra.mxu1 %v12232_v22  ;;  %v6483_v52 = vpop.f32.mrf.mxu0  ;;  %8450 = vmatprep.subr.bf16.mxu0 %v12237_v54  ;;  %v7799_v43 = vadd.f32 %v13478_v1, %v6591_v14 }
 0x318   :  { %v6596_v24 = vpop.f32.mrf.mxu1  ;;  %v6484_v13 = vadd.f32 %v6483_v52, %v13473_v42  ;;  %v13570_v44 = vpack.c.bf16 %v7890_v15, %v7884_v60  ;;  %v6595_v26 = vadd.f32 %v6594_v11, %v6482_v49  ;;  %v7800_v61 = vadd.f32 %v13483_v58, %v6593_v21  ;;  %v12238_v42 = vld [vmem:[#allocation9 + $0x128] ss:$24 sps:$4 sm:$0xff]   ;;  %v12249_v49 = vld [vmem:[#allocation9 + $0x9c] ss:$24 sps:$4 sm:$0xff]  }
 0x319   :  { %v6633_v10 = vpop.f32.mrf.mxu0  ;;  %7310 = vmatmul.mubr.bf16.vlgmr.msra.gmra.mxu0 %v12589_v0  ;;  %v7895_v12 = vmax.f32 %v7799_v43, 0.0  ;;  %v12244_v60 = vld [vmem:[#allocation9 + $0xc8] ss:$24 sps:$4 sm:$0xff]  }
 0x31a   :  { %v6746_v41 = vpop.f32.mrf.mxu1  ;;  %8178 = vmatmul.mubr.bf16.vlgmr.msra.gmra.mxu1 %v13142_v62  ;;  %v6597_v3 = vadd.f32 %v6596_v24, %v6484_v13  ;;  %8451 = vmatpush1.bf16.msra.mxu0 %v12235_v25  ;;  %v7805_v35 = vadd.f32 %v13478_v1, %v6595_v26  ;;  %v7896_v63 = vmax.f32 %v7800_v61, 0.0  ;;  %v12241_v1 = vld [vmem:[#allocation9 + $0xf8] ss:$24 sps:$4 sm:$0xff]  }
 0x31b   :  { %v13575_v29 = vadd.f32 %v6746_v41, %v6633_v10  ;;  %8187 = vmatprep.mubr.bf16.mxu1 %v13169_v34  ;;  %v6635_v20 = vpop.f32.mrf.mxu0  ;;  %8452 = vmatprep.subr.bf16.mxu0 %v12240_v17  ;;  %v12592_v25 = vld [vmem:[#allocation3 + $0x114] ss:$56 sps:$4 sm:$0xff]  }
 0x31c   :  { %v6748_v19 = vpop.f32.mrf.mxu1  ;;  %7319 = vmatprep.mubr.bf16.mxu0 %v12590_v38  ;;  %v7806_v8 = vadd.f32 %v13483_v58, %v6597_v3  ;;  %v7901_v57 = vmax.f32 %v7805_v35, 0.0  ;;  %v12285_v41 = vld [vmem:[#allocation9 + $0x164] ss:$24 sps:$4 sm:$0xff]   ;;  %v12283_v35 = vld [vmem:[#allocation9 + $0x160] ss:$24 sps:$4 sm:$0xff]  }
 0x31d   :  { %v13580_v62 = vadd.f32 %v6748_v19, %v6635_v20  ;;  %v6637_v32 = vpop.f32.mrf.mxu0  ;;  %v12593_v3 = vld [vmem:[#allocation3 + $0x110] ss:$56 sps:$4 sm:$0xff]   ;;  %8755 = vmatprep.subr.bf16.mxu1 %v12285_v41  ;;  %v12261_v41 = vld [vmem:[#allocation9 + $0x2dc] ss:$24 sps:$4 sm:$0xff]  }
 0x31e   :  { %v6750_v22 = vpop.f32.mrf.mxu1  ;;  %v7902_v34 = vmax.f32 %v7806_v8, 0.0  ;;  %8453 = vmatpush1.bf16.msra.mxu0 %v12238_v42  ;;  %v13584_v56 = vpack.c.bf16 %v7901_v57, %v7895_v12  ;;  %v14424_v42 = vld [vmem:[#allocation22_spill] sm:$0xff]  ;;  %v14425_v19 = vld [vmem:[#allocation24_spill] sm:$0xff]  ;;  %8756 = vmatpush1.bf16.msra.mxu1 %v12283_v35 }
 0x31f   :  { %v13582_v6 = vadd.f32 %v6750_v22, %v6637_v32  ;;  %v6639_v54 = vpop.f32.mrf.mxu0  ;;  %8454 = vmatprep.subr.bf16.mxu0 %v12243_v48  ;;  %v12250_v38 = vld [vmem:[#allocation9 + $0x68] ss:$24 sps:$4 sm:$0xff]   ;;  %v12255_v57 = vld [vmem:[#allocation9 + $0x3c] ss:$24 sps:$4 sm:$0xff]  }
 0x320   :  { %v6752_v7 = vpop.f32.mrf.mxu1  ;;  %v13588_v58 = vpack.c.bf16 %v7902_v34, %v7896_v63  ;;  %v12594_v12 = vld [vmem:[#allocation3 + $0x184] ss:$56 sps:$4 sm:$0xff]  }
 0x321   :  { %v13586_v14 = vadd.f32 %v6752_v7, %v6639_v54  ;;  %v6643_v18 = vpop.f32.mrf.mxu0  ;;  %7320 = vmatmul.mubr.bf16.gmra.mxu0 %v12591_v2  ;;  %v12288_v22 = vld [vmem:[#allocation9 + $0x134] ss:$24 sps:$4 sm:$0xff]   ;;  %v12253_v54 = vld [vmem:[#allocation9 + $0x38] ss:$24 sps:$4 sm:$0xff]  }
 0x322   :  { %v6756_v23 = vpop.f32.mrf.mxu1  ;;  %8188 = vmatmul.mubr.bf16.gmra.mxu1 %v13162_v5  ;;  %8455 = vmatpush1.bf16.msra.mxu0 %v12241_v1  ;;  %v12247_v5 = vld [vmem:[#allocation9 + $0x98] ss:$24 sps:$4 sm:$0xff]  }
 0x323   :  { %v13591_v11 = vadd.f32 %v6756_v23, %v6643_v18  ;;  %8197 = vmatprep.mubr.bf16.mxu1 %v13189_v59  ;;  %v6645_v15 = vpop.f32.mrf.mxu0  ;;  %8456 = vmatprep.subr.bf16.mxu0 %v12246_v45  ;;  %v12252_v59 = vld [vmem:[#allocation9 + $0x6c] ss:$24 sps:$4 sm:$0xff]   ;;  %v12286_v2 = vld [vmem:[#allocation9 + $0x130] ss:$24 sps:$4 sm:$0xff]  }
 0x324   :  { %v6758_v21 = vpop.f32.mrf.mxu1  ;;  %7329 = vmatprep.mubr.bf16.mxu0 %v12592_v25  ;;  %8757 = vmatprep.subr.bf16.mxu1 %v12288_v22  ;;  %v12258_v18 = vld [vmem:[#allocation9 + $0xc] ss:$24 sps:$4 sm:$0xff]   ;;  %v14426_v25 = vld [vmem:[#allocation23_spill] sm:$0xff] }
 0x325   :  { %v13594_v52 = vadd.f32 %v6758_v21, %v6645_v15  ;;  %v6647_v24 = vpop.f32.mrf.mxu0  ;;  %v12595_v21 = vld [vmem:[#allocation3 + $0x180] ss:$56 sps:$4 sm:$0xff]   ;;  %8758 = vmatpush1.bf16.msra.mxu1 %v12286_v2  ;;  %v12262_v2 = vld [vmem:[#allocation9 + $0x2a8] ss:$24 sps:$4 sm:$0xff]  }
 0x326   :  { %v6760_v17 = vpop.f32.mrf.mxu1  ;;  %8457 = vmatpush1.bf16.msra.mxu0 %v12244_v60 }
 0x327   :  { %v13596_v13 = vadd.f32 %v6760_v17, %v6647_v24  ;;  %v6649_v43 = vpop.f32.mrf.mxu0  ;;  %8458 = vmatprep.subr.bf16.mxu0 %v12249_v49  ;;  %v12291_v49 = vld [vmem:[#allocation9 + $0x104] ss:$24 sps:$4 sm:$0xff]   ;;  %v14427_v17 = vld [vmem:[#allocation26_spill] sm:$0xff] }
 0x328   :  { %v6762_v26 = vpop.f32.mrf.mxu1  ;;  %8759 = vmatprep.subr.bf16.mxu1 %v12291_v49  ;;  %v12267_v49 = vld [vmem:[#allocation9 + $0x27c] ss:$24 sps:$4 sm:$0xff]  }
 0x329   :  { %v13598_v10 = vadd.f32 %v6762_v26, %v6649_v43  ;;  %v6653_v0 = vpop.f32.mrf.mxu0  ;;  %7330 = vmatmul.mubr.bf16.gmra.mxu0 %v12593_v3 }
 0x32a   :  { %v6766_v61 = vpop.f32.mrf.mxu1  ;;  %8198 = vmatmul.mubr.bf16.gmra.mxu1 %v14424_v42  ;;  %8459 = vmatpush1.bf16.msra.mxu0 %v12247_v5  ;;  %v12256_v5 = vld [vmem:[#allocation9 + $0x8] ss:$24 sps:$4 sm:$0xff]  }
 0x32b   :  { %v13601_v20 = vadd.f32 %v6766_v61, %v6653_v0  ;;  %8207 = vmatprep.mubr.bf16.mxu1 %v14425_v19  ;;  %v6655_v48 = vpop.f32.mrf.mxu0  ;;  %8460 = vmatprep.subr.bf16.mxu0 %v12252_v59  ;;  %v12596_v59 = vld [vmem:[#allocation3 + $0x1f4] ss:$56 sps:$4 sm:$0xff]   ;;  %v12289_v61 = vld [vmem:[#allocation9 + $0x100] ss:$24 sps:$4 sm:$0xff]  }
 0x32c   :  { %v6768_v8 = vpop.f32.mrf.mxu1  ;;  %7339 = vmatprep.mubr.bf16.mxu0 %v12594_v12  ;;  %v12259_v19 = vld [vmem:[#allocation9 + $0x2d8] ss:$24 sps:$4 sm:$0xff]   ;;  %8760 = vmatpush1.bf16.msra.mxu1 %v12289_v61 }
 0x32d   :  { %v13604_v32 = vadd.f32 %v6768_v8, %v6655_v48  ;;  %v6657_v63 = vpop.f32.mrf.mxu0  ;;  %v12264_v8 = vld [vmem:[#allocation9 + $0x2ac] ss:$24 sps:$4 sm:$0xff]  }
 0x32e   :  { %v6770_v34 = vpop.f32.mrf.mxu1  ;;  %8461 = vmatpush1.bf16.msra.mxu0 %v12250_v38 }
 0x32f   :  { %v13606_v1 = vadd.f32 %v6770_v34, %v6657_v63  ;;  %v6659_v7 = vpop.f32.mrf.mxu0  ;;  %8462 = vmatprep.subr.bf16.mxu0 %v12255_v57  ;;  %v12294_v57 = vld [vmem:[#allocation9 + $0xd4] ss:$24 sps:$4 sm:$0xff]  }
 0x330   :  { %v6772_v45 = vpop.f32.mrf.mxu1  ;;  %v12597_v34 = vld [vmem:[#allocation3 + $0x1f0] ss:$56 sps:$4 sm:$0xff]   ;;  %8761 = vmatprep.subr.bf16.mxu1 %v12294_v57 }
 0x331   :  { %v13608_v23 = vadd.f32 %v6772_v45, %v6659_v7  ;;  %v6663_v60 = vpop.f32.mrf.mxu0  ;;  %7340 = vmatmul.mubr.bf16.gmra.mxu0 %v12595_v21  ;;  %v12292_v7 = vld [vmem:[#allocation9 + $0xd0] ss:$24 sps:$4 sm:$0xff]   ;;  %v12300_v57 = vld [vmem:[#allocation9 + $0x74] ss:$24 sps:$4 sm:$0xff]  }
 0x332   :  { %v6776_v15 = vpop.f32.mrf.mxu1  ;;  %8208 = vmatmul.mubr.bf16.gmra.mxu1 %v14426_v25  ;;  %8463 = vmatpush1.bf16.msra.mxu0 %v12253_v54  ;;  %v14428_v54 = vld [vmem:[#allocation25_spill] sm:$0xff]  ;;  %v12598_v25 = vld [vmem:[#allocation3 + $0x264] ss:$56 sps:$4 sm:$0xff]  }
 0x333   :  { %v13611_v24 = vadd.f32 %v6776_v15, %v6663_v60  ;;  %8217 = vmatprep.mubr.bf16.mxu1 %v14427_v17  ;;  %v6665_v43 = vpop.f32.mrf.mxu0  ;;  %8464 = vmatprep.subr.bf16.mxu0 %v12258_v18  ;;  %v14429_v18 = vld [vmem:[#allocation28_spill] sm:$0xff] }
 0x334   :  { %v6778_v26 = vpop.f32.mrf.mxu1  ;;  %7349 = vmatprep.mubr.bf16.mxu0 %v12596_v59  ;;  %v12297_v60 = vld [vmem:[#allocation9 + $0xa4] ss:$24 sps:$4 sm:$0xff]   ;;  %8762 = vmatpush1.bf16.msra.mxu1 %v12292_v7  ;;  %v12265_v59 = vld [vmem:[#allocation9 + $0x278] ss:$24 sps:$4 sm:$0xff]  }
 0x335   :  { %v13614_v0 = vadd.f32 %v6778_v26, %v6665_v43  ;;  %v6667_v3 = vpop.f32.mrf.mxu0  ;;  %8763 = vmatprep.subr.bf16.mxu1 %v12297_v60 }
 0x336   :  { %v6780_v42 = vpop.f32.mrf.mxu1  ;;  %8465 = vmatpush1.bf16.msra.mxu0 %v12256_v5 }
 0x337   :  { %v13616_v35 = vadd.f32 %v6780_v42, %v6667_v3  ;;  %v6669_v38 = vpop.f32.mrf.mxu0  ;;  %8466 = vmatprep.subr.bf16.mxu0 %v12261_v41  ;;  %v12270_v3 = vld [vmem:[#allocation9 + $0x24c] ss:$24 sps:$4 sm:$0xff]   ;;  %v12295_v42 = vld [vmem:[#allocation9 + $0xa0] ss:$24 sps:$4 sm:$0xff]  }
 0x338   :  { %v6782_v48 = vpop.f32.mrf.mxu1  ;;  %8764 = vmatpush1.bf16.msra.mxu1 %v12295_v42  ;;  %v14434_v42 = vld [vmem:[#allocation29_spill] sm:$0xff] }
 0x339   :  { %v13618_v12 = vadd.f32 %v6782_v48, %v6669_v38  ;;  %v6673_v22 = vpop.f32.mrf.mxu0  ;;  %7350 = vmatmul.mubr.bf16.gmra.mxu0 %v12597_v34  ;;  %v12599_v48 = vld [vmem:[#allocation3 + $0x260] ss:$56 sps:$4 sm:$0xff]   ;;  %v12268_v34 = vld [vmem:[#allocation9 + $0x248] ss:$24 sps:$4 sm:$0xff]   ;;  %8765 = vmatprep.subr.bf16.mxu1 %v12300_v57 }
 0x33a   :  { %v6786_v63 = vpop.f32.mrf.mxu1  ;;  %8218 = vmatmul.mubr.bf16.gmra.mxu1 %v14428_v54  ;;  %8467 = vmatpush2.bf16.msra.mxu0 %v12259_v19 }
 0x33b   :  { %v13621_v45 = vadd.f32 %v6786_v63, %v6673_v22  ;;  %8227 = vmatprep.mubr.bf16.mxu1 %v14429_v18  ;;  %v6675_v15 = vpop.f32.mrf.mxu0  ;;  %8468 = vmatprep.subr.bf16.mxu0 %v12264_v8  ;;  %v14430_v8 = vld [vmem:[#allocation27_spill] sm:$0xff]  ;;  %v14431_v63 = vld [vmem:[#allocation30_spill] sm:$0xff] }
 0x33c   :  { %v6788_v21 = vpop.f32.mrf.mxu1  ;;  %7359 = vmatprep.mubr.bf16.mxu0 %v12598_v25  ;;  %v12600_v18 = vld [vmem:[#allocation3 + $0x2d4] ss:$56 sps:$4 sm:$0xff]  }
 0x33d   :  { %v13624_v17 = vadd.f32 %v6788_v21, %v6675_v15  ;;  %v6677_v5 = vpop.f32.mrf.mxu0  ;;  %v12298_v15 = vld [vmem:[#allocation9 + $0x70] ss:$24 sps:$4 sm:$0xff]  }
 0x33e   :  { %v6790_v43 = vpop.f32.mrf.mxu1  ;;  %8469 = vmatpush2.bf16.msra.mxu0 %v12262_v2  ;;  %v12273_v2 = vld [vmem:[#allocation9 + $0x21c] ss:$24 sps:$4 sm:$0xff]   ;;  %8766 = vmatpush1.bf16.msra.mxu1 %v12298_v15 }
 0x33f   :  { %v13626_v26 = vadd.f32 %v6790_v43, %v6677_v5  ;;  %v13628_v41 = vpop.f32.mrf.mxu0  ;;  %8470 = vmatprep.subr.bf16.mxu0 %v12267_v49  ;;  %v12271_v5 = vld [vmem:[#allocation9 + $0x218] ss:$24 sps:$4 sm:$0xff]   ;;  %v12279_v15 = vld [vmem:[#allocation9 + $0x1bc] ss:$24 sps:$4 sm:$0xff]  }
 0x340   :  { %v13630_v61 = vpop.f32.mrf.mxu1 }
 0x341   :  { %v6683_v19 = vpop.f32.mrf.mxu0  ;;  %7360 = vmatmul.mubr.bf16.gmra.mxu0 %v12599_v48 }
 0x342   :  { %v6796_v38 = vpop.f32.mrf.mxu1  ;;  %8228 = vmatmul.mubr.bf16.gmra.mxu1 %v14430_v8  ;;  %8471 = vmatpush2.bf16.msra.mxu0 %v12265_v59  ;;  %v12601_v8 = vld [vmem:[#allocation3 + $0x2d0] ss:$56 sps:$4 sm:$0xff]  }
 0x343   :  { %v13633_v22 = vadd.f32 %v6796_v38, %v6683_v19  ;;  %8237 = vmatprep.mubr.bf16.mxu1 %v14431_v63  ;;  %v6685_v54 = vpop.f32.mrf.mxu0  ;;  %8472 = vmatprep.subr.bf16.mxu0 %v12270_v3  ;;  %v12276_v3 = vld [vmem:[#allocation9 + $0x1ec] ss:$24 sps:$4 sm:$0xff]   ;;  %v12301_v63 = vld [vmem:[#allocation9 + $0x40] ss:$24 sps:$4 sm:$0xff]  }
 0x344   :  { %v6798_v7 = vpop.f32.mrf.mxu1  ;;  %7369 = vmatprep.mubr.bf16.mxu0 %v12600_v18  ;;  %v12303_v19 = vld [vmem:[#allocation9 + $0x44] ss:$24 sps:$4 sm:$0xff]  }
 0x345   :  { %v13636_v60 = vadd.f32 %v6798_v7, %v6685_v54  ;;  %v6687_v21 = vpop.f32.mrf.mxu0  ;;  %v12306_v54 = vld [vmem:[#allocation9 + $0x14] ss:$24 sps:$4 sm:$0xff]   ;;  %8767 = vmatprep.subr.bf16.mxu1 %v12303_v19 }
 0x346   :  { %v6800_v25 = vpop.f32.mrf.mxu1  ;;  %8473 = vmatpush2.bf16.msra.mxu0 %v12268_v34  ;;  %v12274_v34 = vld [vmem:[#allocation9 + $0x1e8] ss:$24 sps:$4 sm:$0xff]   ;;  %8768 = vmatpush1.bf16.msra.mxu1 %v12301_v63 }
 0x347   :  { %v13638_v49 = vadd.f32 %v6800_v25, %v6687_v21  ;;  %v13640_v43 = vpop.f32.mrf.mxu0  ;;  %8474 = vmatprep.subr.bf16.mxu0 %v12273_v2  ;;  %v12602_v2 = vld [vmem:[#allocation3 + $0x344] ss:$56 sps:$4 sm:$0xff]   ;;  %8769 = vmatprep.subr.bf16.mxu1 %v12306_v54 }
 0x348   :  { %14432 = vst [vmem:[#allocation22_spill] sm:$0xff] %v13640_v43  ;;  %v13642_v59 = vpop.f32.mrf.mxu1  ;;  %v12280_v63 = vld [vmem:[#allocation9 + $0x188] ss:$24 sps:$4 sm:$0xff]  }
 0x349   :  { %14433 = vst [vmem:[#allocation24_spill] sm:$0xff] %v13642_v59  ;;  %v6693_v38 = vpop.f32.mrf.mxu0  ;;  %7370 = vmatmul.mubr.bf16.gmra.mxu0 %v12601_v8  ;;  %v13691_v59 = vld [vmem:[#allocation12 + $0x28] sm:$0xff]  }
 0x34a   :  { %v6806_v48 = vpop.f32.mrf.mxu1  ;;  %8238 = vmatmul.mubr.bf16.gmra.mxu1 %v14434_v42  ;;  %8475 = vmatpush2.bf16.msra.mxu0 %v12271_v5  ;;  %14440 = vst [vmem:[#allocation30_spill] sm:$0xff] %v13691_v59 }
 0x34b   :  { %v13645_v57 = vadd.f32 %v6806_v48, %v6693_v38  ;;  %8247 = vmatprep.mubr.bf16.mxu1 %v13286_v33  ;;  %v6695_v7 = vpop.f32.mrf.mxu0  ;;  %8476 = vmatprep.subr.bf16.mxu0 %v12276_v3  ;;  %v12277_v38 = vld [vmem:[#allocation9 + $0x1b8] ss:$24 sps:$4 sm:$0xff]   ;;  %v12282_v3 = vld [vmem:[#allocation9 + $0x18c] ss:$24 sps:$4 sm:$0xff]  }
 0x34c   :  { %v6808_v18 = vpop.f32.mrf.mxu1  ;;  %7379 = vmatprep.mubr.bf16.mxu0 %v12602_v2  ;;  %v12304_v48 = vld [vmem:[#allocation9 + $0x10] ss:$24 sps:$4 sm:$0xff]   ;;  %v12311_v2 = vld [vmem:[#allocation9 + $0x2e4] ss:$24 sps:$4 sm:$0xff]  }
 0x34d   :  { %v13648_v21 = vadd.f32 %v6808_v18, %v6695_v7  ;;  %v6697_v25 = vpop.f32.mrf.mxu0  ;;  %v12603_v18 = vld [vmem:[#allocation3 + $0x340] ss:$56 sps:$4 sm:$0xff]   ;;  %8770 = vmatpush1.bf16.msra.mxu1 %v12304_v48 }
 0x34e   :  { %v6810_v8 = vpop.f32.mrf.mxu1  ;;  %8477 = vmatpush2.bf16.msra.mxu0 %v12274_v34  ;;  %8771 = vmatprep.subr.bf16.mxu1 %v12311_v2  ;;  %v12314_v48 = vld [vmem:[#allocation9 + $0x2b0] ss:$24 sps:$4 sm:$0xff]   ;;  %v12321_v2 = vld [vmem:[#allocation9 + $0x284] ss:$24 sps:$4 sm:$0xff]  }
 0x34f   :  { %v13650_v42 = vadd.f32 %v6810_v8, %v6697_v25  ;;  %v13652_v33 = vpop.f32.mrf.mxu0  ;;  %8478 = vmatprep.subr.bf16.mxu0 %v12279_v15  ;;  %v13660_v15 = vld [vmem:[#allocation12 + $0x78] sm:$0xff]  }
 0x350   :  { %14435 = vst [vmem:[#allocation23_spill] sm:$0xff] %v13652_v33  ;;  %v13654_v5 = vpop.f32.mrf.mxu1  ;;  %v12309_v25 = vld [vmem:[#allocation9 + $0x2e0] ss:$24 sps:$4 sm:$0xff]  }
 0x351   :  { %14436 = vst [vmem:[#allocation26_spill] sm:$0xff] %v13654_v5  ;;  %v6703_v4 = vpop.f32.mrf.mxu0  ;;  %7380 = vmatmul.mubr.bf16.gmra.mxu0 %v12603_v18  ;;  %8772 = vmatpush2.bf16.msra.mxu1 %v12309_v25  ;;  %v13682_v25 = vld [vmem:[#allocation12 + $0x68] sm:$0xff]  }
 0x352   :  { %v6816_v7 = vpop.f32.mrf.mxu1  ;;  %8248 = vmatmul.mubr.bf16.gmra.mxu1 %v13278_v36  ;;  %8479 = vmatpush2.bf16.msra.mxu0 %v12277_v38  ;;  %14439 = vst [vmem:[#allocation27_spill] sm:$0xff] %v13682_v25 }
 0x353   :  { %v13657_v19 = vadd.f32 %v6816_v7, %v6703_v4  ;;  %8482 = vmatprep.mubr.bf16.mxu0 %v13497_v39  ;;  %v6705_v34 = vpop.f32.mrf.mxu0  ;;  %8480 = vmatprep.subr.bf16.mxu0 %v12282_v3  ;;  %v13666_v4 = vld [vmem:[#allocation12 + $0x38] sm:$0xff]   ;;  %v13673_v3 = vld [vmem:[#allocation12 + $0x70] sm:$0xff]  }
 0x354   :  { %v6818_v54 = vpop.f32.mrf.mxu1  ;;  %8773 = vmatprep.subr.bf16.mxu1 %v12316_v46  ;;  %v12319_v46 = vld [vmem:[#allocation9 + $0x280] ss:$24 sps:$4 sm:$0xff]  }
 0x355   :  { %v13662_v8 = vadd.f32 %v6818_v54, %v6705_v34  ;;  %v6707_v18 = vpop.f32.mrf.mxu0  ;;  %8774 = vmatpush2.bf16.msra.mxu1 %v12314_v48 }
 0x356   :  { %v6820_v5 = vpop.f32.mrf.mxu1  ;;  %8481 = vmatpush2.bf16.msra.mxu0 %v12280_v63  ;;  %v13679_v63 = vld [vmem:[#allocation12 + $0x30] sm:$0xff]   ;;  %8775 = vmatprep.subr.bf16.mxu1 %v12321_v2 }
 0x357   :  { %v13664_v36 = vadd.f32 %v6820_v5, %v6707_v18  ;;  %v13668_v39 = vpop.f32.mrf.mxu0  ;;  %10787 = vmatprep.subr.bf16.mxu0 %v13660_v15 }
 0x358   :  { %14437 = vst [vmem:[#allocation25_spill] sm:$0xff] %v13668_v39  ;;  %v13670_v38 = vpop.f32.mrf.mxu1 }
 0x359   :  { %14438 = vst [vmem:[#allocation28_spill] sm:$0xff] %v13670_v38  ;;  %v6859_v7 = vpop.f32.mrf.mxu0  ;;  %8483 = vmatmul.mubr.bf16.vlgmr.msra.gmra.mxu0 %v13493_v31  ;;  %8776 = vmatpush2.bf16.msra.mxu1 %v12319_v46  ;;  %v13707_v46 = vld [vmem:[#allocation12 + $0x20] sm:$0xff]  }
 0x35a   :  { %v6972_v34 = vpop.f32.mrf.mxu1  ;;  %v6860_v5 = vadd.f32 %v6859_v7, %v13575_v29  ;;  %8492 = vmatprep.mubr.bf16.mxu0 %v13511_v9  ;;  %10788 = vmatpush3.bf16.msra.mxu0 %v13666_v4  ;;  %v12326_v29 = vld [vmem:[#allocation9 + $0x254] ss:$24 sps:$4 sm:$0xff]  }
 0x35b   :  { %v6861_v54 = vpop.f32.mrf.mxu0  ;;  %10789 = vmatprep.subr.bf16.mxu0 %v13673_v3  ;;  %8777 = vmatprep.subr.bf16.mxu1 %v12326_v29  ;;  %v12329_v29 = vld [vmem:[#allocation9 + $0x220] ss:$24 sps:$4 sm:$0xff]  }
 0x35c   :  { %v6974_v18 = vpop.f32.mrf.mxu1  ;;  %v13684_v38 = vadd.f32 %v6972_v34, %v6860_v5  ;;  %v6862_v31 = vadd.f32 %v6861_v54, %v13580_v62  ;;  %v13696_v34 = vld [vmem:[#allocation12 + $0x60] sm:$0xff]  }
 0x35d   :  { %v6863_v7 = vpop.f32.mrf.mxu0  ;;  %14441 = vst [vmem:[#allocation29_spill] sm:$0xff] %v13696_v34  ;;  %v12324_v62 = vld [vmem:[#allocation9 + $0x250] ss:$24 sps:$4 sm:$0xff]  }
 0x35e   :  { %v6976_v9 = vpop.f32.mrf.mxu1  ;;  %v13687_v39 = vadd.f32 %v6974_v18, %v6862_v31  ;;  %v6864_v33 = vadd.f32 %v6863_v7, %v13582_v6  ;;  %10790 = vmatpush3.bf16.msra.mxu0 %v13679_v63  ;;  %v12331_v6 = vld [vmem:[#allocation9 + $0x224] ss:$24 sps:$4 sm:$0xff]   ;;  %8778 = vmatpush2.bf16.msra.mxu1 %v12324_v62 }
 0x35f   :  { %v6865_v48 = vpop.f32.mrf.mxu0  ;;  %10791 = vmatprep.subr.bf16.mxu0 %v13682_v25  ;;  %8779 = vmatprep.subr.bf16.mxu1 %v12331_v6  ;;  %v13719_v25 = vld [vmem:[#allocation12 + $0x18] sm:$0xff]  }
 0x360   :  { %v13693_v43 = vpop.f32.mrf.mxu1  ;;  %v13698_v2 = vadd.f32 %v6976_v9, %v6864_v33  ;;  %v13701_v5 = vadd.f32 %v6865_v48, %v13586_v14  ;;  %v13710_v14 = vld [vmem:[#allocation12 + $0x58] sm:$0xff]   ;;  %14443 = vst [vmem:[#allocation32_spill] sm:$0xff] %v13719_v25 }
 0x361   :  { %v6869_v54 = vpop.f32.mrf.mxu0  ;;  %8493 = vmatmul.mubr.bf16.gmra.mxu0 %v13506_v16  ;;  %14442 = vst [vmem:[#allocation31_spill] sm:$0xff] %v13710_v14 }
 0x362   :  { %v6982_v18 = vpop.f32.mrf.mxu1  ;;  %v6870_v31 = vadd.f32 %v6869_v54, %v13591_v11  ;;  %8502 = vmatprep.mubr.bf16.mxu0 %v13521_v50  ;;  %10792 = vmatpush3.bf16.msra.mxu0 %v13691_v59  ;;  %v12336_v11 = vld [vmem:[#allocation9 + $0x1f4] ss:$24 sps:$4 sm:$0xff]  }
 0x363   :  { %v6871_v7 = vpop.f32.mrf.mxu0  ;;  %10793 = vmatprep.subr.bf16.mxu0 %v13696_v34  ;;  %8780 = vmatpush2.bf16.msra.mxu1 %v12329_v29  ;;  %v13735_v29 = vld [vmem:[#allocation12 + $0x10] sm:$0xff]  }
 0x364   :  { %v6984_v33 = vpop.f32.mrf.mxu1  ;;  %v13712_v9 = vadd.f32 %v6982_v18, %v6870_v31  ;;  %v6872_v16 = vadd.f32 %v6871_v7, %v13594_v52  ;;  %v13724_v18 = vld [vmem:[#allocation12 + $0x50] sm:$0xff]   ;;  %v12334_v52 = vld [vmem:[#allocation9 + $0x1f0] ss:$24 sps:$4 sm:$0xff]   ;;  %8781 = vmatprep.subr.bf16.mxu1 %v12336_v11  ;;  %14445 = vst [vmem:[#allocation34_spill] sm:$0xff] %v13735_v29 }
 0x365   :  { %v6873_v48 = vpop.f32.mrf.mxu0  ;;  %14444 = vst [vmem:[#allocation33_spill] sm:$0xff] %v13724_v18  ;;  %v12339_v11 = vld [vmem:[#allocation9 + $0x1c0] ss:$24 sps:$4 sm:$0xff]  }
 0x366   :  { %v6986_v50 = vpop.f32.mrf.mxu1  ;;  %v13715_v54 = vadd.f32 %v6984_v33, %v6872_v16  ;;  %v6874_v59 = vadd.f32 %v6873_v48, %v13596_v13  ;;  %10794 = vmatpush3.bf16.msra.mxu0 %v13707_v46  ;;  %v12341_v13 = vld [vmem:[#allocation9 + $0x1c4] ss:$24 sps:$4 sm:$0xff]  }
 0x367   :  { %v6875_v62 = vpop.f32.mrf.mxu0  ;;  %10795 = vmatprep.subr.bf16.mxu0 %v13710_v14  ;;  %8782 = vmatpush2.bf16.msra.mxu1 %v12334_v52  ;;  %v13747_v14 = vld [vmem:[#allocation12 + $0x8] sm:$0xff]  }
 0x368   :  { %v13721_v34 = vpop.f32.mrf.mxu1  ;;  %v13726_v6 = vadd.f32 %v6986_v50, %v6874_v59  ;;  %v13729_v31 = vadd.f32 %v6875_v62, %v13598_v10  ;;  %v13738_v10 = vld [vmem:[#allocation12 + $0x48] sm:$0xff]   ;;  %8783 = vmatprep.subr.bf16.mxu1 %v12341_v13  ;;  %14447 = vst [vmem:[#allocation36_spill] sm:$0xff] %v13747_v14 }
 0x369   :  { %v6879_v7 = vpop.f32.mrf.mxu0  ;;  %8503 = vmatmul.mubr.bf16.gmra.mxu0 %v13517_v27  ;;  %14446 = vst [vmem:[#allocation35_spill] sm:$0xff] %v13738_v10 }
 0x36a   :  { %v6992_v33 = vpop.f32.mrf.mxu1  ;;  %v6880_v16 = vadd.f32 %v6879_v7, %v13601_v20  ;;  %8512 = vmatprep.mubr.bf16.mxu0 %v13535_v28  ;;  %10796 = vmatpush3.bf16.msra.mxu0 %v13719_v25  ;;  %v12346_v20 = vld [vmem:[#allocation9 + $0x194] ss:$24 sps:$4 sm:$0xff]  }
 0x36b   :  { %v6881_v48 = vpop.f32.mrf.mxu0  ;;  %10797 = vmatprep.subr.bf16.mxu0 %v13724_v18  ;;  %8784 = vmatpush2.bf16.msra.mxu1 %v12339_v11  ;;  %v13763_v11 = vld [vmem:[#allocation12] sm:$0xff]  }
 0x36c   :  { %v6994_v59 = vpop.f32.mrf.mxu1  ;;  %v13740_v50 = vadd.f32 %v6992_v33, %v6880_v16  ;;  %v6882_v27 = vadd.f32 %v6881_v48, %v13604_v32  ;;  %v13752_v33 = vld [vmem:[#allocation12 + $0x40] sm:$0xff]   ;;  %8785 = vmatprep.subr.bf16.mxu1 %v12346_v20  ;;  %14449 = vst [vmem:[#allocation38_spill] sm:$0xff] %v13763_v11 }
 0x36d   :  { %v6883_v62 = vpop.f32.mrf.mxu0  ;;  %14448 = vst [vmem:[#allocation37_spill] sm:$0xff] %v13752_v33  ;;  %v12344_v32 = vld [vmem:[#allocation9 + $0x190] ss:$24 sps:$4 sm:$0xff]  }
 0x36e   :  { %v6996_v28 = vpop.f32.mrf.mxu1  ;;  %v13743_v7 = vadd.f32 %v6994_v59, %v6882_v27  ;;  %v6884_v25 = vadd.f32 %v6883_v62, %v13606_v1  ;;  %10798 = vmatpush3.bf16.msra.mxu0 %v13735_v29 }
 0x36f   :  { %v6885_v52 = vpop.f32.mrf.mxu0  ;;  %10799 = vmatprep.subr.bf16.mxu0 %v13738_v10  ;;  %8786 = vmatpush2.bf16.msra.mxu1 %v12344_v32 }
 0x370   :  { %v13749_v18 = vpop.f32.mrf.mxu1  ;;  %v13754_v13 = vadd.f32 %v6996_v28, %v6884_v25  ;;  %v13757_v16 = vadd.f32 %v6885_v52, %v13608_v23  ;;  %10979 = vmatprep.subr.bf16.mxu1 %v13660_v15 }
 0x371   :  { %v6889_v1 = vpop.f32.mrf.mxu0  ;;  %8513 = vmatmul.mubr.bf16.gmra.mxu0 %v13530_v51 }
 0x372   :  { %v7002_v48 = vpop.f32.mrf.mxu1  ;;  %v6890_v59 = vadd.f32 %v6889_v1, %v13611_v24  ;;  %8522 = vmatprep.mubr.bf16.mxu0 %v13545_v53  ;;  %10800 = vmatpush3.bf16.msra.mxu0 %v13747_v14 }
 0x373   :  { %v6891_v27 = vpop.f32.mrf.mxu0  ;;  %10801 = vmatprep.subr.bf16.mxu0 %v13752_v33 }
 0x374   :  { %v7004_v62 = vpop.f32.mrf.mxu1  ;;  %v13766_v23 = vadd.f32 %v7002_v48, %v6890_v59  ;;  %v6892_v25 = vadd.f32 %v6891_v27, %v13614_v0 }
 0x375   :  { %v6893_v51 = vpop.f32.mrf.mxu0 }
 0x376   :  { %v7006_v20 = vpop.f32.mrf.mxu1  ;;  %v13770_v24 = vadd.f32 %v7004_v62, %v6892_v25  ;;  %v6894_v53 = vadd.f32 %v6893_v51, %v13616_v35  ;;  %10802 = vmatpush3.bf16.msra.mxu0 %v13763_v11 }
 0x377   :  { %v6895_v28 = vpop.f32.mrf.mxu0 }
 0x378   :  { %v13774_v52 = vpop.f32.mrf.mxu1  ;;  %v13776_v1 = vadd.f32 %v7006_v20, %v6894_v53  ;;  %v13779_v32 = vadd.f32 %v6895_v28, %v13618_v12 }
 0x379   :  { %v6899_v48 = vpop.f32.mrf.mxu0  ;;  %8523 = vmatmul.mubr.bf16.gmra.mxu0 %v13541_v47 }
 0x37a   :  { %v7012_v0 = vpop.f32.mrf.mxu1  ;;  %v6900_v15 = vadd.f32 %v6899_v48, %v13621_v45  ;;  %8532 = vmatprep.mubr.bf16.mxu0 %v13559_v40 }
 0x37b   :  { %v6901_v59 = vpop.f32.mrf.mxu0 }
 0x37c   :  { %v7014_v35 = vpop.f32.mrf.mxu1  ;;  %v13784_v27 = vadd.f32 %v7012_v0, %v6900_v15  ;;  %v6902_v62 = vadd.f32 %v6901_v59, %v13624_v17 }
 0x37d   :  { %v6903_v25 = vpop.f32.mrf.mxu0 }
 0x37e   :  { %v7016_v51 = vpop.f32.mrf.mxu1  ;;  %v13787_v20 = vadd.f32 %v7014_v35, %v6902_v62  ;;  %v6904_v12 = vadd.f32 %v6903_v25, %v13626_v26 }
 0x37f   :  { %v13790_v53 = vpop.f32.mrf.mxu0 }
 0x380   :  { %v13792_v28 = vpop.f32.mrf.mxu1  ;;  %v13794_v47 = vadd.f32 %v7016_v51, %v6904_v12 }
 0x381   :  { %v6909_v45 = vpop.f32.mrf.mxu0  ;;  %8533 = vmatmul.mubr.bf16.gmra.mxu0 %v13554_v30 }
 0x382   :  { %v7022_v40 = vpop.f32.mrf.mxu1  ;;  %v6910_v48 = vadd.f32 %v6909_v45, %v13633_v22  ;;  %8542 = vmatprep.mubr.bf16.mxu0 %v13570_v44 }
 0x383   :  { %v6911_v17 = vpop.f32.mrf.mxu0 }
 0x384   :  { %v7024_v0 = vpop.f32.mrf.mxu1  ;;  %v13799_v15 = vadd.f32 %v7022_v40, %v6910_v48  ;;  %v6912_v26 = vadd.f32 %v6911_v17, %v13636_v60 }
 0x385   :  { %v6913_v59 = vpop.f32.mrf.mxu0 }
 0x386   :  { %v7026_v35 = vpop.f32.mrf.mxu1  ;;  %v13802_v62 = vadd.f32 %v7024_v0, %v6912_v26  ;;  %v6914_v25 = vadd.f32 %v6913_v59, %v13638_v49 }
 0x387   :  { %v13805_v51 = vpop.f32.mrf.mxu0 }
 0x388   :  { %14450 = vst [vmem:[#allocation39_spill] sm:$0xff] %v13805_v51  ;;  %v13807_v12 = vpop.f32.mrf.mxu1  ;;  %v13809_v30 = vadd.f32 %v7026_v35, %v6914_v25 }
 0x389   :  { %14451 = vst [vmem:[#allocation40_spill] sm:$0xff] %v13807_v12  ;;  %v6919_v22 = vpop.f32.mrf.mxu0  ;;  %8543 = vmatmul.mubr.bf16.gmra.mxu0 %v13566_v37 }
 0x38a   :  { %v7032_v44 = vpop.f32.mrf.mxu1  ;;  %v6920_v45 = vadd.f32 %v6919_v22, %v13645_v57  ;;  %8552 = vmatprep.mubr.bf16.mxu0 %v13588_v58 }
 0x38b   :  { %v6921_v60 = vpop.f32.mrf.mxu0 }
 0x38c   :  { %v7034_v40 = vpop.f32.mrf.mxu1  ;;  %v13814_v48 = vadd.f32 %v7032_v44, %v6920_v45  ;;  %v6922_v49 = vadd.f32 %v6921_v60, %v13648_v21 }
 0x38d   :  { %v6923_v17 = vpop.f32.mrf.mxu0 }
 0x38e   :  { %v7036_v0 = vpop.f32.mrf.mxu1  ;;  %v13817_v26 = vadd.f32 %v7034_v40, %v6922_v49  ;;  %v6924_v59 = vadd.f32 %v6923_v17, %v13650_v42 }
 0x38f   :  { %v13820_v35 = vpop.f32.mrf.mxu0 }
 0x390   :  { %14452 = vst [vmem:[#allocation41_spill] sm:$0xff] %v13820_v35  ;;  %v13822_v25 = vpop.f32.mrf.mxu1  ;;  %v13824_v37 = vadd.f32 %v7036_v0, %v6924_v59 }
 0x391   :  { %14453 = vst [vmem:[#allocation42_spill] sm:$0xff] %v13822_v25  ;;  %v6929_v57 = vpop.f32.mrf.mxu0  ;;  %8553 = vmatmul.mubr.bf16.gmra.mxu0 %v13584_v56 }
 0x392   :  { %v7042_v58 = vpop.f32.mrf.mxu1  ;;  %v6930_v22 = vadd.f32 %v6929_v57, %v13657_v19 }
 0x393   :  { %v6931_v44 = vpop.f32.mrf.mxu0 }
 0x394   :  { %v7044_v21 = vpop.f32.mrf.mxu1  ;;  %v13828_v45 = vadd.f32 %v7042_v58, %v6930_v22  ;;  %v6932_v60 = vadd.f32 %v6931_v44, %v13662_v8 }
 0x395   :  { %v6933_v40 = vpop.f32.mrf.mxu0 }
 0x396   :  { %v7046_v42 = vpop.f32.mrf.mxu1  ;;  %v13831_v49 = vadd.f32 %v7044_v21, %v6932_v60  ;;  %v6934_v17 = vadd.f32 %v6933_v40, %v13664_v36 }
 0x397   :  { %v13834_v0 = vpop.f32.mrf.mxu0 }
 0x398   :  { %14454 = vst [vmem:[#allocation43_spill] sm:$0xff] %v13834_v0  ;;  %v13836_v59 = vpop.f32.mrf.mxu1  ;;  %v13838_v11 = vadd.f32 %v7046_v42, %v6934_v17 }
 0x399   :  { %14455 = vst [vmem:[#allocation44_spill] sm:$0xff] %v13836_v59  ;;  %v7085_v56 = vpop.f32.mrf.mxu0 }
 0x39a   :  { %v7198_v19 = vpop.f32.mrf.mxu1  ;;  %v7086_v57 = vadd.f32 %v7085_v56, %v13684_v38 }
 0x39b   :  { %v7087_v58 = vpop.f32.mrf.mxu0 }
 0x39c   :  { %v7200_v22 = vpop.f32.mrf.mxu1  ;;  %v13841_v25 = vadd.f32 %v7198_v19, %v7086_v57  ;;  %v7088_v8 = vadd.f32 %v7087_v58, %v13687_v39 }
 0x39d   :  { %v7089_v44 = vpop.f32.mrf.mxu0 }
 0x39e   :  { %v7202_v21 = vpop.f32.mrf.mxu1  ;;  %v13844_v60 = vadd.f32 %v7200_v22, %v7088_v8  ;;  %v7090_v36 = vadd.f32 %v7089_v44, %v13698_v2 }
 0x39f   :  { %v13847_v40 = vpop.f32.mrf.mxu0 }
 0x3a0   :  { %v13849_v42 = vpop.f32.mrf.mxu1  ;;  %v13851_v17 = vadd.f32 %v7202_v21, %v7090_v36 }
 0x3a1   :  { %v7095_v59 = vpop.f32.mrf.mxu0 }
 0x3a2   :  { %v7208_v38 = vpop.f32.mrf.mxu1  ;;  %v7096_v56 = vadd.f32 %v7095_v59, %v13712_v9 }
 0x3a3   :  { %v7097_v19 = vpop.f32.mrf.mxu0 }
 0x3a4   :  { %v7210_v57 = vpop.f32.mrf.mxu1  ;;  %v13854_v0 = vadd.f32 %v7208_v38, %v7096_v56  ;;  %v7098_v39 = vadd.f32 %v7097_v19, %v13715_v54 }
 0x3a5   :  { %v7099_v58 = vpop.f32.mrf.mxu0 }
 0x3a6   :  { %v7212_v22 = vpop.f32.mrf.mxu1  ;;  %v13857_v8 = vadd.f32 %v7210_v57, %v7098_v39  ;;  %v7100_v2 = vadd.f32 %v7099_v58, %v13726_v6 }
 0x3a7   :  { %v13860_v44 = vpop.f32.mrf.mxu0 }
 0x3a8   :  { %v13862_v21 = vpop.f32.mrf.mxu1  ;;  %v13864_v36 = vadd.f32 %v7212_v22, %v7100_v2 }
 0x3a9   :  { %v7105_v33 = vpop.f32.mrf.mxu0 }
 0x3aa   :  { %v7218_v9 = vpop.f32.mrf.mxu1  ;;  %v7106_v59 = vadd.f32 %v7105_v33, %v13740_v50 }
 0x3ab   :  { %v7107_v38 = vpop.f32.mrf.mxu0 }
 0x3ac   :  { %v7220_v56 = vpop.f32.mrf.mxu1  ;;  %v13867_v14 = vadd.f32 %v7218_v9, %v7106_v59  ;;  %v7108_v54 = vadd.f32 %v7107_v38, %v13743_v7 }
 0x3ad   :  { %v7109_v19 = vpop.f32.mrf.mxu0 }
 0x3ae   :  { %v7222_v57 = vpop.f32.mrf.mxu1  ;;  %v13870_v39 = vadd.f32 %v7220_v56, %v7108_v54  ;;  %v7110_v6 = vadd.f32 %v7109_v19, %v13754_v13 }
 0x3af   :  { %v13873_v58 = vpop.f32.mrf.mxu0 }
 0x3b0   :  { %v13875_v22 = vpop.f32.mrf.mxu1  ;;  %v13877_v2 = vadd.f32 %v7222_v57, %v7110_v6 }
 0x3b1   :  { %v7115_v35 = vpop.f32.mrf.mxu0 }
 0x3b2   :  { %v7228_v50 = vpop.f32.mrf.mxu1  ;;  %v7116_v33 = vadd.f32 %v7115_v35, %v13766_v23 }
 0x3b3   :  { %v7117_v9 = vpop.f32.mrf.mxu0 }
 0x3b4   :  { %v7230_v59 = vpop.f32.mrf.mxu1  ;;  %v13880_v10 = vadd.f32 %v7228_v50, %v7116_v33  ;;  %v7118_v7 = vadd.f32 %v7117_v9, %v13770_v24 }
 0x3b5   :  { %v7119_v38 = vpop.f32.mrf.mxu0 }
 0x3b6   :  { %v7232_v56 = vpop.f32.mrf.mxu1  ;;  %v13883_v54 = vadd.f32 %v7230_v59, %v7118_v7  ;;  %v7120_v13 = vadd.f32 %v7119_v38, %v13776_v1 }
 0x3b7   :  { %v13886_v19 = vpop.f32.mrf.mxu0 }
 0x3b8   :  { %v13888_v57 = vpop.f32.mrf.mxu1  ;;  %v13890_v6 = vadd.f32 %v7232_v56, %v7120_v13 }
 0x3b9   :  { %v7125_v29 = vpop.f32.mrf.mxu0 }
 0x3ba   :  { %v7238_v23 = vpop.f32.mrf.mxu1  ;;  %v7126_v35 = vadd.f32 %v7125_v29, %v13784_v27 }
 0x3bb   :  { %v7127_v50 = vpop.f32.mrf.mxu0 }
 0x3bc   :  { %v7240_v33 = vpop.f32.mrf.mxu1  ;;  %v13893_v12 = vadd.f32 %v7238_v23, %v7126_v35  ;;  %v7128_v24 = vadd.f32 %v7127_v50, %v13787_v20 }
 0x3bd   :  { %v7129_v9 = vpop.f32.mrf.mxu0 }
 0x3be   :  { %14456 = vst [vmem:[#allocation45_spill] sm:$0xff] %v13893_v12  ;;  %v7242_v59 = vpop.f32.mrf.mxu1  ;;  %v13896_v7 = vadd.f32 %v7240_v33, %v7128_v24  ;;  %v7130_v1 = vadd.f32 %v7129_v9, %v13794_v47 }
 0x3bf   :  { %v13899_v38 = vpop.f32.mrf.mxu0 }
 0x3c0   :  { %v13901_v56 = vpop.f32.mrf.mxu1  ;;  %v13903_v13 = vadd.f32 %v7242_v59, %v7130_v1 }
 0x3c1   :  { %v7135_v51 = vpop.f32.mrf.mxu0 }
 0x3c2   :  { %14457 = vst [vmem:[#allocation46_spill] sm:$0xff] %v13903_v13  ;;  %v7248_v29 = vpop.f32.mrf.mxu1  ;;  %v7136_v27 = vadd.f32 %v7135_v51, %v13799_v15 }
 0x3c3   :  { %v7137_v23 = vpop.f32.mrf.mxu0 }
 0x3c4   :  { %v7250_v35 = vpop.f32.mrf.mxu1  ;;  %v13906_v12 = vadd.f32 %v7248_v29, %v7136_v27  ;;  %v7138_v20 = vadd.f32 %v7137_v23, %v13802_v62 }
 0x3c5   :  { %v7139_v50 = vpop.f32.mrf.mxu0 }
 0x3c6   :  { %14458 = vst [vmem:[#allocation47_spill] sm:$0xff] %v13906_v12  ;;  %v7252_v33 = vpop.f32.mrf.mxu1  ;;  %v13909_v24 = vadd.f32 %v7250_v35, %v7138_v20  ;;  %v7140_v47 = vadd.f32 %v7139_v50, %v13809_v30 }
 0x3c7   :  { %v13912_v9 = vpop.f32.mrf.mxu0 }
 0x3c8   :  { %v13914_v59 = vpop.f32.mrf.mxu1  ;;  %v13916_v1 = vadd.f32 %v7252_v33, %v7140_v47 }
 0x3c9   :  { %v7145_v13 = vpop.f32.mrf.mxu0 }
 0x3ca   :  { %14459 = vst [vmem:[#allocation48_spill] sm:$0xff] %v13916_v1  ;;  %v7258_v15 = vpop.f32.mrf.mxu1  ;;  %v7146_v51 = vadd.f32 %v7145_v13, %v13814_v48 }
 0x3cb   :  { %v7147_v29 = vpop.f32.mrf.mxu0 }
 0x3cc   :  { %v7260_v27 = vpop.f32.mrf.mxu1  ;;  %v13919_v12 = vadd.f32 %v7258_v15, %v7146_v51  ;;  %v7148_v62 = vadd.f32 %v7147_v29, %v13817_v26 }
 0x3cd   :  { %v7149_v23 = vpop.f32.mrf.mxu0 }
 0x3ce   :  { %14460 = vst [vmem:[#allocation49_spill] sm:$0xff] %v13919_v12  ;;  %v7262_v35 = vpop.f32.mrf.mxu1  ;;  %v13922_v20 = vadd.f32 %v7260_v27, %v7148_v62  ;;  %v7150_v30 = vadd.f32 %v7149_v23, %v13824_v37  ;;  %v14409_v37 = vsub.s32 4, %v13098_v55 }
 0x3cf   :  { %v13925_v50 = vpop.f32.mrf.mxu0 }
 0x3d0   :  { %14461 = vst [vmem:[#allocation50_spill] sm:$0xff] %v13922_v20  ;;  %v13927_v33 = vpop.f32.mrf.mxu1  ;;  %v13929_v47 = vadd.f32 %v7262_v35, %v7150_v30 }
 0x3d1   :  { %14462 = vst [vmem:[#allocation51_spill] sm:$0xff] %v13927_v33  ;;  %v7155_v1 = vpop.f32.mrf.mxu0 }
 0x3d2   :  { %14463 = vst [vmem:[#allocation52_spill] sm:$0xff] %v13929_v47  ;;  %v7268_v48 = vpop.f32.mrf.mxu1  ;;  %v7156_v13 = vadd.f32 %v7155_v1, %v13828_v45  ;;  %v6979_v45 = vadd.f32 %v13693_v43, %v13701_v5 }
 0x3d3   :  { %v7157_v15 = vpop.f32.mrf.mxu0 }
 0x3d4   :  { %v7270_v51 = vpop.f32.mrf.mxu1  ;;  %v13932_v12 = vadd.f32 %v7268_v48, %v7156_v13  ;;  %v7158_v26 = vadd.f32 %v7157_v15, %v13831_v49  ;;  %v13947_v48 = vld [vmem:[#allocation11] sm:$0x3f]  ;;  %v12604_v15 = vld [vmem:[#allocation8] sm:$0x3f]  ;;  %v7092_v43 = vadd.f32 %v13847_v40, %v6979_v45 }
 0x3d5   :  { %v7159_v29 = vpop.f32.mrf.mxu0  ;;  %14469 = vst [vmem:[#allocation58_spill] sm:$0xff] %v13947_v48 }
 0x3d6   :  { %14464 = vst [vmem:[#allocation53_spill] sm:$0xff] %v13932_v12  ;;  %v7272_v27 = vpop.f32.mrf.mxu1  ;;  %v13936_v62 = vadd.f32 %v7270_v51, %v7158_v26  ;;  %v7160_v23 = vadd.f32 %v7159_v29, %v13838_v11  ;;  %v13952_v51 = vrot.slane %v12604_v15, %v14409_v37  ;;  %v14470_v26 = vsub.s32 1, %v13098_v55 }
 0x3d7   :  { %v13939_v35 = vpop.f32.mrf.mxu0 }
 0x3d8   :  { %14465 = vst [vmem:[#allocation54_spill] sm:$0xff] %v13936_v62  ;;  %14466 = vst [vmem:[#allocation55_spill] sm:$0xff] %v13939_v35  ;;  %v13941_v30 = vpop.f32.mrf.mxu1  ;;  %v13945_v1 = vadd.f32 %v7272_v27, %v7160_v23  ;;  %v13957_v29 = vrot.slane %v13947_v48, %v14470_v26  ;;  %v14471_v27 = vsub.s32 0, %v13098_v55 }
 0x3d9   :  { %14467 = vst [vmem:[#allocation56_spill] sm:$0xff] %v13941_v30  ;;  %v7311_v13 = vpop.f32.mrf.mxu0  ;;  %v14472_v30 = vsub.s32 5, %v13098_v55 }
 0x3da   :  { %14468 = vst [vmem:[#allocation57_spill] sm:$0xff] %v13945_v1  ;;  %v8179_v11 = vpop.f32.mrf.mxu1  ;;  %v7312_v5 = vadd.f32 %v7311_v13, %v13841_v25  ;;  %v13964_v23 = vrot.slane %v13947_v48, %v14471_v27  ;;  %v7205_v25 = vadd.f32 %v13849_v42, %v7092_v43  ;;  %v6989_v27 = vadd.f32 %v13721_v34, %v13729_v31 }
 0x3db   :  { %v7313_v49 = vpop.f32.mrf.mxu0  ;;  %v13969_v62 = vrot.slane %v12604_v15, %v14472_v30 }
 0x3dc   :  { %v8181_v1 = vpop.f32.mrf.mxu1  ;;  %v7314_v37 = vadd.f32 %v7313_v49, %v13844_v60  ;;  %v7717_v26 = vadd.f32 %v13952_v51, %v7312_v5  ;;  %v8900_v48 = vadd.f32 %v13964_v23, %v8179_v11  ;;  %v7102_v42 = vadd.f32 %v13860_v44, %v6989_v27 }
 0x3dd   :  { %v8901_v12 = vadd.f32 %v13957_v29, %v8181_v1  ;;  %v7315_v40 = vpop.f32.mrf.mxu0 }
 0x3de   :  { %v8183_v45 = vpop.f32.mrf.mxu1  ;;  %v7316_v13 = vadd.f32 %v7315_v40, %v13851_v17  ;;  %v7718_v15 = vadd.f32 %v13969_v62, %v7314_v37  ;;  %v7813_v43 = vmax.f32 %v7717_v26, 0.0  ;;  %v8996_v33 = vmax.f32 %v8900_v48, 0.0 }
 0x3df   :  { %v8906_v60 = vadd.f32 %v13964_v23, %v8183_v45  ;;  %v7317_v49 = vpop.f32.mrf.mxu0  ;;  %v8997_v17 = vmax.f32 %v8901_v12, 0.0  ;;  %v7215_v44 = vadd.f32 %v13862_v21, %v7102_v42 }
 0x3e0   :  { %v8185_v30 = vpop.f32.mrf.mxu1  ;;  %v7723_v5 = vadd.f32 %v13952_v51, %v7316_v13  ;;  %v7318_v1 = vadd.f32 %v7317_v49, %v7205_v25  ;;  %v7814_v13 = vmax.f32 %v7718_v15, 0.0  ;;  %v6999_v15 = vadd.f32 %v13749_v18, %v13757_v16 }
 0x3e1   :  { %v8907_v55 = vadd.f32 %v13957_v29, %v8185_v30  ;;  %v9002_v40 = vmax.f32 %v8906_v60, 0.0  ;;  %v7321_v35 = vpop.f32.mrf.mxu0 }
 0x3e2   :  { %v8189_v34 = vpop.f32.mrf.mxu1  ;;  %v7819_v31 = vmax.f32 %v7723_v5, 0.0  ;;  %v7724_v11 = vadd.f32 %v13969_v62, %v7318_v1  ;;  %v7322_v47 = vadd.f32 %v7321_v35, %v13854_v0 }
 0x3e3   :  { %v9003_v45 = vmax.f32 %v8907_v55, 0.0  ;;  %v7323_v37 = vpop.f32.mrf.mxu0  ;;  %v9092_v26 = vpack.c.bf16 %v9002_v40, %v8996_v33  ;;  %v8912_v21 = vadd.f32 %v13964_v23, %v8189_v34 }
 0x3e4   :  { %v8191_v20 = vpop.f32.mrf.mxu1  ;;  %v7909_v25 = vpack.c.bf16 %v7819_v31, %v7813_v43  ;;  %v7820_v49 = vmax.f32 %v7724_v11, 0.0  ;;  %v7729_v12 = vadd.f32 %v13952_v51, %v7322_v47  ;;  %v7324_v27 = vadd.f32 %v7323_v37, %v13857_v8 }
 0x3e5   :  { %v9093_v30 = vpack.c.bf16 %v9003_v45, %v8997_v17  ;;  %v7325_v60 = vpop.f32.mrf.mxu0  ;;  %v8913_v55 = vadd.f32 %v13957_v29, %v8191_v20  ;;  %v9008_v45 = vmax.f32 %v8912_v21, 0.0 }
 0x3e6   :  { %v8193_v5 = vpop.f32.mrf.mxu1  ;;  %v7326_v0 = vadd.f32 %v7325_v60, %v13864_v36  ;;  %v7910_v48 = vpack.c.bf16 %v7820_v49, %v7814_v13  ;;  %v7730_v8 = vadd.f32 %v13969_v62, %v7324_v27  ;;  %v7112_v36 = vadd.f32 %v13873_v58, %v6999_v15 }
 0x3e7   :  { %v8918_v35 = vadd.f32 %v13964_v23, %v8193_v5  ;;  %9563 = vmatprep.mubr.bf16.mxu0 %v9093_v30  ;;  %v7327_v33 = vpop.f32.mrf.mxu0  ;;  %v7825_v43 = vmax.f32 %v7729_v12, 0.0  ;;  %v9009_v18 = vmax.f32 %v8913_v55, 0.0 }
 0x3e8   :  { %v8195_v1 = vpop.f32.mrf.mxu1  ;;  %9564 = vmatmul.mubr.bf16.vlgmr.msra.gmra.mxu0 %v9092_v26  ;;  %v7735_v47 = vadd.f32 %v13952_v51, %v7326_v0  ;;  %v7328_v42 = vadd.f32 %v7327_v33, %v7215_v44  ;;  %8787 = vmatprep.mubr.bf16.mxu1 %v7910_v48  ;;  %v7826_v58 = vmax.f32 %v7730_v8, 0.0  ;;  %v14473_v33 = vld [vmem:[#allocation27_spill] sm:$0xff] }
 0x3e9   :  { %v8919_v20 = vadd.f32 %v13957_v29, %v8195_v1  ;;  %v9014_v17 = vmax.f32 %v8918_v35, 0.0  ;;  %v7331_v40 = vpop.f32.mrf.mxu0  ;;  %8788 = vmatmul.mubr.bf16.vlgmr.msra.gmra.mxu1 %v7909_v25  ;;  %v7009_v35 = vadd.f32 %v13774_v52, %v13779_v32 }
 0x3ea   :  { %v8199_v31 = vpop.f32.mrf.mxu1  ;;  %v7831_v16 = vmax.f32 %v7735_v47, 0.0  ;;  %v7736_v34 = vadd.f32 %v13969_v62, %v7328_v42  ;;  %10987 = vmatpush3.bf16.msra.mxu1 %v13666_v4  ;;  %v7332_v37 = vadd.f32 %v7331_v40, %v13867_v14  ;;  %v7225_v4 = vadd.f32 %v13875_v22, %v7112_v36 }
 0x3eb   :  { %v9015_v11 = vmax.f32 %v8919_v20, 0.0  ;;  %v7333_v13 = vpop.f32.mrf.mxu0  ;;  %10980 = vmatprep.subr.bf16.mxu1 %v13673_v3  ;;  %v9098_v12 = vpack.c.bf16 %v9014_v17, %v9008_v45  ;;  %v6793_v3 = vadd.f32 %v13630_v61, %v13628_v41  ;;  %v8924_v22 = vadd.f32 %v13964_v23, %v8199_v31  ;;  %v14474_v31 = vld [vmem:[#allocation30_spill] sm:$0xff] }
 0x3ec   :  { %v8201_v49 = vpop.f32.mrf.mxu1  ;;  %v7915_v30 = vpack.c.bf16 %v7831_v16, %v7825_v43  ;;  %v7832_v44 = vmax.f32 %v7736_v34, 0.0  ;;  %v7741_v25 = vadd.f32 %v13952_v51, %v7332_v37  ;;  %v7334_v27 = vadd.f32 %v7333_v13, %v13870_v39  ;;  %v14476_v16 = vld [vmem:[#allocation24_spill] sm:$0xff]  ;;  %v14477_v13 = vld [vmem:[#allocation29_spill] sm:$0xff] }
 0x3ed   :  { %v9099_v26 = vpack.c.bf16 %v9015_v11, %v9009_v18  ;;  %v7335_v60 = vpop.f32.mrf.mxu0  ;;  %v8925_v48 = vadd.f32 %v13957_v29, %v8201_v49  ;;  %v7122_v41 = vadd.f32 %v13886_v19, %v7009_v35  ;;  %v6906_v36 = vadd.f32 %v13790_v53, %v6793_v3  ;;  %v14475_v18 = vld [vmem:[#allocation22_spill] sm:$0xff]  ;;  %v14478_v3 = vld [vmem:[#allocation31_spill] sm:$0xff] }
 0x3ee   :  { %v8203_v5 = vpop.f32.mrf.mxu1  ;;  %v7336_v55 = vadd.f32 %v7335_v60, %v13877_v2  ;;  %v7916_v0 = vpack.c.bf16 %v7832_v44, %v7826_v58  ;;  %10988 = vmatpush3.bf16.msra.mxu1 %v13679_v63  ;;  %v7837_v61 = vmax.f32 %v7741_v25, 0.0  ;;  %v7742_v52 = vadd.f32 %v13969_v62, %v7334_v27 }
 0x3ef   :  { %v8930_v14 = vadd.f32 %v13964_v23, %v8203_v5  ;;  %9571 = vmatprep.mubr.bf16.mxu0 %v9099_v26  ;;  %v7337_v15 = vpop.f32.mrf.mxu0  ;;  %10981 = vmatprep.subr.bf16.mxu1 %v14473_v33  ;;  %v9021_v43 = vmax.f32 %v8925_v48, 0.0  ;;  %v6803_v34 = vadd.f32 %v14476_v16, %v14475_v18  ;;  %v9020_v11 = vmax.f32 %v8924_v22, 0.0 }
 0x3f0   :  { %v8205_v39 = vpop.f32.mrf.mxu1  ;;  %9572 = vmatmul.mubr.bf16.gmra.mxu0 %v9098_v12  ;;  %v7747_v2 = vadd.f32 %v13952_v51, %v7336_v55  ;;  %v7338_v21 = vadd.f32 %v7337_v15, %v7225_v4  ;;  %8797 = vmatprep.mubr.bf16.mxu1 %v7916_v0  ;;  %v7838_v49 = vmax.f32 %v7742_v52, 0.0  ;;  %v7235_v26 = vadd.f32 %v13888_v57, %v7122_v41  ;;  %v14480_v41 = vld [vmem:[#allocation39_spill] sm:$0xff] }
 0x3f1   :  { %v8931_v32 = vadd.f32 %v13957_v29, %v8205_v39  ;;  %v7341_v1 = vpop.f32.mrf.mxu0  ;;  %8798 = vmatmul.mubr.bf16.gmra.mxu1 %v7915_v30  ;;  %v9026_v63 = vmax.f32 %v8930_v14, 0.0  ;;  %v7019_v60 = vadd.f32 %v13792_v28, %v6906_v36 }
 0x3f2   :  { %v8209_v8 = vpop.f32.mrf.mxu1  ;;  %v7843_v47 = vmax.f32 %v7747_v2, 0.0  ;;  %v7748_v42 = vadd.f32 %v13969_v62, %v7338_v21  ;;  %v7342_v20 = vadd.f32 %v7341_v1, %v13880_v10  ;;  %10989 = vmatpush3.bf16.msra.mxu1 %v14474_v31  ;;  %v14479_v21 = vld [vmem:[#allocation45_spill] sm:$0xff] }
 0x3f3   :  { %v9027_v17 = vmax.f32 %v8931_v32, 0.0  ;;  %v7343_v40 = vpop.f32.mrf.mxu0  ;;  %10982 = vmatprep.subr.bf16.mxu1 %v14477_v13  ;;  %v9104_v12 = vpack.c.bf16 %v9026_v63, %v9020_v11 }
 0x3f4   :  { %v8211_v19 = vpop.f32.mrf.mxu1  ;;  %v7921_v45 = vpack.c.bf16 %v7843_v47, %v7837_v61  ;;  %v7844_v37 = vmax.f32 %v7748_v42, 0.0  ;;  %v7753_v10 = vadd.f32 %v13952_v51, %v7342_v20  ;;  %v7344_v53 = vadd.f32 %v7343_v40, %v13883_v54  ;;  %v14482_v20 = vld [vmem:[#allocation33_spill] sm:$0xff] }
 0x3f5   :  { %v9105_v58 = vpack.c.bf16 %v9027_v17, %v9021_v43  ;;  %v7345_v30 = vpop.f32.mrf.mxu0  ;;  %v8937_v5 = vadd.f32 %v13957_v29, %v8211_v19  ;;  %v8936_v54 = vadd.f32 %v13964_v23, %v8209_v8  ;;  %v6916_v61 = vadd.f32 %v14480_v41, %v6803_v34  ;;  %v14481_v8 = vld [vmem:[#allocation32_spill] sm:$0xff]  ;;  %v14483_v34 = vld [vmem:[#allocation46_spill] sm:$0xff] }
 0x3f6   :  { %v8213_v44 = vpop.f32.mrf.mxu1  ;;  %v7346_v25 = vadd.f32 %v7345_v30, %v13890_v6  ;;  %v7922_v14 = vpack.c.bf16 %v7844_v37, %v7838_v49  ;;  %10990 = vmatpush3.bf16.msra.mxu1 %v13707_v46  ;;  %v7132_v6 = vadd.f32 %v13899_v38, %v7019_v60  ;;  %v7849_v35 = vmax.f32 %v7753_v10, 0.0  ;;  %v14485_v10 = vld [vmem:[#allocation34_spill] sm:$0xff]  ;;  %v14486_v30 = vld [vmem:[#allocation35_spill] sm:$0xff] }
 0x3f7   :  { %v8942_v27 = vadd.f32 %v13964_v23, %v8213_v44  ;;  %9579 = vmatprep.mubr.bf16.mxu0 %v9105_v58  ;;  %v7347_v4 = vpop.f32.mrf.mxu0  ;;  %10983 = vmatprep.subr.bf16.mxu1 %v14478_v3  ;;  %v7754_v28 = vadd.f32 %v13969_v62, %v7344_v53  ;;  %v9033_v52 = vmax.f32 %v8937_v5, 0.0  ;;  %v9032_v47 = vmax.f32 %v8936_v54, 0.0  ;;  %v14488_v44 = vld [vmem:[#allocation26_spill] sm:$0xff] }
 0x3f8   :  { %v8215_v55 = vpop.f32.mrf.mxu1  ;;  %v7759_v0 = vadd.f32 %v13952_v51, %v7346_v25  ;;  %v7348_v57 = vadd.f32 %v7347_v4, %v7235_v26  ;;  %9580 = vmatmul.mubr.bf16.gmra.mxu0 %v9104_v12  ;;  %8807 = vmatprep.mubr.bf16.mxu1 %v7922_v14  ;;  %v7245_v31 = vadd.f32 %v13901_v56, %v7132_v6  ;;  %v14487_v56 = vld [vmem:[#allocation23_spill] sm:$0xff]  ;;  %v14490_v6 = vld [vmem:[#allocation41_spill] sm:$0xff] }
 0x3f9   :  { %v8943_v48 = vadd.f32 %v13957_v29, %v8215_v55  ;;  %v7351_v15 = vpop.f32.mrf.mxu0  ;;  %v9038_v22 = vmax.f32 %v8942_v27, 0.0  ;;  %8808 = vmatmul.mubr.bf16.gmra.mxu1 %v7921_v45  ;;  %v7850_v36 = vmax.f32 %v7754_v28, 0.0  ;;  %v14484_v45 = vld [vmem:[#allocation40_spill] sm:$0xff]  ;;  %v6813_v26 = vadd.f32 %v14488_v44, %v14487_v56  ;;  %v14489_v55 = vld [vmem:[#allocation47_spill] sm:$0xff] }
 0x3fa   :  { %v14040_v39 = vpop.f32.mrf.mxu1  ;;  %v7855_v46 = vmax.f32 %v7759_v0, 0.0  ;;  %v7760_v2 = vadd.f32 %v13969_v62, %v7348_v57  ;;  %v7352_v33 = vadd.f32 %v7351_v15, %v14479_v21  ;;  %10991 = vmatpush3.bf16.msra.mxu1 %v14481_v8  ;;  %v7029_v37 = vadd.f32 %v14484_v45, %v6916_v61  ;;  %v12363_v0 = vld [vmem:[#allocation12 + $0x178] sm:$0xff]   ;;  %v12365_v3 = vld [vmem:[#allocation12 + $0x170] sm:$0xff]  }
 0x3fb   :  { %v9039_v38 = vmax.f32 %v8943_v48, 0.0  ;;  %v7353_v32 = vpop.f32.mrf.mxu0  ;;  %10984 = vmatprep.subr.bf16.mxu1 %v14482_v20  ;;  %v9110_v18 = vpack.c.bf16 %v9038_v22, %v9032_v47  ;;  %v12364_v57 = vld [vmem:[#allocation12 + $0x138] sm:$0xff]   ;;  %10915 = vmatprep.subr.bf16.mxu0 %v12363_v0  ;;  %v12366_v41 = vld [vmem:[#allocation12 + $0x130] sm:$0xff]   ;;  %v12367_v47 = vld [vmem:[#allocation12 + $0x168] sm:$0xff]  }
 0x3fc   :  { %v14045_v1 = vpop.f32.mrf.mxu1  ;;  %v7927_v63 = vpack.c.bf16 %v7855_v46, %v7849_v35  ;;  %v7856_v42 = vmax.f32 %v7760_v2, 0.0  ;;  %v7354_v17 = vadd.f32 %v7353_v32, %v13896_v7  ;;  %v7765_v16 = vadd.f32 %v13952_v51, %v7352_v33  ;;  %v14492_v46 = vld [vmem:[#allocation37_spill] sm:$0xff]  ;;  %v12347_v22 = vld [vmem:[#allocation12 + $0xf8] sm:$0xff]   ;;  %10916 = vmatpush3.bf16.msra.mxu0 %v12364_v57 }
 0x3fd   :  { %v9111_v43 = vpack.c.bf16 %v9039_v38, %v9033_v52  ;;  %v7355_v40 = vpop.f32.mrf.mxu0  ;;  %v7142_v12 = vadd.f32 %v13912_v9, %v7029_v37  ;;  %v6926_v35 = vadd.f32 %v14490_v6, %v6813_v26  ;;  %v14491_v9 = vld [vmem:[#allocation36_spill] sm:$0xff]  ;;  %10917 = vmatprep.subr.bf16.mxu0 %v12365_v3 }
 0x3fe   :  { %v14050_v19 = vpop.f32.mrf.mxu1  ;;  %v7356_v11 = vadd.f32 %v7355_v40, %v14483_v34  ;;  %v7928_v58 = vpack.c.bf16 %v7856_v42, %v7850_v36  ;;  %10992 = vmatpush3.bf16.msra.mxu1 %v14485_v10  ;;  %v7766_v25 = vadd.f32 %v13969_v62, %v7354_v17  ;;  %v7861_v60 = vmax.f32 %v7765_v16, 0.0  ;;  %v14493_v32 = vld [vmem:[#allocation48_spill] sm:$0xff]  ;;  %v14496_v40 = vld [vmem:[#allocation25_spill] sm:$0xff] }
 0x3ff   :  { %9587 = vmatprep.mubr.bf16.mxu0 %v9111_v43  ;;  %v7357_v13 = vpop.f32.mrf.mxu0  ;;  %10985 = vmatprep.subr.bf16.mxu1 %v14486_v30  ;;  %v7255_v61 = vadd.f32 %v13914_v59, %v7142_v12  ;;  %v14495_v43 = vld [vmem:[#allocation38_spill] sm:$0xff]  ;;  %v14497_v59 = vld [vmem:[#allocation28_spill] sm:$0xff]  ;;  %v14498_v10 = vld [vmem:[#allocation49_spill] sm:$0xff] }
 0x400   :  { %v14056_v49 = vpop.f32.mrf.mxu1  ;;  %v7771_v7 = vadd.f32 %v13952_v51, %v7356_v11  ;;  %v7358_v53 = vadd.f32 %v7357_v13, %v7245_v31  ;;  %9588 = vmatmul.mubr.bf16.gmra.mxu0 %v9110_v18  ;;  %8817 = vmatprep.mubr.bf16.mxu1 %v7928_v58  ;;  %v7862_v2 = vmax.f32 %v7766_v25, 0.0  ;;  %v6823_v31 = vadd.f32 %v14497_v59, %v14496_v40  ;;  %v12368_v11 = vld [vmem:[#allocation12 + $0x128] sm:$0xff]   ;;  %v14499_v30 = vld [vmem:[#allocation43_spill] sm:$0xff]  ;;  %v14502_v57 = vld [vmem:[#allocation52_spill] sm:$0xff] }
 0x401   :  { %v7361_v27 = vpop.f32.mrf.mxu0  ;;  %8818 = vmatmul.mubr.bf16.gmra.mxu1 %v7927_v63  ;;  %v14494_v63 = vld [vmem:[#allocation42_spill] sm:$0xff]  ;;  %10918 = vmatpush3.bf16.msra.mxu0 %v12366_v41  ;;  %v14503_v6 = vld [vmem:[#allocation44_spill] sm:$0xff] }
 0x402   :  { %v7867_v5 = vmax.f32 %v7771_v7, 0.0  ;;  %v7772_v4 = vadd.f32 %v13969_v62, %v7358_v53  ;;  %v7362_v14 = vadd.f32 %v7361_v27, %v14489_v55  ;;  %v14067_v54 = vpop.f32.mrf.mxu1  ;;  %10993 = vmatpush3.bf16.msra.mxu1 %v14491_v9  ;;  %v7039_v42 = vadd.f32 %v14494_v63, %v6926_v35  ;;  %10919 = vmatprep.subr.bf16.mxu0 %v12367_v47  ;;  %v12369_v53 = vld [vmem:[#allocation12 + $0x160] sm:$0xff]   ;;  %v14500_v25 = vld [vmem:[#allocation50_spill] sm:$0xff] }
 0x403   :  { %v7363_v28 = vpop.f32.mrf.mxu0  ;;  %10986 = vmatprep.subr.bf16.mxu1 %v14492_v46  ;;  %v6936_v56 = vadd.f32 %v14499_v30, %v6823_v31  ;;  %v14504_v46 = vld [vmem:[#allocation55_spill] sm:$0xff] }
 0x404   :  { %v7933_v48 = vpack.c.bf16 %v7867_v5, %v7861_v60  ;;  %v7868_v15 = vmax.f32 %v7772_v4, 0.0  ;;  %v7364_v21 = vadd.f32 %v7363_v28, %v13909_v24  ;;  %v7777_v52 = vadd.f32 %v13952_v51, %v7362_v14  ;;  %v14075_v38 = vpop.f32.mrf.mxu1  ;;  %v12370_v5 = vld [vmem:[#allocation12 + $0x120] sm:$0xff]   ;;  %v14501_v4 = vld [vmem:[#allocation51_spill] sm:$0xff] }
 0x405   :  { %v7365_v33 = vpop.f32.mrf.mxu0  ;;  %v7152_v18 = vadd.f32 %v13925_v50, %v7039_v42  ;;  %10920 = vmatpush3.bf16.msra.mxu0 %v12368_v11  ;;  %v7049_v35 = vadd.f32 %v14503_v6, %v6936_v56 }
 0x406   :  { %v7366_v8 = vadd.f32 %v7365_v33, %v14493_v32  ;;  %v7934_v36 = vpack.c.bf16 %v7868_v15, %v7862_v2  ;;  %10994 = vmatpush3.bf16.msra.mxu1 %v14495_v43  ;;  %v7778_v16 = vadd.f32 %v13969_v62, %v7364_v21  ;;  %v7873_v45 = vmax.f32 %v7777_v52, 0.0  ;;  %v14085_v13 = vpop.f32.mrf.mxu1  ;;  %10921 = vmatprep.subr.bf16.mxu0 %v12369_v53  ;;  %v14505_v32 = vld [vmem:[#allocation53_spill] sm:$0xff] }
 0x407   :  { %v7367_v20 = vpop.f32.mrf.mxu0  ;;  %10851 = vmatprep.subr.bf16.mxu1 %v12347_v22  ;;  %v7265_v55 = vadd.f32 %v14501_v4, %v7152_v18  ;;  %v7162_v22 = vadd.f32 %v14504_v46, %v7049_v35  ;;  %v14508_v18 = vld [vmem:[#allocation57_spill] sm:$0xff]  ;;  %v8961_v35 = vadd.f32 %v13957_v29, %v14075_v38  ;;  %v12371_v46 = vld [vmem:[#allocation12 + $0x158] sm:$0xff]   ;;  %v12349_v38 = vld [vmem:[#allocation12 + $0xf0] sm:$0xff]  }
 0x408   :  { %v7783_v24 = vadd.f32 %v13952_v51, %v7366_v8  ;;  %v7368_v17 = vadd.f32 %v7367_v20, %v7255_v61  ;;  %8827 = vmatprep.mubr.bf16.mxu1 %v7934_v36  ;;  %v7874_v12 = vmax.f32 %v7778_v16, 0.0  ;;  %v8235_v14 = vpop.f32.mrf.mxu1  ;;  %v14506_v20 = vld [vmem:[#allocation54_spill] sm:$0xff] }
 0x409   :  { %v7371_v34 = vpop.f32.mrf.mxu0  ;;  %8828 = vmatmul.mubr.bf16.gmra.mxu1 %v7933_v48  ;;  %10922 = vmatpush3.bf16.msra.mxu0 %v12370_v5 }
 0x40a   :  { %v7879_v37 = vmax.f32 %v7783_v24, 0.0  ;;  %v7784_v58 = vadd.f32 %v13969_v62, %v7368_v17  ;;  %v7372_v7 = vadd.f32 %v7371_v34, %v14498_v10  ;;  %v14098_v41 = vpop.f32.mrf.mxu1  ;;  %v14507_v17 = vld [vmem:[#allocation56_spill] sm:$0xff]  ;;  %v8955_v10 = vadd.f32 %v13957_v29, %v14056_v49  ;;  %10923 = vmatprep.subr.bf16.mxu0 %v12371_v46  ;;  %v12357_v46 = vld [vmem:[#allocation12 + $0xd0] sm:$0xff]  }
 0x40b   :  { %v7373_v50 = vpop.f32.mrf.mxu0  ;;  %v7275_v40 = vadd.f32 %v14507_v17, %v7162_v22  ;;  %v9057_v22 = vmax.f32 %v8961_v35, 0.0  ;;  %v12351_v17 = vld [vmem:[#allocation12 + $0xe8] sm:$0xff]  }
 0x40c   :  { %v7939_v44 = vpack.c.bf16 %v7879_v37, %v7873_v45  ;;  %v7880_v26 = vmax.f32 %v7784_v58, 0.0  ;;  %v7374_v27 = vadd.f32 %v7373_v50, %v14500_v25  ;;  %v7789_v0 = vadd.f32 %v13952_v51, %v7372_v7  ;;  %v8241_v59 = vpop.f32.mrf.mxu1  ;;  %v14511_v35 = vld [vmem:[#allocation58_spill] sm:$0xff] }
 0x40d   :  { %v7375_v60 = vpop.f32.mrf.mxu0 }
 0x40e   :  { %v7376_v3 = vadd.f32 %v7375_v60, %v14502_v57  ;;  %v7940_v9 = vpack.c.bf16 %v7880_v26, %v7874_v12  ;;  %v7790_v2 = vadd.f32 %v13969_v62, %v7374_v27  ;;  %v7885_v33 = vmax.f32 %v7789_v0, 0.0  ;;  %v14112_v53 = vpop.f32.mrf.mxu1 }
 0x40f   :  { %v7377_v28 = vpop.f32.mrf.mxu0  ;;  %v9051_v27 = vmax.f32 %v8955_v10, 0.0  ;;  %v12353_v10 = vld [vmem:[#allocation12 + $0xe0] sm:$0xff]  }
 0x410   :  { %v7795_v48 = vadd.f32 %v13952_v51, %v7376_v3  ;;  %v7378_v15 = vadd.f32 %v7377_v28, %v7265_v55  ;;  %8837 = vmatprep.mubr.bf16.mxu1 %v7940_v9  ;;  %v7886_v43 = vmax.f32 %v7790_v2, 0.0  ;;  %v8245_v60 = vpop.f32.mrf.mxu1  ;;  %v8948_v3 = vadd.f32 %v13964_v23, %v14040_v39  ;;  %v12348_v39 = vld [vmem:[#allocation12 + $0xb8] sm:$0xff]  }
 0x411   :  { %v7381_v21 = vpop.f32.mrf.mxu0  ;;  %8838 = vmatmul.mubr.bf16.gmra.mxu1 %v7939_v44  ;;  %v8949_v44 = vadd.f32 %v13957_v29, %v14045_v1  ;;  %v8967_v1 = vadd.f32 %v13957_v29, %v8235_v14 }
 0x412   :  { %v7891_v61 = vmax.f32 %v7795_v48, 0.0  ;;  %v7796_v52 = vadd.f32 %v13969_v62, %v7378_v15  ;;  %v7382_v8 = vadd.f32 %v7381_v21, %v14505_v32  ;;  %v14130_v6 = vpop.f32.mrf.mxu1  ;;  %v9044_v15 = vmax.f32 %v8948_v3, 0.0  ;;  %v12372_v21 = vld [vmem:[#allocation12 + $0x118] sm:$0xff]  }
 0x413   :  { %v7383_v47 = vpop.f32.mrf.mxu0  ;;  %v9045_v4 = vmax.f32 %v8949_v44, 0.0  ;;  %v8979_v32 = vadd.f32 %v13957_v29, %v8245_v60  ;;  %10924 = vmatpush3.bf16.msra.mxu0 %v12372_v21  ;;  %v8972_v44 = vadd.f32 %v13964_v23, %v14098_v41 }
 0x414   :  { %v7945_v63 = vpack.c.bf16 %v7891_v61, %v7885_v33  ;;  %v7892_v42 = vmax.f32 %v7796_v52, 0.0  ;;  %v7384_v36 = vadd.f32 %v7383_v47, %v14506_v20  ;;  %v7801_v31 = vadd.f32 %v13952_v51, %v7382_v8  ;;  %v8251_v14 = vpop.f32.mrf.mxu1 }
 0x415   :  { %v7385_v24 = vpop.f32.mrf.mxu0  ;;  %v9117_v0 = vpack.c.bf16 %v9051_v27, %v9045_v4  ;;  %v8966_v61 = vadd.f32 %v13964_v23, %v14085_v13  ;;  %v8960_v47 = vadd.f32 %v13964_v23, %v14067_v54  ;;  %v8973_v20 = vadd.f32 %v13957_v29, %v8241_v59  ;;  %v12350_v13 = vld [vmem:[#allocation12 + $0xb0] sm:$0xff]   ;;  %v12378_v27 = vld [vmem:[#allocation12 + $0x100] sm:$0xff]  }
 0x416   :  { %v7386_v16 = vadd.f32 %v7385_v24, %v14508_v18  ;;  %v7946_v11 = vpack.c.bf16 %v7892_v42, %v7886_v43  ;;  %v7802_v45 = vadd.f32 %v13969_v62, %v7384_v36  ;;  %v7897_v30 = vmax.f32 %v7801_v31, 0.0  ;;  %v12373_v42 = vld [vmem:[#allocation12 + $0x150] sm:$0xff]  }
 0x417   :  { %v7387_v34 = vpop.f32.mrf.mxu0  ;;  %v12374_v43 = vld [vmem:[#allocation12 + $0x110] sm:$0xff]   ;;  %v9062_v24 = vmax.f32 %v8966_v61, 0.0  ;;  %10925 = vmatprep.subr.bf16.mxu0 %v12373_v42  ;;  %v9056_v54 = vmax.f32 %v8960_v47, 0.0  ;;  %v12359_v47 = vld [vmem:[#allocation12 + $0xc8] sm:$0xff]  }
 0x418   :  { %v7807_v37 = vadd.f32 %v13952_v51, %v7386_v16  ;;  %v7388_v58 = vadd.f32 %v7387_v34, %v7275_v40  ;;  %8847 = vmatprep.mubr.bf16.mxu1 %v7946_v11  ;;  %v7898_v51 = vmax.f32 %v7802_v45, 0.0  ;;  %v9075_v40 = vmax.f32 %v8979_v32, 0.0  ;;  %10926 = vmatpush3.bf16.msra.mxu0 %v12374_v43  ;;  %v12375_v16 = vld [vmem:[#allocation12 + $0x148] sm:$0xff]  }
 0x419   :  { %v14110_v7 = vpop.f32.mrf.mxu0  ;;  %8848 = vmatmul.mubr.bf16.gmra.mxu1 %v7945_v63  ;;  %v8253_v63 = vpop.f32.mrf.mxu1  ;;  %v9069_v34 = vmax.f32 %v8973_v20, 0.0  ;;  %v12352_v11 = vld [vmem:[#allocation12 + $0xa8] sm:$0xff]   ;;  %10927 = vmatprep.subr.bf16.mxu0 %v12375_v16 }
 0x41a   :  { %v7903_v56 = vmax.f32 %v7807_v37, 0.0  ;;  %v7808_v50 = vadd.f32 %v13969_v62, %v7388_v58  ;;  %v8954_v62 = vadd.f32 %v13964_v23, %v14050_v19  ;;  %v9063_v19 = vmax.f32 %v8967_v1, 0.0  ;;  %v12376_v45 = vld [vmem:[#allocation12 + $0x108] sm:$0xff]  }
 0x41b   :  { %v14117_v26 = vpop.f32.mrf.mxu0  ;;  %v8255_v18 = vpop.f32.mrf.mxu1  ;;  %v9122_v37 = vpack.c.bf16 %v9062_v24, %v9056_v54  ;;  %v8978_v58 = vadd.f32 %v13964_v23, %v14112_v53  ;;  %v12354_v53 = vld [vmem:[#allocation12 + $0xa0] sm:$0xff]  }
 0x41c   :  { %v7951_v12 = vpack.c.bf16 %v7903_v56, %v7897_v30  ;;  %v7904_v25 = vmax.f32 %v7808_v50, 0.0  ;;  %v9050_v9 = vmax.f32 %v8954_v62, 0.0  ;;  %v9123_v52 = vpack.c.bf16 %v9063_v19, %v9057_v22  ;;  %10928 = vmatpush3.bf16.msra.mxu0 %v12376_v45  ;;  %v14509_v1 = vld [vmem:[#allocation21_spill] sm:$0xff]  ;;  %v12356_v19 = vld [vmem:[#allocation12 + $0x98] sm:$0xff]  }
 0x41d   :  { %v14119_v49 = vpop.f32.mrf.mxu0  ;;  %v9129_v30 = vpack.c.bf16 %v9075_v40, %v9069_v34  ;;  %v8991_v56 = vadd.f32 %v13957_v29, %v8255_v18  ;;  %v9074_v60 = vmax.f32 %v8978_v58, 0.0  ;;  %v14510_v3 = vsub.s32 3, %v14509_v1 }
 0x41e   :  { %v7952_v5 = vpack.c.bf16 %v7904_v25, %v7898_v51  ;;  %v9116_v33 = vpack.c.bf16 %v9050_v9, %v9044_v15  ;;  %v12377_v51 = vld [vmem:[#allocation12 + $0x140] sm:$0xff]   ;;  %v14512_v20 = vsub.s32 2, %v14509_v1 }
 0x41f   :  { %v14121_v55 = vpop.f32.mrf.mxu0  ;;  %10929 = vmatprep.subr.bf16.mxu0 %v12377_v51  ;;  %v9087_v4 = vmax.f32 %v8991_v56, 0.0 }
 0x420   :  { %8857 = vmatprep.mubr.bf16.mxu1 %v7952_v5  ;;  %v12355_v5 = vld [vmem:[#allocation12 + $0xd8] sm:$0xff]   ;;  %10930 = vmatpush3.bf16.msra.mxu0 %v12378_v27 }
 0x421   :  { %v14126_v57 = vpop.f32.mrf.mxu0  ;;  %8858 = vmatmul.mubr.bf16.gmra.mxu1 %v7951_v12  ;;  %v8985_v12 = vadd.f32 %v13957_v29, %v8251_v14  ;;  %v14169_v29 = vrot.slane %v14511_v35, %v14510_v3  ;;  %v8990_v14 = vadd.f32 %v13964_v23, %v8253_v63 }
 0x422   :  { %9595 = vmatprep.mubr.bf16.mxu1 %v9117_v0  ;;  %v9068_v0 = vmax.f32 %v8972_v44, 0.0 }
 0x423   :  { %v14134_v28 = vpop.f32.mrf.mxu0  ;;  %v9081_v41 = vmax.f32 %v8985_v12, 0.0  ;;  %v8903_v61 = vadd.f32 %v14169_v29, %v14117_v26  ;;  %v9086_v32 = vmax.f32 %v8990_v14, 0.0 }
 0x424   :  { %v9128_v15 = vpack.c.bf16 %v9074_v60, %v9068_v0  ;;  %v8915_v34 = vadd.f32 %v14169_v29, %v14134_v28 }
 0x425   :  { %v14136_v48 = vpop.f32.mrf.mxu0  ;;  %v9135_v22 = vpack.c.bf16 %v9087_v4, %v9081_v41 }
 0x427   :  { %v14138_v2 = vpop.f32.mrf.mxu0 }
 0x428   :  { %v8921_v54 = vadd.f32 %v14169_v29, %v14138_v2 }
 0x429   :  { %v14143_v8 = vpop.f32.mrf.mxu0  ;;  %9596 = vmatmul.mubr.bf16.vlgmr.msra.gmra.mxu1 %v9116_v33  ;;  %v8984_v33 = vadd.f32 %v13964_v23, %v14130_v6  ;;  %v14189_v23 = vrot.slane %v14511_v35, %v14512_v20  ;;  %v8999_v6 = vmax.f32 %v8903_v61, 0.0 }
 0x42a   :  { %9603 = vmatprep.mubr.bf16.mxu1 %v9123_v52  ;;  %10852 = vmatpush3.bf16.msra.mxu1 %v12348_v39  ;;  %v8909_v39 = vadd.f32 %v14169_v29, %v14121_v55  ;;  %v12358_v52 = vld [vmem:[#allocation12 + $0x90] sm:$0xff]  }
 0x42b   :  { %v14148_v36 = vpop.f32.mrf.mxu0  ;;  %10853 = vmatprep.subr.bf16.mxu1 %v12349_v38  ;;  %v9080_v55 = vmax.f32 %v8984_v33, 0.0  ;;  %v8908_v24 = vadd.f32 %v14189_v23, %v14119_v49  ;;  %v8902_v18 = vadd.f32 %v14189_v23, %v14110_v7  ;;  %v9017_v49 = vmax.f32 %v8921_v54, 0.0 }
 0x42c   :  { %v9005_v63 = vmax.f32 %v8909_v39, 0.0  ;;  %v8920_v7 = vadd.f32 %v14189_v23, %v14136_v48  ;;  %v8914_v28 = vadd.f32 %v14189_v23, %v14126_v57  ;;  %v8927_v51 = vadd.f32 %v14169_v29, %v14148_v36 }
 0x42d   :  { %v14150_v31 = vpop.f32.mrf.mxu0  ;;  %v9134_v43 = vpack.c.bf16 %v9086_v32, %v9080_v55  ;;  %v9004_v45 = vmax.f32 %v8908_v24, 0.0  ;;  %v8926_v57 = vadd.f32 %v14189_v23, %v14143_v8 }
 0x42e   :  { %10854 = vmatpush3.bf16.msra.mxu1 %v12350_v13  ;;  %v12360_v13 = vld [vmem:[#allocation12 + $0x88] sm:$0xff]   ;;  %v9095_v40 = vpack.c.bf16 %v9005_v63, %v8999_v6  ;;  %v9016_v12 = vmax.f32 %v8920_v7, 0.0  ;;  %v9010_v27 = vmax.f32 %v8914_v28, 0.0  ;;  %v8932_v48 = vadd.f32 %v14189_v23, %v14150_v31 }
 0x42f   :  { %v14152_v59 = vpop.f32.mrf.mxu0  ;;  %10855 = vmatprep.subr.bf16.mxu1 %v12351_v17  ;;  %v12361_v17 = vld [vmem:[#allocation12 + $0xc0] sm:$0xff]  }
 0x430   :  { %v8933_v56 = vadd.f32 %v14169_v29, %v14152_v59  ;;  %v9100_v4 = vpack.c.bf16 %v9016_v12, %v9010_v27  ;;  %v9028_v3 = vmax.f32 %v8932_v48, 0.0 }
 0x431   :  { %v14157_v50 = vpop.f32.mrf.mxu0  ;;  %9604 = vmatmul.mubr.bf16.gmra.mxu1 %v9122_v37  ;;  %v8998_v37 = vmax.f32 %v8902_v18, 0.0 }
 0x432   :  { %9611 = vmatprep.mubr.bf16.mxu1 %v9129_v30  ;;  %10856 = vmatpush3.bf16.msra.mxu1 %v12352_v11  ;;  %v12362_v11 = vld [vmem:[#allocation12 + $0x80] sm:$0xff]   ;;  %v8938_v8 = vadd.f32 %v14189_v23, %v14157_v50 }
 0x433   :  { %v14162_v25 = vpop.f32.mrf.mxu0  ;;  %10857 = vmatprep.subr.bf16.mxu1 %v12353_v10  ;;  %v9011_v10 = vmax.f32 %v8915_v34, 0.0  ;;  %v9094_v2 = vpack.c.bf16 %v9004_v45, %v8998_v37 }
 0x434   :  { %v8939_v36 = vadd.f32 %v14169_v29, %v14162_v25 }
 0x435   :  { %v14164_v62 = vpop.f32.mrf.mxu0  ;;  %v9101_v30 = vpack.c.bf16 %v9017_v49, %v9011_v10 }
 0x436   :  { %10858 = vmatpush3.bf16.msra.mxu1 %v12354_v53  ;;  %v9029_v53 = vmax.f32 %v8933_v56, 0.0  ;;  %v9035_v14 = vmax.f32 %v8939_v36, 0.0  ;;  %v8944_v31 = vadd.f32 %v14189_v23, %v14164_v62 }
 0x437   :  { %v14171_v9 = vpop.f32.mrf.mxu0  ;;  %10859 = vmatprep.subr.bf16.mxu1 %v12355_v5  ;;  %v9023_v5 = vmax.f32 %v8927_v51, 0.0 }
 0x438   :  { %v8945_v59 = vadd.f32 %v14169_v29, %v14171_v9  ;;  %v9040_v33 = vmax.f32 %v8944_v31, 0.0 }
 0x439   :  { %v14176_v21 = vpop.f32.mrf.mxu0  ;;  %9612 = vmatmul.mubr.bf16.gmra.mxu1 %v9128_v15  ;;  %v9107_v0 = vpack.c.bf16 %v9029_v53, %v9023_v5 }
 0x43a   :  { %9619 = vmatprep.mubr.bf16.mxu1 %v9135_v22  ;;  %10860 = vmatpush3.bf16.msra.mxu1 %v12356_v19  ;;  %v9041_v35 = vmax.f32 %v8945_v59, 0.0  ;;  %v9022_v19 = vmax.f32 %v8926_v57, 0.0  ;;  %v8950_v50 = vadd.f32 %v14189_v23, %v14176_v21 }
 0x43b   :  { %v14182_v38 = vpop.f32.mrf.mxu0  ;;  %10861 = vmatprep.subr.bf16.mxu1 %v12357_v46 }
 0x43c   :  { %v9106_v46 = vpack.c.bf16 %v9028_v3, %v9022_v19  ;;  %v9113_v22 = vpack.c.bf16 %v9041_v35, %v9035_v14  ;;  %v8951_v25 = vadd.f32 %v14169_v29, %v14182_v38  ;;  %v14514_v3 = vsub.s32 4, %v14509_v1 }
 0x43d   :  { %v14184_v42 = vpop.f32.mrf.mxu0 }
 0x43e   :  { %10862 = vmatpush3.bf16.msra.mxu1 %v12358_v52  ;;  %v9034_v52 = vmax.f32 %v8938_v8, 0.0  ;;  %v8956_v62 = vadd.f32 %v14189_v23, %v14184_v42 }
 0x43f   :  { %v8530_v26 = vpop.f32.mrf.mxu0  ;;  %10863 = vmatprep.subr.bf16.mxu1 %v12359_v47  ;;  %v9047_v47 = vmax.f32 %v8951_v25, 0.0 }
 0x440   :  { %v8957_v9 = vadd.f32 %v14169_v29, %v8530_v26  ;;  %v9112_v63 = vpack.c.bf16 %v9040_v33, %v9034_v52  ;;  %v9052_v26 = vmax.f32 %v8956_v62, 0.0 }
 0x441   :  { %v14197_v16 = vpop.f32.mrf.mxu0  ;;  %9620 = vmatmul.mubr.bf16.gmra.mxu1 %v9134_v43  ;;  %v9046_v43 = vmax.f32 %v8950_v50, 0.0 }
 0x442   :  { %10864 = vmatpush3.bf16.msra.mxu1 %v12360_v13  ;;  %9660 = vmatprep.mubr.bf16.mxu1 %v9095_v40  ;;  %v9053_v61 = vmax.f32 %v8957_v9, 0.0  ;;  %v8962_v34 = vadd.f32 %v14189_v23, %v14197_v16 }
 0x443   :  { %10865 = vmatprep.subr.bf16.mxu1 %v12361_v17  ;;  %v8536_v58 = vpop.f32.mrf.mxu0  ;;  %v9118_v40 = vpack.c.bf16 %v9052_v26, %v9046_v43 }
 0x444   :  { %v9119_v55 = vpack.c.bf16 %v9053_v61, %v9047_v47  ;;  %v8963_v38 = vadd.f32 %v14169_v29, %v8536_v58  ;;  %v9058_v37 = vmax.f32 %v8962_v34, 0.0 }
 0x445   :  { %v8538_v44 = vpop.f32.mrf.mxu0 }
 0x446   :  { %10866 = vmatpush3.bf16.msra.mxu1 %v12362_v11  ;;  %v9059_v17 = vmax.f32 %v8963_v38, 0.0  ;;  %v8968_v54 = vadd.f32 %v14189_v23, %v8538_v44 }
 0x447   :  { %v8540_v60 = vpop.f32.mrf.mxu0 }
 0x448   :  { %v8969_v20 = vadd.f32 %v14169_v29, %v8540_v60  ;;  %v9064_v45 = vmax.f32 %v8968_v54, 0.0 }
 0x449   :  { %9661 = vmatmul.mubr.bf16.vlgmr.msra.gmra.mxu1 %v9094_v2  ;;  %v8544_v41 = vpop.f32.mrf.mxu0 }
 0x44a   :  { %9668 = vmatprep.mubr.bf16.mxu1 %v9101_v30  ;;  %v9065_v13 = vmax.f32 %v8969_v20, 0.0  ;;  %v9124_v2 = vpack.c.bf16 %v9064_v45, %v9058_v37  ;;  %v8974_v28 = vadd.f32 %v14189_v23, %v8544_v41  ;;  %v12605_v41 = vld [vmem:[#allocation11] sm:$0x3f] }
 0x44b   :  { %v8546_v15 = vpop.f32.mrf.mxu0  ;;  %v14247_v35 = vrot.slane %v12605_v41, %v14514_v3 }
 0x44c   :  { %v9125_v42 = vpack.c.bf16 %v9065_v13, %v9059_v17  ;;  %v8975_v11 = vadd.f32 %v14169_v29, %v8546_v15  ;;  %v9070_v12 = vmax.f32 %v8974_v28, 0.0 }
 0x44d   :  { %v8548_v39 = vpop.f32.mrf.mxu0 }
 0x44e   :  { %v9071_v10 = vmax.f32 %v8975_v11, 0.0  ;;  %v8980_v7 = vadd.f32 %v14189_v23, %v8548_v39 }
 0x44f   :  { %v8550_v32 = vpop.f32.mrf.mxu0 }
 0x450   :  { %v8981_v18 = vadd.f32 %v14169_v29, %v8550_v32  ;;  %v9076_v44 = vmax.f32 %v8980_v7, 0.0 }
 0x451   :  { %9669 = vmatmul.mubr.bf16.gmra.mxu1 %v9100_v4  ;;  %v8554_v6 = vpop.f32.mrf.mxu0 }
 0x452   :  { %9676 = vmatprep.mubr.bf16.mxu1 %v9107_v0  ;;  %v9077_v49 = vmax.f32 %v8981_v18, 0.0  ;;  %v9130_v27 = vpack.c.bf16 %v9076_v44, %v9070_v12  ;;  %v8986_v4 = vadd.f32 %v14189_v23, %v8554_v6 }
 0x453   :  { %v8556_v24 = vpop.f32.mrf.mxu0 }
 0x454   :  { %v9131_v30 = vpack.c.bf16 %v9077_v49, %v9071_v10  ;;  %v8987_v16 = vadd.f32 %v14169_v29, %v8556_v24  ;;  %v9082_v0 = vmax.f32 %v8986_v4, 0.0 }
 0x455   :  { %v8558_v21 = vpop.f32.mrf.mxu0 }
 0x456   :  { %v9083_v53 = vmax.f32 %v8987_v16, 0.0  ;;  %v8992_v60 = vadd.f32 %v14189_v23, %v8558_v21 }
 0x457   :  { %v8560_v58 = vpop.f32.mrf.mxu0 }
 0x458   :  { %v8993_v56 = vadd.f32 %v14169_v29, %v8560_v58  ;;  %v9088_v48 = vmax.f32 %v8992_v60, 0.0  ;;  %v14513_v29 = vsub.s32 5, %v14509_v1 }
 0x459   :  { %9677 = vmatmul.mubr.bf16.gmra.mxu1 %v9106_v46 }
 0x45a   :  { %9684 = vmatprep.mubr.bf16.mxu1 %v9113_v22  ;;  %v9089_v51 = vmax.f32 %v8993_v56, 0.0  ;;  %v9136_v59 = vpack.c.bf16 %v9088_v48, %v9082_v0  ;;  %v14243_v36 = vrot.slane %v12605_v41, %v14513_v29 }
 0x45c   :  { %v9137_v5 = vpack.c.bf16 %v9089_v51, %v9083_v53 }
 0x461   :  { %9685 = vmatmul.mubr.bf16.gmra.mxu1 %v9112_v63 }
 0x462   :  { %9692 = vmatprep.mubr.bf16.mxu1 %v9119_v55 }
 0x469   :  { %9693 = vmatmul.mubr.bf16.gmra.mxu1 %v9118_v40 }
 0x46a   :  { %9700 = vmatprep.mubr.bf16.mxu1 %v9125_v42 }
 0x471   :  { %9701 = vmatmul.mubr.bf16.gmra.mxu1 %v9124_v2 }
 0x472   :  { %9708 = vmatprep.mubr.bf16.mxu1 %v9131_v30 }
 0x479   :  { %9709 = vmatmul.mubr.bf16.gmra.mxu1 %v9130_v27 }
 0x47a   :  { %9716 = vmatprep.mubr.bf16.mxu1 %v9137_v5 }
 0x481   :  { %9717 = vmatmul.mubr.bf16.gmra.mxu1 %v9136_v59 }
 0x4a9   :  { %v8789_v57 = vpop.f32.mrf.mxu1 }
 0x4aa   :  { %v8904_v46 = vadd.f32 %v14247_v35, %v8789_v57 }
 0x4ab   :  { %v8791_v19 = vpop.f32.mrf.mxu1 }
 0x4ac   :  { %v8905_v23 = vadd.f32 %v14243_v36, %v8791_v19  ;;  %v9000_v33 = vmax.f32 %v8904_v46, 0.0 }
 0x4ad   :  { %v8793_v15 = vpop.f32.mrf.mxu1 }
 0x4ae   :  { %v8910_v14 = vadd.f32 %v14247_v35, %v8793_v15  ;;  %v9001_v39 = vmax.f32 %v8905_v23, 0.0 }
 0x4af   :  { %v8795_v31 = vpop.f32.mrf.mxu1 }
 0x4b0   :  { %v8911_v22 = vadd.f32 %v14243_v36, %v8795_v31  ;;  %v9006_v9 = vmax.f32 %v8910_v14, 0.0 }
 0x4b1   :  { %v8799_v8 = vpop.f32.mrf.mxu1 }
 0x4b2   :  { %v9007_v25 = vmax.f32 %v8911_v22, 0.0  ;;  %v9096_v52 = vpack.c.bf16 %v9006_v9, %v9000_v33  ;;  %v8916_v62 = vadd.f32 %v14247_v35, %v8799_v8 }
 0x4b3   :  { %v8801_v61 = vpop.f32.mrf.mxu1 }
 0x4b4   :  { %v9097_v1 = vpack.c.bf16 %v9007_v25, %v9001_v39  ;;  %v8917_v47 = vadd.f32 %v14243_v36, %v8801_v61  ;;  %v9012_v13 = vmax.f32 %v8916_v62, 0.0 }
 0x4b5   :  { %v8803_v32 = vpop.f32.mrf.mxu1 }
 0x4b6   :  { %v8922_v63 = vadd.f32 %v14247_v35, %v8803_v32  ;;  %9757 = vmatprep.mubr.bf16.mxu0 %v9097_v1  ;;  %v9013_v6 = vmax.f32 %v8917_v47, 0.0 }
 0x4b7   :  { %v8805_v55 = vpop.f32.mrf.mxu1  ;;  %9758 = vmatmul.mubr.bf16.vlgmr.msra.gmra.mxu0 %v9096_v52 }
 0x4b8   :  { %v8923_v20 = vadd.f32 %v14243_v36, %v8805_v55  ;;  %v9018_v50 = vmax.f32 %v8922_v63, 0.0 }
 0x4b9   :  { %v8809_v26 = vpop.f32.mrf.mxu1 }
 0x4ba   :  { %v9019_v38 = vmax.f32 %v8923_v20, 0.0  ;;  %v9102_v17 = vpack.c.bf16 %v9018_v50, %v9012_v13  ;;  %v8928_v18 = vadd.f32 %v14247_v35, %v8809_v26 }
 0x4bb   :  { %v8811_v24 = vpop.f32.mrf.mxu1 }
 0x4bc   :  { %v9103_v43 = vpack.c.bf16 %v9019_v38, %v9013_v6  ;;  %v8929_v54 = vadd.f32 %v14243_v36, %v8811_v24  ;;  %v9024_v58 = vmax.f32 %v8928_v18, 0.0 }
 0x4bd   :  { %v8813_v40 = vpop.f32.mrf.mxu1 }
 0x4be   :  { %9765 = vmatprep.mubr.bf16.mxu0 %v9103_v43  ;;  %v8934_v42 = vadd.f32 %v14247_v35, %v8813_v40  ;;  %v9025_v49 = vmax.f32 %v8929_v54, 0.0 }
 0x4bf   :  { %9766 = vmatmul.mubr.bf16.gmra.mxu0 %v9102_v17  ;;  %v8815_v34 = vpop.f32.mrf.mxu1 }
 0x4c0   :  { %v8935_v21 = vadd.f32 %v14243_v36, %v8815_v34  ;;  %v9030_v11 = vmax.f32 %v8934_v42, 0.0 }
 0x4c1   :  { %v8819_v45 = vpop.f32.mrf.mxu1 }
 0x4c2   :  { %v9031_v37 = vmax.f32 %v8935_v21, 0.0  ;;  %v9108_v7 = vpack.c.bf16 %v9030_v11, %v9024_v58  ;;  %v8940_v16 = vadd.f32 %v14247_v35, %v8819_v45 }
 0x4c3   :  { %v8821_v10 = vpop.f32.mrf.mxu1 }
 0x4c4   :  { %v9109_v2 = vpack.c.bf16 %v9031_v37, %v9025_v49  ;;  %v8941_v56 = vadd.f32 %v14243_v36, %v8821_v10  ;;  %v9036_v5 = vmax.f32 %v8940_v16, 0.0 }
 0x4c5   :  { %v8823_v30 = vpop.f32.mrf.mxu1 }
 0x4c6   :  { %v8946_v28 = vadd.f32 %v14247_v35, %v8823_v30  ;;  %9773 = vmatprep.mubr.bf16.mxu0 %v9109_v2  ;;  %v9037_v27 = vmax.f32 %v8941_v56, 0.0 }
 0x4c7   :  { %v8825_v44 = vpop.f32.mrf.mxu1  ;;  %9774 = vmatmul.mubr.bf16.gmra.mxu0 %v9108_v7 }
 0x4c8   :  { %v8947_v51 = vadd.f32 %v14243_v36, %v8825_v44  ;;  %v9042_v12 = vmax.f32 %v8946_v28, 0.0 }
 0x4c9   :  { %v8829_v53 = vpop.f32.mrf.mxu1 }
 0x4ca   :  { %v9043_v60 = vmax.f32 %v8947_v51, 0.0  ;;  %v9114_v0 = vpack.c.bf16 %v9042_v12, %v9036_v5  ;;  %v8952_v29 = vadd.f32 %v14247_v35, %v8829_v53 }
 0x4cb   :  { %v8831_v4 = vpop.f32.mrf.mxu1 }
 0x4cc   :  { %v9115_v48 = vpack.c.bf16 %v9043_v60, %v9037_v27  ;;  %v8953_v57 = vadd.f32 %v14243_v36, %v8831_v4  ;;  %v9048_v31 = vmax.f32 %v8952_v29, 0.0 }
 0x4cd   :  { %v8833_v59 = vpop.f32.mrf.mxu1 }
 0x4ce   :  { %v8958_v41 = vadd.f32 %v14247_v35, %v8833_v59  ;;  %9781 = vmatprep.mubr.bf16.mxu0 %v9115_v48  ;;  %v9049_v14 = vmax.f32 %v8953_v57, 0.0 }
 0x4cf   :  { %v8835_v3 = vpop.f32.mrf.mxu1  ;;  %9782 = vmatmul.mubr.bf16.gmra.mxu0 %v9114_v0 }
 0x4d0   :  { %v8959_v19 = vadd.f32 %v14243_v36, %v8835_v3  ;;  %v9054_v15 = vmax.f32 %v8958_v41, 0.0 }
 0x4d1   :  { %v8839_v23 = vpop.f32.mrf.mxu1 }
 0x4d2   :  { %v9055_v46 = vmax.f32 %v8959_v19, 0.0  ;;  %v9120_v8 = vpack.c.bf16 %v9054_v15, %v9048_v31  ;;  %v8964_v61 = vadd.f32 %v14247_v35, %v8839_v23 }
 0x4d3   :  { %v8841_v22 = vpop.f32.mrf.mxu1 }
 0x4d4   :  { %v9121_v9 = vpack.c.bf16 %v9055_v46, %v9049_v14  ;;  %v8965_v25 = vadd.f32 %v14243_v36, %v8841_v22  ;;  %v9060_v55 = vmax.f32 %v8964_v61, 0.0  ;;  %v10803_v14 = vpop.f32.mrf.mxu0 }
 0x4d5   :  { %v8843_v39 = vpop.f32.mrf.mxu1 }
 0x4d6   :  { %v8970_v33 = vadd.f32 %v14247_v35, %v8843_v39  ;;  %9789 = vmatprep.mubr.bf16.mxu0 %v9121_v9  ;;  %v9061_v63 = vmax.f32 %v8965_v25, 0.0  ;;  %v10804_v31 = vpop.f32.mrf.mxu0 }
 0x4d7   :  { %v8845_v1 = vpop.f32.mrf.mxu1  ;;  %9790 = vmatmul.mubr.bf16.gmra.mxu0 %v9120_v8 }
 0x4d8   :  { %v8971_v52 = vadd.f32 %v14243_v36, %v8845_v1  ;;  %v9066_v32 = vmax.f32 %v8970_v33, 0.0  ;;  %v10806_v9 = vpop.f32.mrf.mxu0 }
 0x4d9   :  { %v8849_v47 = vpop.f32.mrf.mxu1 }
 0x4da   :  { %v9067_v62 = vmax.f32 %v8971_v52, 0.0  ;;  %v9126_v6 = vpack.c.bf16 %v9066_v32, %v9060_v55  ;;  %v8976_v43 = vadd.f32 %v14247_v35, %v8849_v47  ;;  %v10807_v39 = vpop.f32.mrf.mxu0 }
 0x4db   :  { %v8851_v20 = vpop.f32.mrf.mxu1 }
 0x4dc   :  { %v9127_v50 = vpack.c.bf16 %v9067_v62, %v9061_v63  ;;  %v8977_v26 = vadd.f32 %v14243_v36, %v8851_v20  ;;  %v9072_v34 = vmax.f32 %v8976_v43, 0.0  ;;  %v10809_v33 = vpop.f32.mrf.mxu0 }
 0x4dd   :  { %v8853_v38 = vpop.f32.mrf.mxu1 }
 0x4de   :  { %v8982_v13 = vadd.f32 %v14247_v35, %v8853_v38  ;;  %9797 = vmatprep.mubr.bf16.mxu0 %v9127_v50  ;;  %v9073_v42 = vmax.f32 %v8977_v26, 0.0  ;;  %v10810_v1 = vpop.f32.mrf.mxu0 }
 0x4df   :  { %v8855_v24 = vpop.f32.mrf.mxu1  ;;  %9798 = vmatmul.mubr.bf16.gmra.mxu0 %v9126_v6 }
 0x4e0   :  { %v8983_v17 = vadd.f32 %v14243_v36, %v8855_v24  ;;  %v9078_v40 = vmax.f32 %v8982_v13, 0.0  ;;  %v10812_v32 = vpop.f32.mrf.mxu0 }
 0x4e1   :  { %v8859_v54 = vpop.f32.mrf.mxu1 }
 0x4e2   :  { %v9079_v18 = vmax.f32 %v8983_v17, 0.0  ;;  %v9132_v45 = vpack.c.bf16 %v9078_v40, %v9072_v34  ;;  %v8988_v10 = vadd.f32 %v14247_v35, %v8859_v54  ;;  %v10813_v63 = vpop.f32.mrf.mxu0 }
 0x4e3   :  { %v8861_v21 = vpop.f32.mrf.mxu1 }
 0x4e4   :  { %v9133_v11 = vpack.c.bf16 %v9079_v18, %v9073_v42  ;;  %v8989_v37 = vadd.f32 %v14243_v36, %v8861_v21  ;;  %v9084_v16 = vmax.f32 %v8988_v10, 0.0  ;;  %v10815_v55 = vpop.f32.mrf.mxu0  ;;  %v10805_v18 = vadd.f32 %v10804_v31, %v10803_v14  ;;  %v14327_v21 = vld [vmem:[#allocation14] ss:$0 sm:$0xff] }
 0x4e5   :  { %v8863_v49 = vpop.f32.mrf.mxu1 }
 0x4e6   :  { %v8994_v58 = vadd.f32 %v14247_v35, %v8863_v49  ;;  %9805 = vmatprep.mubr.bf16.mxu0 %v9133_v11  ;;  %v9085_v56 = vmax.f32 %v8989_v37, 0.0  ;;  %v10816_v50 = vpop.f32.mrf.mxu0  ;;  %v9566_v37 = vadd.f32 %v10805_v18, %v14327_v21 }
 0x4e7   :  { %v8865_v2 = vpop.f32.mrf.mxu1  ;;  %9806 = vmatmul.mubr.bf16.gmra.mxu0 %v9132_v45 }
 0x4e8   :  { %v8995_v7 = vadd.f32 %v14243_v36, %v8865_v2  ;;  %v9090_v30 = vmax.f32 %v8994_v58, 0.0  ;;  %v10818_v38 = vpop.f32.mrf.mxu0  ;;  %v10808_v58 = vadd.f32 %v10807_v39, %v10806_v9  ;;  %v10814_v39 = vadd.f32 %v10813_v63, %v10812_v32 }
 0x4e9   :  { %v14281_v12 = vpop.f32.mrf.mxu1 }
 0x4ea   :  { %v9091_v28 = vmax.f32 %v8995_v7, 0.0  ;;  %v9138_v51 = vpack.c.bf16 %v9090_v30, %v9084_v16  ;;  %v10819_v13 = vpop.f32.mrf.mxu0  ;;  %v9569_v16 = vadd.f32 %v10808_v58, %v14327_v21 }
 0x4eb   :  { %v14283_v53 = vpop.f32.mrf.mxu1 }
 0x4ec   :  { %v9139_v44 = vpack.c.bf16 %v9091_v28, %v9085_v56  ;;  %v10821_v24 = vpop.f32.mrf.mxu0 }
 0x4ed   :  { %v14285_v27 = vpop.f32.mrf.mxu1 }
 0x4ee   :  { %9813 = vmatprep.mubr.bf16.mxu0 %v9139_v44  ;;  %v10822_v40 = vpop.f32.mrf.mxu0  ;;  %v10811_v44 = vadd.f32 %v10810_v1, %v10809_v33 }
 0x4ef   :  { %9814 = vmatmul.mubr.bf16.gmra.mxu0 %v9138_v51  ;;  %v14287_v60 = vpop.f32.mrf.mxu1 }
 0x4f0   :  { %v14323_v42 = vpop.f32.mrf.mxu0  ;;  %v9574_v9 = vadd.f32 %v10811_v44, %v14327_v21 }
 0x4f1   :  { %v14289_v35 = vpop.f32.mrf.mxu1 }
 0x4f2   :  { %v14329_v11 = vpop.f32.mrf.mxu0 }
 0x4f3   :  { %v14291_v5 = vpop.f32.mrf.mxu1 }
 0x4f5   :  { %v14293_v36 = vpop.f32.mrf.mxu1 }
 0x4f7   :  { %v14295_v4 = vpop.f32.mrf.mxu1 }
 0x4f9   :  { %v14297_v48 = vpop.f32.mrf.mxu1 }
 0x4fb   :  { %v14299_v0 = vpop.f32.mrf.mxu1 }
 0x4fd   :  { %v14301_v59 = vpop.f32.mrf.mxu1 }
 0x4ff   :  { %v14303_v57 = vpop.f32.mrf.mxu1 }
 0x501   :  { %v14305_v41 = vpop.f32.mrf.mxu1 }
 0x503   :  { %v14307_v29 = vpop.f32.mrf.mxu1 }
 0x505   :  { %v14309_v3 = vpop.f32.mrf.mxu1 }
 0x506   :  { %14515 = vst [vmem:[#allocation27_spill] sm:$0xff] %v14309_v3 }
 0x507   :  { %v14311_v19 = vpop.f32.mrf.mxu1 }
 0x508   :  { %14516 = vst [vmem:[#allocation30_spill] sm:$0xff] %v14311_v19 }
 0x509   :  { %v10867_v15 = vpop.f32.mrf.mxu1 }
 0x50b   :  { %v10868_v23 = vpop.f32.mrf.mxu1 }
 0x50c   :  { %v10869_v45 = vadd.f32 %v10868_v23, %v10867_v15 }
 0x50d   :  { %v10870_v46 = vpop.f32.mrf.mxu1 }
 0x50e   :  { %v9663_v7 = vadd.f32 %v10869_v45, %v9566_v37  ;;  %v9577_v37 = vadd.f32 %v10814_v39, %v14327_v21 }
 0x50f   :  { %v10871_v22 = vpop.f32.mrf.mxu1 }
 0x510   :  { %v10872_v30 = vadd.f32 %v10871_v22, %v10870_v46 }
 0x511   :  { %v10873_v8 = vpop.f32.mrf.mxu1 }
 0x512   :  { %v9666_v19 = vadd.f32 %v10872_v30, %v9569_v16 }
 0x513   :  { %v10874_v25 = vpop.f32.mrf.mxu1 }
 0x514   :  { %v10875_v15 = vadd.f32 %v10874_v25, %v10873_v8  ;;  %v10817_v25 = vadd.f32 %v10816_v50, %v10815_v55  ;;  %v10823_v50 = vadd.f32 %v10822_v40, %v10821_v24 }
 0x515   :  { %v10876_v61 = vpop.f32.mrf.mxu1 }
 0x516   :  { %v9671_v45 = vadd.f32 %v10875_v15, %v9574_v9  ;;  %v9590_v39 = vadd.f32 %v10823_v50, %v14327_v21 }
 0x517   :  { %v10877_v52 = vpop.f32.mrf.mxu1 }
 0x519   :  { %v10879_v47 = vpop.f32.mrf.mxu1 }
 0x51b   :  { %v10880_v62 = vpop.f32.mrf.mxu1 }
 0x51c   :  { %v10881_v32 = vadd.f32 %v10880_v62, %v10879_v47 }
 0x51d   :  { %v14313_v20 = vpop.f32.mrf.mxu1 }
 0x51f   :  { %v10883_v6 = vpop.f32.mrf.mxu1 }
 0x520   :  { %v10884_v44 = vadd.f32 %v10883_v6, %v14313_v20  ;;  %v10826_v20 = vadd.f32 %v14329_v11, %v14323_v42 }
 0x521   :  { %v14315_v26 = vpop.f32.mrf.mxu1 }
 0x523   :  { %v14317_v43 = vpop.f32.mrf.mxu1 }
 0x524   :  { %v10887_v62 = vadd.f32 %v14317_v43, %v14315_v26  ;;  %v9593_v26 = vadd.f32 %v10826_v20, %v14327_v21  ;;  %v10829_v43 = vadd.f32 %v14283_v53, %v14281_v12 }
 0x525   :  { %v14319_v17 = vpop.f32.mrf.mxu1 }
 0x527   :  { %v14321_v54 = vpop.f32.mrf.mxu1 }
 0x528   :  { %v10890_v24 = vadd.f32 %v14321_v54, %v14319_v17  ;;  %v9598_v17 = vadd.f32 %v10829_v43, %v14327_v21  ;;  %v10832_v54 = vadd.f32 %v14287_v60, %v14285_v27 }
 0x529   :  { %v14325_v34 = vpop.f32.mrf.mxu1 }
 0x52b   :  { %v14332_v10 = vpop.f32.mrf.mxu1 }
 0x52c   :  { %v10893_v42 = vadd.f32 %v14332_v10, %v14325_v34  ;;  %v9601_v34 = vadd.f32 %v10832_v54, %v14327_v21  ;;  %v10835_v10 = vadd.f32 %v14291_v5, %v14289_v35 }
 0x52d   :  { %v14335_v51 = vpop.f32.mrf.mxu1 }
 0x52f   :  { %v14338_v3 = vpop.f32.mrf.mxu1 }
 0x530   :  { %v10896_v12 = vadd.f32 %v14338_v3, %v14335_v51  ;;  %v9606_v3 = vadd.f32 %v10835_v10, %v14327_v21  ;;  %v10838_v51 = vadd.f32 %v14295_v4, %v14293_v36 }
 0x531   :  { %v14341_v58 = vpop.f32.mrf.mxu1 }
 0x533   :  { %v10898_v63 = vpop.f32.mrf.mxu1 }
 0x534   :  { %v10899_v27 = vadd.f32 %v10898_v63, %v14341_v58  ;;  %v10841_v58 = vadd.f32 %v14299_v0, %v14297_v48 }
 0x577   :  { %v10931_v49 = vpop.f32.mrf.mxu0 }
 0x579   :  { %v10932_v2 = vpop.f32.mrf.mxu0 }
 0x57a   :  { %v10933_v56 = vadd.f32 %v10932_v2, %v10931_v49  ;;  %v10878_v49 = vadd.f32 %v10877_v52, %v10876_v61  ;;  %v10820_v61 = vadd.f32 %v10819_v13, %v10818_v38 }
 0x57b   :  { %v10934_v28 = vpop.f32.mrf.mxu0 }
 0x57c   :  { %v9760_v14 = vadd.f32 %v10933_v56, %v9663_v7  ;;  %v9674_v7 = vadd.f32 %v10878_v49, %v9577_v37  ;;  %v9585_v55 = vadd.f32 %v10820_v61, %v14327_v21  ;;  %v9690_v37 = vadd.f32 %v10890_v24, %v9593_v26 }
 0x57d   :  { %v10935_v31 = vpop.f32.mrf.mxu0  ;;  %v9698_v61 = vadd.f32 %v10896_v12, %v9601_v34  ;;  %v10847_v24 = vadd.f32 %v14307_v29, %v14305_v41 }
 0x57e   :  { %9822 = vst [vmem:[#allocation15] sm:$0xff] %v9760_v14  ;;  %v10936_v23 = vadd.f32 %v10935_v31, %v10934_v28  ;;  %v9582_v28 = vadd.f32 %v10817_v25, %v14327_v21  ;;  %v10900_v31 = vpop.f32.mrf.mxu1  ;;  %v9682_v47 = vadd.f32 %v10884_v44, %v9585_v55 }
 0x57f   :  { %v10937_v18 = vpop.f32.mrf.mxu0 }
 0x580   :  { %v9763_v46 = vadd.f32 %v10936_v23, %v9666_v19  ;;  %v9679_v16 = vadd.f32 %v10881_v32, %v9582_v28  ;;  %v10901_v38 = vpop.f32.mrf.mxu1 }
 0x581   :  { %v10938_v22 = vpop.f32.mrf.mxu0  ;;  %v10902_v55 = vadd.f32 %v10901_v38, %v10900_v31  ;;  %v10844_v31 = vadd.f32 %v14303_v57, %v14301_v59 }
 0x582   :  { %9823 = vst [vmem:[#allocation15 + $0x8] sm:$0xff] %v9763_v46  ;;  %v10939_v33 = vadd.f32 %v10938_v22, %v10937_v18  ;;  %v9687_v22 = vadd.f32 %v10887_v62, %v9590_v39 }
 0x583   :  { %v10940_v1 = vpop.f32.mrf.mxu0 }
 0x584   :  { %v9768_v8 = vadd.f32 %v10939_v33, %v9671_v45  ;;  %v10903_v45 = vpop.f32.mrf.mxu1 }
 0x585   :  { %v10941_v2 = vpop.f32.mrf.mxu0 }
 0x586   :  { %9824 = vst [vmem:[#allocation15 + $0x10] sm:$0xff] %v9768_v8  ;;  %v10942_v30 = vadd.f32 %v10941_v2, %v10940_v1  ;;  %v10904_v8 = vpop.f32.mrf.mxu1 }
 0x587   :  { %v10943_v19 = vpop.f32.mrf.mxu0  ;;  %v10905_v62 = vadd.f32 %v10904_v8, %v10903_v45 }
 0x588   :  { %v9771_v56 = vadd.f32 %v10942_v30, %v9674_v7  ;;  %v9695_v30 = vadd.f32 %v10893_v42, %v9598_v17  ;;  %v10906_v32 = vpop.f32.mrf.mxu1 }
 0x589   :  { %v10944_v52 = vpop.f32.mrf.mxu0 }
 0x58a   :  { %9825 = vst [vmem:[#allocation15 + $0x18] sm:$0xff] %v9771_v56  ;;  %v10945_v14 = vadd.f32 %v10944_v52, %v10943_v19  ;;  %v10907_v52 = vpop.f32.mrf.mxu1 }
 0x58b   :  { %v10946_v15 = vpop.f32.mrf.mxu0 }
 0x58c   :  { %v9776_v23 = vadd.f32 %v10945_v14, %v9679_v16  ;;  %v10909_v5 = vpop.f32.mrf.mxu1 }
 0x58d   :  { %v10947_v18 = vpop.f32.mrf.mxu0 }
 0x58e   :  { %9826 = vst [vmem:[#allocation15 + $0x20] sm:$0xff] %v9776_v23  ;;  %v10948_v9 = vadd.f32 %v10947_v18, %v10946_v15  ;;  %v9703_v15 = vadd.f32 %v10899_v27, %v9606_v3  ;;  %v9609_v23 = vadd.f32 %v10838_v51, %v14327_v21  ;;  %v10910_v36 = vpop.f32.mrf.mxu1 }
 0x58f   :  { %v10949_v13 = vpop.f32.mrf.mxu0  ;;  %v10911_v26 = vadd.f32 %v10910_v36, %v10909_v5 }
 0x590   :  { %v9779_v6 = vadd.f32 %v10948_v9, %v9682_v47  ;;  %v9706_v47 = vadd.f32 %v10902_v55, %v9609_v23  ;;  %v10912_v48 = vpop.f32.mrf.mxu1 }
 0x591   :  { %v10950_v46 = vpop.f32.mrf.mxu0 }
 0x592   :  { %9827 = vst [vmem:[#allocation15 + $0x28] sm:$0xff] %v9779_v6  ;;  %v10951_v40 = vadd.f32 %v10950_v46, %v10949_v13  ;;  %v9614_v13 = vadd.f32 %v10841_v58, %v14327_v21  ;;  %v10908_v6 = vadd.f32 %v10907_v52, %v10906_v32  ;;  %v10913_v59 = vpop.f32.mrf.mxu1 }
 0x593   :  { %v10952_v49 = vpop.f32.mrf.mxu0  ;;  %v10914_v17 = vadd.f32 %v10913_v59, %v10912_v48 }
 0x594   :  { %v9784_v33 = vadd.f32 %v10951_v40, %v9687_v22  ;;  %v9711_v20 = vadd.f32 %v10905_v62, %v9614_v13  ;;  %v9617_v22 = vadd.f32 %v10844_v31, %v14327_v21 }
 0x595   :  { %v10953_v1 = vpop.f32.mrf.mxu0 }
 0x596   :  { %9828 = vst [vmem:[#allocation15 + $0x30] sm:$0xff] %v9784_v33  ;;  %v10954_v11 = vadd.f32 %v10953_v1, %v10952_v49  ;;  %v9714_v49 = vadd.f32 %v10908_v6, %v9617_v22  ;;  %v9622_v33 = vadd.f32 %v10847_v24, %v14327_v21  ;;  %v14517_v1 = vld [vmem:[#allocation27_spill] sm:$0xff] }
 0x597   :  { %v10955_v25 = vpop.f32.mrf.mxu0 }
 0x598   :  { %v9787_v2 = vadd.f32 %v10954_v11, %v9690_v37  ;;  %v14518_v37 = vld [vmem:[#allocation30_spill] sm:$0xff] }
 0x599   :  { %v10956_v7 = vpop.f32.mrf.mxu0  ;;  %v10850_v42 = vadd.f32 %v14518_v37, %v14517_v1 }
 0x59a   :  { %9829 = vst [vmem:[#allocation15 + $0x38] sm:$0xff] %v9787_v2  ;;  %v10957_v53 = vadd.f32 %v10956_v7, %v10955_v25  ;;  %v9719_v25 = vadd.f32 %v10911_v26, %v9622_v33 }
 0x59b   :  { %v10958_v56 = vpop.f32.mrf.mxu0  ;;  %v9625_v29 = vadd.f32 %v10850_v42, %v14327_v21 }
 0x59c   :  { %v9792_v19 = vadd.f32 %v10957_v53, %v9695_v30 }
 0x59d   :  { %v10959_v28 = vpop.f32.mrf.mxu0  ;;  %v9722_v30 = vadd.f32 %v10914_v17, %v9625_v29 }
 0x59e   :  { %9830 = vst [vmem:[#allocation15 + $0x40] sm:$0xff] %v9792_v19  ;;  %v10960_v60 = vadd.f32 %v10959_v28, %v10958_v56 }
 0x59f   :  { %v10961_v16 = vpop.f32.mrf.mxu0 }
 0x5a0   :  { %v9795_v44 = vadd.f32 %v10960_v60, %v9698_v61 }
 0x5a1   :  { %v10962_v14 = vpop.f32.mrf.mxu0 }
 0x5a2   :  { %9831 = vst [vmem:[#allocation15 + $0x48] sm:$0xff] %v9795_v44  ;;  %v10963_v35 = vadd.f32 %v10962_v14, %v10961_v16 }
 0x5a3   :  { %v10964_v50 = vpop.f32.mrf.mxu0 }
 0x5a4   :  { %v9800_v63 = vadd.f32 %v10963_v35, %v9703_v15 }
 0x5a5   :  { %v10965_v18 = vpop.f32.mrf.mxu0 }
 0x5a6   :  { %9832 = vst [vmem:[#allocation15 + $0x50] sm:$0xff] %v9800_v63  ;;  %v10966_v9 = vadd.f32 %v10965_v18, %v10964_v50 }
 0x5a7   :  { %v10967_v4 = vpop.f32.mrf.mxu0 }
 0x5a8   :  { %v9803_v38 = vadd.f32 %v10966_v9, %v9706_v47 }
 0x5a9   :  { %v10968_v39 = vpop.f32.mrf.mxu0 }
 0x5aa   :  { %9833 = vst [vmem:[#allocation15 + $0x58] sm:$0xff] %v9803_v38  ;;  %v10969_v46 = vadd.f32 %v10968_v39, %v10967_v4 }
 0x5ab   :  { %v10970_v0 = vpop.f32.mrf.mxu0 }
 0x5ac   :  { %v9808_v40 = vadd.f32 %v10969_v46, %v9711_v20 }
 0x5ad   :  { %v10971_v45 = vpop.f32.mrf.mxu0 }
 0x5ae   :  { %9834 = vst [vmem:[#allocation15 + $0x60] sm:$0xff] %v9808_v40  ;;  %v10972_v43 = vadd.f32 %v10971_v45, %v10970_v0 }
 0x5af   :  { %v10973_v57 = vpop.f32.mrf.mxu0 }
 0x5b0   :  { %v9811_v11 = vadd.f32 %v10972_v43, %v9714_v49 }
 0x5b1   :  { %v10974_v8 = vpop.f32.mrf.mxu0 }
 0x5b2   :  { %9835 = vst [vmem:[#allocation15 + $0x68] sm:$0xff] %v9811_v11  ;;  %v10975_v54 = vadd.f32 %v10974_v8, %v10973_v57 }
 0x5b3   :  { %v10976_v41 = vpop.f32.mrf.mxu0 }
 0x5b4   :  { %v9816_v2 = vadd.f32 %v10975_v54, %v9719_v25 }
 0x5b5   :  { %v10977_v7 = vpop.f32.mrf.mxu0 }
 0x5b6   :  { %9836 = vst [vmem:[#allocation15 + $0x70] sm:$0xff] %v9816_v2  ;;  %v10978_v12 = vadd.f32 %v10977_v7, %v10976_v41 }
 0x5b8   :  { %v9819_v53 = vadd.f32 %v10978_v12, %v9722_v30 }
 0x5ba   :  { %9837 = vst [vmem:[#allocation15 + $0x78] sm:$0xff] %v9819_v53 }
 0x5bb   :  { %12757 = shalt.err (!%p12754_p11)
}
 0x5bc   :  { %s12790_s1 = smov 128   ;;  %s12791_s16 = smov 8  }
 0x5bd   :  { %9849 = dma.vmem_to_hbm [thread:$0]  %s9844_s6, 2048, %s14393_s7, [#allocation5], %s12790_s1, %s12790_s1, %s12791_s16  }
 0x5be   :  { %12774 = dma.done.wait [#allocation5], 2048  }
 0x5bf   :  { %12775 = vsyncadd [#allocation5], 4294965248 }
 0x5c0   :  { %9853 = vsyncpa [#allocation4], 1 }
 0x5c1   :  { %9854 = vsyncpa [#allocation7], 1 }
 0x5c2   :  { %9855 = vsyncpa [#allocation10], 1 }
 0x5c3   :  { %9856 = vsyncpa [#allocation13], 1 }
 0x5c4   :  { %9857 = vsyncpa [#allocation5], 1 }

</bundles_post_ra>
